<compile_context>
chip_gen: v5e
topology: v5e:2x2
jax: 0.10.0
libtpu: 0.0.40
codegen_flags: <defaults>
</compile_context>

<pallas_src>
import jax
import jax.numpy as jnp
from jax.experimental import pallas as pl
from jax.experimental.pallas import tpu as pltpu


# ---------------------------------------------------------------- kernel -----
def _make_fused_kernel(has_dup):
    """has_dup[i] == True iff block i is a 'downsample' block (2*K == P)."""
    n_blocks = len(has_dup)

    def kernel(*refs):
        refs = list(refs)
        out_ref = refs.pop()          # single output, no scratch refs
        it = iter(refs)

        x_ref = next(it)              # (M_pad, col_size) f32
        sw_ref = next(it)             # (col_size, 64)    bf16 (BN-scale folded)
        sb_ref = next(it)             # (1, 64)           f32

        # ---- stem: relu(bn(conv1(x))) ----
        h = jnp.dot(x_ref[...].astype(jnp.bfloat16), sw_ref[...],
                    preferred_element_type=jnp.float32)
        h = jnp.maximum(h + sb_ref[...], 0.0)

        # ---- BasicBlocks ----
        for bi in range(n_blocks):
            w1 = next(it)             # (K, P)  bf16
            b1 = next(it)             # (1, P)  f32
            w2 = next(it)             # (P, P)  bf16
            b2 = next(it)             # (1, P)  f32
            if has_dup[bi]:
                d = next(it)          # (K, 2K) f32 == [I | I]
                # identity = torch.cat((x, x), channel)  ==  x @ [I | I]
                identity = jnp.dot(h, d[...], preferred_element_type=jnp.float32)
            else:
                identity = h

            t = jnp.dot(h.astype(jnp.bfloat16), w1[...],
                        preferred_element_type=jnp.float32)
            t = jnp.maximum(t + b1[...], 0.0)
            y = jnp.dot(t.astype(jnp.bfloat16), w2[...],
                        preferred_element_type=jnp.float32)
            y = y + b2[...]
            h = jnp.maximum(y + identity, 0.0)

        # ---- head: adaptive_avg_pool over W (pool matrix) + Linear(512 -> 1) ----
        pool_ref = next(it)           # (N, M_pad) f32, rows sum to 1 per batch
        fcw_ref = next(it)            # (512, 1)   f32
        fcb_ref = next(it)            # (1, 1)     f32
        pooled = jnp.dot(pool_ref[...], h, preferred_element_type=jnp.float32)
        out_ref[...] = jnp.dot(pooled, fcw_ref[...],
                               preferred_element_type=jnp.float32) + fcb_ref[...]

    return kernel


# ------------------------------------------------------------- parameters ----
def _bn_fold(c, eps=1e-5):
    # inference-mode BN with default init -> per-channel (scale, bias)
    gamma = jnp.ones((c,), jnp.float32)
    beta = jnp.zeros((c,), jnp.float32)
    mean = jnp.zeros((c,), jnp.float32)
    var = jnp.ones((c,), jnp.float32)
    scale = gamma / jnp.sqrt(var + eps)
    bias = beta - mean * scale
    return scale, bias


def _conv_w(key, kh, cout):
    # torch weight (cout, 1, kh, 1); kaiming_normal_(fan_out) -> std = sqrt(2/(cout*kh))
    std = (2.0 / (cout * kh)) ** 0.5
    w = jax.random.normal(key, (cout, kh), jnp.float32) * std
    return jnp.transpose(w)           # (kh, cout) so the kernel computes A @ W


def make_params(key, col_size, layers):
    keys = iter(jax.random.split(key, 4 * sum(layers) + 8))
    params = {}

    # stem: conv1(1, 64, (col_size, 1)) + bn1, BN scale folded into the weight
    w = _conv_w(next(keys), col_size, 64)
    s, b = _bn_fold(64)
    params["stem_w"] = (w * s[None, :]).astype(jnp.bfloat16)
    params["stem_b"] = b.reshape(1, 64)

    # layer1..layer4   (planes, first-block kernel_size, nblocks)
    plan = [(64, 64, layers[0]), (128, 64, layers[1]),
            (256, 128, layers[2]), (512, 256, layers[3])]
    blocks = []
    for planes, ksize, nblocks in plan:
        k = ksize
        for _ in range(nblocks):
            w1 = _conv_w(next(keys), k, planes)        # conv1: (planes, 1, k, 1)
            s1, b1 = _bn_fold(planes)
            w2 = _conv_w(next(keys), planes, planes)   # conv2: (planes, 1, planes, 1)
            s2, b2 = _bn_fold(planes)
            dup = None
            if k != planes:
                assert 2 * k == planes
                eye = jnp.eye(k, dtype=jnp.float32)
                dup = jnp.concatenate([eye, eye], axis=1)   # (k, 2k): x @ dup == cat((x,x))
            blocks.append({
                "w1": (w1 * s1[None, :]).astype(jnp.bfloat16),
                "b1": b1.reshape(1, planes),
                "w2": (w2 * s2[None, :]).astype(jnp.bfloat16),
                "b2": b2.reshape(1, planes),
                "dup": dup,
            })
            k = planes
    params["blocks"] = blocks

    # fc: Linear(512, 1), default torch init (uniform +- 1/sqrt(512))
    bound = 1.0 / (512.0 ** 0.5)
    params["fc_w"] = jax.random.uniform(next(keys), (512, 1), jnp.float32, -bound, bound)
    params["fc_b"] = jax.random.uniform(next(keys), (1, 1), jnp.float32, -bound, bound)
    return params


# ----------------------------------------------------------------- forward ---
def forward(x_nchw, params):
    # x_nchw: (N, 1, col_size, W)  -- PyTorch NCHW input
    N, _, H, W = x_nchw.shape
    M = N * W
    a = jnp.transpose(x_nchw[:, 0], (0, 2, 1)).reshape(M, H).astype(jnp.float32)

    # pad rows only to the next multiple of 8 (sublane alignment)
    m_pad = ((M + 7) // 8) * 8
    if m_pad != M:
        a = jnp.pad(a, ((0, m_pad - M), (0, 0)))

    # mean-over-W pooling matrix (N, m_pad); padded rows get weight 0
    row = jnp.arange(m_pad)
    pool = jnp.where((row[None, :] // W) == jnp.arange(N)[:, None], 1.0 / W, 0.0)
    pool = pool.astype(jnp.float32)

    blocks = params["blocks"]
    has_dup = tuple(b["dup"] is not None for b in blocks)

    inputs = [a, params["stem_w"], params["stem_b"]]
    for b in blocks:
        inputs += [b["w1"], b["b1"], b["w2"], b["b2"]]
        if b["dup"] is not None:
            inputs.append(b["dup"])
    inputs += [pool, params["fc_w"], params["fc_b"]]

    def _spec(arr):
        nd = arr.ndim
        return pl.BlockSpec(arr.shape, lambda i, _nd=nd: (0,) * _nd)

    return pl.pallas_call(
        _make_fused_kernel(has_dup),
        out_shape=jax.ShapeDtypeStruct((N, 1), jnp.float32),
        grid=(1,),
        in_specs=[_spec(x) for x in inputs],
        out_specs=pl.BlockSpec((N, 1), lambda i: (0, 0)),
        compiler_params=pltpu.CompilerParams(
            dimension_semantics=("arbitrary",),
            vmem_limit_bytes=32 * 1024 * 1024),
    )(*inputs)


# -------------------------------------------------------------------- main ---
if __name__ == "__main__":
    col_size = 16
    layers = [2, 2, 2, 2]      # ResNet-18-style BasicBlock counts
    N, W = 2, 16               # batch=2, spatial width=16

    key = jax.random.PRNGKey(0)
    kx, kp = jax.random.split(key)
    x = jax.random.normal(kx, (N, 1, col_size, W), jnp.float32)
    params = make_params(kp, col_size, layers)

    fwd = jax.jit(forward)
    out = jax.block_until_ready(fwd(x, params))

    assert out.shape == (N, 1) and out.dtype == jnp.float32
    print("KERNEL_OK")
</pallas_src>

<mosaic_0001>
module attributes {stable_mosaic.version = 11 : i64} {
  func.func @kernel(%arg0: i32, %arg1: memref<32x16xf32, #tpu.memory_space<vmem>>, %arg2: memref<16x64xbf16, #tpu.memory_space<vmem>>, %arg3: memref<1x64xf32, #tpu.memory_space<vmem>>, %arg4: memref<64x64xbf16, #tpu.memory_space<vmem>>, %arg5: memref<1x64xf32, #tpu.memory_space<vmem>>, %arg6: memref<64x64xbf16, #tpu.memory_space<vmem>>, %arg7: memref<1x64xf32, #tpu.memory_space<vmem>>, %arg8: memref<64x64xbf16, #tpu.memory_space<vmem>>, %arg9: memref<1x64xf32, #tpu.memory_space<vmem>>, %arg10: memref<64x64xbf16, #tpu.memory_space<vmem>>, %arg11: memref<1x64xf32, #tpu.memory_space<vmem>>, %arg12: memref<64x128xbf16, #tpu.memory_space<vmem>>, %arg13: memref<1x128xf32, #tpu.memory_space<vmem>>, %arg14: memref<128x128xbf16, #tpu.memory_space<vmem>>, %arg15: memref<1x128xf32, #tpu.memory_space<vmem>>, %arg16: memref<64x128xf32, #tpu.memory_space<vmem>>, %arg17: memref<128x128xbf16, #tpu.memory_space<vmem>>, %arg18: memref<1x128xf32, #tpu.memory_space<vmem>>, %arg19: memref<128x128xbf16, #tpu.memory_space<vmem>>, %arg20: memref<1x128xf32, #tpu.memory_space<vmem>>, %arg21: memref<128x256xbf16, #tpu.memory_space<vmem>>, %arg22: memref<1x256xf32, #tpu.memory_space<vmem>>, %arg23: memref<256x256xbf16, #tpu.memory_space<vmem>>, %arg24: memref<1x256xf32, #tpu.memory_space<vmem>>, %arg25: memref<128x256xf32, #tpu.memory_space<vmem>>, %arg26: memref<256x256xbf16, #tpu.memory_space<vmem>>, %arg27: memref<1x256xf32, #tpu.memory_space<vmem>>, %arg28: memref<256x256xbf16, #tpu.memory_space<vmem>>, %arg29: memref<1x256xf32, #tpu.memory_space<vmem>>, %arg30: memref<256x512xbf16, #tpu.memory_space<vmem>>, %arg31: memref<1x512xf32, #tpu.memory_space<vmem>>, %arg32: memref<512x512xbf16, #tpu.memory_space<vmem>>, %arg33: memref<1x512xf32, #tpu.memory_space<vmem>>, %arg34: memref<256x512xf32, #tpu.memory_space<vmem>>, %arg35: memref<512x512xbf16, #tpu.memory_space<vmem>>, %arg36: memref<1x512xf32, #tpu.memory_space<vmem>>, %arg37: memref<512x512xbf16, #tpu.memory_space<vmem>>, %arg38: memref<1x512xf32, #tpu.memory_space<vmem>>, %arg39: memref<2x32xf32, #tpu.memory_space<vmem>>, %arg40: memref<512x1xf32, #tpu.memory_space<vmem>>, %arg41: memref<1x1xf32, #tpu.memory_space<vmem>>, %arg42: memref<2x1xf32, #tpu.memory_space<vmem>>) attributes {dimension_semantics = [#tpu.dimension_semantics<arbitrary>], iteration_bounds = array<i64: 1>, scalar_prefetch = 0 : i64, scratch_operands = 0 : i64, tpu.core_type = #tpu.core_type<tc>, window_params = [{pipeline_mode = #tpu.pipeline_mode<synchronous>, transform_indices = @transform_0, window_bounds = array<i64: 32, 16>}, {pipeline_mode = #tpu.pipeline_mode<synchronous>, transform_indices = @transform_1, window_bounds = array<i64: 16, 64>}, {pipeline_mode = #tpu.pipeline_mode<synchronous>, transform_indices = @transform_2, window_bounds = array<i64: 1, 64>}, {pipeline_mode = #tpu.pipeline_mode<synchronous>, transform_indices = @transform_3, window_bounds = array<i64: 64, 64>}, {pipeline_mode = #tpu.pipeline_mode<synchronous>, transform_indices = @transform_4, window_bounds = array<i64: 1, 64>}, {pipeline_mode = #tpu.pipeline_mode<synchronous>, transform_indices = @transform_5, window_bounds = array<i64: 64, 64>}, {pipeline_mode = #tpu.pipeline_mode<synchronous>, transform_indices = @transform_6, window_bounds = array<i64: 1, 64>}, {pipeline_mode = #tpu.pipeline_mode<synchronous>, transform_indices = @transform_7, window_bounds = array<i64: 64, 64>}, {pipeline_mode = #tpu.pipeline_mode<synchronous>, transform_indices = @transform_8, window_bounds = array<i64: 1, 64>}, {pipeline_mode = #tpu.pipeline_mode<synchronous>, transform_indices = @transform_9, window_bounds = array<i64: 64, 64>}, {pipeline_mode = #tpu.pipeline_mode<synchronous>, transform_indices = @transform_10, window_bounds = array<i64: 1, 64>}, {pipeline_mode = #tpu.pipeline_mode<synchronous>, transform_indices = @transform_11, window_bounds = array<i64: 64, 128>}, {pipeline_mode = #tpu.pipeline_mode<synchronous>, transform_indices = @transform_12, window_bounds = array<i64: 1, 128>}, {pipeline_mode = #tpu.pipeline_mode<synchronous>, transform_indices = @transform_13, window_bounds = array<i64: 128, 128>}, {pipeline_mode = #tpu.pipeline_mode<synchronous>, transform_indices = @transform_14, window_bounds = array<i64: 1, 128>}, {pipeline_mode = #tpu.pipeline_mode<synchronous>, transform_indices = @transform_15, window_bounds = array<i64: 64, 128>}, {pipeline_mode = #tpu.pipeline_mode<synchronous>, transform_indices = @transform_16, window_bounds = array<i64: 128, 128>}, {pipeline_mode = #tpu.pipeline_mode<synchronous>, transform_indices = @transform_17, window_bounds = array<i64: 1, 128>}, {pipeline_mode = #tpu.pipeline_mode<synchronous>, transform_indices = @transform_18, window_bounds = array<i64: 128, 128>}, {pipeline_mode = #tpu.pipeline_mode<synchronous>, transform_indices = @transform_19, window_bounds = array<i64: 1, 128>}, {pipeline_mode = #tpu.pipeline_mode<synchronous>, transform_indices = @transform_20, window_bounds = array<i64: 128, 256>}, {pipeline_mode = #tpu.pipeline_mode<synchronous>, transform_indices = @transform_21, window_bounds = array<i64: 1, 256>}, {pipeline_mode = #tpu.pipeline_mode<synchronous>, transform_indices = @transform_22, window_bounds = array<i64: 256, 256>}, {pipeline_mode = #tpu.pipeline_mode<synchronous>, transform_indices = @transform_23, window_bounds = array<i64: 1, 256>}, {pipeline_mode = #tpu.pipeline_mode<synchronous>, transform_indices = @transform_24, window_bounds = array<i64: 128, 256>}, {pipeline_mode = #tpu.pipeline_mode<synchronous>, transform_indices = @transform_25, window_bounds = array<i64: 256, 256>}, {pipeline_mode = #tpu.pipeline_mode<synchronous>, transform_indices = @transform_26, window_bounds = array<i64: 1, 256>}, {pipeline_mode = #tpu.pipeline_mode<synchronous>, transform_indices = @transform_27, window_bounds = array<i64: 256, 256>}, {pipeline_mode = #tpu.pipeline_mode<synchronous>, transform_indices = @transform_28, window_bounds = array<i64: 1, 256>}, {pipeline_mode = #tpu.pipeline_mode<synchronous>, transform_indices = @transform_29, window_bounds = array<i64: 256, 512>}, {pipeline_mode = #tpu.pipeline_mode<synchronous>, transform_indices = @transform_30, window_bounds = array<i64: 1, 512>}, {pipeline_mode = #tpu.pipeline_mode<synchronous>, transform_indices = @transform_31, window_bounds = array<i64: 512, 512>}, {pipeline_mode = #tpu.pipeline_mode<synchronous>, transform_indices = @transform_32, window_bounds = array<i64: 1, 512>}, {pipeline_mode = #tpu.pipeline_mode<synchronous>, transform_indices = @transform_33, window_bounds = array<i64: 256, 512>}, {pipeline_mode = #tpu.pipeline_mode<synchronous>, transform_indices = @transform_34, window_bounds = array<i64: 512, 512>}, {pipeline_mode = #tpu.pipeline_mode<synchronous>, transform_indices = @transform_35, window_bounds = array<i64: 1, 512>}, {pipeline_mode = #tpu.pipeline_mode<synchronous>, transform_indices = @transform_36, window_bounds = array<i64: 512, 512>}, {pipeline_mode = #tpu.pipeline_mode<synchronous>, transform_indices = @transform_37, window_bounds = array<i64: 1, 512>}, {pipeline_mode = #tpu.pipeline_mode<synchronous>, transform_indices = @transform_38, window_bounds = array<i64: 2, 32>}, {pipeline_mode = #tpu.pipeline_mode<synchronous>, transform_indices = @transform_39, window_bounds = array<i64: 512, 1>}, {pipeline_mode = #tpu.pipeline_mode<synchronous>, transform_indices = @transform_40, window_bounds = array<i64: 1, 1>}, {pipeline_mode = #tpu.pipeline_mode<synchronous>, transform_indices = @transform_41, window_bounds = array<i64: 2, 1>}]} {
    %c0 = arith.constant 0 : index
    %c0_0 = arith.constant 0 : index
    %0 = vector.load %arg1[%c0, %c0_0] : memref<32x16xf32, #tpu.memory_space<vmem>>, vector<32x16xf32>
    %1 = arith.truncf %0 : vector<32x16xf32> to vector<32x16xbf16>
    %c0_1 = arith.constant 0 : index
    %c0_2 = arith.constant 0 : index
    %2 = vector.load %arg2[%c0_1, %c0_2] : memref<16x64xbf16, #tpu.memory_space<vmem>>, vector<16x64xbf16>
    %cst = arith.constant dense<0.000000e+00> : vector<32x64xf32>
    %3 = tpu.matmul %1, %2, %cst {dimension_numbers = #tpu.dot_dimension_numbers<[1], [0], [0], [1], [0, 0, 1, 1], [], []>} : vector<32x16xbf16>, vector<16x64xbf16>, vector<32x64xf32> -> vector<32x64xf32>
    %c0_3 = arith.constant 0 : index
    %c0_4 = arith.constant 0 : index
    %4 = vector.load %arg3[%c0_3, %c0_4] : memref<1x64xf32, #tpu.memory_space<vmem>>, vector<1x64xf32>
    %5 = vector.broadcast %4 : vector<1x64xf32> to vector<32x64xf32>
    %6 = arith.addf %3, %5 : vector<32x64xf32>
    %cst_5 = arith.constant 0.000000e+00 : f32
    %7 = vector.broadcast %cst_5 : f32 to vector<32x64xf32>
    %8 = arith.maximumf %6, %7 : vector<32x64xf32>
    %9 = arith.truncf %8 : vector<32x64xf32> to vector<32x64xbf16>
    %c0_6 = arith.constant 0 : index
    %c0_7 = arith.constant 0 : index
    %10 = vector.load %arg4[%c0_6, %c0_7] : memref<64x64xbf16, #tpu.memory_space<vmem>>, vector<64x64xbf16>
    %cst_8 = arith.constant dense<0.000000e+00> : vector<32x64xf32>
    %11 = tpu.matmul %9, %10, %cst_8 {dimension_numbers = #tpu.dot_dimension_numbers<[1], [0], [0], [1], [0, 0, 1, 1], [], []>} : vector<32x64xbf16>, vector<64x64xbf16>, vector<32x64xf32> -> vector<32x64xf32>
    %c0_9 = arith.constant 0 : index
    %c0_10 = arith.constant 0 : index
    %12 = vector.load %arg5[%c0_9, %c0_10] : memref<1x64xf32, #tpu.memory_space<vmem>>, vector<1x64xf32>
    %13 = vector.broadcast %12 : vector<1x64xf32> to vector<32x64xf32>
    %14 = arith.addf %11, %13 : vector<32x64xf32>
    %cst_11 = arith.constant 0.000000e+00 : f32
    %15 = vector.broadcast %cst_11 : f32 to vector<32x64xf32>
    %16 = arith.maximumf %14, %15 : vector<32x64xf32>
    %17 = arith.truncf %16 : vector<32x64xf32> to vector<32x64xbf16>
    %c0_12 = arith.constant 0 : index
    %c0_13 = arith.constant 0 : index
    %18 = vector.load %arg6[%c0_12, %c0_13] : memref<64x64xbf16, #tpu.memory_space<vmem>>, vector<64x64xbf16>
    %cst_14 = arith.constant dense<0.000000e+00> : vector<32x64xf32>
    %19 = tpu.matmul %17, %18, %cst_14 {dimension_numbers = #tpu.dot_dimension_numbers<[1], [0], [0], [1], [0, 0, 1, 1], [], []>} : vector<32x64xbf16>, vector<64x64xbf16>, vector<32x64xf32> -> vector<32x64xf32>
    %c0_15 = arith.constant 0 : index
    %c0_16 = arith.constant 0 : index
    %20 = vector.load %arg7[%c0_15, %c0_16] : memref<1x64xf32, #tpu.memory_space<vmem>>, vector<1x64xf32>
    %21 = vector.broadcast %20 : vector<1x64xf32> to vector<32x64xf32>
    %22 = arith.addf %19, %21 : vector<32x64xf32>
    %23 = arith.addf %22, %8 : vector<32x64xf32>
    %cst_17 = arith.constant 0.000000e+00 : f32
    %24 = vector.broadcast %cst_17 : f32 to vector<32x64xf32>
    %25 = arith.maximumf %23, %24 : vector<32x64xf32>
    %26 = arith.truncf %25 : vector<32x64xf32> to vector<32x64xbf16>
    %c0_18 = arith.constant 0 : index
    %c0_19 = arith.constant 0 : index
    %27 = vector.load %arg8[%c0_18, %c0_19] : memref<64x64xbf16, #tpu.memory_space<vmem>>, vector<64x64xbf16>
    %cst_20 = arith.constant dense<0.000000e+00> : vector<32x64xf32>
    %28 = tpu.matmul %26, %27, %cst_20 {dimension_numbers = #tpu.dot_dimension_numbers<[1], [0], [0], [1], [0, 0, 1, 1], [], []>} : vector<32x64xbf16>, vector<64x64xbf16>, vector<32x64xf32> -> vector<32x64xf32>
    %c0_21 = arith.constant 0 : index
    %c0_22 = arith.constant 0 : index
    %29 = vector.load %arg9[%c0_21, %c0_22] : memref<1x64xf32, #tpu.memory_space<vmem>>, vector<1x64xf32>
    %30 = vector.broadcast %29 : vector<1x64xf32> to vector<32x64xf32>
    %31 = arith.addf %28, %30 : vector<32x64xf32>
    %cst_23 = arith.constant 0.000000e+00 : f32
    %32 = vector.broadcast %cst_23 : f32 to vector<32x64xf32>
    %33 = arith.maximumf %31, %32 : vector<32x64xf32>
    %34 = arith.truncf %33 : vector<32x64xf32> to vector<32x64xbf16>
    %c0_24 = arith.constant 0 : index
    %c0_25 = arith.constant 0 : index
    %35 = vector.load %arg10[%c0_24, %c0_25] : memref<64x64xbf16, #tpu.memory_space<vmem>>, vector<64x64xbf16>
    %cst_26 = arith.constant dense<0.000000e+00> : vector<32x64xf32>
    %36 = tpu.matmul %34, %35, %cst_26 {dimension_numbers = #tpu.dot_dimension_numbers<[1], [0], [0], [1], [0, 0, 1, 1], [], []>} : vector<32x64xbf16>, vector<64x64xbf16>, vector<32x64xf32> -> vector<32x64xf32>
    %c0_27 = arith.constant 0 : index
    %c0_28 = arith.constant 0 : index
    %37 = vector.load %arg11[%c0_27, %c0_28] : memref<1x64xf32, #tpu.memory_space<vmem>>, vector<1x64xf32>
    %38 = vector.broadcast %37 : vector<1x64xf32> to vector<32x64xf32>
    %39 = arith.addf %36, %38 : vector<32x64xf32>
    %40 = arith.addf %39, %25 : vector<32x64xf32>
    %cst_29 = arith.constant 0.000000e+00 : f32
    %41 = vector.broadcast %cst_29 : f32 to vector<32x64xf32>
    %42 = arith.maximumf %40, %41 : vector<32x64xf32>
    %c0_30 = arith.constant 0 : index
    %c0_31 = arith.constant 0 : index
    %43 = vector.load %arg16[%c0_30, %c0_31] : memref<64x128xf32, #tpu.memory_space<vmem>>, vector<64x128xf32>
    %cst_32 = arith.constant dense<0.000000e+00> : vector<32x128xf32>
    %44 = tpu.matmul %42, %43, %cst_32 {dimension_numbers = #tpu.dot_dimension_numbers<[1], [0], [0], [1], [0, 0, 1, 1], [], []>} : vector<32x64xf32>, vector<64x128xf32>, vector<32x128xf32> -> vector<32x128xf32>
    %45 = arith.truncf %42 : vector<32x64xf32> to vector<32x64xbf16>
    %c0_33 = arith.constant 0 : index
    %c0_34 = arith.constant 0 : index
    %46 = vector.load %arg12[%c0_33, %c0_34] : memref<64x128xbf16, #tpu.memory_space<vmem>>, vector<64x128xbf16>
    %cst_35 = arith.constant dense<0.000000e+00> : vector<32x128xf32>
    %47 = tpu.matmul %45, %46, %cst_35 {dimension_numbers = #tpu.dot_dimension_numbers<[1], [0], [0], [1], [0, 0, 1, 1], [], []>} : vector<32x64xbf16>, vector<64x128xbf16>, vector<32x128xf32> -> vector<32x128xf32>
    %c0_36 = arith.constant 0 : index
    %c0_37 = arith.constant 0 : index
    %48 = vector.load %arg13[%c0_36, %c0_37] : memref<1x128xf32, #tpu.memory_space<vmem>>, vector<1x128xf32>
    %49 = vector.broadcast %48 : vector<1x128xf32> to vector<32x128xf32>
    %50 = arith.addf %47, %49 : vector<32x128xf32>
    %cst_38 = arith.constant 0.000000e+00 : f32
    %51 = vector.broadcast %cst_38 : f32 to vector<32x128xf32>
    %52 = arith.maximumf %50, %51 : vector<32x128xf32>
    %53 = arith.truncf %52 : vector<32x128xf32> to vector<32x128xbf16>
    %c0_39 = arith.constant 0 : index
    %c0_40 = arith.constant 0 : index
    %54 = vector.load %arg14[%c0_39, %c0_40] : memref<128x128xbf16, #tpu.memory_space<vmem>>, vector<128x128xbf16>
    %cst_41 = arith.constant dense<0.000000e+00> : vector<32x128xf32>
    %55 = tpu.matmul %53, %54, %cst_41 {dimension_numbers = #tpu.dot_dimension_numbers<[1], [0], [0], [1], [0, 0, 1, 1], [], []>} : vector<32x128xbf16>, vector<128x128xbf16>, vector<32x128xf32> -> vector<32x128xf32>
    %c0_42 = arith.constant 0 : index
    %c0_43 = arith.constant 0 : index
    %56 = vector.load %arg15[%c0_42, %c0_43] : memref<1x128xf32, #tpu.memory_space<vmem>>, vector<1x128xf32>
    %57 = vector.broadcast %56 : vector<1x128xf32> to vector<32x128xf32>
    %58 = arith.addf %55, %57 : vector<32x128xf32>
    %59 = arith.addf %58, %44 : vector<32x128xf32>
    %cst_44 = arith.constant 0.000000e+00 : f32
    %60 = vector.broadcast %cst_44 : f32 to vector<32x128xf32>
    %61 = arith.maximumf %59, %60 : vector<32x128xf32>
    %62 = arith.truncf %61 : vector<32x128xf32> to vector<32x128xbf16>
    %c0_45 = arith.constant 0 : index
    %c0_46 = arith.constant 0 : index
    %63 = vector.load %arg17[%c0_45, %c0_46] : memref<128x128xbf16, #tpu.memory_space<vmem>>, vector<128x128xbf16>
    %cst_47 = arith.constant dense<0.000000e+00> : vector<32x128xf32>
    %64 = tpu.matmul %62, %63, %cst_47 {dimension_numbers = #tpu.dot_dimension_numbers<[1], [0], [0], [1], [0, 0, 1, 1], [], []>} : vector<32x128xbf16>, vector<128x128xbf16>, vector<32x128xf32> -> vector<32x128xf32>
    %c0_48 = arith.constant 0 : index
    %c0_49 = arith.constant 0 : index
    %65 = vector.load %arg18[%c0_48, %c0_49] : memref<1x128xf32, #tpu.memory_space<vmem>>, vector<1x128xf32>
    %66 = vector.broadcast %65 : vector<1x128xf32> to vector<32x128xf32>
    %67 = arith.addf %64, %66 : vector<32x128xf32>
    %cst_50 = arith.constant 0.000000e+00 : f32
    %68 = vector.broadcast %cst_50 : f32 to vector<32x128xf32>
    %69 = arith.maximumf %67, %68 : vector<32x128xf32>
    %70 = arith.truncf %69 : vector<32x128xf32> to vector<32x128xbf16>
    %c0_51 = arith.constant 0 : index
    %c0_52 = arith.constant 0 : index
    %71 = vector.load %arg19[%c0_51, %c0_52] : memref<128x128xbf16, #tpu.memory_space<vmem>>, vector<128x128xbf16>
    %cst_53 = arith.constant dense<0.000000e+00> : vector<32x128xf32>
    %72 = tpu.matmul %70, %71, %cst_53 {dimension_numbers = #tpu.dot_dimension_numbers<[1], [0], [0], [1], [0, 0, 1, 1], [], []>} : vector<32x128xbf16>, vector<128x128xbf16>, vector<32x128xf32> -> vector<32x128xf32>
    %c0_54 = arith.constant 0 : index
    %c0_55 = arith.constant 0 : index
    %73 = vector.load %arg20[%c0_54, %c0_55] : memref<1x128xf32, #tpu.memory_space<vmem>>, vector<1x128xf32>
    %74 = vector.broadcast %73 : vector<1x128xf32> to vector<32x128xf32>
    %75 = arith.addf %72, %74 : vector<32x128xf32>
    %76 = arith.addf %75, %61 : vector<32x128xf32>
    %cst_56 = arith.constant 0.000000e+00 : f32
    %77 = vector.broadcast %cst_56 : f32 to vector<32x128xf32>
    %78 = arith.maximumf %76, %77 : vector<32x128xf32>
    %c0_57 = arith.constant 0 : index
    %c0_58 = arith.constant 0 : index
    %79 = vector.load %arg25[%c0_57, %c0_58] : memref<128x256xf32, #tpu.memory_space<vmem>>, vector<128x256xf32>
    %cst_59 = arith.constant dense<0.000000e+00> : vector<32x256xf32>
    %80 = tpu.matmul %78, %79, %cst_59 {dimension_numbers = #tpu.dot_dimension_numbers<[1], [0], [0], [1], [0, 0, 1, 1], [], []>} : vector<32x128xf32>, vector<128x256xf32>, vector<32x256xf32> -> vector<32x256xf32>
    %81 = arith.truncf %78 : vector<32x128xf32> to vector<32x128xbf16>
    %c0_60 = arith.constant 0 : index
    %c0_61 = arith.constant 0 : index
    %82 = vector.load %arg21[%c0_60, %c0_61] : memref<128x256xbf16, #tpu.memory_space<vmem>>, vector<128x256xbf16>
    %cst_62 = arith.constant dense<0.000000e+00> : vector<32x256xf32>
    %83 = tpu.matmul %81, %82, %cst_62 {dimension_numbers = #tpu.dot_dimension_numbers<[1], [0], [0], [1], [0, 0, 1, 1], [], []>} : vector<32x128xbf16>, vector<128x256xbf16>, vector<32x256xf32> -> vector<32x256xf32>
    %c0_63 = arith.constant 0 : index
    %c0_64 = arith.constant 0 : index
    %84 = vector.load %arg22[%c0_63, %c0_64] : memref<1x256xf32, #tpu.memory_space<vmem>>, vector<1x256xf32>
    %85 = vector.broadcast %84 : vector<1x256xf32> to vector<32x256xf32>
    %86 = arith.addf %83, %85 : vector<32x256xf32>
    %cst_65 = arith.constant 0.000000e+00 : f32
    %87 = vector.broadcast %cst_65 : f32 to vector<32x256xf32>
    %88 = arith.maximumf %86, %87 : vector<32x256xf32>
    %89 = arith.truncf %88 : vector<32x256xf32> to vector<32x256xbf16>
    %c0_66 = arith.constant 0 : index
    %c0_67 = arith.constant 0 : index
    %90 = vector.load %arg23[%c0_66, %c0_67] : memref<256x256xbf16, #tpu.memory_space<vmem>>, vector<256x256xbf16>
    %cst_68 = arith.constant dense<0.000000e+00> : vector<32x256xf32>
    %91 = tpu.matmul %89, %90, %cst_68 {dimension_numbers = #tpu.dot_dimension_numbers<[1], [0], [0], [1], [0, 0, 1, 1], [], []>} : vector<32x256xbf16>, vector<256x256xbf16>, vector<32x256xf32> -> vector<32x256xf32>
    %c0_69 = arith.constant 0 : index
    %c0_70 = arith.constant 0 : index
    %92 = vector.load %arg24[%c0_69, %c0_70] : memref<1x256xf32, #tpu.memory_space<vmem>>, vector<1x256xf32>
    %93 = vector.broadcast %92 : vector<1x256xf32> to vector<32x256xf32>
    %94 = arith.addf %91, %93 : vector<32x256xf32>
    %95 = arith.addf %94, %80 : vector<32x256xf32>
    %cst_71 = arith.constant 0.000000e+00 : f32
    %96 = vector.broadcast %cst_71 : f32 to vector<32x256xf32>
    %97 = arith.maximumf %95, %96 : vector<32x256xf32>
    %98 = arith.truncf %97 : vector<32x256xf32> to vector<32x256xbf16>
    %c0_72 = arith.constant 0 : index
    %c0_73 = arith.constant 0 : index
    %99 = vector.load %arg26[%c0_72, %c0_73] : memref<256x256xbf16, #tpu.memory_space<vmem>>, vector<256x256xbf16>
    %cst_74 = arith.constant dense<0.000000e+00> : vector<32x256xf32>
    %100 = tpu.matmul %98, %99, %cst_74 {dimension_numbers = #tpu.dot_dimension_numbers<[1], [0], [0], [1], [0, 0, 1, 1], [], []>} : vector<32x256xbf16>, vector<256x256xbf16>, vector<32x256xf32> -> vector<32x256xf32>
    %c0_75 = arith.constant 0 : index
    %c0_76 = arith.constant 0 : index
    %101 = vector.load %arg27[%c0_75, %c0_76] : memref<1x256xf32, #tpu.memory_space<vmem>>, vector<1x256xf32>
    %102 = vector.broadcast %101 : vector<1x256xf32> to vector<32x256xf32>
    %103 = arith.addf %100, %102 : vector<32x256xf32>
    %cst_77 = arith.constant 0.000000e+00 : f32
    %104 = vector.broadcast %cst_77 : f32 to vector<32x256xf32>
    %105 = arith.maximumf %103, %104 : vector<32x256xf32>
    %106 = arith.truncf %105 : vector<32x256xf32> to vector<32x256xbf16>
    %c0_78 = arith.constant 0 : index
    %c0_79 = arith.constant 0 : index
    %107 = vector.load %arg28[%c0_78, %c0_79] : memref<256x256xbf16, #tpu.memory_space<vmem>>, vector<256x256xbf16>
    %cst_80 = arith.constant dense<0.000000e+00> : vector<32x256xf32>
    %108 = tpu.matmul %106, %107, %cst_80 {dimension_numbers = #tpu.dot_dimension_numbers<[1], [0], [0], [1], [0, 0, 1, 1], [], []>} : vector<32x256xbf16>, vector<256x256xbf16>, vector<32x256xf32> -> vector<32x256xf32>
    %c0_81 = arith.constant 0 : index
    %c0_82 = arith.constant 0 : index
    %109 = vector.load %arg29[%c0_81, %c0_82] : memref<1x256xf32, #tpu.memory_space<vmem>>, vector<1x256xf32>
    %110 = vector.broadcast %109 : vector<1x256xf32> to vector<32x256xf32>
    %111 = arith.addf %108, %110 : vector<32x256xf32>
    %112 = arith.addf %111, %97 : vector<32x256xf32>
    %cst_83 = arith.constant 0.000000e+00 : f32
    %113 = vector.broadcast %cst_83 : f32 to vector<32x256xf32>
    %114 = arith.maximumf %112, %113 : vector<32x256xf32>
    %c0_84 = arith.constant 0 : index
    %c0_85 = arith.constant 0 : index
    %115 = vector.load %arg34[%c0_84, %c0_85] : memref<256x512xf32, #tpu.memory_space<vmem>>, vector<256x512xf32>
    %cst_86 = arith.constant dense<0.000000e+00> : vector<32x512xf32>
    %116 = tpu.matmul %114, %115, %cst_86 {dimension_numbers = #tpu.dot_dimension_numbers<[1], [0], [0], [1], [0, 0, 1, 1], [], []>} : vector<32x256xf32>, vector<256x512xf32>, vector<32x512xf32> -> vector<32x512xf32>
    %117 = arith.truncf %114 : vector<32x256xf32> to vector<32x256xbf16>
    %c0_87 = arith.constant 0 : index
    %c0_88 = arith.constant 0 : index
    %118 = vector.load %arg30[%c0_87, %c0_88] : memref<256x512xbf16, #tpu.memory_space<vmem>>, vector<256x512xbf16>
    %cst_89 = arith.constant dense<0.000000e+00> : vector<32x512xf32>
    %119 = tpu.matmul %117, %118, %cst_89 {dimension_numbers = #tpu.dot_dimension_numbers<[1], [0], [0], [1], [0, 0, 1, 1], [], []>} : vector<32x256xbf16>, vector<256x512xbf16>, vector<32x512xf32> -> vector<32x512xf32>
    %c0_90 = arith.constant 0 : index
    %c0_91 = arith.constant 0 : index
    %120 = vector.load %arg31[%c0_90, %c0_91] : memref<1x512xf32, #tpu.memory_space<vmem>>, vector<1x512xf32>
    %121 = vector.broadcast %120 : vector<1x512xf32> to vector<32x512xf32>
    %122 = arith.addf %119, %121 : vector<32x512xf32>
    %cst_92 = arith.constant 0.000000e+00 : f32
    %123 = vector.broadcast %cst_92 : f32 to vector<32x512xf32>
    %124 = arith.maximumf %122, %123 : vector<32x512xf32>
    %125 = arith.truncf %124 : vector<32x512xf32> to vector<32x512xbf16>
    %c0_93 = arith.constant 0 : index
    %c0_94 = arith.constant 0 : index
    %126 = vector.load %arg32[%c0_93, %c0_94] : memref<512x512xbf16, #tpu.memory_space<vmem>>, vector<512x512xbf16>
    %cst_95 = arith.constant dense<0.000000e+00> : vector<32x512xf32>
    %127 = tpu.matmul %125, %126, %cst_95 {dimension_numbers = #tpu.dot_dimension_numbers<[1], [0], [0], [1], [0, 0, 1, 1], [], []>} : vector<32x512xbf16>, vector<512x512xbf16>, vector<32x512xf32> -> vector<32x512xf32>
    %c0_96 = arith.constant 0 : index
    %c0_97 = arith.constant 0 : index
    %128 = vector.load %arg33[%c0_96, %c0_97] : memref<1x512xf32, #tpu.memory_space<vmem>>, vector<1x512xf32>
    %129 = vector.broadcast %128 : vector<1x512xf32> to vector<32x512xf32>
    %130 = arith.addf %127, %129 : vector<32x512xf32>
    %131 = arith.addf %130, %116 : vector<32x512xf32>
    %cst_98 = arith.constant 0.000000e+00 : f32
    %132 = vector.broadcast %cst_98 : f32 to vector<32x512xf32>
    %133 = arith.maximumf %131, %132 : vector<32x512xf32>
    %134 = arith.truncf %133 : vector<32x512xf32> to vector<32x512xbf16>
    %c0_99 = arith.constant 0 : index
    %c0_100 = arith.constant 0 : index
    %135 = vector.load %arg35[%c0_99, %c0_100] : memref<512x512xbf16, #tpu.memory_space<vmem>>, vector<512x512xbf16>
    %cst_101 = arith.constant dense<0.000000e+00> : vector<32x512xf32>
    %136 = tpu.matmul %134, %135, %cst_101 {dimension_numbers = #tpu.dot_dimension_numbers<[1], [0], [0], [1], [0, 0, 1, 1], [], []>} : vector<32x512xbf16>, vector<512x512xbf16>, vector<32x512xf32> -> vector<32x512xf32>
    %c0_102 = arith.constant 0 : index
    %c0_103 = arith.constant 0 : index
    %137 = vector.load %arg36[%c0_102, %c0_103] : memref<1x512xf32, #tpu.memory_space<vmem>>, vector<1x512xf32>
    %138 = vector.broadcast %137 : vector<1x512xf32> to vector<32x512xf32>
    %139 = arith.addf %136, %138 : vector<32x512xf32>
    %cst_104 = arith.constant 0.000000e+00 : f32
    %140 = vector.broadcast %cst_104 : f32 to vector<32x512xf32>
    %141 = arith.maximumf %139, %140 : vector<32x512xf32>
    %142 = arith.truncf %141 : vector<32x512xf32> to vector<32x512xbf16>
    %c0_105 = arith.constant 0 : index
    %c0_106 = arith.constant 0 : index
    %143 = vector.load %arg37[%c0_105, %c0_106] : memref<512x512xbf16, #tpu.memory_space<vmem>>, vector<512x512xbf16>
    %cst_107 = arith.constant dense<0.000000e+00> : vector<32x512xf32>
    %144 = tpu.matmul %142, %143, %cst_107 {dimension_numbers = #tpu.dot_dimension_numbers<[1], [0], [0], [1], [0, 0, 1, 1], [], []>} : vector<32x512xbf16>, vector<512x512xbf16>, vector<32x512xf32> -> vector<32x512xf32>
    %c0_108 = arith.constant 0 : index
    %c0_109 = arith.constant 0 : index
    %145 = vector.load %arg38[%c0_108, %c0_109] : memref<1x512xf32, #tpu.memory_space<vmem>>, vector<1x512xf32>
    %146 = vector.broadcast %145 : vector<1x512xf32> to vector<32x512xf32>
    %147 = arith.addf %144, %146 : vector<32x512xf32>
    %148 = arith.addf %147, %133 : vector<32x512xf32>
    %cst_110 = arith.constant 0.000000e+00 : f32
    %149 = vector.broadcast %cst_110 : f32 to vector<32x512xf32>
    %150 = arith.maximumf %148, %149 : vector<32x512xf32>
    %c0_111 = arith.constant 0 : index
    %c0_112 = arith.constant 0 : index
    %151 = vector.load %arg39[%c0_111, %c0_112] : memref<2x32xf32, #tpu.memory_space<vmem>>, vector<2x32xf32>
    %cst_113 = arith.constant dense<0.000000e+00> : vector<2x512xf32>
    %152 = tpu.matmul %151, %150, %cst_113 {dimension_numbers = #tpu.dot_dimension_numbers<[1], [0], [0], [1], [0, 0, 1, 1], [], []>} : vector<2x32xf32>, vector<32x512xf32>, vector<2x512xf32> -> vector<2x512xf32>
    %c0_114 = arith.constant 0 : index
    %c0_115 = arith.constant 0 : index
    %153 = vector.load %arg40[%c0_114, %c0_115] : memref<512x1xf32, #tpu.memory_space<vmem>>, vector<512x1xf32>
    %cst_116 = arith.constant dense<0.000000e+00> : vector<2x1xf32>
    %154 = tpu.matmul %152, %153, %cst_116 {dimension_numbers = #tpu.dot_dimension_numbers<[1], [0], [0], [1], [0, 0, 1, 1], [], []>} : vector<2x512xf32>, vector<512x1xf32>, vector<2x1xf32> -> vector<2x1xf32>
    %c0_117 = arith.constant 0 : index
    %c0_118 = arith.constant 0 : index
    %155 = vector.load %arg41[%c0_117, %c0_118] : memref<1x1xf32, #tpu.memory_space<vmem>>, vector<1x1xf32>
    %156 = vector.broadcast %155 : vector<1x1xf32> to vector<2x1xf32>
    %157 = arith.addf %154, %156 : vector<2x1xf32>
    %c0_119 = arith.constant 0 : index
    %c0_120 = arith.constant 0 : index
    %158 = vector.load %arg42[%c0_119, %c0_120] : memref<2x1xf32, #tpu.memory_space<vmem>>, vector<2x1xf32>
    tpu.vector_store %arg42[%c0_119, %c0_120], %157 {strides = array<i32>} : memref<2x1xf32, #tpu.memory_space<vmem>>, vector<2x1xf32>,
    return
  }
  func.func @transform_0(%arg0: i32) -> (i32, i32) {
    %c0_i32 = arith.constant 0 : i32
    %c0_i32_0 = arith.constant 0 : i32
    %c0_i32_1 = arith.constant 0 : i32
    return %c0_i32, %c0_i32_0 : i32, i32
  }
  func.func @transform_1(%arg0: i32) -> (i32, i32) {
    %c0_i32 = arith.constant 0 : i32
    %c0_i32_0 = arith.constant 0 : i32
    %c0_i32_1 = arith.constant 0 : i32
    return %c0_i32, %c0_i32_0 : i32, i32
  }
  func.func @transform_2(%arg0: i32) -> (i32, i32) {
    %c0_i32 = arith.constant 0 : i32
    %c0_i32_0 = arith.constant 0 : i32
    %c0_i32_1 = arith.constant 0 : i32
    return %c0_i32, %c0_i32_0 : i32, i32
  }
  func.func @transform_3(%arg0: i32) -> (i32, i32) {
    %c0_i32 = arith.constant 0 : i32
    %c0_i32_0 = arith.constant 0 : i32
    %c0_i32_1 = arith.constant 0 : i32
    return %c0_i32, %c0_i32_0 : i32, i32
  }
  func.func @transform_4(%arg0: i32) -> (i32, i32) {
    %c0_i32 = arith.constant 0 : i32
    %c0_i32_0 = arith.constant 0 : i32
    %c0_i32_1 = arith.constant 0 : i32
    return %c0_i32, %c0_i32_0 : i32, i32
  }
  func.func @transform_5(%arg0: i32) -> (i32, i32) {
    %c0_i32 = arith.constant 0 : i32
    %c0_i32_0 = arith.constant 0 : i32
    %c0_i32_1 = arith.constant 0 : i32
    return %c0_i32, %c0_i32_0 : i32, i32
  }
  func.func @transform_6(%arg0: i32) -> (i32, i32) {
    %c0_i32 = arith.constant 0 : i32
    %c0_i32_0 = arith.constant 0 : i32
    %c0_i32_1 = arith.constant 0 : i32
    return %c0_i32, %c0_i32_0 : i32, i32
  }
  func.func @transform_7(%arg0: i32) -> (i32, i32) {
    %c0_i32 = arith.constant 0 : i32
    %c0_i32_0 = arith.constant 0 : i32
    %c0_i32_1 = arith.constant 0 : i32
    return %c0_i32, %c0_i32_0 : i32, i32
  }
  func.func @transform_8(%arg0: i32) -> (i32, i32) {
    %c0_i32 = arith.constant 0 : i32
    %c0_i32_0 = arith.constant 0 : i32
    %c0_i32_1 = arith.constant 0 : i32
    return %c0_i32, %c0_i32_0 : i32, i32
  }
  func.func @transform_9(%arg0: i32) -> (i32, i32) {
    %c0_i32 = arith.constant 0 : i32
    %c0_i32_0 = arith.constant 0 : i32
    %c0_i32_1 = arith.constant 0 : i32
    return %c0_i32, %c0_i32_0 : i32, i32
  }
  func.func @transform_10(%arg0: i32) -> (i32, i32) {
    %c0_i32 = arith.constant 0 : i32
    %c0_i32_0 = arith.constant 0 : i32
    %c0_i32_1 = arith.constant 0 : i32
    return %c0_i32, %c0_i32_0 : i32, i32
  }
  func.func @transform_11(%arg0: i32) -> (i32, i32) {
    %c0_i32 = arith.constant 0 : i32
    %c0_i32_0 = arith.constant 0 : i32
    %c0_i32_1 = arith.constant 0 : i32
    return %c0_i32, %c0_i32_0 : i32, i32
  }
  func.func @transform_12(%arg0: i32) -> (i32, i32) {
    %c0_i32 = arith.constant 0 : i32
    %c0_i32_0 = arith.constant 0 : i32
    %c0_i32_1 = arith.constant 0 : i32
    return %c0_i32, %c0_i32_0 : i32, i32
  }
  func.func @transform_13(%arg0: i32) -> (i32, i32) {
    %c0_i32 = arith.constant 0 : i32
    %c0_i32_0 = arith.constant 0 : i32
    %c0_i32_1 = arith.constant 0 : i32
    return %c0_i32, %c0_i32_0 : i32, i32
  }
  func.func @transform_14(%arg0: i32) -> (i32, i32) {
    %c0_i32 = arith.constant 0 : i32
    %c0_i32_0 = arith.constant 0 : i32
    %c0_i32_1 = arith.constant 0 : i32
    return %c0_i32, %c0_i32_0 : i32, i32
  }
  func.func @transform_15(%arg0: i32) -> (i32, i32) {
    %c0_i32 = arith.constant 0 : i32
    %c0_i32_0 = arith.constant 0 : i32
    %c0_i32_1 = arith.constant 0 : i32
    return %c0_i32, %c0_i32_0 : i32, i32
  }
  func.func @transform_16(%arg0: i32) -> (i32, i32) {
    %c0_i32 = arith.constant 0 : i32
    %c0_i32_0 = arith.constant 0 : i32
    %c0_i32_1 = arith.constant 0 : i32
    return %c0_i32, %c0_i32_0 : i32, i32
  }
  func.func @transform_17(%arg0: i32) -> (i32, i32) {
    %c0_i32 = arith.constant 0 : i32
    %c0_i32_0 = arith.constant 0 : i32
    %c0_i32_1 = arith.constant 0 : i32
    return %c0_i32, %c0_i32_0 : i32, i32
  }
  func.func @transform_18(%arg0: i32) -> (i32, i32) {
    %c0_i32 = arith.constant 0 : i32
    %c0_i32_0 = arith.constant 0 : i32
    %c0_i32_1 = arith.constant 0 : i32
    return %c0_i32, %c0_i32_0 : i32, i32
  }
  func.func @transform_19(%arg0: i32) -> (i32, i32) {
    %c0_i32 = arith.constant 0 : i32
    %c0_i32_0 = arith.constant 0 : i32
    %c0_i32_1 = arith.constant 0 : i32
    return %c0_i32, %c0_i32_0 : i32, i32
  }
  func.func @transform_20(%arg0: i32) -> (i32, i32) {
    %c0_i32 = arith.constant 0 : i32
    %c0_i32_0 = arith.constant 0 : i32
    %c0_i32_1 = arith.constant 0 : i32
    return %c0_i32, %c0_i32_0 : i32, i32
  }
  func.func @transform_21(%arg0: i32) -> (i32, i32) {
    %c0_i32 = arith.constant 0 : i32
    %c0_i32_0 = arith.constant 0 : i32
    %c0_i32_1 = arith.constant 0 : i32
    return %c0_i32, %c0_i32_0 : i32, i32
  }
  func.func @transform_22(%arg0: i32) -> (i32, i32) {
    %c0_i32 = arith.constant 0 : i32
    %c0_i32_0 = arith.constant 0 : i32
    %c0_i32_1 = arith.constant 0 : i32
    return %c0_i32, %c0_i32_0 : i32, i32
  }
  func.func @transform_23(%arg0: i32) -> (i32, i32) {
    %c0_i32 = arith.constant 0 : i32
    %c0_i32_0 = arith.constant 0 : i32
    %c0_i32_1 = arith.constant 0 : i32
    return %c0_i32, %c0_i32_0 : i32, i32
  }
  func.func @transform_24(%arg0: i32) -> (i32, i32) {
    %c0_i32 = arith.constant 0 : i32
    %c0_i32_0 = arith.constant 0 : i32
    %c0_i32_1 = arith.constant 0 : i32
    return %c0_i32, %c0_i32_0 : i32, i32
  }
  func.func @transform_25(%arg0: i32) -> (i32, i32) {
    %c0_i32 = arith.constant 0 : i32
    %c0_i32_0 = arith.constant 0 : i32
    %c0_i32_1 = arith.constant 0 : i32
    return %c0_i32, %c0_i32_0 : i32, i32
  }
  func.func @transform_26(%arg0: i32) -> (i32, i32) {
    %c0_i32 = arith.constant 0 : i32
    %c0_i32_0 = arith.constant 0 : i32
    %c0_i32_1 = arith.constant 0 : i32
    return %c0_i32, %c0_i32_0 : i32, i32
  }
  func.func @transform_27(%arg0: i32) -> (i32, i32) {
    %c0_i32 = arith.constant 0 : i32
    %c0_i32_0 = arith.constant 0 : i32
    %c0_i32_1 = arith.constant 0 : i32
    return %c0_i32, %c0_i32_0 : i32, i32
  }
  func.func @transform_28(%arg0: i32) -> (i32, i32) {
    %c0_i32 = arith.constant 0 : i32
    %c0_i32_0 = arith.constant 0 : i32
    %c0_i32_1 = arith.constant 0 : i32
    return %c0_i32, %c0_i32_0 : i32, i32
  }
  func.func @transform_29(%arg0: i32) -> (i32, i32) {
    %c0_i32 = arith.constant 0 : i32
    %c0_i32_0 = arith.constant 0 : i32
    %c0_i32_1 = arith.constant 0 : i32
    return %c0_i32, %c0_i32_0 : i32, i32
  }
  func.func @transform_30(%arg0: i32) -> (i32, i32) {
    %c0_i32 = arith.constant 0 : i32
    %c0_i32_0 = arith.constant 0 : i32
    %c0_i32_1 = arith.constant 0 : i32
    return %c0_i32, %c0_i32_0 : i32, i32
  }
  func.func @transform_31(%arg0: i32) -> (i32, i32) {
    %c0_i32 = arith.constant 0 : i32
    %c0_i32_0 = arith.constant 0 : i32
    %c0_i32_1 = arith.constant 0 : i32
    return %c0_i32, %c0_i32_0 : i32, i32
  }
  func.func @transform_32(%arg0: i32) -> (i32, i32) {
    %c0_i32 = arith.constant 0 : i32
    %c0_i32_0 = arith.constant 0 : i32
    %c0_i32_1 = arith.constant 0 : i32
    return %c0_i32, %c0_i32_0 : i32, i32
  }
  func.func @transform_33(%arg0: i32) -> (i32, i32) {
    %c0_i32 = arith.constant 0 : i32
    %c0_i32_0 = arith.constant 0 : i32
    %c0_i32_1 = arith.constant 0 : i32
    return %c0_i32, %c0_i32_0 : i32, i32
  }
  func.func @transform_34(%arg0: i32) -> (i32, i32) {
    %c0_i32 = arith.constant 0 : i32
    %c0_i32_0 = arith.constant 0 : i32
    %c0_i32_1 = arith.constant 0 : i32
    return %c0_i32, %c0_i32_0 : i32, i32
  }
  func.func @transform_35(%arg0: i32) -> (i32, i32) {
    %c0_i32 = arith.constant 0 : i32
    %c0_i32_0 = arith.constant 0 : i32
    %c0_i32_1 = arith.constant 0 : i32
    return %c0_i32, %c0_i32_0 : i32, i32
  }
  func.func @transform_36(%arg0: i32) -> (i32, i32) {
    %c0_i32 = arith.constant 0 : i32
    %c0_i32_0 = arith.constant 0 : i32
    %c0_i32_1 = arith.constant 0 : i32
    return %c0_i32, %c0_i32_0 : i32, i32
  }
  func.func @transform_37(%arg0: i32) -> (i32, i32) {
    %c0_i32 = arith.constant 0 : i32
    %c0_i32_0 = arith.constant 0 : i32
    %c0_i32_1 = arith.constant 0 : i32
    return %c0_i32, %c0_i32_0 : i32, i32
  }
  func.func @transform_38(%arg0: i32) -> (i32, i32) {
    %c0_i32 = arith.constant 0 : i32
    %c0_i32_0 = arith.constant 0 : i32
    %c0_i32_1 = arith.constant 0 : i32
    return %c0_i32, %c0_i32_0 : i32, i32
  }
  func.func @transform_39(%arg0: i32) -> (i32, i32) {
    %c0_i32 = arith.constant 0 : i32
    %c0_i32_0 = arith.constant 0 : i32
    %c0_i32_1 = arith.constant 0 : i32
    return %c0_i32, %c0_i32_0 : i32, i32
  }
  func.func @transform_40(%arg0: i32) -> (i32, i32) {
    %c0_i32 = arith.constant 0 : i32
    %c0_i32_0 = arith.constant 0 : i32
    %c0_i32_1 = arith.constant 0 : i32
    return %c0_i32, %c0_i32_0 : i32, i32
  }
  func.func @transform_41(%arg0: i32) -> (i32, i32) {
    %c0_i32 = arith.constant 0 : i32
    %c0_i32_0 = arith.constant 0 : i32
    %c0_i32_1 = arith.constant 0 : i32
    return %c0_i32, %c0_i32_0 : i32, i32
  }
}

</mosaic_0001>

<bundles_post_ra>
// kernel: forward.1
= control target key start
LH: loop header
LB: loop body
LE: loop exit
PB: predicated region body
PF: predicated region fallthrough
CT: control target
= control target key end

     0   :  { %s10795_s6 = smov 1   ;;  %s10796_s10 = smov 2   ;;  %s12389_s0 = inlined_call_operand.smem [shape: u32[42], index: -1, kind: input, shape index: {}] }
   0x1   :  { %s10879_s5 = sld [smem:[%s12389_s0]]   ;;  %s10797_s14 = smov 3  }
   0x2   :  { %s10884_s9 = sld [smem:[%s12389_s0 + %s10795_s6]]   ;;  %s10798_s18 = smov 4  }
   0x3   :  { %s10889_s13 = sld [smem:[%s12389_s0 + %s10796_s10]]   ;;  %s10799_s22 = smov 5  }
   0x4   :  { %s10894_s17 = sld [smem:[%s12389_s0 + %s10797_s14]]   ;;  %s10800_s26 = smov 6  }
   0x5   :  { %s10899_s21 = sld [smem:[%s12389_s0 + %s10798_s18]]   ;;  %s10801_s30 = smov 7  }
   0x6   :  { %s10904_s25 = sld [smem:[%s12389_s0 + %s10799_s22]]   ;;  %s10802_s4 = smov 8  }
   0x7   :  { %12417 = sst [smem:[#allocation58_spill]] %s10879_s5  ;;  %s10803_s10 = smov 9  }
   0x8   :  { %12418 = sst [smem:[#allocation59_spill]] %s10884_s9  ;;  %s10804_s15 = smov 10  }
   0x9   :  { %12419 = sst [smem:[#allocation60_spill]] %s10889_s13  ;;  %s10805_s20 = smov 11  }
   0xa   :  { %s10909_s29 = sld [smem:[%s12389_s0 + %s10800_s26]]   ;;  %s10806_s26 = smov 12  }
   0xb   :  { %s10914_s3 = sld [smem:[%s12389_s0 + %s10801_s30]]   ;;  %s10807_s1 = smov 13  }
   0xc   :  { %12420 = sst [smem:[#allocation61_spill]] %s10904_s25  ;;  %s10808_s7 = smov 14  }
   0xd   :  { %s10919_s8 = sld [smem:[%s12389_s0 + %s10802_s4]]   ;;  %s10810_s22 = smov 16  }
   0xe   :  { %s10924_s14 = sld [smem:[%s12389_s0 + %s10803_s10]]   ;;  %s10811_s28 = smov 17  }
   0xf   :  { %s10929_s19 = sld [smem:[%s12389_s0 + %s10804_s15]]   ;;  %s10809_s15 = smov 15  }
  0x10   :  { %s10934_s24 = sld [smem:[%s12389_s0 + %s10805_s20]]  }
  0x11   :  { %12421 = sst [smem:[#allocation62_spill]] %s10914_s3 }
  0x12   :  { %s10939_s30 = sld [smem:[%s12389_s0 + %s10806_s26]]  }
  0x13   :  { %s10944_s6 = sld [smem:[%s12389_s0 + %s10807_s1]]   ;;  %s10835_s1 = smov 41  }
  0x14   :  { %12422 = sst [smem:[#allocation63_spill]] %s10924_s14 }
  0x15   :  { %s10949_s12 = sld [smem:[%s12389_s0 + %s10808_s7]]   ;;  %s10812_s7 = smov 18  }
  0x16   :  { %12423 = sst [smem:[#allocation64_spill]] %s10934_s24 }
  0x17   :  { %s10954_s20 = sld [smem:[%s12389_s0 + %s10809_s15]]   ;;  %s10813_s15 = smov 19  }
  0x18   :  { %s10959_s27 = sld [smem:[%s12389_s0 + %s10810_s22]]   ;;  %s10814_s22 = smov 20  }
  0x19   :  { %12424 = sst [smem:[#allocation65_spill]] %s10944_s6 }
  0x1a   :  { %s10964_s4 = sld [smem:[%s12389_s0 + %s10811_s28]]   ;;  %s10815_s28 = smov 21  }
  0x1b   :  { %12425 = sst [smem:[#allocation66_spill]] %s10949_s12 }
  0x1c   :  { %s10969_s6 = sld [smem:[%s12389_s0 + %s10812_s7]]   ;;  %s10816_s7 = smov 22  }
  0x1d   :  { %s10974_s13 = sld [smem:[%s12389_s0 + %s10813_s15]]   ;;  %s10817_s15 = smov 23  }
  0x1e   :  { %12426 = sst [smem:[#allocation67_spill]] %s10959_s27 }
  0x1f   :  { %s10979_s5 = sld [smem:[%s12389_s0 + %s10814_s22]]   ;;  %s10818_s22 = smov 24  }
  0x20   :  { %s10984_s9 = sld [smem:[%s12389_s0 + %s10815_s28]]   ;;  %s10819_s28 = smov 25  }
  0x21   :  { %s10994_s27 = sld [smem:[%s12389_s0 + %s10817_s15]]   ;;  %s10821_s15 = smov 27  }
  0x22   :  { %12427 = sst [smem:[#allocation68_spill]] %s10969_s6 }
  0x23   :  { %s10989_s6 = sld [smem:[%s12389_s0 + %s10816_s7]]   ;;  %s10820_s7 = smov 26  }
  0x24   :  { %s11004_s12 = sld [smem:[%s12389_s0 + %s10819_s28]]   ;;  %s10823_s28 = smov 29  }
  0x25   :  { %12428 = sst [smem:[#allocation69_spill]] %s10979_s5 }
  0x26   :  { %s10999_s5 = sld [smem:[%s12389_s0 + %s10818_s22]]   ;;  %s10822_s22 = smov 28  }
  0x27   :  { %s11014_s24 = sld [smem:[%s12389_s0 + %s10821_s15]]   ;;  %s10825_s15 = smov 31  }
  0x28   :  { %s11024_s14 = sld [smem:[%s12389_s0 + %s10823_s28]]   ;;  %s10827_s28 = smov 33  }
  0x29   :  { %12429 = sst [smem:[#allocation70_spill]] %s10989_s6 }
  0x2a   :  { %s11009_s6 = sld [smem:[%s12389_s0 + %s10820_s7]]   ;;  %s10824_s7 = smov 30  }
  0x2c   :  { %12430 = sst [smem:[#allocation71_spill]] %s10999_s5 }
  0x2d   :  { %12432 = sst [smem:[#allocation73_spill]] %s11014_s24 }
  0x2e   :  { %s11019_s5 = sld [smem:[%s12389_s0 + %s10822_s22]]   ;;  %s10826_s22 = smov 32  }
  0x2f   :  { %12434 = sst [smem:[#allocation75_spill]] %s11024_s14 }
  0x30   :  { %12431 = sst [smem:[#allocation72_spill]] %s11009_s6 }
  0x31   :  { %s11029_s6 = sld [smem:[%s12389_s0 + %s10824_s7]]   ;;  %s10828_s7 = smov 34  }
  0x32   :  { %s11034_s24 = sld [smem:[%s12389_s0 + %s10825_s15]]   ;;  %s10829_s15 = smov 35  }
  0x33   :  { %s11044_s14 = sld [smem:[%s12389_s0 + %s10827_s28]]   ;;  %s10831_s28 = smov 37  }
  0x34   :  { %12433 = sst [smem:[#allocation74_spill]] %s11019_s5 }
  0x35   :  { %s11039_s5 = sld [smem:[%s12389_s0 + %s10826_s22]]   ;;  %s10830_s22 = smov 36  }
  0x36   :  { %s11054_s3 = sld [smem:[%s12389_s0 + %s10829_s15]]   ;;  %s10833_s15 = smov 39  }
  0x37   :  { %12435 = sst [smem:[#allocation76_spill]] %s11029_s6 }
  0x38   :  { %s11049_s6 = sld [smem:[%s12389_s0 + %s10828_s7]]   ;;  %s10832_s7 = smov 38  }
  0x39   :  { %12437 = sst [smem:[#allocation78_spill]] %s11044_s14 }
  0x3a   :  { %s11064_s14 = sld [smem:[%s12389_s0 + %s10831_s28]]  }
  0x3b   :  { %12436 = sst [smem:[#allocation77_spill]] %s11039_s5 }
  0x3c   :  { %12438 = sst [smem:[#allocation79_spill]] %s11054_s3 }
  0x3d   :  { %s11059_s5 = sld [smem:[%s12389_s0 + %s10830_s22]]   ;;  %s10834_s22 = smov 40  }
  0x3e   :  { %s11069_s25 = sld [smem:[%s12389_s0 + %s10832_s7]]  }
  0x3f   :  { %s11074_s3 = sld [smem:[%s12389_s0 + %s10833_s15]]  }
  0x40   :  { %12440 = sst [smem:[#allocation81_spill]] %s11064_s14 }
  0x41   :  { %s11082_s14 = sld [smem:[%s12389_s0 + %s10835_s1]]  }
  0x43   :  { %12439 = sst [smem:[#allocation80_spill]] %s11059_s5 }
  0x44   :  { %s6982_s5 = sld [smem:[%s12389_s0 + %s10834_s22]]  }
  0x4a   :  { %v88_v0 = vstv %s6982_s5 }
  0x4b   :  { %89 = vst [vmem:[#allocation2] sm:$0x1] %v88_v0 }
  0x4c   :  { %90 = vsyncpa [#allocation4], 0 }
  0x4d   :  { %91 = vsyncpa [#allocation6], 0 }
  0x4e   :  { %92 = vsyncpa [#allocation9], 0 }
  0x4f   :  { %93 = vsyncpa [#allocation12], 0 }
  0x50   :  { %94 = vsyncpa [#allocation15], 0 }
  0x51   :  { %95 = vsyncpa [#allocation18], 0 }
  0x52   :  { %96 = vsyncpa [#allocation21], 0 }
  0x53   :  { %97 = vsyncpa [#allocation24], 0 }
  0x54   :  { %98 = vsyncpa [#allocation27], 0 }
  0x55   :  { %99 = vsyncpa [#allocation30], 0 }
  0x56   :  { %100 = vsyncpa [#allocation33], 0 }
  0x57   :  { %101 = vsyncpa [#allocation36], 0 }
  0x58   :  { %102 = vsyncpa [#allocation39], 0  ;;  %s128_s7 = sshll.u32 %s10899_s21, 4  ;;  %s129_s7 = int_to_ptr.hbm [resolvable:$true] %s128_s7 }
  0x59   :  { %103 = vsyncpa [#allocation42], 0  ;;  %s10836_s0 = smov [#allocation5]   ;;  %s152_s10 = sshll.u32 %s10909_s29, 4  ;;  %s153_s10 = int_to_ptr.hbm [resolvable:$true] %s152_s10 }
  0x5a   :  { %s130_s5 = sshll.u32 %s10836_s0, 4  ;;  %s10119_s11 = sshra.s32 %s129_s7, 4  ;;  %s131_s5 = int_to_ptr.vmem [resolvable:$true] %s130_s5  ;;  %s10120_s11 = int_to_ptr.hbm [resolvable:$true] %s10119_s11 }
  0x5b   :  { %s10121_s15 = scalar_lea.hbm %s10120_s11, 1  ;;  %s10123_s16 = scalar_lea.hbm %s10899_s21, 1 }
  0x5c   :  { %p10122_p0 = scmp.ne.s32.totalorder %s10120_s11, %s10121_s15  ;;  %p10124_p1 = scmp.lt.s32.totalorder %s10120_s11, %s10899_s21 }
  0x5d   :  { %p10125_p2 = scmp.lt.s32.totalorder %s10123_s16, %s10121_s15 }
  0x5f   :  { %p10126_p3 = por %p10125_p2, %p10124_p1 }
  0x61   :  { %p10127_p4 = pnand %p10126_p3, %p10122_p0 }
  0x63   :  { %10130 = shalt.err (!%p10127_p4)
}
  0x64   :  { %133 = dma.hbm_to_vmem [thread:$0]  %s129_s7, 16, %s131_s5, [#allocation6]  }
  0x65   :  { %s10837_s18 = smov [#allocation8]   ;;  %s176_s23 = sshll.u32 %s10919_s8, 4  ;;  %s177_s23 = int_to_ptr.hbm [resolvable:$true] %s176_s23 }
  0x66   :  { %s154_s22 = sshll.u32 %s10837_s18, 4  ;;  %s10143_s26 = sshra.s32 %s153_s10, 4  ;;  %s155_s22 = int_to_ptr.vmem [resolvable:$true] %s154_s22  ;;  %s10144_s26 = int_to_ptr.hbm [resolvable:$true] %s10143_s26 }
  0x67   :  { %s10145_s1 = scalar_lea.hbm %s10144_s26, 1  ;;  %s10147_s28 = scalar_lea.hbm %s10909_s29, 1 }
  0x68   :  { %p10146_p5 = scmp.ne.s32.totalorder %s10144_s26, %s10145_s1  ;;  %p10148_p6 = scmp.lt.s32.totalorder %s10144_s26, %s10909_s29 }
  0x69   :  { %p10149_p7 = scmp.lt.s32.totalorder %s10147_s28, %s10145_s1 }
  0x6b   :  { %p10150_p8 = por %p10149_p7, %p10148_p6 }
  0x6d   :  { %p10151_p9 = pnand %p10150_p8, %p10146_p5 }
  0x6f   :  { %10154 = shalt.err (!%p10151_p9)
}
  0x70   :  { %157 = dma.hbm_to_vmem [thread:$0]  %s153_s10, 16, %s155_s22, [#allocation9]  }
  0x71   :  { %s200_s21 = sshll.u32 %s10929_s19, 4  ;;  %s10838_s2 = smov [#allocation11]   ;;  %s201_s21 = int_to_ptr.hbm [resolvable:$true] %s200_s21 }
  0x72   :  { %s178_s7 = sshll.u32 %s10838_s2, 4  ;;  %s10167_s0 = sshra.s32 %s177_s23, 4  ;;  %s179_s7 = int_to_ptr.vmem [resolvable:$true] %s178_s7  ;;  %s10168_s0 = int_to_ptr.hbm [resolvable:$true] %s10167_s0 }
  0x73   :  { %s10169_s5 = scalar_lea.hbm %s10168_s0, 1  ;;  %s10171_s11 = scalar_lea.hbm %s10919_s8, 1 }
  0x74   :  { %p10170_p10 = scmp.ne.s32.totalorder %s10168_s0, %s10169_s5  ;;  %p10172_p11 = scmp.lt.s32.totalorder %s10168_s0, %s10919_s8 }
  0x75   :  { %p10173_p12 = scmp.lt.s32.totalorder %s10171_s11, %s10169_s5 }
  0x77   :  { %p10174_p13 = por %p10173_p12, %p10172_p11 }
  0x79   :  { %p10175_p0 = pnand %p10174_p13, %p10170_p10 }
  0x7b   :  { %10178 = shalt.err (!%p10175_p0)
}
  0x7c   :  { %181 = dma.hbm_to_vmem [thread:$0]  %s177_s23, 16, %s179_s7, [#allocation12]  }
  0x7d   :  { %s10839_s29 = smov [#allocation14]   ;;  %s224_s15 = sshll.u32 %s10939_s30, 4  ;;  %s225_s15 = int_to_ptr.hbm [resolvable:$true] %s224_s15 }
  0x7e   :  { %s202_s10 = sshll.u32 %s10839_s29, 4  ;;  %s10191_s16 = sshra.s32 %s201_s21, 4  ;;  %s203_s10 = int_to_ptr.vmem [resolvable:$true] %s202_s10  ;;  %s10192_s16 = int_to_ptr.hbm [resolvable:$true] %s10191_s16 }
  0x7f   :  { %s10193_s18 = scalar_lea.hbm %s10192_s16, 1  ;;  %s10195_s22 = scalar_lea.hbm %s10929_s19, 1 }
  0x80   :  { %p10194_p1 = scmp.ne.s32.totalorder %s10192_s16, %s10193_s18  ;;  %p10196_p2 = scmp.lt.s32.totalorder %s10192_s16, %s10929_s19 }
  0x81   :  { %p10197_p3 = scmp.lt.s32.totalorder %s10195_s22, %s10193_s18 }
  0x83   :  { %p10198_p4 = por %p10197_p3, %p10196_p2 }
  0x85   :  { %p10199_p5 = pnand %p10198_p4, %p10194_p1 }
  0x87   :  { %10202 = shalt.err (!%p10199_p5)
}
  0x88   :  { %205 = dma.hbm_to_vmem [thread:$0]  %s201_s21, 16, %s203_s10, [#allocation15]  }
  0x89   :  { %s247_s8 = sshll.u32 %s10954_s20, 4  ;;  %s10840_s23 = smov [#allocation17]   ;;  %s11098_s8 = int_to_ptr.hbm [resolvable:$true] %s247_s8 }
  0x8a   :  { %s226_s26 = sshll.u32 %s10840_s23, 4  ;;  %s10215_s1 = sshra.s32 %s225_s15, 4  ;;  %s227_s26 = int_to_ptr.vmem [resolvable:$true] %s226_s26  ;;  %s10216_s1 = int_to_ptr.hbm [resolvable:$true] %s10215_s1 }
  0x8b   :  { %s10217_s28 = scalar_lea.hbm %s10216_s1, 1  ;;  %s10219_s2 = scalar_lea.hbm %s10939_s30, 1 }
  0x8c   :  { %p10218_p6 = scmp.ne.s32.totalorder %s10216_s1, %s10217_s28  ;;  %p10220_p7 = scmp.lt.s32.totalorder %s10216_s1, %s10939_s30 }
  0x8d   :  { %p10221_p8 = scmp.lt.s32.totalorder %s10219_s2, %s10217_s28 }
  0x8f   :  { %p10222_p9 = por %p10221_p8, %p10220_p7 }
  0x91   :  { %p10223_p10 = pnand %p10222_p9, %p10218_p6 }
  0x93   :  { %10226 = shalt.err (!%p10223_p10)
}
  0x94   :  { %229 = dma.hbm_to_vmem [thread:$0]  %s225_s15, 16, %s227_s26, [#allocation18]  }
  0x95   :  { %s10841_s19 = smov [#allocation20]   ;;  %s10239_s7 = sshra.s32 %s11098_s8, 4  ;;  %s10240_s7 = int_to_ptr.hbm [resolvable:$true] %s10239_s7 }
  0x96   :  { %s249_s21 = sshll.u32 %s10841_s19, 4  ;;  %s10241_s0 = scalar_lea.hbm %s10240_s7, 64  ;;  %s250_s21 = int_to_ptr.vmem [resolvable:$true] %s249_s21 }
  0x97   :  { %p10242_p11 = scmp.ne.s32.totalorder %s10240_s7, %s10241_s0  ;;  %s10243_s5 = scalar_lea.hbm %s10954_s20, 64 }
  0x98   :  { %p10244_p12 = scmp.lt.s32.totalorder %s10240_s7, %s10954_s20  ;;  %p10245_p13 = scmp.lt.s32.totalorder %s10243_s5, %s10241_s0 }
  0x9a   :  { %p10246_p0 = por %p10245_p13, %p10244_p12 }
  0x9c   :  { %p10247_p1 = pnand %p10246_p0, %p10242_p11 }
  0x9e   :  { %10250 = shalt.err (!%p10247_p1)
}
  0x9f   :  { %s10842_s30 = smov 128   ;;  %s10843_s11 = smov 8  }
  0xa0   :  { %255 = dma.hbm_to_vmem [thread:$0]  %s11098_s8, 1024, %s250_s21, [#allocation21], %s10842_s30, %s10842_s30, %s10843_s11  }
  0xa1   :  { %s274_s29 = sshll.u32 %s10964_s4, 4  ;;  %s10844_s10 = smov [#allocation23]   ;;  %s275_s29 = int_to_ptr.hbm [resolvable:$true] %s274_s29 }
  0xa2   :  { %s276_s15 = sshll.u32 %s10844_s10, 4  ;;  %s298_s20 = sshll.u32 %s10974_s13, 4  ;;  %s277_s15 = int_to_ptr.vmem [resolvable:$true] %s276_s15  ;;  %s299_s20 = int_to_ptr.hbm [resolvable:$true] %s298_s20 }
  0xa3   :  { %s10263_s16 = sshra.s32 %s275_s29, 4  ;;  %s10267_s22 = scalar_lea.hbm %s10964_s4, 1  ;;  %s10264_s16 = int_to_ptr.hbm [resolvable:$true] %s10263_s16 }
  0xa4   :  { %s10265_s18 = scalar_lea.hbm %s10264_s16, 1  ;;  %p10268_p3 = scmp.lt.s32.totalorder %s10264_s16, %s10964_s4 }
  0xa5   :  { %p10266_p2 = scmp.ne.s32.totalorder %s10264_s16, %s10265_s18  ;;  %p10269_p4 = scmp.lt.s32.totalorder %s10267_s22, %s10265_s18 }
  0xa7   :  { %p10270_p5 = por %p10269_p4, %p10268_p3 }
  0xa9   :  { %p10271_p6 = pnand %p10270_p5, %p10266_p2 }
  0xab   :  { %10274 = shalt.err (!%p10271_p6)
}
  0xac   :  { %279 = dma.hbm_to_vmem [thread:$0]  %s275_s29, 16, %s277_s15, [#allocation24]  }
  0xad   :  { %s10845_s8 = smov [#allocation26]   ;;  %s322_s26 = sshll.u32 %s10984_s9, 4  ;;  %s323_s26 = int_to_ptr.hbm [resolvable:$true] %s322_s26 }
  0xae   :  { %s300_s23 = sshll.u32 %s10845_s8, 4  ;;  %s10287_s1 = sshra.s32 %s299_s20, 4  ;;  %s301_s23 = int_to_ptr.vmem [resolvable:$true] %s300_s23  ;;  %s10288_s1 = int_to_ptr.hbm [resolvable:$true] %s10287_s1 }
  0xaf   :  { %s10289_s28 = scalar_lea.hbm %s10288_s1, 1  ;;  %s10291_s2 = scalar_lea.hbm %s10974_s13, 1 }
  0xb0   :  { %p10290_p7 = scmp.ne.s32.totalorder %s10288_s1, %s10289_s28  ;;  %p10292_p8 = scmp.lt.s32.totalorder %s10288_s1, %s10974_s13 }
  0xb1   :  { %p10293_p9 = scmp.lt.s32.totalorder %s10291_s2, %s10289_s28 }
  0xb3   :  { %p10294_p10 = por %p10293_p9, %p10292_p8 }
  0xb5   :  { %p10295_p11 = pnand %p10294_p10, %p10290_p7 }
  0xb7   :  { %10298 = shalt.err (!%p10295_p11)
}
  0xb8   :  { %303 = dma.hbm_to_vmem [thread:$0]  %s299_s20, 16, %s301_s23, [#allocation27]  }
  0xb9   :  { %s346_s4 = sshll.u32 %s10994_s27, 4  ;;  %s10846_s19 = smov [#allocation29]   ;;  %s347_s4 = int_to_ptr.hbm [resolvable:$true] %s346_s4 }
  0xba   :  { %s324_s21 = sshll.u32 %s10846_s19, 4  ;;  %s10311_s7 = sshra.s32 %s323_s26, 4  ;;  %s325_s21 = int_to_ptr.vmem [resolvable:$true] %s324_s21  ;;  %s10312_s7 = int_to_ptr.hbm [resolvable:$true] %s10311_s7 }
  0xbb   :  { %s10313_s0 = scalar_lea.hbm %s10312_s7, 2  ;;  %s10315_s5 = scalar_lea.hbm %s10984_s9, 2 }
  0xbc   :  { %p10314_p12 = scmp.ne.s32.totalorder %s10312_s7, %s10313_s0  ;;  %p10316_p13 = scmp.lt.s32.totalorder %s10312_s7, %s10984_s9 }
  0xbd   :  { %p10317_p0 = scmp.lt.s32.totalorder %s10315_s5, %s10313_s0 }
  0xbf   :  { %p10318_p1 = por %p10317_p0, %p10316_p13 }
  0xc1   :  { %p10319_p2 = pnand %p10318_p1, %p10314_p12 }
  0xc3   :  { %10322 = shalt.err (!%p10319_p2)
}
  0xc4   :  { %327 = dma.hbm_to_vmem [thread:$0]  %s323_s26, 32, %s325_s21, [#allocation30]  }
  0xc5   :  { %s10847_s13 = smov [#allocation32]   ;;  %s369_s10 = sshll.u32 %s11004_s12, 4  ;;  %s11120_s10 = int_to_ptr.hbm [resolvable:$true] %s369_s10 }
  0xc6   :  { %s348_s29 = sshll.u32 %s10847_s13, 4  ;;  %s10335_s15 = sshra.s32 %s347_s4, 4  ;;  %s349_s29 = int_to_ptr.vmem [resolvable:$true] %s348_s29  ;;  %s10336_s15 = int_to_ptr.hbm [resolvable:$true] %s10335_s15 }
  0xc7   :  { %s10337_s20 = scalar_lea.hbm %s10336_s15, 2  ;;  %s10339_s16 = scalar_lea.hbm %s10994_s27, 2 }
  0xc8   :  { %p10338_p3 = scmp.ne.s32.totalorder %s10336_s15, %s10337_s20  ;;  %p10340_p4 = scmp.lt.s32.totalorder %s10336_s15, %s10994_s27 }
  0xc9   :  { %p10341_p5 = scmp.lt.s32.totalorder %s10339_s16, %s10337_s20 }
  0xcb   :  { %p10342_p6 = por %p10341_p5, %p10340_p4 }
  0xcd   :  { %p10343_p7 = pnand %p10342_p6, %p10338_p3 }
  0xcf   :  { %10346 = shalt.err (!%p10343_p7)
}
  0xd0   :  { %351 = dma.hbm_to_vmem [thread:$0]  %s347_s4, 32, %s349_s29, [#allocation33]  }
  0xd1   :  { %s10848_s9 = smov [#allocation35]   ;;  %s403_s22 = sshll.u32 %s11034_s24, 4  ;;  %s404_s22 = int_to_ptr.hbm [resolvable:$true] %s403_s22 }
  0xd2   :  { %s371_s18 = sshll.u32 %s10848_s9, 4  ;;  %s10359_s8 = sshra.s32 %s11120_s10, 4  ;;  %s372_s18 = int_to_ptr.vmem [resolvable:$true] %s371_s18  ;;  %s10360_s8 = int_to_ptr.hbm [resolvable:$true] %s10359_s8 }
  0xd3   :  { %s10361_s23 = scalar_lea.hbm %s10360_s8, 256  ;;  %s10363_s26 = scalar_lea.hbm %s11004_s12, 256 }
  0xd4   :  { %p10362_p8 = scmp.ne.s32.totalorder %s10360_s8, %s10361_s23  ;;  %p10364_p9 = scmp.lt.s32.totalorder %s10360_s8, %s11004_s12 }
  0xd5   :  { %p10365_p10 = scmp.lt.s32.totalorder %s10363_s26, %s10361_s23 }
  0xd7   :  { %p10366_p11 = por %p10365_p10, %p10364_p9 }
  0xd9   :  { %p10367_p12 = pnand %p10366_p11, %p10362_p8 }
  0xdb   :  { %10370 = shalt.err (!%p10367_p12)
}
  0xdc   :  { %377 = dma.hbm_to_vmem [thread:$0]  %s11120_s10, 4096, %s372_s18, [#allocation36], %s10842_s30, %s10842_s30, %s10843_s11  }
  0xdd   :  { %s10849_s27 = smov [#allocation38]   ;;  %s431_s28 = sshll.u32 %s11049_s6, 4  ;;  %s11133_s28 = int_to_ptr.hbm [resolvable:$true] %s431_s28 }
  0xde   :  { %s405_s1 = sshll.u32 %s10849_s27, 4  ;;  %s10383_s12 = sshra.s32 %s404_s22, 4  ;;  %s406_s1 = int_to_ptr.vmem [resolvable:$true] %s405_s1  ;;  %s10384_s12 = int_to_ptr.hbm [resolvable:$true] %s10383_s12 }
  0xdf   :  { %s10385_s2 = scalar_lea.hbm %s10384_s12, 1024  ;;  %s10387_s4 = scalar_lea.hbm %s11034_s24, 1024 }
  0xe0   :  { %p10386_p13 = scmp.ne.s32.totalorder %s10384_s12, %s10385_s2  ;;  %p10388_p0 = scmp.lt.s32.totalorder %s10384_s12, %s11034_s24 }
  0xe1   :  { %p10389_p1 = scmp.lt.s32.totalorder %s10387_s4, %s10385_s2 }
  0xe3   :  { %p10390_p2 = por %p10389_p1, %p10388_p0 }
  0xe5   :  { %p10391_p3 = pnand %p10390_p2, %p10386_p13 }
  0xe7   :  { %10394 = shalt.err (!%p10391_p3)
}
  0xe8   :  { %s10850_s19 = smov 256   ;;  %s10851_s21 = smov 16  }
  0xe9   :  { %411 = dma.hbm_to_vmem [thread:$0]  %s404_s22, 16384, %s406_s1, [#allocation39], %s10850_s19, %s10850_s19, %s10851_s21  }
  0xea   :  { %s114_s7 = sshll.u32 %s10894_s17, 4  ;;  %s10852_s0 = smov [#allocation41]   ;;  %s11141_s7 = int_to_ptr.hbm [resolvable:$true] %s114_s7 }
  0xeb   :  { %s433_s5 = sshll.u32 %s10852_s0, 4  ;;  %s10407_s24 = sshra.s32 %s11133_s28, 4  ;;  %s434_s5 = int_to_ptr.vmem [resolvable:$true] %s433_s5  ;;  %s10408_s24 = int_to_ptr.hbm [resolvable:$true] %s10407_s24 }
  0xec   :  { %s10409_s13 = scalar_lea.hbm %s10408_s24, 1024  ;;  %s10411_s29 = scalar_lea.hbm %s11049_s6, 1024 }
  0xed   :  { %p10410_p4 = scmp.ne.s32.totalorder %s10408_s24, %s10409_s13  ;;  %p10412_p5 = scmp.lt.s32.totalorder %s10408_s24, %s11049_s6 }
  0xee   :  { %p10413_p6 = scmp.lt.s32.totalorder %s10411_s29, %s10409_s13 }
  0xf0   :  { %p10414_p7 = por %p10413_p6, %p10412_p5 }
  0xf2   :  { %p10415_p8 = pnand %p10414_p7, %p10410_p4 }
  0xf4   :  { %10418 = shalt.err (!%p10415_p8)
}
  0xf5   :  { %439 = dma.hbm_to_vmem [thread:$0]  %s11133_s28, 16384, %s434_s5, [#allocation42], %s10850_s19, %s10850_s19, %s10851_s21  }
  0xf6   :  { %s10853_s10 = smov [#allocation3]   ;;  %s10431_s20 = sshra.s32 %s11141_s7, 4  ;;  %s10432_s20 = int_to_ptr.hbm [resolvable:$true] %s10431_s20 }
  0xf7   :  { %s116_s15 = sshll.u32 %s10853_s10, 4  ;;  %s10433_s16 = scalar_lea.hbm %s10432_s20, 32  ;;  %s117_s15 = int_to_ptr.vmem [resolvable:$true] %s116_s15 }
  0xf8   :  { %p10434_p9 = scmp.ne.s32.totalorder %s10432_s20, %s10433_s16  ;;  %s10435_s6 = scalar_lea.hbm %s10894_s17, 32 }
  0xf9   :  { %p10436_p10 = scmp.lt.s32.totalorder %s10432_s20, %s10894_s17  ;;  %p10437_p11 = scmp.lt.s32.totalorder %s10435_s6, %s10433_s16 }
  0xfb   :  { %p10438_p12 = por %p10437_p11, %p10436_p10 }
  0xfd   :  { %p10439_p13 = pnand %p10438_p12, %p10434_p9 }
  0xff   :  { %10442 = shalt.err (!%p10439_p13)
}
 0x100   :  { %s10854_s9 = smov 64   ;;  %s12441_s18 = sld [smem:[#allocation61_spill]] }
 0x101   :  { %s12442_s22 = sld [smem:[#allocation62_spill]]  ;;  %s10855_s8 = smov 4  }
 0x102   :  { %122 = dma.hbm_to_vmem [thread:$0]  %s11141_s7, 512, %s117_s15, [#allocation4], %s10854_s9, %s10854_s9, %s10855_s8  }
 0x103   :  { %s10856_s26 = smov [#allocation7]  }
 0x104   :  { %s140_s27 = sshll.u32 %s10856_s26, 4  ;;  %s141_s27 = int_to_ptr.vmem [resolvable:$true] %s140_s27 }
 0x106   :  { %s138_s23 = sshll.u32 %s12441_s18, 4  ;;  %s10459_s12 = scalar_lea.hbm %s12441_s18, 32  ;;  %s139_s23 = int_to_ptr.hbm [resolvable:$true] %s138_s23 }
 0x107   :  { %s162_s17 = sshll.u32 %s12442_s22, 4  ;;  %s10455_s1 = sshra.s32 %s139_s23, 4  ;;  %s10456_s1 = int_to_ptr.hbm [resolvable:$true] %s10455_s1  ;;  %s163_s17 = int_to_ptr.hbm [resolvable:$true] %s162_s17 }
 0x108   :  { %s10457_s28 = scalar_lea.hbm %s10456_s1, 32  ;;  %p10460_p1 = scmp.lt.s32.totalorder %s10456_s1, %s12441_s18 }
 0x109   :  { %p10458_p0 = scmp.ne.s32.totalorder %s10456_s1, %s10457_s28  ;;  %p10461_p2 = scmp.lt.s32.totalorder %s10459_s12, %s10457_s28 }
 0x10b   :  { %p10462_p3 = por %p10461_p2, %p10460_p1 }
 0x10d   :  { %p10463_p4 = pnand %p10462_p3, %p10458_p0 }
 0x10f   :  { %10466 = shalt.err (!%p10463_p4)
}
 0x110   :  { %s12443_s2 = sld [smem:[#allocation63_spill]]  ;;  %s10857_s4 = smov [#allocation10]  }
 0x111   :  { %146 = dma.hbm_to_vmem [thread:$0]  %s139_s23, 512, %s141_s27, [#allocation6], %s10854_s9, %s10854_s9, %s10855_s8  }
 0x112   :  { %s164_s7 = sshll.u32 %s10857_s4, 4  ;;  %s10479_s5 = sshra.s32 %s163_s17, 4  ;;  %s165_s7 = int_to_ptr.vmem [resolvable:$true] %s164_s7  ;;  %s10480_s5 = int_to_ptr.hbm [resolvable:$true] %s10479_s5 }
 0x113   :  { %s10481_s24 = scalar_lea.hbm %s10480_s5, 32  ;;  %s10483_s13 = scalar_lea.hbm %s12442_s22, 32 }
 0x114   :  { %p10482_p5 = scmp.ne.s32.totalorder %s10480_s5, %s10481_s24  ;;  %p10484_p6 = scmp.lt.s32.totalorder %s10480_s5, %s12442_s22 }
 0x115   :  { %p10485_p7 = scmp.lt.s32.totalorder %s10483_s13, %s10481_s24 }
 0x116   :  { %s186_s0 = sshll.u32 %s12443_s2, 4  ;;  %s11165_s0 = int_to_ptr.hbm [resolvable:$true] %s186_s0 }
 0x117   :  { %p10486_p8 = por %p10485_p7, %p10484_p6 }
 0x119   :  { %p10487_p9 = pnand %p10486_p8, %p10482_p5 }
 0x11b   :  { %10490 = shalt.err (!%p10487_p9)
}
 0x11c   :  { %s12444_s29 = sld [smem:[#allocation64_spill]]  ;;  %s10858_s15 = smov [#allocation13]  }
 0x11d   :  { %170 = dma.hbm_to_vmem [thread:$0]  %s163_s17, 512, %s165_s7, [#allocation9], %s10854_s9, %s10854_s9, %s10855_s8  }
 0x11e   :  { %s188_s20 = sshll.u32 %s10858_s15, 4  ;;  %s10503_s16 = sshra.s32 %s11165_s0, 4  ;;  %s189_s20 = int_to_ptr.vmem [resolvable:$true] %s188_s20  ;;  %s10504_s16 = int_to_ptr.hbm [resolvable:$true] %s10503_s16 }
 0x11f   :  { %s10505_s6 = scalar_lea.hbm %s10504_s16, 32  ;;  %s10507_s18 = scalar_lea.hbm %s12443_s2, 32 }
 0x120   :  { %p10506_p10 = scmp.ne.s32.totalorder %s10504_s16, %s10505_s6  ;;  %p10508_p11 = scmp.lt.s32.totalorder %s10504_s16, %s12443_s2 }
 0x121   :  { %p10509_p12 = scmp.lt.s32.totalorder %s10507_s18, %s10505_s6 }
 0x122   :  { %s210_s10 = sshll.u32 %s12444_s29, 4  ;;  %s11173_s10 = int_to_ptr.hbm [resolvable:$true] %s210_s10 }
 0x123   :  { %p10510_p13 = por %p10509_p12, %p10508_p11 }
 0x125   :  { %p10511_p0 = pnand %p10510_p13, %p10506_p10 }
 0x127   :  { %10514 = shalt.err (!%p10511_p0)
}
 0x128   :  { %s12445_s22 = sld [smem:[#allocation66_spill]]  ;;  %s10859_s23 = smov [#allocation16]  }
 0x129   :  { %194 = dma.hbm_to_vmem [thread:$0]  %s11165_s0, 512, %s189_s20, [#allocation12], %s10854_s9, %s10854_s9, %s10855_s8  }
 0x12a   :  { %s212_s26 = sshll.u32 %s10859_s23, 4  ;;  %s10527_s17 = sshra.s32 %s11173_s10, 4  ;;  %s213_s26 = int_to_ptr.vmem [resolvable:$true] %s212_s26  ;;  %s10528_s17 = int_to_ptr.hbm [resolvable:$true] %s10527_s17 }
 0x12b   :  { %s10529_s1 = scalar_lea.hbm %s10528_s17, 32  ;;  %s10531_s28 = scalar_lea.hbm %s12444_s29, 32 }
 0x12c   :  { %p10530_p1 = scmp.ne.s32.totalorder %s10528_s17, %s10529_s1  ;;  %p10532_p2 = scmp.lt.s32.totalorder %s10528_s17, %s12444_s29 }
 0x12d   :  { %p10533_p3 = scmp.lt.s32.totalorder %s10531_s28, %s10529_s1 }
 0x12e   :  { %s237_s27 = sshll.u32 %s12445_s22, 4  ;;  %s238_s27 = int_to_ptr.hbm [resolvable:$true] %s237_s27 }
 0x12f   :  { %p10534_p4 = por %p10533_p3, %p10532_p2 }
 0x131   :  { %p10535_p5 = pnand %p10534_p4, %p10530_p1 }
 0x133   :  { %10538 = shalt.err (!%p10535_p5)
}
 0x134   :  { %s12446_s12 = sld [smem:[#allocation67_spill]]  ;;  %s10860_s4 = smov [#allocation19]  }
 0x135   :  { %218 = dma.hbm_to_vmem [thread:$0]  %s11173_s10, 512, %s213_s26, [#allocation15], %s10854_s9, %s10854_s9, %s10855_s8  }
 0x136   :  { %s239_s7 = sshll.u32 %s10860_s4, 4  ;;  %s10551_s0 = sshra.s32 %s238_s27, 4  ;;  %s240_s7 = int_to_ptr.vmem [resolvable:$true] %s239_s7  ;;  %s10552_s0 = int_to_ptr.hbm [resolvable:$true] %s10551_s0 }
 0x137   :  { %s10553_s5 = scalar_lea.hbm %s10552_s0, 1  ;;  %s10555_s24 = scalar_lea.hbm %s12445_s22, 1 }
 0x138   :  { %p10554_p6 = scmp.ne.s32.totalorder %s10552_s0, %s10553_s5  ;;  %p10556_p7 = scmp.lt.s32.totalorder %s10552_s0, %s12445_s22 }
 0x139   :  { %p10557_p8 = scmp.lt.s32.totalorder %s10555_s24, %s10553_s5 }
 0x13a   :  { %s260_s2 = sshll.u32 %s12446_s12, 4  ;;  %s11191_s2 = int_to_ptr.hbm [resolvable:$true] %s260_s2 }
 0x13b   :  { %p10558_p9 = por %p10557_p8, %p10556_p7 }
 0x13d   :  { %p10559_p10 = pnand %p10558_p9, %p10554_p6 }
 0x13f   :  { %10562 = shalt.err (!%p10559_p10)
}
 0x140   :  { %242 = dma.hbm_to_vmem [thread:$0]  %s238_s27, 16, %s240_s7, [#allocation18]  }
 0x141   :  { %s12447_s13 = sld [smem:[#allocation68_spill]]  ;;  %s10861_s29 = smov [#allocation22]  }
 0x142   :  { %s262_s10 = sshll.u32 %s10861_s29, 4  ;;  %s10575_s20 = sshra.s32 %s11191_s2, 4  ;;  %s263_s10 = int_to_ptr.vmem [resolvable:$true] %s262_s10  ;;  %s10576_s20 = int_to_ptr.hbm [resolvable:$true] %s10575_s20 }
 0x143   :  { %s10577_s16 = scalar_lea.hbm %s10576_s20, 64  ;;  %s10579_s6 = scalar_lea.hbm %s12446_s12, 64 }
 0x144   :  { %p10578_p11 = scmp.ne.s32.totalorder %s10576_s20, %s10577_s16  ;;  %p10580_p12 = scmp.lt.s32.totalorder %s10576_s20, %s12446_s12 }
 0x145   :  { %p10581_p13 = scmp.lt.s32.totalorder %s10579_s6, %s10577_s16 }
 0x147   :  { %s284_s15 = sshll.u32 %s12447_s13, 4  ;;  %p10582_p0 = por %p10581_p13, %p10580_p12  ;;  %s11196_s15 = int_to_ptr.hbm [resolvable:$true] %s284_s15 }
 0x149   :  { %p10583_p1 = pnand %p10582_p0, %p10578_p11 }
 0x14b   :  { %10586 = shalt.err (!%p10583_p1)
}
 0x14c   :  { %s12448_s18 = sld [smem:[#allocation69_spill]]  ;;  %s10862_s23 = smov [#allocation25]  }
 0x14d   :  { %268 = dma.hbm_to_vmem [thread:$0]  %s11191_s2, 1024, %s263_s10, [#allocation21], %s10854_s9, %s10854_s9, %s10855_s8  }
 0x14e   :  { %s286_s26 = sshll.u32 %s10862_s23, 4  ;;  %s10599_s27 = sshra.s32 %s11196_s15, 4  ;;  %s287_s26 = int_to_ptr.vmem [resolvable:$true] %s286_s26  ;;  %s10600_s27 = int_to_ptr.hbm [resolvable:$true] %s10599_s27 }
 0x14f   :  { %s10601_s17 = scalar_lea.hbm %s10600_s27, 64  ;;  %s10603_s1 = scalar_lea.hbm %s12447_s13, 64 }
 0x150   :  { %p10602_p2 = scmp.ne.s32.totalorder %s10600_s27, %s10601_s17  ;;  %p10604_p3 = scmp.lt.s32.totalorder %s10600_s27, %s12447_s13 }
 0x151   :  { %p10605_p4 = scmp.lt.s32.totalorder %s10603_s1, %s10601_s17 }
 0x152   :  { %s308_s22 = sshll.u32 %s12448_s18, 4  ;;  %s11206_s22 = int_to_ptr.hbm [resolvable:$true] %s308_s22 }
 0x153   :  { %p10606_p5 = por %p10605_p4, %p10604_p3 }
 0x155   :  { %p10607_p6 = pnand %p10606_p5, %p10602_p2 }
 0x157   :  { %10610 = shalt.err (!%p10607_p6)
}
 0x158   :  { %s12449_s28 = sld [smem:[#allocation70_spill]]  ;;  %s10863_s12 = smov [#allocation28]  }
 0x159   :  { %292 = dma.hbm_to_vmem [thread:$0]  %s11196_s15, 1024, %s287_s26, [#allocation24], %s10854_s9, %s10854_s9, %s10855_s8  }
 0x15a   :  { %s310_s2 = sshll.u32 %s10863_s12, 4  ;;  %s10623_s7 = sshra.s32 %s11206_s22, 4  ;;  %s311_s2 = int_to_ptr.vmem [resolvable:$true] %s310_s2  ;;  %s10624_s7 = int_to_ptr.hbm [resolvable:$true] %s10623_s7 }
 0x15b   :  { %s10625_s0 = scalar_lea.hbm %s10624_s7, 128  ;;  %s10627_s5 = scalar_lea.hbm %s12448_s18, 128 }
 0x15c   :  { %p10626_p7 = scmp.ne.s32.totalorder %s10624_s7, %s10625_s0  ;;  %p10628_p8 = scmp.lt.s32.totalorder %s10624_s7, %s12448_s18 }
 0x15d   :  { %p10629_p9 = scmp.lt.s32.totalorder %s10627_s5, %s10625_s0 }
 0x15e   :  { %s332_s4 = sshll.u32 %s12449_s28, 4  ;;  %s11216_s4 = int_to_ptr.hbm [resolvable:$true] %s332_s4 }
 0x15f   :  { %p10630_p10 = por %p10629_p9, %p10628_p8 }
 0x161   :  { %p10631_p11 = pnand %p10630_p10, %p10626_p7 }
 0x163   :  { %10634 = shalt.err (!%p10631_p11)
}
 0x164   :  { %s12450_s9 = sld [smem:[#allocation71_spill]]  ;;  %s10864_s24 = smov [#allocation31]  }
 0x165   :  { %316 = dma.hbm_to_vmem [thread:$0]  %s11206_s22, 2048, %s311_s2, [#allocation27], %s10842_s30, %s10842_s30, %s10843_s11  }
 0x166   :  { %s334_s13 = sshll.u32 %s10864_s24, 4  ;;  %s10647_s29 = sshra.s32 %s11216_s4, 4  ;;  %s335_s13 = int_to_ptr.vmem [resolvable:$true] %s334_s13  ;;  %s10648_s29 = int_to_ptr.hbm [resolvable:$true] %s10647_s29 }
 0x167   :  { %s10649_s10 = scalar_lea.hbm %s10648_s29, 256  ;;  %s10651_s15 = scalar_lea.hbm %s12449_s28, 256 }
 0x168   :  { %p10650_p12 = scmp.ne.s32.totalorder %s10648_s29, %s10649_s10  ;;  %p10652_p13 = scmp.lt.s32.totalorder %s10648_s29, %s12449_s28 }
 0x169   :  { %p10653_p0 = scmp.lt.s32.totalorder %s10651_s15, %s10649_s10 }
 0x16a   :  { %s356_s8 = sshll.u32 %s12450_s9, 4  ;;  %s11226_s8 = int_to_ptr.hbm [resolvable:$true] %s356_s8 }
 0x16b   :  { %p10654_p1 = por %p10653_p0, %p10652_p13 }
 0x16d   :  { %p10655_p2 = pnand %p10654_p1, %p10650_p12 }
 0x16f   :  { %10658 = shalt.err (!%p10655_p2)
}
 0x170   :  { %s12451_s20 = sld [smem:[#allocation73_spill]]  ;;  %s10865_s16 = smov [#allocation34]  }
 0x171   :  { %340 = dma.hbm_to_vmem [thread:$0]  %s11216_s4, 4096, %s335_s13, [#allocation30], %s10842_s30, %s10842_s30, %s10843_s11  }
 0x172   :  { %s358_s6 = sshll.u32 %s10865_s16, 4  ;;  %s10671_s22 = sshra.s32 %s11226_s8, 4  ;;  %s359_s6 = int_to_ptr.vmem [resolvable:$true] %s358_s6  ;;  %s10672_s22 = int_to_ptr.hbm [resolvable:$true] %s10671_s22 }
 0x173   :  { %s10673_s23 = scalar_lea.hbm %s10672_s22, 256  ;;  %s10675_s26 = scalar_lea.hbm %s12450_s9, 256 }
 0x174   :  { %p10674_p3 = scmp.ne.s32.totalorder %s10672_s22, %s10673_s23  ;;  %p10676_p4 = scmp.lt.s32.totalorder %s10672_s22, %s12450_s9 }
 0x175   :  { %p10677_p5 = scmp.lt.s32.totalorder %s10675_s26, %s10673_s23 }
 0x176   :  { %s384_s18 = sshll.u32 %s12451_s20, 4  ;;  %s11236_s18 = int_to_ptr.hbm [resolvable:$true] %s384_s18 }
 0x177   :  { %p10678_p6 = por %p10677_p5, %p10676_p4 }
 0x179   :  { %p10679_p7 = pnand %p10678_p6, %p10674_p3 }
 0x17b   :  { %10682 = shalt.err (!%p10679_p7)
}
 0x17c   :  { %s12452_s27 = sld [smem:[#allocation78_spill]]  ;;  %s10866_s1 = smov [#allocation37]  }
 0x17d   :  { %364 = dma.hbm_to_vmem [thread:$0]  %s11226_s8, 4096, %s359_s6, [#allocation33], %s10850_s19, %s10850_s19, %s10851_s21  }
 0x17e   :  { %s386_s28 = sshll.u32 %s10866_s1, 4  ;;  %s10695_s12 = sshra.s32 %s11236_s18, 4  ;;  %s387_s28 = int_to_ptr.vmem [resolvable:$true] %s386_s28  ;;  %s10696_s12 = int_to_ptr.hbm [resolvable:$true] %s10695_s12 }
 0x17f   :  { %s10697_s2 = scalar_lea.hbm %s10696_s12, 256  ;;  %s10699_s4 = scalar_lea.hbm %s12451_s20, 256 }
 0x180   :  { %p10698_p8 = scmp.ne.s32.totalorder %s10696_s12, %s10697_s2  ;;  %p10700_p9 = scmp.lt.s32.totalorder %s10696_s12, %s12451_s20 }
 0x181   :  { %p10701_p10 = scmp.lt.s32.totalorder %s10699_s4, %s10697_s2 }
 0x182   :  { %s418_s17 = sshll.u32 %s12452_s27, 4  ;;  %s11246_s17 = int_to_ptr.hbm [resolvable:$true] %s418_s17 }
 0x183   :  { %p10702_p11 = por %p10701_p10, %p10700_p9 }
 0x185   :  { %p10703_p12 = pnand %p10702_p11, %p10698_p8 }
 0x187   :  { %10706 = shalt.err (!%p10703_p12)
}
 0x188   :  { %392 = dma.hbm_to_vmem [thread:$0]  %s11236_s18, 4096, %s387_s28, [#allocation36], %s10842_s30, %s10842_s30, %s10843_s11  }
 0x189   :  { %s10867_s7 = smov [#allocation40]   ;;  %s10719_s5 = sshra.s32 %s11246_s17, 4  ;;  %s10720_s5 = int_to_ptr.hbm [resolvable:$true] %s10719_s5 }
 0x18a   :  { %s420_s0 = sshll.u32 %s10867_s7, 4  ;;  %s10721_s9 = scalar_lea.hbm %s10720_s5, 1024  ;;  %s421_s0 = int_to_ptr.vmem [resolvable:$true] %s420_s0 }
 0x18b   :  { %p10722_p13 = scmp.ne.s32.totalorder %s10720_s5, %s10721_s9  ;;  %s10723_s8 = scalar_lea.hbm %s12452_s27, 1024 }
 0x18c   :  { %p10724_p0 = scmp.lt.s32.totalorder %s10720_s5, %s12452_s27  ;;  %p10725_p1 = scmp.lt.s32.totalorder %s10723_s8, %s10721_s9 }
 0x18e   :  { %p10726_p2 = por %p10725_p1, %p10724_p0 }
 0x190   :  { %p10727_p3 = pnand %p10726_p2, %p10722_p13 }
 0x192   :  { %10730 = shalt.err (!%p10727_p3)
}
 0x193   :  { %s10868_s24 = smov 512   ;;  %s12453_s13 = sld [smem:[#allocation80_spill]] }
 0x194   :  { %s10869_s29 = smov 32   ;;  %s10870_s11 = smov [#allocation43]  }
 0x195   :  { %426 = dma.hbm_to_vmem [thread:$0]  %s11246_s17, 16384, %s421_s0, [#allocation39], %s10868_s24, %s10868_s24, %s10869_s29  }
 0x196   :  { %s448_s10 = sshll.u32 %s10870_s11, 4  ;;  %s449_s10 = int_to_ptr.vmem [resolvable:$true] %s448_s10 }
 0x199   :  { %s446_s30 = sshll.u32 %s12453_s13, 4  ;;  %s10747_s16 = scalar_lea.hbm %s12453_s13, 1024  ;;  %s447_s30 = int_to_ptr.hbm [resolvable:$true] %s446_s30 }
 0x19a   :  { %s10743_s15 = sshra.s32 %s447_s30, 4  ;;  %s10744_s15 = int_to_ptr.hbm [resolvable:$true] %s10743_s15 }
 0x19b   :  { %s10745_s20 = scalar_lea.hbm %s10744_s15, 1024  ;;  %p10748_p5 = scmp.lt.s32.totalorder %s10744_s15, %s12453_s13 }
 0x19c   :  { %p10746_p4 = scmp.ne.s32.totalorder %s10744_s15, %s10745_s20  ;;  %p10749_p6 = scmp.lt.s32.totalorder %s10747_s16, %s10745_s20 }
 0x19e   :  { %p10750_p7 = por %p10749_p6, %p10748_p5 }
 0x1a0   :  { %p10751_p8 = pnand %p10750_p7, %p10746_p4 }
 0x1a2   :  { %10754 = shalt.err (!%p10751_p8)
}
 0x1a3   :  { %454 = dma.hbm_to_vmem [thread:$0]  %s447_s30, 16384, %s449_s10, [#allocation42], %s10850_s19, %s10850_s19, %s10851_s21  }
 0x1a4   :  { %10767 = dma.done.wait [#allocation4], 512  }
 0x1a5   :  { %10768 = vsyncadd [#allocation4], 4294966784 }
 0x1a6   :  { %10769 = dma.done.wait [#allocation6], 528  }
 0x1a7   :  { %10770 = vsyncadd [#allocation6], 4294966768 }
 0x1a8   :  { %10771 = dma.done.wait [#allocation9], 528  }
 0x1a9   :  { %10772 = vsyncadd [#allocation9], 4294966768 }
 0x1aa   :  { %10773 = dma.done.wait [#allocation12], 528  }
 0x1ab   :  { %10774 = vsyncadd [#allocation12], 4294966768 }
 0x1ac   :  { %10775 = dma.done.wait [#allocation15], 528  }
 0x1ad   :  { %10776 = vsyncadd [#allocation15], 4294966768 }
 0x1ae   :  { %10777 = dma.done.wait [#allocation18], 32  }
 0x1af   :  { %10778 = vsyncadd [#allocation18], 4294967264 }
 0x1b0   :  { %10779 = dma.done.wait [#allocation21], 2048  }
 0x1b1   :  { %10780 = vsyncadd [#allocation21], 4294965248 }
 0x1b2   :  { %10781 = dma.done.wait [#allocation24], 1040  }
 0x1b3   :  { %10782 = vsyncadd [#allocation24], 4294966256 }
 0x1b4   :  { %10783 = dma.done.wait [#allocation27], 2064  }
 0x1b5   :  { %10784 = vsyncadd [#allocation27], 4294965232 }
 0x1b6   :  { %10785 = dma.done.wait [#allocation30], 4128  }
 0x1b7   :  { %10786 = vsyncadd [#allocation30], 4294963168 }
 0x1b8   :  { %10787 = dma.done.wait [#allocation33], 4128  }
 0x1b9   :  { %10788 = vsyncadd [#allocation33], 4294963168 }
 0x1ba   :  { %10789 = dma.done.wait [#allocation36], 8192  }
 0x1bb   :  { %10790 = vsyncadd [#allocation36], 4294959104 }
 0x1bc   :  { %10791 = dma.done.wait [#allocation39], 32768  }
 0x1bd   :  { %10792 = vsyncadd [#allocation39], 4294934528 }
 0x1be   :  { %10793 = dma.done.wait [#allocation42], 32768  }
 0x1bf   :  { %10794 = vsyncadd [#allocation42], 4294934528  ;;  %s12454_s19 = sld [smem:[#allocation59_spill]]  ;;  %vm590_vm0 = vcmask 130048   ;;  %v9428_v8 = vld [vmem:[#allocation3 + $0x18] sm:$0xff]  ;;  %v9427_v9 = vld [vmem:[#allocation3 + $0x10] sm:$0xff] }
 0x1c0   :  { %s12455_s21 = sld [smem:[#allocation58_spill]]  ;;  %669 = vmatpush.bf16.msra.mxu1 %v9428_v8  ;;  %v9426_v10 = vld [vmem:[#allocation3 + $0x8] sm:$0xff]  ;;  %v9425_v11 = vld [vmem:[#allocation3] sm:$0xff]  ;;  %vm658_vm1 = vcmask 523264   ;;  %v9431_v28 = vld [vmem:[#allocation7 + $0x10] sm:$0xff]  ;;  %vm6691_vm2 = vcmask 261120  }
 0x1c1   :  { %s12456_s6 = sld [smem:[#allocation60_spill]]  ;;  %v9432_v27 = vld [vmem:[#allocation7 + $0x18] sm:$0xff]  ;;  %v9430_v29 = vld [vmem:[#allocation7 + $0x8] sm:$0xff]  ;;  %v9429_v30 = vld [vmem:[#allocation7] sm:$0xff]  ;;  %vm6923_vm3 = vcmask 1024  }
 0x1c2   :  { %10029 = vmatpush.bf16.msra.mxu2 %v9432_v27  ;;  %v10110_v32 = vld [vmem:[#allocation5] ss:$0 sm:$0xff]  ;;  %v9435_v47 = vld [vmem:[#allocation10 + $0x10] sm:$0xff]  ;;  %v9434_v48 = vld [vmem:[#allocation10 + $0x8] sm:$0xff]  ;;  %s12457_s18 = sld [smem:[#allocation65_spill]] }
 0x1c3   :  { %v9436_v46 = vld [vmem:[#allocation10 + $0x18] sm:$0xff]  ;;  %v9433_v49 = vld [vmem:[#allocation10] sm:$0xff]  ;;  %s12458_s22 = sld [smem:[#allocation72_spill]] }
 0x1c4   :  { %670 = vmatpush.bf16.msra.mxu1 %v9427_v9  ;;  %807 = vmatpush.bf16.msra.mxu3 %v9436_v46  ;;  %v10111_v51 = vld [vmem:[#allocation8] ss:$0 sm:$0xff]  ;;  %v9437_v8 = vld [vmem:[#allocation13] sm:$0xff]  ;;  %s12459_s23 = sld [smem:[#allocation74_spill]] }
 0x1c5   :  { %v9424_v1 = vld [vmem:[%s12454_s19] sm:$0xff]  ;;  %s12460_s26 = sld [smem:[#allocation75_spill]] }
 0x1c6   :  { %v572_v2 = vld [vmem:[%s12455_s21] sm:$0xff]  ;;  %v573_v3 = vld [vmem:[%s12455_s21 + $0x8] sm:$0xff]  ;;  %604 = vmatpush.bf16.msra.mxu0 %v9424_v1  ;;  %v574_v5 = vld [vmem:[%s12455_s21 + $0x10] sm:$0xff]  ;;  %10030 = vmatpush.bf16.msra.mxu2 %v9431_v28  ;;  %s12461_s27 = sld [smem:[#allocation76_spill]] }
 0x1c7   :  { %v576_v4 = vpack.c.bf16 %v573_v3, %v572_v2  ;;  %v575_v6 = vld [vmem:[%s12455_s21 + $0x18] sm:$0xff]  ;;  %v10109_v13 = vld [vmem:[%s12456_s6] ss:$0 sm:$0xff]  ;;  %s12462_s17 = sld [smem:[#allocation77_spill]] }
 0x1c8   :  { %v577_v7 = vpack.c.bf16 %v575_v6, %v574_v5  ;;  %671 = vmatpush.bf16.msra.mxu1 %v9426_v10  ;;  %808 = vmatpush.bf16.msra.mxu3 %v9435_v47  ;;  %v9440_v5 = vld [vmem:[#allocation13 + $0x18] sm:$0xff]  ;;  %v9439_v6 = vld [vmem:[#allocation13 + $0x10] sm:$0xff]  ;;  %s12463_s1 = sld [smem:[#allocation79_spill]] }
 0x1c9   :  { %6988 = vmatmul.msk.bf16.vlgmr.msra.gmra.mxu0 %vm590_vm0, %v576_v4  ;;  %v10112_v10 = vld [vmem:[#allocation11] ss:$0 sm:$0xff]  ;;  %s12464_s28 = sld [smem:[#allocation81_spill]] }
 0x1ca   :  { %736 = vmatpush.bf16.msrb.mxu0 %v9432_v27  ;;  %10031 = vmatpush.bf16.msra.mxu2 %v9430_v29 }
 0x1cc   :  { %672 = vmatpush.bf16.msra.mxu1 %v9425_v11  ;;  %809 = vmatpush.bf16.msra.mxu3 %v9434_v48  ;;  %v904_v11 = vld [vmem:[#allocation20 + $0x38] sm:$0xff] }
 0x1ce   :  { %737 = vmatpush.bf16.msrb.mxu0 %v9431_v28  ;;  %10032 = vmatpush.bf16.msra.mxu2 %v9429_v30  ;;  %v900_v28 = vld [vmem:[#allocation20 + $0x18] sm:$0xff] }
 0x1d0   :  { %810 = vmatpush.bf16.msra.mxu3 %v9433_v49  ;;  %925 = vmatpush.msrb.mxu1 %v904_v11 }
 0x1d2   :  { %738 = vmatpush.bf16.msrb.mxu0 %v9430_v29  ;;  %v9444_v29 = vld [vmem:[#allocation16 + $0x18] sm:$0xff] }
 0x1d3   :  { %994 = vmatpush.bf16.msrb.mxu2 %v9444_v29 }
 0x1d6   :  { %739 = vmatpush.bf16.msrb.mxu0 %v9429_v30  ;;  %v899_v30 = vld [vmem:[#allocation20 + $0x10] sm:$0xff] }
 0x1d9   :  { %6989 = vmatmul.msk.bf16.gmra.mxu0 %vm590_vm0, %v577_v7  ;;  %v9438_v7 = vld [vmem:[#allocation13 + $0x8] sm:$0xff] }
 0x1da   :  { %874 = vmatpush.bf16.msra.mxu0 %v9440_v5 }
 0x1de   :  { %875 = vmatpush.bf16.msra.mxu0 %v9439_v6 }
 0x1e2   :  { %876 = vmatpush.bf16.msra.mxu0 %v9438_v7 }
 0x1e6   :  { %877 = vmatpush.bf16.msra.mxu0 %v9437_v8  ;;  %v9458_v8 = vld [vmem:[#allocation22 + $0x28] sm:$0xff] }
 0x246   :  { %v606_v12 = vpop.f32.mrf.mxu0 }
 0x247   :  { %v607_v14 = vadd.f32 %v10109_v13, %v606_v12  ;;  %v903_v12 = vld [vmem:[#allocation20 + $0x30] sm:$0xff] }
 0x248   :  { %926 = vmatpush.msrb.mxu1 %v903_v12 }
 0x249   :  { %v616_v17 = vmax.f32 %v607_v14, 0.0  ;;  %v902_v14 = vld [vmem:[#allocation20 + $0x28] sm:$0xff] }
 0x24a   :  { %927 = vmatpush.msrb.mxu1 %v902_v14 }
 0x24e   :  { %v608_v15 = vpop.f32.mrf.mxu0 }
 0x24f   :  { %v609_v16 = vadd.f32 %v10109_v13, %v608_v15 }
 0x251   :  { %v617_v18 = vmax.f32 %v609_v16, 0.0 }
 0x253   :  { %v620_v19 = vpack.c.bf16 %v617_v18, %v616_v17 }
 0x255   :  { %7006 = vmatmul.msk.bf16.vlgmr.msra.gmra.mxu1 %vm658_vm1, %v620_v19 }
 0x256   :  { %v611_v20 = vpop.f32.mrf.mxu0 }
 0x257   :  { %v612_v21 = vadd.f32 %v10109_v13, %v611_v20 }
 0x259   :  { %v618_v24 = vmax.f32 %v612_v21, 0.0 }
 0x25e   :  { %v613_v22 = vpop.f32.mrf.mxu0 }
 0x25f   :  { %v614_v23 = vadd.f32 %v10109_v13, %v613_v22 }
 0x261   :  { %v619_v25 = vmax.f32 %v614_v23, 0.0 }
 0x263   :  { %v621_v26 = vpack.c.bf16 %v619_v25, %v618_v24 }
 0x265   :  { %7007 = vmatmul.msk.bf16.gmra.mxu1 %vm658_vm1, %v621_v26 }
 0x2d2   :  { %v674_v31 = vpop.f32.mrf.mxu1 }
 0x2d3   :  { %v675_v33 = vadd.f32 %v10110_v32, %v674_v31  ;;  %v898_v31 = vld [vmem:[#allocation20 + $0x8] sm:$0xff] }
 0x2d5   :  { %v684_v36 = vmax.f32 %v675_v33, 0.0  ;;  %v897_v33 = vld [vmem:[#allocation20] sm:$0xff] }
 0x2da   :  { %v676_v34 = vpop.f32.mrf.mxu1 }
 0x2db   :  { %v677_v35 = vadd.f32 %v10110_v32, %v676_v34  ;;  %v9442_v34 = vld [vmem:[#allocation16 + $0x8] sm:$0xff] }
 0x2dd   :  { %v685_v37 = vmax.f32 %v677_v35, 0.0  ;;  %v9441_v35 = vld [vmem:[#allocation16] sm:$0xff] }
 0x2df   :  { %v688_v38 = vpack.c.bf16 %v685_v37, %v684_v36  ;;  %v10113_v36 = vld [vmem:[#allocation14] ss:$0 sm:$0xff] }
 0x2e1   :  { %7024 = vmatmul.msk.bf16.vlgmr.msrb.gmra.mxu0 %vm658_vm1, %v688_v38 }
 0x2e2   :  { %v679_v39 = vpop.f32.mrf.mxu1 }
 0x2e3   :  { %v680_v40 = vadd.f32 %v10110_v32, %v679_v39 }
 0x2e5   :  { %v686_v43 = vmax.f32 %v680_v40, 0.0 }
 0x2ea   :  { %v681_v41 = vpop.f32.mrf.mxu1 }
 0x2eb   :  { %v682_v42 = vadd.f32 %v10110_v32, %v681_v41  ;;  %v9443_v32 = vld [vmem:[#allocation16 + $0x10] sm:$0xff] }
 0x2ec   :  { %995 = vmatpush.bf16.msrb.mxu2 %v9443_v32 }
 0x2ed   :  { %v687_v44 = vmax.f32 %v682_v42, 0.0 }
 0x2ef   :  { %v689_v45 = vpack.c.bf16 %v687_v44, %v686_v43 }
 0x2f0   :  { %996 = vmatpush.bf16.msrb.mxu2 %v9442_v34 }
 0x2f1   :  { %7025 = vmatmul.msk.bf16.vlgmr.msra.gmra.mxu2 %vm658_vm1, %v689_v45 }
 0x2f4   :  { %997 = vmatpush.bf16.msrb.mxu2 %v9441_v35  ;;  %v9466_v35 = vld [vmem:[#allocation25 + $0x28] sm:$0xff] }
 0x35e   :  { %v741_v50 = vpop.f32.mrf.mxu0 }
 0x35f   :  { %v742_v52 = vadd.f32 %v10111_v51, %v741_v50 }
 0x361   :  { %v11275_v54 = vadd.f32 %v742_v52, %v616_v17  ;;  %v901_v17 = vld [vmem:[#allocation20 + $0x20] sm:$0xff] }
 0x362   :  { %928 = vmatpush.msrb.mxu1 %v901_v17 }
 0x363   :  { %v755_v57 = vmax.f32 %v11275_v54, 0.0 }
 0x364   :  { %929 = vmatpush.msrb.mxu1 %v900_v28 }
 0x366   :  { %v743_v53 = vpop.f32.mrf.mxu0  ;;  %930 = vmatpush.msrb.mxu1 %v899_v30  ;;  %v9467_v30 = vld [vmem:[#allocation25 + $0x30] sm:$0xff] }
 0x367   :  { %v744_v55 = vadd.f32 %v10111_v51, %v743_v53 }
 0x368   :  { %931 = vmatpush.msrb.mxu1 %v898_v31 }
 0x369   :  { %v11277_v56 = vadd.f32 %v744_v55, %v617_v18  ;;  %v9452_v55 = vld [vmem:[%s12457_s18 + $0x38] sm:$0xff] }
 0x36a   :  { %932 = vmatpush.msrb.mxu1 %v897_v33  ;;  %1083 = vmatpush.bf16.msrb.mxu3 %v9452_v55  ;;  %v1330_v55 = vld [vmem:[#allocation34 + $0xf0] sm:$0xff] }
 0x36b   :  { %v756_v58 = vmax.f32 %v11277_v56, 0.0  ;;  %v9451_v56 = vld [vmem:[%s12457_s18 + $0x30] sm:$0xff]  ;;  %1332 = vmatpush.msra.mxu2 %v1330_v55 }
 0x36d   :  { %v759_v59 = vpack.c.bf16 %v756_v58, %v755_v57 }
 0x36e   :  { %1084 = vmatpush.bf16.msrb.mxu3 %v9451_v56  ;;  %v1331_v56 = vld [vmem:[#allocation34 + $0xf8] sm:$0xff] }
 0x36f   :  { %7042 = vmatmul.msk.bf16.vlgmr.msra.gmra.mxu3 %vm658_vm1, %v759_v59  ;;  %v9448_v59 = vld [vmem:[%s12457_s18 + $0x18] sm:$0xff] }
 0x374   :  { %v746_v60 = vpop.f32.mrf.mxu2 }
 0x375   :  { %v747_v61 = vadd.f32 %v10111_v51, %v746_v60  ;;  %v9447_v60 = vld [vmem:[%s12457_s18 + $0x10] sm:$0xff] }
 0x377   :  { %v11286_v63 = vadd.f32 %v747_v61, %v618_v24  ;;  %v9446_v61 = vld [vmem:[%s12457_s18 + $0x8] sm:$0xff] }
 0x379   :  { %v757_v2 = vmax.f32 %v11286_v63, 0.0 }
 0x37c   :  { %v748_v62 = vpop.f32.mrf.mxu2 }
 0x37d   :  { %v749_v0 = vadd.f32 %v10111_v51, %v748_v62  ;;  %v9445_v62 = vld [vmem:[%s12457_s18] sm:$0xff] }
 0x37f   :  { %v11288_v1 = vadd.f32 %v749_v0, %v619_v25  ;;  %v10114_v0 = vld [vmem:[#allocation17] ss:$0 sm:$0xff] }
 0x381   :  { %v758_v3 = vmax.f32 %v11288_v1, 0.0  ;;  %v9460_v1 = vld [vmem:[#allocation22 + $0x38] sm:$0xff] }
 0x382   :  { %1180 = vmatpush.bf16.msrb.mxu0 %v9460_v1 }
 0x383   :  { %v760_v4 = vpack.c.bf16 %v758_v3, %v757_v2 }
 0x385   :  { %7043 = vmatmul.msk.bf16.gmra.mxu3 %vm658_vm1, %v760_v4 }
 0x3f2   :  { %v812_v9 = vpop.f32.mrf.mxu3 }
 0x3f3   :  { %v813_v13 = vadd.f32 %v10112_v10, %v812_v9 }
 0x3f5   :  { %v822_v18 = vmax.f32 %v813_v13, 0.0 }
 0x3fa   :  { %v814_v15 = vpop.f32.mrf.mxu3 }
 0x3fb   :  { %v815_v16 = vadd.f32 %v10112_v10, %v814_v15 }
 0x3fd   :  { %v823_v19 = vmax.f32 %v815_v16, 0.0 }
 0x3ff   :  { %v826_v20 = vpack.c.bf16 %v823_v19, %v822_v18  ;;  %v9456_v18 = vld [vmem:[#allocation22 + $0x18] sm:$0xff]  ;;  %v9455_v19 = vld [vmem:[#allocation22 + $0x10] sm:$0xff] }
 0x401   :  { %7060 = vmatmul.msk.bf16.vlgmr.msra.gmra.mxu0 %vm658_vm1, %v826_v20  ;;  %v9454_v20 = vld [vmem:[#allocation22 + $0x8] sm:$0xff] }
 0x408   :  { %v817_v21 = vpop.f32.mrf.mxu3 }
 0x409   :  { %v818_v22 = vadd.f32 %v10112_v10, %v817_v21  ;;  %v9453_v21 = vld [vmem:[#allocation22] sm:$0xff] }
 0x40b   :  { %v824_v25 = vmax.f32 %v818_v22, 0.0 }
 0x410   :  { %v819_v23 = vpop.f32.mrf.mxu3 }
 0x411   :  { %v820_v24 = vadd.f32 %v10112_v10, %v819_v23  ;;  %v9457_v10 = vld [vmem:[#allocation22 + $0x20] sm:$0xff] }
 0x413   :  { %v825_v26 = vmax.f32 %v820_v24, 0.0  ;;  %v10115_v24 = vld [vmem:[#allocation19] ss:$0 sm:$0xff] }
 0x415   :  { %v827_v27 = vpack.c.bf16 %v825_v26, %v824_v25  ;;  %v9468_v26 = vld [vmem:[#allocation25 + $0x38] sm:$0xff] }
 0x416   :  { %1273 = vmatpush.bf16.msra.mxu1 %v9468_v26  ;;  %v7224_v26 = vld [vmem:[#allocation28 + $0x58] sm:$0xf0] }
 0x417   :  { %7061 = vmatmul.msk.bf16.gmra.mxu0 %vm658_vm1, %v827_v27 }
 0x41a   :  { %1274 = vmatpush.bf16.msra.mxu1 %v9467_v30 }
 0x41e   :  { %1275 = vmatpush.bf16.msra.mxu1 %v9466_v35  ;;  %v7214_v35 = vld [vmem:[#allocation28 + $0x40] sm:$0xf] }
 0x47e   :  { %v879_v37 = vpop.f32.mrf.mxu0 }
 0x47f   :  { %v880_v38 = vadd.f32 %v10113_v36, %v879_v37  ;;  %v9465_v37 = vld [vmem:[#allocation25 + $0x20] sm:$0xff] }
 0x480   :  { %1276 = vmatpush.bf16.msra.mxu1 %v9465_v37  ;;  %v9477_v37 = vld [vmem:[#allocation28 + $0x44] sm:$0xf] }
 0x481   :  { %v889_v39 = vadd.f32 %v880_v38, %v755_v57  ;;  %v9450_v57 = vld [vmem:[%s12457_s18 + $0x28] sm:$0xff] }
 0x482   :  { %1085 = vmatpush.bf16.msrb.mxu3 %v9450_v57  ;;  %v1328_v57 = vld [vmem:[#allocation34 + $0xe0] sm:$0xff] }
 0x483   :  { %v893_v40 = vmax.f32 %v889_v39, 0.0  ;;  %1333 = vmatpush.msra.mxu2 %v1328_v57 }
 0x485   :  { %7062 = vmatmul.msk.f32.vlgmr.msrb.gmra.mxu1 %vm658_vm1, %v893_v40 }
 0x486   :  { %v881_v41 = vpop.f32.mrf.mxu0 }
 0x487   :  { %v882_v42 = vadd.f32 %v10113_v36, %v881_v41 }
 0x489   :  { %v890_v43 = vadd.f32 %v882_v42, %v756_v58  ;;  %v9449_v58 = vld [vmem:[%s12457_s18 + $0x20] sm:$0xff] }
 0x48a   :  { %1086 = vmatpush.bf16.msrb.mxu3 %v9449_v58  ;;  %v1329_v58 = vld [vmem:[#allocation34 + $0xe8] sm:$0xff] }
 0x48b   :  { %v894_v44 = vmax.f32 %v890_v43, 0.0 }
 0x48d   :  { %7063 = vmatmul.msk.f32.gmra.mxu1 %vm658_vm1, %v894_v44  ;;  %v946_v45 = vpack.c.bf16 %v894_v44, %v893_v40 }
 0x48e   :  { %1087 = vmatpush.bf16.msrb.mxu3 %v9448_v59 }
 0x48f   :  { %7082 = vmatmul.msk.bf16.vlgmr.msrb.gmra.mxu2 %vm658_vm1, %v946_v45 }
 0x492   :  { %1088 = vmatpush.bf16.msrb.mxu3 %v9447_v60  ;;  %v1326_v60 = vld [vmem:[#allocation34 + $0xd0] sm:$0xff] }
 0x493   :  { %1334 = vmatpush.msra.mxu2 %v1326_v60 }
 0x494   :  { %v884_v46 = vpop.f32.mrf.mxu0 }
 0x495   :  { %v885_v47 = vadd.f32 %v10113_v36, %v884_v46 }
 0x496   :  { %1089 = vmatpush.bf16.msrb.mxu3 %v9446_v61  ;;  %v1327_v61 = vld [vmem:[#allocation34 + $0xd8] sm:$0xff] }
 0x497   :  { %v891_v48 = vadd.f32 %v885_v47, %v757_v2 }
 0x499   :  { %v895_v49 = vmax.f32 %v891_v48, 0.0 }
 0x49a   :  { %1090 = vmatpush.bf16.msrb.mxu3 %v9445_v62 }
 0x49b   :  { %7064 = vmatmul.msk.f32.gmra.mxu1 %vm658_vm1, %v895_v49 }
 0x49c   :  { %v886_v50 = vpop.f32.mrf.mxu0 }
 0x49d   :  { %v887_v51 = vadd.f32 %v10113_v36, %v886_v50  ;;  %v9463_v50 = vld [vmem:[#allocation25 + $0x10] sm:$0xff] }
 0x49e   :  { %1361 = vmatpush.msra.mxu3 %v1331_v56 }
 0x49f   :  { %v892_v52 = vadd.f32 %v887_v51, %v758_v3  ;;  %v9459_v3 = vld [vmem:[#allocation22 + $0x30] sm:$0xff] }
 0x4a0   :  { %1181 = vmatpush.bf16.msrb.mxu0 %v9459_v3  ;;  %v9462_v51 = vld [vmem:[#allocation25 + $0x8] sm:$0xff]  ;;  %1362 = vmatpush.msra.mxu3 %v1329_v58  ;;  %v9484_v3 = vld [vmem:[#allocation28 + $0x74] sm:$0xf0] }
 0x4a1   :  { %v896_v53 = vmax.f32 %v892_v52, 0.0  ;;  %v9461_v52 = vld [vmem:[#allocation25] sm:$0xff] }
 0x4a2   :  { %1363 = vmatpush.msra.mxu3 %v1327_v61  ;;  %v1306_v61 = vld [vmem:[#allocation34 + $0x30] sm:$0xff] }
 0x4a3   :  { %7065 = vmatmul.msk.f32.gmra.mxu1 %vm658_vm1, %v896_v53  ;;  %v947_v54 = vpack.c.bf16 %v896_v53, %v895_v49  ;;  %v9464_v49 = vld [vmem:[#allocation25 + $0x18] sm:$0xff] }
 0x4a4   :  { %1182 = vmatpush.bf16.msrb.mxu0 %v9458_v8  ;;  %1277 = vmatpush.bf16.msra.mxu1 %v9464_v49 }
 0x4a5   :  { %7083 = vmatmul.msk.bf16.gmra.mxu2 %vm658_vm1, %v947_v54  ;;  %v11341_v54 = vld [vmem:[#allocation23] ss:$0 sm:$0xff] }
 0x4a8   :  { %1183 = vmatpush.bf16.msrb.mxu0 %v9457_v10  ;;  %1278 = vmatpush.bf16.msra.mxu1 %v9463_v50  ;;  %v1323_v10 = vld [vmem:[#allocation34 + $0xb8] sm:$0xff]  ;;  %v1310_v50 = vld [vmem:[#allocation34 + $0x50] sm:$0xff] }
 0x4ac   :  { %1184 = vmatpush.bf16.msrb.mxu0 %v9456_v18  ;;  %1279 = vmatpush.bf16.msra.mxu1 %v9462_v51  ;;  %v1321_v18 = vld [vmem:[#allocation34 + $0xa8] sm:$0xff]  ;;  %v1311_v51 = vld [vmem:[#allocation34 + $0x58] sm:$0xff] }
 0x4b0   :  { %1185 = vmatpush.bf16.msrb.mxu0 %v9455_v19  ;;  %1280 = vmatpush.bf16.msra.mxu1 %v9461_v52  ;;  %v1308_v52 = vld [vmem:[#allocation34 + $0x40] sm:$0xff] }
 0x4b4   :  { %1186 = vmatpush.bf16.msrb.mxu0 %v9454_v20 }
 0x4b8   :  { %1187 = vmatpush.bf16.msrb.mxu0 %v9453_v21  ;;  %v1318_v21 = vld [vmem:[#allocation34 + $0x90] sm:$0xff] }
 0x502   :  { %v934_v22 = vpop.f32.mrf.mxu1 }
 0x50a   :  { %v937_v31 = vpop.f32.mrf.mxu1 }
 0x512   :  { %v999_v63 = vpop.f32.mrf.mxu2 }
 0x513   :  { %v1000_v2 = vadd.f32 %v10114_v0, %v999_v63  ;;  %v1324_v63 = vld [vmem:[#allocation34 + $0xc0] sm:$0xff] }
 0x514   :  { %1335 = vmatpush.msra.mxu2 %v1324_v63  ;;  %v7206_v63 = vld [vmem:[#allocation28 + $0x30] sm:$0xf] }
 0x515   :  { %v1009_v6 = vmax.f32 %v1000_v2, 0.0  ;;  %v7238_v2 = vld [vmem:[#allocation28 + $0x70] sm:$0xf] }
 0x518   :  { %v940_v38 = vpop.f32.mrf.mxu1 }
 0x51a   :  { %v1001_v4 = vpop.f32.mrf.mxu2 }
 0x51b   :  { %v1002_v5 = vadd.f32 %v10114_v0, %v1001_v4  ;;  %v9483_v4 = vld [vmem:[#allocation28 + $0x74] sm:$0xf] }
 0x51d   :  { %v1010_v7 = vmax.f32 %v1002_v5, 0.0  ;;  %v7239_v5 = vor.u32 %v9484_v3, %v7238_v2  ;;  %v7208_v2 = vld [vmem:[#allocation28 + $0x38] sm:$0xf0]  ;;  %v1304_v3 = vld [vmem:[#allocation34 + $0x20] sm:$0xff] }
 0x51f   :  { %v1013_v9 = vpack.c.bf16 %v1010_v7, %v1009_v6  ;;  %v7240_v6 = vld [vmem:[#allocation28 + $0x78] sm:$0xf0]  ;;  %1494 = vmatpush.bf16.msra.mxu0 %v7239_v5 }
 0x520   :  { %v943_v44 = vpop.f32.mrf.mxu1 }
 0x521   :  { %1091 = vmatmul.bf16.vlgmr.msrb.gmra.mxu3 %v1013_v9  ;;  %v1322_v9 = vld [vmem:[#allocation34 + $0xb0] sm:$0xff] }
 0x522   :  { %1336 = vmatpush.msra.mxu2 %v1322_v9  ;;  %v9474_v9 = vld [vmem:[#allocation28 + $0x24] sm:$0xf0] }
 0x528   :  { %v1004_v11 = vpop.f32.mrf.mxu2 }
 0x529   :  { %v1005_v12 = vadd.f32 %v10114_v0, %v1004_v11  ;;  %v7243_v11 = vor.u32 %v9483_v4, %v7240_v6  ;;  %v1305_v4 = vld [vmem:[#allocation34 + $0x28] sm:$0xff] }
 0x52b   :  { %v1011_v15 = vmax.f32 %v1005_v12, 0.0  ;;  %v7230_v12 = vld [vmem:[#allocation28 + $0x60] sm:$0xf]  ;;  %1513 = vmatpush.bf16.msrb.mxu1 %v7243_v11  ;;  %v7200_v11 = vld [vmem:[#allocation28 + $0x28] sm:$0xf0] }
 0x530   :  { %v1006_v13 = vpop.f32.mrf.mxu2 }
 0x531   :  { %v1007_v14 = vadd.f32 %v10114_v0, %v1006_v13  ;;  %v1325_v0 = vld [vmem:[#allocation34 + $0xc8] sm:$0xff]  ;;  %v9482_v13 = vld [vmem:[#allocation28 + $0x64] sm:$0xf0] }
 0x532   :  { %1364 = vmatpush.msra.mxu3 %v1325_v0  ;;  %v7231_v19 = vor.u32 %v9482_v13, %v7230_v12  ;;  %v9476_v0 = vld [vmem:[#allocation28 + $0x34] sm:$0xf0]  ;;  %v1300_v12 = vld [vmem:[#allocation34] sm:$0xff]  ;;  %v1301_v13 = vld [vmem:[#allocation34 + $0x8] sm:$0xff] }
 0x533   :  { %v1012_v16 = vmax.f32 %v1007_v14, 0.0  ;;  %v9481_v14 = vld [vmem:[#allocation28 + $0x64] sm:$0xf]  ;;  %v7207_v5 = vor.u32 %v9476_v0, %v7206_v63 }
 0x534   :  { %1365 = vmatpush.msra.mxu3 %v1323_v10  ;;  %1495 = vmatpush.bf16.msra.mxu0 %v7231_v19  ;;  %v9473_v10 = vld [vmem:[#allocation28 + $0x24] sm:$0xf] }
 0x535   :  { %v1014_v17 = vpack.c.bf16 %v1012_v16, %v1011_v15  ;;  %v7232_v15 = vld [vmem:[#allocation28 + $0x68] sm:$0xf0] }
 0x536   :  { %v7235_v20 = vor.u32 %v9481_v14, %v7232_v15  ;;  %1366 = vmatpush.msra.mxu3 %v1321_v18  ;;  %v7203_v15 = vor.u32 %v9473_v10, %v7200_v11  ;;  %v9471_v18 = vld [vmem:[#allocation28 + $0x14] sm:$0xf]  ;;  %v7352_v10 = vld [vmem:[#allocation31 + $0xd8] sm:$0xf0] }
 0x537   :  { %1096 = vmatmul.bf16.gmra.mxu3 %v1014_v17  ;;  %v1320_v17 = vld [vmem:[#allocation34 + $0xa0] sm:$0xff] }
 0x538   :  { %1337 = vmatpush.msra.mxu2 %v1320_v17  ;;  %1514 = vmatpush.bf16.msrb.mxu1 %v7235_v20  ;;  %v9472_v17 = vld [vmem:[#allocation28 + $0x14] sm:$0xf0]  ;;  %v7192_v20 = vld [vmem:[#allocation28 + $0x18] sm:$0xf0] }
 0x53a   :  { %1338 = vmatpush.msra.mxu2 %v1318_v21  ;;  %v7195_v21 = vor.u32 %v9471_v18, %v7192_v20 }
 0x5a4   :  { %v1092_v23 = vpop.f32.mrf.mxu3 }
 0x5a5   :  { %v1093_v25 = vadd.f32 %v10115_v24, %v1092_v23  ;;  %v9480_v23 = vld [vmem:[#allocation28 + $0x54] sm:$0xf0] }
 0x5a7   :  { %v11321_v28 = vadd.f32 %v1093_v25, %v934_v22  ;;  %v7222_v22 = vld [vmem:[#allocation28 + $0x50] sm:$0xf]  ;;  %v9479_v25 = vld [vmem:[#allocation28 + $0x54] sm:$0xf] }
 0x5a8   :  { %v7223_v30 = vor.u32 %v9480_v23, %v7222_v22  ;;  %v7182_v22 = vld [vmem:[#allocation28] sm:$0xf]  ;;  %v9470_v23 = vld [vmem:[#allocation28 + $0x4] sm:$0xf0] }
 0x5a9   :  { %v1106_v33 = vmax.f32 %v11321_v28, 0.0 }
 0x5aa   :  { %1496 = vmatpush.bf16.msra.mxu0 %v7223_v30 }
 0x5ac   :  { %v1094_v27 = vpop.f32.mrf.mxu3 }
 0x5ad   :  { %v1095_v29 = vadd.f32 %v10115_v24, %v1094_v27  ;;  %v1316_v27 = vld [vmem:[#allocation34 + $0x80] sm:$0xff] }
 0x5ae   :  { %1339 = vmatpush.msra.mxu2 %v1316_v27 }
 0x5af   :  { %v11323_v32 = vadd.f32 %v1095_v29, %v937_v31  ;;  %v1317_v29 = vld [vmem:[#allocation34 + $0x88] sm:$0xff]  ;;  %v7227_v31 = vor.u32 %v9479_v25, %v7224_v26  ;;  %v7183_v25 = vor.u32 %v9470_v23, %v7182_v22  ;;  %v7278_v23 = vld [vmem:[#allocation31 + $0x40] sm:$0xf] }
 0x5b0   :  { %v7184_v26 = vld [vmem:[#allocation28 + $0x8] sm:$0xf0] }
 0x5b1   :  { %v1107_v34 = vmax.f32 %v11323_v32, 0.0  ;;  %1515 = vmatpush.bf16.msrb.mxu1 %v7227_v31  ;;  %v9495_v32 = vld [vmem:[#allocation31 + $0x54] sm:$0xf] }
 0x5b3   :  { %v1110_v36 = vpack.c.bf16 %v1107_v34, %v1106_v33 }
 0x5b5   :  { %1188 = vmatmul.bf16.vlgmr.msrb.gmra.mxu0 %v1110_v36  ;;  %v9478_v36 = vld [vmem:[#allocation28 + $0x44] sm:$0xf0] }
 0x5ba   :  { %v1097_v39 = vpop.f32.mrf.mxu3 }
 0x5bb   :  { %v1098_v40 = vadd.f32 %v10115_v24, %v1097_v39  ;;  %v1314_v39 = vld [vmem:[#allocation34 + $0x70] sm:$0xff] }
 0x5bc   :  { %1340 = vmatpush.msra.mxu2 %v1314_v39  ;;  %v7366_v39 = vld [vmem:[#allocation31 + $0xf0] sm:$0xf] }
 0x5bd   :  { %v11331_v42 = vadd.f32 %v1098_v40, %v940_v38  ;;  %v7216_v38 = vld [vmem:[#allocation28 + $0x48] sm:$0xf0]  ;;  %v1315_v40 = vld [vmem:[#allocation34 + $0x78] sm:$0xff] }
 0x5bf   :  { %v1108_v46 = vmax.f32 %v11331_v42, 0.0 }
 0x5c2   :  { %v1099_v41 = vpop.f32.mrf.mxu3 }
 0x5c3   :  { %v1100_v43 = vadd.f32 %v10115_v24, %v1099_v41  ;;  %v1319_v24 = vld [vmem:[#allocation34 + $0x98] sm:$0xff]  ;;  %v1312_v41 = vld [vmem:[#allocation34 + $0x60] sm:$0xff] }
 0x5c4   :  { %1367 = vmatpush.msra.mxu3 %v1319_v24  ;;  %1341 = vmatpush.msra.mxu2 %v1312_v41  ;;  %v9469_v24 = vld [vmem:[#allocation28 + $0x4] sm:$0xf] }
 0x5c5   :  { %v11333_v45 = vadd.f32 %v1100_v43, %v943_v44  ;;  %v1313_v43 = vld [vmem:[#allocation34 + $0x68] sm:$0xff]  ;;  %v7215_v44 = vor.u32 %v9478_v36, %v7214_v35  ;;  %v7187_v27 = vor.u32 %v9469_v24, %v7184_v26  ;;  %v9493_v26 = vld [vmem:[#allocation31 + $0x44] sm:$0xf] }
 0x5c6   :  { %1368 = vmatpush.msra.mxu3 %v1317_v29  ;;  %1342 = vmatpush.msra.mxu2 %v1310_v50  ;;  %v11347_v29 = vld [vmem:[#allocation26] ss:$0 sm:$0xff]  ;;  %v9494_v24 = vld [vmem:[#allocation31 + $0x44] sm:$0xf0] }
 0x5c7   :  { %v1109_v47 = vmax.f32 %v11333_v45, 0.0  ;;  %1497 = vmatpush.bf16.msra.mxu0 %v7215_v44  ;;  %v9499_v44 = vld [vmem:[#allocation31 + $0x74] sm:$0xf]  ;;  %v7279_v42 = vor.u32 %v9494_v24, %v7278_v23 }
 0x5c8   :  { %1369 = vmatpush.msra.mxu3 %v1315_v40  ;;  %1343 = vmatpush.msra.mxu2 %v1308_v52  ;;  %v9515_v52 = vld [vmem:[#allocation31 + $0xf4] sm:$0xf] }
 0x5c9   :  { %v1111_v48 = vpack.c.bf16 %v1109_v47, %v1108_v46 }
 0x5ca   :  { %1370 = vmatpush.msra.mxu3 %v1313_v43  ;;  %1344 = vmatpush.msra.mxu2 %v1306_v61  ;;  %v9516_v43 = vld [vmem:[#allocation31 + $0xf4] sm:$0xf0]  ;;  %v7296_v61 = vld [vmem:[#allocation31 + $0x68] sm:$0xf0] }
 0x5cb   :  { %1193 = vmatmul.bf16.gmra.mxu0 %v1111_v48  ;;  %v7219_v48 = vor.u32 %v9477_v37, %v7216_v38  ;;  %v7302_v37 = vld [vmem:[#allocation31 + $0x70] sm:$0xf]  ;;  %v9500_v38 = vld [vmem:[#allocation31 + $0x74] sm:$0xf0]  ;;  %v7367_v50 = vor.u32 %v9516_v43, %v7366_v39  ;;  %v7272_v43 = vld [vmem:[#allocation31 + $0x38] sm:$0xf0] }
 0x5cc   :  { %1371 = vmatpush.msra.mxu3 %v1311_v51  ;;  %1345 = vmatpush.msra.mxu2 %v1304_v3  ;;  %v7303_v41 = vor.u32 %v9500_v38, %v7302_v37  ;;  %v9496_v3 = vld [vmem:[#allocation31 + $0x54] sm:$0xf0]  ;;  %v7334_v38 = vld [vmem:[#allocation31 + $0xb0] sm:$0xf] }
 0x5cd   :  { %1516 = vmatpush.bf16.msrb.mxu1 %v7219_v48  ;;  %1498 = vmatpush.bf16.msra.mxu0 %v7207_v5  ;;  %v7304_v48 = vld [vmem:[#allocation31 + $0x78] sm:$0xf0]  ;;  %v7350_v5 = vld [vmem:[#allocation31 + $0xd0] sm:$0xf]  ;;  %v9508_v39 = vld [vmem:[#allocation31 + $0xb4] sm:$0xf0] }
 0x5ce   :  { %v7307_v51 = vor.u32 %v9499_v44, %v7304_v48  ;;  %v9507_v44 = vld [vmem:[#allocation31 + $0xb4] sm:$0xf] }
 0x632   :  { %v1189_v53 = vpop.f32.mrf.mxu0 }
 0x633   :  { %v1190_v59 = vadd.f32 %v11341_v54, %v1189_v53  ;;  %v1309_v53 = vld [vmem:[#allocation34 + $0x48] sm:$0xff] }
 0x634   :  { %1372 = vmatpush.msra.mxu3 %v1309_v53  ;;  %v7368_v53 = vld [vmem:[#allocation31 + $0xf8] sm:$0xf0] }
 0x635   :  { %v1199_v7 = vmax.f32 %v1190_v59, 0.0  ;;  %v7371_v28 = vor.u32 %v9515_v52, %v7368_v53  ;;  %v9490_v52 = vld [vmem:[#allocation31 + $0x24] sm:$0xf0]  ;;  %v7326_v53 = vld [vmem:[#allocation31 + $0xa0] sm:$0xf] }
 0x63a   :  { %v1191_v62 = vpop.f32.mrf.mxu0 }
 0x63b   :  { %v1192_v1 = vadd.f32 %v11341_v54, %v1191_v62  ;;  %v1307_v62 = vld [vmem:[#allocation34 + $0x38] sm:$0xff] }
 0x63c   :  { %1373 = vmatpush.msra.mxu3 %v1307_v62  ;;  %v9513_v62 = vld [vmem:[#allocation31 + $0xe4] sm:$0xf] }
 0x63d   :  { %v1200_v8 = vmax.f32 %v1192_v1, 0.0  ;;  %v9475_v1 = vld [vmem:[#allocation28 + $0x34] sm:$0xf] }
 0x63e   :  { %v7211_v6 = vor.u32 %v9475_v1, %v7208_v2  ;;  %1374 = vmatpush.msra.mxu3 %v1305_v4  ;;  %v7360_v1 = vld [vmem:[#allocation31 + $0xe8] sm:$0xf0]  ;;  %v7286_v2 = vld [vmem:[#allocation31 + $0x50] sm:$0xf] }
 0x63f   :  { %v1203_v16 = vpack.c.bf16 %v1200_v8, %v1199_v7  ;;  %v1303_v7 = vld [vmem:[#allocation34 + $0x18] sm:$0xff] }
 0x640   :  { %1517 = vmatpush.bf16.msrb.mxu1 %v7211_v6  ;;  %v7198_v8 = vld [vmem:[#allocation28 + $0x20] sm:$0xf]  ;;  %1375 = vmatpush.msra.mxu3 %v1303_v7  ;;  %v9512_v6 = vld [vmem:[#allocation31 + $0xd4] sm:$0xf0]  ;;  %v7287_v7 = vor.u32 %v9496_v3, %v7286_v2  ;;  %v9487_v3 = vld [vmem:[#allocation31 + $0x14] sm:$0xf] }
 0x641   :  { %1281 = vmatmul.bf16.vlgmr.msra.gmra.mxu1 %v1203_v16  ;;  %v7199_v14 = vor.u32 %v9474_v9, %v7198_v8  ;;  %v7190_v16 = vld [vmem:[#allocation28 + $0x10] sm:$0xf]  ;;  %v9511_v9 = vld [vmem:[#allocation31 + $0xd4] sm:$0xf]  ;;  %v7351_v11 = vor.u32 %v9512_v6, %v7350_v5  ;;  %v9504_v2 = vld [vmem:[#allocation31 + $0x94] sm:$0xf0] }
 0x642   :  { %1376 = vmatpush.msra.mxu3 %v1301_v13  ;;  %v7191_v19 = vor.u32 %v9472_v17, %v7190_v16  ;;  %v7355_v13 = vor.u32 %v9511_v9, %v7352_v10  ;;  %v7310_v9 = vld [vmem:[#allocation31 + $0x80] sm:$0xf] }
 0x643   :  { %1499 = vmatpush.bf16.msra.mxu0 %v7199_v14 }
 0x644   :  { %1518 = vmatpush.bf16.msrb.mxu1 %v7203_v15  ;;  %1761 = vmatpush.bf16.msrb.mxu3 %v7367_v50 }
 0x647   :  { %1500 = vmatpush.bf16.msra.mxu0 %v7191_v19 }
 0x648   :  { %v1194_v49 = vpop.f32.mrf.mxu0  ;;  %1519 = vmatpush.bf16.msrb.mxu1 %v7195_v21 }
 0x649   :  { %v1195_v55 = vadd.f32 %v11341_v54, %v1194_v49 }
 0x64b   :  { %v1201_v58 = vmax.f32 %v1195_v55, 0.0  ;;  %1501 = vmatpush.bf16.msra.mxu0 %v7183_v25  ;;  %v7294_v55 = vld [vmem:[#allocation31 + $0x60] sm:$0xf] }
 0x64c   :  { %1520 = vmatpush.bf16.msrb.mxu1 %v7187_v27  ;;  %v7342_v25 = vld [vmem:[#allocation31 + $0xc0] sm:$0xf]  ;;  %v7280_v27 = vld [vmem:[#allocation31 + $0x48] sm:$0xf0] }
 0x64f   :  { %1780 = vmatpush.bf16.msrb.mxu0 %v7307_v51  ;;  %v7262_v51 = vld [vmem:[#allocation31 + $0x20] sm:$0xf] }
 0x650   :  { %v1196_v56 = vpop.f32.mrf.mxu0  ;;  %1799 = vmatpush.bf16.msra.mxu1 %v7371_v28  ;;  %v9506_v28 = vld [vmem:[#allocation31 + $0xa4] sm:$0xf0] }
 0x651   :  { %v1197_v57 = vadd.f32 %v11341_v54, %v1196_v56  ;;  %v1302_v54 = vld [vmem:[#allocation34 + $0x10] sm:$0xff]  ;;  %v7358_v56 = vld [vmem:[#allocation31 + $0xe0] sm:$0xf] }
 0x652   :  { %1346 = vmatpush.msra.mxu2 %v1302_v54  ;;  %v7363_v54 = vor.u32 %v9513_v62, %v7360_v1  ;;  %v7254_v62 = vld [vmem:[#allocation31 + $0x10] sm:$0xf] }
 0x653   :  { %v1202_v59 = vmax.f32 %v1197_v57, 0.0  ;;  %v9514_v57 = vld [vmem:[#allocation31 + $0xe4] sm:$0xf0] }
 0x654   :  { %1347 = vmatpush.msra.mxu2 %v1300_v12  ;;  %v7359_v63 = vor.u32 %v9514_v57, %v7358_v56  ;;  %1800 = vmatpush.bf16.msra.mxu1 %v7363_v54  ;;  %v7264_v56 = vld [vmem:[#allocation31 + $0x28] sm:$0xf0]  ;;  %v7327_v57 = vor.u32 %v9506_v28, %v7326_v53  ;;  %v9503_v54 = vld [vmem:[#allocation31 + $0x94] sm:$0xf]  ;;  %v9544_v28 = vld [vmem:[#allocation35 + $0xd4] sm:$0xf0] }
 0x655   :  { %v1204_v60 = vpack.c.bf16 %v1202_v59, %v1201_v58 }
 0x656   :  { %1742 = vmatpush.bf16.msrb.mxu2 %v7303_v41  ;;  %1762 = vmatpush.bf16.msrb.mxu3 %v7359_v63  ;;  %v7335_v41 = vor.u32 %v9508_v39, %v7334_v38  ;;  %v9488_v63 = vld [vmem:[#allocation31 + $0x14] sm:$0xf0]  ;;  %v9545_v38 = vld [vmem:[#allocation35 + $0xe4] sm:$0xf]  ;;  %v7488_v39 = vld [vmem:[#allocation35 + $0xe8] sm:$0xf0] }
 0x657   :  { %1286 = vmatmul.bf16.gmra.mxu1 %v1204_v60  ;;  %v9497_v60 = vld [vmem:[#allocation31 + $0x64] sm:$0xf]  ;;  %v7255_v1 = vor.u32 %v9488_v63, %v7254_v62  ;;  %v7424_v62 = vld [vmem:[#allocation35 + $0x68] sm:$0xf0] }
 0x658   :  { %v7299_v0 = vor.u32 %v9497_v60, %v7296_v61  ;;  %1801 = vmatpush.bf16.msra.mxu1 %v7355_v13  ;;  %v7328_v60 = vld [vmem:[#allocation31 + $0xa8] sm:$0xf0] }
 0x659   :  { %v7248_v13 = vld [vmem:[#allocation31 + $0x8] sm:$0xf0] }
 0x65a   :  { %1781 = vmatpush.bf16.msrb.mxu0 %v7299_v0  ;;  %1763 = vmatpush.bf16.msrb.mxu3 %v7351_v11  ;;  %v7318_v0 = vld [vmem:[#allocation31 + $0x90] sm:$0xf]  ;;  %v9502_v11 = vld [vmem:[#allocation31 + $0x84] sm:$0xf0] }
 0x65b   :  { %v7319_v5 = vor.u32 %v9504_v2, %v7318_v0 }
 0x6be   :  { %v1282_v30 = vpop.f32.mrf.mxu1 }
 0x6bf   :  { %v1283_v31 = vadd.f32 %v11347_v29, %v1282_v30 }
 0x6c1   :  { %v1292_v35 = vadd.f32 %v1283_v31, %v1106_v33  ;;  %v9498_v33 = vld [vmem:[#allocation31 + $0x64] sm:$0xf0]  ;;  %v7283_v31 = vor.u32 %v9493_v26, %v7280_v27  ;;  %v7494_v26 = vld [vmem:[#allocation35 + $0xf0] sm:$0xf]  ;;  %v9548_v27 = vld [vmem:[#allocation35 + $0xf4] sm:$0xf0] }
 0x6c2   :  { %v7295_v59 = vor.u32 %v9498_v33, %v7294_v55  ;;  %v7263_v55 = vor.u32 %v9490_v52, %v7262_v51  ;;  %v9489_v33 = vld [vmem:[#allocation31 + $0x24] sm:$0xf]  ;;  %v7491_v51 = vor.u32 %v9545_v38, %v7488_v39 }
 0x6c3   :  { %v1296_v36 = vmax.f32 %v1292_v35, 0.0  ;;  %v9509_v35 = vld [vmem:[#allocation31 + $0xc4] sm:$0xf] }
 0x6c4   :  { %1743 = vmatpush.bf16.msrb.mxu2 %v7295_v59  ;;  %v9505_v59 = vld [vmem:[#allocation31 + $0xa4] sm:$0xf] }
 0x6c5   :  { %1348 = vmatmul.f32.vlgmr.msra.gmra.mxu2 %v1296_v36  ;;  %1377 = vmatmul.f32.vlgmr.msra.gmra.mxu3 %v1296_v36  ;;  %v7331_v61 = vor.u32 %v9505_v59, %v7328_v60  ;;  %v7422_v59 = vld [vmem:[#allocation35 + $0x60] sm:$0xf]  ;;  %v9530_v60 = vld [vmem:[#allocation35 + $0x64] sm:$0xf0]  ;;  %v9525_v38 = vld [vmem:[#allocation35 + $0x44] sm:$0xf] }
 0x6c6   :  { %v1284_v40 = vpop.f32.mrf.mxu1  ;;  %v7423_v2 = vor.u32 %v9530_v60, %v7422_v59  ;;  %v9535_v59 = vld [vmem:[#allocation35 + $0x94] sm:$0xf] }
 0x6c7   :  { %v1285_v49 = vadd.f32 %v11347_v29, %v1284_v40  ;;  %v9491_v40 = vld [vmem:[#allocation31 + $0x34] sm:$0xf] }
 0x6c8   :  { %1744 = vmatpush.bf16.msrb.mxu2 %v7287_v7  ;;  %v7275_v48 = vor.u32 %v9491_v40, %v7272_v43  ;;  %v7320_v7 = vld [vmem:[#allocation31 + $0x98] sm:$0xf0]  ;;  %v7430_v40 = vld [vmem:[#allocation35 + $0x70] sm:$0xf] }
 0x6c9   :  { %v1293_v58 = vadd.f32 %v1285_v49, %v1107_v34  ;;  %v7288_v34 = vld [vmem:[#allocation31 + $0x58] sm:$0xf0] }
 0x6ca   :  { %v7291_v12 = vor.u32 %v9495_v32, %v7288_v34  ;;  %v7336_v49 = vld [vmem:[#allocation31 + $0xb8] sm:$0xf0]  ;;  %v7323_v32 = vor.u32 %v9503_v54, %v7320_v7  ;;  %v7246_v34 = vld [vmem:[#allocation31] sm:$0xf] }
 0x6cb   :  { %v1297_v4 = vmax.f32 %v1293_v58, 0.0  ;;  %v7339_v50 = vor.u32 %v9507_v44, %v7336_v49  ;;  %v7267_v58 = vor.u32 %v9489_v33, %v7264_v56  ;;  %v9531_v49 = vld [vmem:[#allocation35 + $0x74] sm:$0xf] }
 0x6cc   :  { %1782 = vmatpush.bf16.msrb.mxu0 %v7291_v12  ;;  %1745 = vmatpush.bf16.msrb.mxu2 %v7279_v42  ;;  %v9485_v12 = vld [vmem:[#allocation31 + $0x4] sm:$0xf]  ;;  %v9543_v33 = vld [vmem:[#allocation35 + $0xd4] sm:$0xf] }
 0x6cd   :  { %1351 = vmatmul.f32.gmra.mxu2 %v1297_v4  ;;  %1380 = vmatmul.f32.gmra.mxu3 %v1297_v4  ;;  %v1390_v8 = vpack.c.bf16 %v1297_v4, %v1296_v36  ;;  %v9492_v36 = vld [vmem:[#allocation31 + $0x34] sm:$0xf0]  ;;  %v7256_v4 = vld [vmem:[#allocation31 + $0x18] sm:$0xf0] }
 0x6ce   :  { %v7259_v6 = vor.u32 %v9487_v3, %v7256_v4 }
 0x6cf   :  { %1502 = vmatmul.bf16.vlgmr.msra.gmra.mxu0 %v1390_v8  ;;  %1521 = vmatmul.bf16.vlgmr.msrb.gmra.mxu1 %v1390_v8  ;;  %v9486_v8 = vld [vmem:[#allocation31 + $0x4] sm:$0xf0] }
 0x6d0   :  { %1783 = vmatpush.bf16.msrb.mxu0 %v7283_v31  ;;  %v7247_v10 = vor.u32 %v9486_v8, %v7246_v34  ;;  %v7495_v31 = vor.u32 %v9548_v27, %v7494_v26 }
 0x6d4   :  { %v1287_v14 = vpop.f32.mrf.mxu1  ;;  %1784 = vmatpush.bf16.msrb.mxu0 %v7275_v48  ;;  %v9532_v48 = vld [vmem:[#allocation35 + $0x74] sm:$0xf0] }
 0x6d5   :  { %v1288_v15 = vadd.f32 %v11347_v29, %v1287_v14  ;;  %v7311_v14 = vor.u32 %v9502_v11, %v7310_v9  ;;  %v7431_v52 = vor.u32 %v9532_v48, %v7430_v40  ;;  %v7408_v40 = vld [vmem:[#allocation35 + $0x48] sm:$0xf0] }
 0x6d7   :  { %v1294_v16 = vadd.f32 %v1288_v15, %v1108_v46  ;;  %v9510_v46 = vld [vmem:[#allocation31 + $0xc4] sm:$0xf0]  ;;  %v7251_v15 = vor.u32 %v9485_v12, %v7248_v13 }
 0x6d8   :  { %v7343_v30 = vor.u32 %v9510_v46, %v7342_v25  ;;  %1785 = vmatpush.bf16.msrb.mxu0 %v7267_v58  ;;  %v7480_v58 = vld [vmem:[#allocation35 + $0xd8] sm:$0xf0] }
 0x6d9   :  { %v1298_v17 = vmax.f32 %v1294_v16, 0.0  ;;  %v9501_v16 = vld [vmem:[#allocation31 + $0x84] sm:$0xf]  ;;  %v7483_v3 = vor.u32 %v9543_v33, %v7480_v58  ;;  %v7400_v33 = vld [vmem:[#allocation35 + $0x38] sm:$0xf0] }
 0x6da   :  { %1764 = vmatpush.bf16.msrb.mxu3 %v7343_v30  ;;  %v9547_v30 = vld [vmem:[#allocation35 + $0xf4] sm:$0xf]  ;;  %v9536_v58 = vld [vmem:[#allocation35 + $0x94] sm:$0xf0] }
 0x6db   :  { %1354 = vmatmul.f32.gmra.mxu2 %v1298_v17  ;;  %1383 = vmatmul.f32.gmra.mxu3 %v1298_v17 }
 0x6dc   :  { %v1289_v18 = vpop.f32.mrf.mxu1  ;;  %1786 = vmatpush.bf16.msrb.mxu0 %v7259_v6 }
 0x6dd   :  { %v1290_v19 = vadd.f32 %v11347_v29, %v1289_v18  ;;  %v7344_v29 = vld [vmem:[#allocation31 + $0xc8] sm:$0xf0] }
 0x6de   :  { %v7347_v45 = vor.u32 %v9509_v35, %v7344_v29  ;;  %1765 = vmatpush.bf16.msrb.mxu3 %v7335_v41  ;;  %v7496_v35 = vld [vmem:[#allocation35 + $0xf8] sm:$0xf0]  ;;  %v7486_v29 = vld [vmem:[#allocation35 + $0xe0] sm:$0xf] }
 0x6df   :  { %v1295_v20 = vadd.f32 %v1290_v19, %v1109_v47  ;;  %v7270_v47 = vld [vmem:[#allocation31 + $0x30] sm:$0xf]  ;;  %v1408_v19 = vld [vmem:[#allocation29] sm:$0x3] }
 0x6e0   :  { %1802 = vmatpush.bf16.msra.mxu1 %v7347_v45  ;;  %v7271_v37 = vor.u32 %v9492_v36, %v7270_v47  ;;  %1787 = vmatpush.bf16.msrb.mxu0 %v7251_v15  ;;  %v9546_v45 = vld [vmem:[#allocation35 + $0xe4] sm:$0xf0] }
 0x6e1   :  { %v1299_v21 = vmax.f32 %v1295_v20, 0.0  ;;  %v11361_v20 = vperm.slane %v1408_v19, 0  ;;  %v7487_v44 = vor.u32 %v9546_v45, %v7486_v29  ;;  %v7464_v45 = vld [vmem:[#allocation35 + $0xb8] sm:$0xf0] }
 0x6e2   :  { %1746 = vmatpush.bf16.msrb.mxu2 %v7271_v37  ;;  %1766 = vmatpush.bf16.msrb.mxu3 %v7327_v57  ;;  %v7499_v37 = vor.u32 %v9547_v30, %v7496_v35  ;;  %v7462_v30 = vld [vmem:[#allocation35 + $0xb0] sm:$0xf]  ;;  %v9539_v35 = vld [vmem:[#allocation35 + $0xb4] sm:$0xf] }
 0x6e3   :  { %1357 = vmatmul.f32.gmra.mxu2 %v1299_v21  ;;  %1386 = vmatmul.f32.gmra.mxu3 %v1299_v21  ;;  %v1391_v22 = vpack.c.bf16 %v1299_v21, %v1298_v17  ;;  %v7312_v17 = vld [vmem:[#allocation31 + $0x88] sm:$0xf0]  ;;  %v11363_v21 = vperm.slane %v1408_v19, 1 }
 0x6e4   :  { %1803 = vmatpush.bf16.msra.mxu1 %v7339_v50  ;;  %v7315_v18 = vor.u32 %v9501_v16, %v7312_v17  ;;  %v7432_v50 = vld [vmem:[#allocation35 + $0x78] sm:$0xf0]  ;;  %v7470_v16 = vld [vmem:[#allocation35 + $0xc0] sm:$0xf]  ;;  %v9542_v17 = vld [vmem:[#allocation35 + $0xc4] sm:$0xf0] }
 0x6e5   :  { %1507 = vmatmul.bf16.gmra.mxu0 %v1391_v22  ;;  %1526 = vmatmul.bf16.gmra.mxu1 %v1391_v22  ;;  %v7435_v53 = vor.u32 %v9531_v49, %v7432_v50  ;;  %v7471_v19 = vor.u32 %v9542_v17, %v7470_v16  ;;  %v9537_v49 = vld [vmem:[#allocation35 + $0xa4] sm:$0xf]  ;;  %v7456_v50 = vld [vmem:[#allocation35 + $0xa8] sm:$0xf0] }
 0x6e6   :  { %1747 = vmatpush.bf16.msrb.mxu2 %v7263_v55  ;;  %1767 = vmatpush.bf16.msrb.mxu3 %v7319_v5  ;;  %v7478_v55 = vld [vmem:[#allocation35 + $0xd0] sm:$0xf] }
 0x6e7   :  { %2074 = vmatpush.bf16.msra.mxu0 %v7435_v53  ;;  %v9524_v53 = vld [vmem:[#allocation35 + $0x34] sm:$0xf0] }
 0x6e8   :  { %1804 = vmatpush.bf16.msra.mxu1 %v7331_v61  ;;  %v9529_v61 = vld [vmem:[#allocation35 + $0x64] sm:$0xf] }
 0x6e9   :  { %v7427_v4 = vor.u32 %v9529_v61, %v7424_v62  ;;  %v7448_v61 = vld [vmem:[#allocation35 + $0x98] sm:$0xf0] }
 0x6ea   :  { %1748 = vmatpush.bf16.msrb.mxu2 %v7255_v1  ;;  %1768 = vmatpush.bf16.msrb.mxu3 %v7311_v14  ;;  %v7479_v1 = vor.u32 %v9544_v28, %v7478_v55  ;;  %v9523_v55 = vld [vmem:[#allocation35 + $0x34] sm:$0xf] }
 0x6eb   :  { %2075 = vmatpush.bf16.msra.mxu0 %v7427_v4 }
 0x6ec   :  { %1805 = vmatpush.bf16.msra.mxu1 %v7323_v32 }
 0x6ee   :  { %1749 = vmatpush.bf16.msrb.mxu2 %v7247_v10  ;;  %2055 = vmatpush.bf16.msra.mxu3 %v7495_v31  ;;  %v9540_v31 = vld [vmem:[#allocation35 + $0xb4] sm:$0xf0] }
 0x6ef   :  { %v7463_v29 = vor.u32 %v9540_v31, %v7462_v30 }
 0x6f0   :  { %1806 = vmatpush.bf16.msra.mxu1 %v7315_v18  ;;  %v9541_v18 = vld [vmem:[#allocation35 + $0xc4] sm:$0xf] }
 0x6f2   :  { %2036 = vmatpush.bf16.msra.mxu2 %v7431_v52  ;;  %2056 = vmatpush.bf16.msra.mxu3 %v7487_v44  ;;  %v9538_v44 = vld [vmem:[#allocation35 + $0xa4] sm:$0xf0]  ;;  %v7398_v52 = vld [vmem:[#allocation35 + $0x30] sm:$0xf] }
 0x6f3   :  { %v7399_v28 = vor.u32 %v9524_v53, %v7398_v52  ;;  %v9580_v52 = vld [vmem:[#allocation37 + $0xf4] sm:$0xf0]  ;;  %v9579_v53 = vld [vmem:[#allocation37 + $0xf4] sm:$0xf] }
 0x6f4   :  { %2093 = vmatpush.bf16.msrb.mxu1 %v7499_v37  ;;  %v9526_v37 = vld [vmem:[#allocation35 + $0x44] sm:$0xf0] }
 0x6f6   :  { %2057 = vmatpush.bf16.msra.mxu3 %v7479_v1  ;;  %2037 = vmatpush.bf16.msra.mxu2 %v7423_v2  ;;  %v7390_v1 = vld [vmem:[#allocation35 + $0x20] sm:$0xf]  ;;  %v9522_v2 = vld [vmem:[#allocation35 + $0x24] sm:$0xf0] }
 0x6f7   :  { %v7391_v4 = vor.u32 %v9522_v2, %v7390_v1 }
 0x6f8   :  { %2094 = vmatpush.bf16.msrb.mxu1 %v7491_v51  ;;  %v7459_v51 = vor.u32 %v9537_v49, %v7456_v50 }
 0x6fa   :  { %2058 = vmatpush.bf16.msra.mxu3 %v7471_v19  ;;  %v9518_v19 = vld [vmem:[#allocation35 + $0x4] sm:$0xf0] }
 0x6fc   :  { %2095 = vmatpush.bf16.msrb.mxu1 %v7483_v3  ;;  %v9521_v3 = vld [vmem:[#allocation35 + $0x24] sm:$0xf] }
 0x6fe   :  { %2059 = vmatpush.bf16.msra.mxu3 %v7463_v29 }
 0x748   :  { %v11375_v26 = vpop.f32.mrf.mxu3 }
 0x74c   :  { %v1503_v22 = vpop.f32.mrf.mxu0  ;;  %v1522_v23 = vpop.f32.mrf.mxu1 }
 0x74d   :  { %v1504_v24 = vadd.f32 %v1503_v22, %v11361_v20  ;;  %v1523_v25 = vadd.f32 %v1522_v23, %v11363_v21  ;;  %v7472_v22 = vld [vmem:[#allocation35 + $0xc8] sm:$0xf0] }
 0x74e   :  { %v7475_v23 = vor.u32 %v9541_v18, %v7472_v22  ;;  %v7374_v18 = vld [vmem:[#allocation35] sm:$0xf]  ;;  %v9517_v22 = vld [vmem:[#allocation35 + $0x4] sm:$0xf] }
 0x74f   :  { %v1532_v42 = vmax.f32 %v1504_v24, 0.0  ;;  %v1533_v46 = vmax.f32 %v1523_v25, 0.0  ;;  %v7414_v24 = vld [vmem:[#allocation35 + $0x50] sm:$0xf]  ;;  %v9527_v25 = vld [vmem:[#allocation35 + $0x54] sm:$0xf] }
 0x750   :  { %2096 = vmatpush.bf16.msrb.mxu1 %v7475_v23  ;;  %v7375_v23 = vor.u32 %v9518_v19, %v7374_v18 }
 0x754   :  { %v1505_v47 = vpop.f32.mrf.mxu0  ;;  %v1524_v36 = vpop.f32.mrf.mxu1 }
 0x755   :  { %v1506_v41 = vadd.f32 %v1505_v47, %v11361_v20  ;;  %v1525_v43 = vadd.f32 %v1524_v36, %v11363_v21  ;;  %v7467_v47 = vor.u32 %v9539_v35, %v7464_v45  ;;  %v7406_v36 = vld [vmem:[#allocation35 + $0x40] sm:$0xf] }
 0x756   :  { %v7407_v39 = vor.u32 %v9526_v37, %v7406_v36 }
 0x757   :  { %v1534_v56 = vmax.f32 %v1506_v41, 0.0  ;;  %v1535_v57 = vmax.f32 %v1525_v43, 0.0  ;;  %2097 = vmatpush.bf16.msrb.mxu1 %v7467_v47  ;;  %v7411_v41 = vor.u32 %v9525_v38, %v7408_v40  ;;  %v7454_v43 = vld [vmem:[#allocation35 + $0xa0] sm:$0xf] }
 0x758   :  { %v7455_v48 = vor.u32 %v9538_v44, %v7454_v43 }
 0x759   :  { %v1540_v63 = vpack.c.bf16 %v1534_v56, %v1532_v42  ;;  %v1541_v0 = vpack.c.bf16 %v1535_v57, %v1533_v46  ;;  %v7416_v42 = vld [vmem:[#allocation35 + $0x58] sm:$0xf0]  ;;  %v11373_v46 = vpop.f32.mrf.mxu2  ;;  %v7403_v56 = vor.u32 %v9523_v55, %v7400_v33  ;;  %v7446_v57 = vld [vmem:[#allocation35 + $0x90] sm:$0xf] }
 0x75a   :  { %v7419_v27 = vor.u32 %v9527_v25, %v7416_v42  ;;  %2060 = vmatpush.bf16.msra.mxu3 %v7455_v48  ;;  %v7447_v60 = vor.u32 %v9536_v58, %v7446_v57  ;;  %v1576_v25 = vld [vmem:[#allocation32] sm:$0x3]  ;;  %v7614_v58 = vld [vmem:[#allocation37 + $0xe0] sm:$0xf] }
 0x75b   :  { %1750 = vmatmul.bf16.vlgmr.msrb.gmra.mxu2 %v1540_v63  ;;  %1769 = vmatmul.bf16.vlgmr.msrb.gmra.mxu3 %v1541_v0  ;;  %v11390_v29 = vperm.slane %v1576_v25, 0  ;;  %v7624_v57 = vld [vmem:[#allocation37 + $0xf8] sm:$0xf0] }
 0x75c   :  { %1788 = vmatmul.bf16.vlgmr.msrb.gmra.mxu0 %v1540_v63  ;;  %1807 = vmatmul.bf16.vlgmr.msra.gmra.mxu1 %v1541_v0  ;;  %v1381_v63 = vpop.f32.mrf.mxu3  ;;  %v7451_v0 = vor.u32 %v9535_v59, %v7448_v61  ;;  %v9578_v61 = vld [vmem:[#allocation37 + $0xe4] sm:$0xf0] }
 0x75d   :  { %2076 = vmatpush.bf16.msra.mxu0 %v7419_v27  ;;  %2098 = vmatpush.bf16.msrb.mxu1 %v7459_v51  ;;  %v11387_v27 = vperm.slane %v1576_v25, 1  ;;  %v7622_v51 = vld [vmem:[#allocation37 + $0xf0] sm:$0xf]  ;;  %v7615_v2 = vor.u32 %v9578_v61, %v7614_v58 }
 0x75e   :  { %2061 = vmatpush.bf16.msra.mxu3 %v7447_v60  ;;  %v7627_v60 = vor.u32 %v9579_v53, %v7624_v57  ;;  %v7552_v53 = vld [vmem:[#allocation37 + $0x68] sm:$0xf0] }
 0x761   :  { %2077 = vmatpush.bf16.msra.mxu0 %v7411_v41  ;;  %v11377_v62 = vpop.f32.mrf.mxu2  ;;  %2099 = vmatpush.bf16.msrb.mxu1 %v7451_v0  ;;  %v7616_v0 = vld [vmem:[#allocation37 + $0xe8] sm:$0xf0] }
 0x762   :  { %v1508_v5 = vpop.f32.mrf.mxu0  ;;  %v1527_v6 = vpop.f32.mrf.mxu1 }
 0x763   :  { %v1509_v54 = vadd.f32 %v1508_v5, %v11361_v20  ;;  %v1528_v7 = vadd.f32 %v1527_v6, %v11363_v21  ;;  %v7392_v5 = vld [vmem:[#allocation35 + $0x28] sm:$0xf0] }
 0x764   :  { %v7395_v6 = vor.u32 %v9521_v3, %v7392_v5  ;;  %v11381_v17 = vpop.f32.mrf.mxu3  ;;  %v7558_v3 = vld [vmem:[#allocation37 + $0x70] sm:$0xf]  ;;  %v9563_v5 = vld [vmem:[#allocation37 + $0x74] sm:$0xf] }
 0x765   :  { %v1536_v10 = vmax.f32 %v1509_v54, 0.0  ;;  %v1537_v11 = vmax.f32 %v1528_v7, 0.0  ;;  %2078 = vmatpush.bf16.msra.mxu0 %v7403_v56  ;;  %v7438_v54 = vld [vmem:[#allocation35 + $0x80] sm:$0xf]  ;;  %v9534_v7 = vld [vmem:[#allocation35 + $0x84] sm:$0xf0]  ;;  %v7623_v56 = vor.u32 %v9580_v52, %v7622_v51 }
 0x766   :  { %v9561_v51 = vld [vmem:[#allocation37 + $0x64] sm:$0xf] }
 0x767   :  { %v7555_v57 = vor.u32 %v9561_v51, %v7552_v53  ;;  %v9553_v51 = vld [vmem:[#allocation37 + $0x24] sm:$0xf]  ;;  %v7520_v53 = vld [vmem:[#allocation37 + $0x28] sm:$0xf0] }
 0x769   :  { %2079 = vmatpush.bf16.msra.mxu0 %v7395_v6  ;;  %v11379_v16 = vpop.f32.mrf.mxu2 }
 0x76a   :  { %v1510_v32 = vpop.f32.mrf.mxu0  ;;  %v1529_v34 = vpop.f32.mrf.mxu1 }
 0x76b   :  { %v1511_v8 = vadd.f32 %v1510_v32, %v11361_v20  ;;  %v1530_v9 = vadd.f32 %v1529_v34, %v11363_v21  ;;  %v9528_v20 = vld [vmem:[#allocation35 + $0x54] sm:$0xf0]  ;;  %v9533_v32 = vld [vmem:[#allocation35 + $0x84] sm:$0xf]  ;;  %v7439_v34 = vor.u32 %v9534_v7, %v7438_v54  ;;  %v7560_v7 = vld [vmem:[#allocation37 + $0x78] sm:$0xf0] }
 0x76c   :  { %v7415_v21 = vor.u32 %v9528_v20, %v7414_v24  ;;  %v7376_v24 = vld [vmem:[#allocation35 + $0x8] sm:$0xf0]  ;;  %v11385_v42 = vpop.f32.mrf.mxu3 }
 0x76d   :  { %v1538_v12 = vmax.f32 %v1511_v8, 0.0  ;;  %v1539_v13 = vmax.f32 %v1530_v9, 0.0  ;;  %v7440_v8 = vld [vmem:[#allocation35 + $0x88] sm:$0xf0]  ;;  %2062 = vmatpush.bf16.msra.mxu3 %v7439_v34  ;;  %v7379_v20 = vor.u32 %v9517_v22, %v7376_v24 }
 0x76e   :  { %2038 = vmatpush.bf16.msra.mxu2 %v7415_v21  ;;  %v7443_v9 = vor.u32 %v9533_v32, %v7440_v8  ;;  %v7563_v32 = vor.u32 %v9563_v5, %v7560_v7  ;;  %v7590_v5 = vld [vmem:[#allocation37 + $0xb0] sm:$0xf]  ;;  %v9571_v7 = vld [vmem:[#allocation37 + $0xb4] sm:$0xf] }
 0x76f   :  { %v1542_v14 = vpack.c.bf16 %v1538_v12, %v1536_v10  ;;  %v1543_v15 = vpack.c.bf16 %v1539_v13, %v1537_v11  ;;  %v7382_v10 = vld [vmem:[#allocation35 + $0x10] sm:$0xf]  ;;  %v9520_v11 = vld [vmem:[#allocation35 + $0x14] sm:$0xf0]  ;;  %v9519_v12 = vld [vmem:[#allocation35 + $0x14] sm:$0xf] }
 0x770   :  { %v7383_v13 = vor.u32 %v9520_v11, %v7382_v10  ;;  %2100 = vmatpush.bf16.msrb.mxu1 %v7443_v9 }
 0x771   :  { %1755 = vmatmul.bf16.gmra.mxu2 %v1542_v14  ;;  %1774 = vmatmul.bf16.gmra.mxu3 %v1543_v15  ;;  %v11383_v21 = vpop.f32.mrf.mxu2 }
 0x772   :  { %1793 = vmatmul.bf16.gmra.mxu0 %v1542_v14  ;;  %1812 = vmatmul.bf16.gmra.mxu1 %v1543_v15  ;;  %v7384_v14 = vld [vmem:[#allocation35 + $0x18] sm:$0xf0] }
 0x773   :  { %2039 = vmatpush.bf16.msra.mxu2 %v7407_v39  ;;  %v7387_v15 = vor.u32 %v9519_v12, %v7384_v14  ;;  %2341 = vmatpush.bf16.msrb.mxu3 %v7623_v56  ;;  %v9574_v56 = vld [vmem:[#allocation37 + $0xc4] sm:$0xf0] }
 0x774   :  { %2379 = vmatpush.bf16.msra.mxu1 %v7627_v60  ;;  %v7600_v60 = vld [vmem:[#allocation37 + $0xc8] sm:$0xf0] }
 0x775   :  { %2080 = vmatpush.bf16.msra.mxu0 %v7387_v15 }
 0x777   :  { %2040 = vmatpush.bf16.msra.mxu2 %v7399_v28  ;;  %2342 = vmatpush.bf16.msrb.mxu3 %v7615_v2 }
 0x779   :  { %2081 = vmatpush.bf16.msra.mxu0 %v7379_v20 }
 0x77b   :  { %2041 = vmatpush.bf16.msra.mxu2 %v7391_v4  ;;  %v9564_v4 = vld [vmem:[#allocation37 + $0x74] sm:$0xf0] }
 0x77c   :  { %v7559_v54 = vor.u32 %v9564_v4, %v7558_v3  ;;  %v7544_v3 = vld [vmem:[#allocation37 + $0x58] sm:$0xf0] }
 0x77d   :  { %2360 = vmatpush.bf16.msrb.mxu0 %v7563_v32  ;;  %v7592_v32 = vld [vmem:[#allocation37 + $0xb8] sm:$0xf0] }
 0x77f   :  { %2042 = vmatpush.bf16.msra.mxu2 %v7383_v13 }
 0x781   :  { %2361 = vmatpush.bf16.msrb.mxu0 %v7555_v57  ;;  %v9566_v57 = vld [vmem:[#allocation37 + $0x84] sm:$0xf0] }
 0x783   :  { %2043 = vmatpush.bf16.msra.mxu2 %v7375_v23 }
 0x787   :  { %2322 = vmatpush.bf16.msrb.mxu2 %v7559_v54 }
 0x7d9   :  { %v1789_v30 = vpop.f32.mrf.mxu0  ;;  %v1808_v31 = vpop.f32.mrf.mxu1 }
 0x7da   :  { %v1790_v35 = vadd.f32 %v1789_v30, %v11387_v27 }
 0x7dc   :  { %v1809_v36 = vadd.f32 %v1808_v31, %v1790_v35 }
 0x7de   :  { %v1751_v45 = vpop.f32.mrf.mxu2  ;;  %v1770_v47 = vpop.f32.mrf.mxu3  ;;  %v11395_v41 = vadd.f32 %v1809_v36, %v11375_v26 }
 0x7df   :  { %v1752_v37 = vadd.f32 %v1751_v45, %v11390_v29 }
 0x7e0   :  { %v1827_v55 = vmax.f32 %v11395_v41, 0.0  ;;  %v2440_v41 = vld [vmem:[#allocation40 + $0xd0] sm:$0xff] }
 0x7e1   :  { %v1791_v38 = vpop.f32.mrf.mxu0  ;;  %v1810_v40 = vpop.f32.mrf.mxu1  ;;  %v1771_v44 = vadd.f32 %v1770_v47, %v1752_v37 }
 0x7e2   :  { %v1792_v39 = vadd.f32 %v1791_v38, %v11387_v27  ;;  %v7606_v38 = vld [vmem:[#allocation37 + $0xd0] sm:$0xf] }
 0x7e3   :  { %v11403_v26 = vadd.f32 %v1771_v44, %v11373_v46  ;;  %v7608_v44 = vld [vmem:[#allocation37 + $0xd8] sm:$0xf0] }
 0x7e4   :  { %v1811_v43 = vadd.f32 %v1810_v40, %v1792_v39  ;;  %v9576_v39 = vld [vmem:[#allocation37 + $0xd4] sm:$0xf0]  ;;  %v9575_v40 = vld [vmem:[#allocation37 + $0xd4] sm:$0xf] }
 0x7e5   :  { %v1826_v34 = vmax.f32 %v11403_v26, 0.0  ;;  %v2433_v26 = vld [vmem:[#allocation40 + $0x98] sm:$0xff] }
 0x7e6   :  { %v11397_v48 = vadd.f32 %v1811_v43, %v1381_v63  ;;  %v1753_v49 = vpop.f32.mrf.mxu2  ;;  %v1772_v33 = vpop.f32.mrf.mxu3  ;;  %v9577_v63 = vld [vmem:[#allocation37 + $0xe4] sm:$0xf]  ;;  %v7607_v43 = vor.u32 %v9576_v39, %v7606_v38  ;;  %v7574_v38 = vld [vmem:[#allocation37 + $0x90] sm:$0xf]  ;;  %v9568_v39 = vld [vmem:[#allocation37 + $0x94] sm:$0xf0] }
 0x7e7   :  { %v1754_v50 = vadd.f32 %v1753_v49, %v11390_v29  ;;  %v7619_v46 = vor.u32 %v9577_v63, %v7616_v0  ;;  %v7550_v49 = vld [vmem:[#allocation37 + $0x60] sm:$0xf]  ;;  %v7542_v63 = vld [vmem:[#allocation37 + $0x50] sm:$0xf]  ;;  %v9560_v0 = vld [vmem:[#allocation37 + $0x54] sm:$0xf0] }
 0x7e8   :  { %v1829_v28 = vmax.f32 %v11397_v48, 0.0  ;;  %2343 = vmatpush.bf16.msrb.mxu3 %v7607_v43  ;;  %v7543_v2 = vor.u32 %v9560_v0, %v7542_v63  ;;  %v7575_v43 = vor.u32 %v9568_v39, %v7574_v38  ;;  %v7510_v63 = vld [vmem:[#allocation37 + $0x10] sm:$0xf]  ;;  %v9552_v0 = vld [vmem:[#allocation37 + $0x14] sm:$0xf0]  ;;  %v2534_v38 = vld [vmem:[#allocation40 + $0x3c0] sm:$0xff] }
 0x7e9   :  { %v1773_v59 = vadd.f32 %v1772_v33, %v1754_v50  ;;  %2380 = vmatpush.bf16.msra.mxu1 %v7619_v46  ;;  %v9562_v50 = vld [vmem:[#allocation37 + $0x64] sm:$0xf0]  ;;  %v7598_v33 = vld [vmem:[#allocation37 + $0xc0] sm:$0xf]  ;;  %v9572_v46 = vld [vmem:[#allocation37 + $0xb4] sm:$0xf0] }
 0x7ea   :  { %v1835_v1 = vpack.c.bf16 %v1829_v28, %v1827_v55  ;;  %v7551_v52 = vor.u32 %v9562_v50, %v7550_v49  ;;  %v7599_v58 = vor.u32 %v9574_v56, %v7598_v33  ;;  %v7591_v54 = vor.u32 %v9572_v46, %v7590_v5  ;;  %v7518_v49 = vld [vmem:[#allocation37 + $0x20] sm:$0xf]  ;;  %v9554_v50 = vld [vmem:[#allocation37 + $0x24] sm:$0xf0]  ;;  %v2428_v48 = vld [vmem:[#allocation40 + $0x70] sm:$0xff] }
 0x7eb   :  { %v11410_v6 = vadd.f32 %v1773_v59, %v11377_v62  ;;  %v9573_v59 = vld [vmem:[#allocation37 + $0xc4] sm:$0xf]  ;;  %v7523_v33 = vor.u32 %v9553_v51, %v7520_v53  ;;  %v7566_v56 = vld [vmem:[#allocation37 + $0x80] sm:$0xf]  ;;  %v9550_v46 = vld [vmem:[#allocation37 + $0x4] sm:$0xf0] }
 0x7ec   :  { %2063 = vmatmul.bf16.vlgmr.msra.gmra.mxu3 %v1835_v1  ;;  %2101 = vmatmul.bf16.vlgmr.msrb.gmra.mxu1 %v1835_v1  ;;  %v7603_v61 = vor.u32 %v9573_v59, %v7600_v60  ;;  %v9559_v1 = vld [vmem:[#allocation37 + $0x54] sm:$0xf]  ;;  %v7567_v59 = vor.u32 %v9566_v57, %v7566_v56  ;;  %v7568_v60 = vld [vmem:[#allocation37 + $0x88] sm:$0xf0]  ;;  %v7502_v5 = vld [vmem:[#allocation37] sm:$0xf] }
 0x7ed   :  { %v1828_v8 = vmax.f32 %v11410_v6, 0.0  ;;  %2323 = vmatpush.bf16.msrb.mxu2 %v7551_v52  ;;  %2344 = vmatpush.bf16.msrb.mxu3 %v7599_v58  ;;  %v7547_v4 = vor.u32 %v9559_v1, %v7544_v3  ;;  %v7519_v52 = vor.u32 %v9554_v50, %v7518_v49  ;;  %v9565_v58 = vld [vmem:[#allocation37 + $0x84] sm:$0xf]  ;;  %v9551_v1 = vld [vmem:[#allocation37 + $0x14] sm:$0xf]  ;;  %v2531_v50 = vld [vmem:[#allocation40 + $0x3a8] sm:$0xff] }
 0x7ee   :  { %v7512_v3 = vld [vmem:[#allocation37 + $0x18] sm:$0xf0]  ;;  %v2530_v49 = vld [vmem:[#allocation40 + $0x3a0] sm:$0xff]  ;;  %v2475_v53 = vld [vmem:[#allocation40 + $0x1e8] sm:$0xff] }
 0x7ef   :  { %v1834_v62 = vpack.c.bf16 %v1828_v8, %v1826_v34  ;;  %v1794_v9 = vpop.f32.mrf.mxu0  ;;  %v1813_v10 = vpop.f32.mrf.mxu1  ;;  %2362 = vmatpush.bf16.msrb.mxu0 %v7547_v4  ;;  %v7515_v4 = vor.u32 %v9551_v1, %v7512_v3  ;;  %v2526_v56 = vld [vmem:[#allocation40 + $0x380] sm:$0xff]  ;;  %v2527_v57 = vld [vmem:[#allocation40 + $0x388] sm:$0xff]  ;;  %v2417_v6 = vld [vmem:[#allocation40 + $0x18] sm:$0xff] }
 0x7f0   :  { %v1795_v11 = vadd.f32 %v1794_v9, %v11387_v27  ;;  %v7534_v9 = vld [vmem:[#allocation37 + $0x40] sm:$0xf] }
 0x7f1   :  { %2044 = vmatmul.bf16.vlgmr.msra.gmra.mxu2 %v1834_v62  ;;  %2082 = vmatmul.bf16.vlgmr.msra.gmra.mxu0 %v1834_v62  ;;  %v7595_v62 = vor.u32 %v9571_v7, %v7592_v32  ;;  %v7503_v7 = vor.u32 %v9550_v46, %v7502_v5  ;;  %v7504_v32 = vld [vmem:[#allocation37 + $0x8] sm:$0xf0]  ;;  %v2518_v3 = vld [vmem:[#allocation40 + $0x340] sm:$0xff] }
 0x7f2   :  { %v1814_v14 = vadd.f32 %v1813_v10, %v1795_v11  ;;  %2324 = vmatpush.bf16.msrb.mxu2 %v7543_v2  ;;  %v9558_v10 = vld [vmem:[#allocation37 + $0x44] sm:$0xf0]  ;;  %v9557_v11 = vld [vmem:[#allocation37 + $0x44] sm:$0xf]  ;;  %2345 = vmatpush.bf16.msrb.mxu3 %v7591_v54  ;;  %v7511_v2 = vor.u32 %v9552_v0, %v7510_v63 }
 0x7f3   :  { %v9549_v54 = vld [vmem:[#allocation37 + $0x4] sm:$0xf]  ;;  %v2523_v0 = vld [vmem:[#allocation40 + $0x368] sm:$0xff] }
 0x7f4   :  { %v1756_v12 = vpop.f32.mrf.mxu2  ;;  %v1775_v13 = vpop.f32.mrf.mxu3  ;;  %v11422_v23 = vadd.f32 %v1814_v14, %v11381_v17  ;;  %v2522_v63 = vld [vmem:[#allocation40 + $0x360] sm:$0xff]  ;;  %v2467_v46 = vld [vmem:[#allocation40 + $0x1a8] sm:$0xff] }
 0x7f5   :  { %v1757_v15 = vadd.f32 %v1756_v12, %v11390_v29  ;;  %v7535_v12 = vor.u32 %v9558_v10, %v7534_v9  ;;  %v1870_v9 = vld [vmem:[%s12458_s22] sm:$0x3] }
 0x7f6   :  { %v1831_v35 = vmax.f32 %v11422_v23, 0.0  ;;  %v9601_v23 = vld [vmem:[%s12460_s26 + $0xa4] sm:$0xf] }
 0x7f7   :  { %v1796_v18 = vpop.f32.mrf.mxu0  ;;  %v1815_v22 = vpop.f32.mrf.mxu1  ;;  %v1776_v20 = vadd.f32 %v1775_v13, %v1757_v15  ;;  %v7536_v13 = vld [vmem:[#allocation37 + $0x48] sm:$0xf0]  ;;  %v7582_v15 = vld [vmem:[#allocation37 + $0xa0] sm:$0xf]  ;;  %2325 = vmatpush.bf16.msrb.mxu2 %v7535_v12  ;;  %v11447_v12 = vperm.slane %v1870_v9, 1 }
 0x7f8   :  { %v1797_v19 = vadd.f32 %v1796_v18, %v11387_v27  ;;  %v7539_v14 = vor.u32 %v9557_v11, %v7536_v13  ;;  %v9570_v18 = vld [vmem:[#allocation37 + $0xa4] sm:$0xf0] }
 0x7f9   :  { %v11431_v36 = vadd.f32 %v1776_v20, %v11379_v16 }
 0x7fa   :  { %v1816_v24 = vadd.f32 %v1815_v22, %v1797_v19  ;;  %v9569_v19 = vld [vmem:[#allocation37 + $0xa4] sm:$0xf]  ;;  %v7583_v22 = vor.u32 %v9570_v18, %v7582_v15  ;;  %2363 = vmatpush.bf16.msrb.mxu0 %v7539_v14  ;;  %v11450_v18 = vperm.slane %v1870_v9, 0  ;;  %v2515_v9 = vld [vmem:[#allocation40 + $0x328] sm:$0xff] }
 0x7fc   :  { %v11425_v25 = vadd.f32 %v1816_v24, %v11385_v42  ;;  %v1758_v30 = vpop.f32.mrf.mxu2  ;;  %v1777_v45 = vpop.f32.mrf.mxu3  ;;  %v7584_v24 = vld [vmem:[#allocation37 + $0xa8] sm:$0xf0]  ;;  %2346 = vmatpush.bf16.msrb.mxu3 %v7583_v22 }
 0x7fd   :  { %v1759_v31 = vadd.f32 %v1758_v30, %v11390_v29  ;;  %v1830_v29 = vmax.f32 %v11431_v36, 0.0  ;;  %v7587_v20 = vor.u32 %v9569_v19, %v7584_v24  ;;  %v7526_v30 = vld [vmem:[#allocation37 + $0x30] sm:$0xf] }
 0x7fe   :  { %v1833_v47 = vmax.f32 %v11425_v25, 0.0  ;;  %v9593_v25 = vld [vmem:[%s12460_s26 + $0x64] sm:$0xf] }
 0x7ff   :  { %v1778_v27 = vadd.f32 %v1777_v45, %v1759_v31  ;;  %v9556_v31 = vld [vmem:[#allocation37 + $0x34] sm:$0xf0]  ;;  %v9555_v45 = vld [vmem:[#allocation37 + $0x34] sm:$0xf] }
 0x800   :  { %v1837_v17 = vpack.c.bf16 %v1833_v47, %v1831_v35  ;;  %2347 = vmatpush.bf16.msrb.mxu3 %v7575_v43 }
 0x801   :  { %v11438_v42 = vadd.f32 %v1778_v27, %v11383_v21  ;;  %v7611_v21 = vor.u32 %v9575_v40, %v7608_v44  ;;  %v7527_v27 = vor.u32 %v9556_v31, %v7526_v30  ;;  %v9567_v40 = vld [vmem:[#allocation37 + $0x94] sm:$0xf]  ;;  %v7576_v44 = vld [vmem:[#allocation37 + $0x98] sm:$0xf0] }
 0x802   :  { %2068 = vmatmul.bf16.gmra.mxu3 %v1837_v17  ;;  %2106 = vmatmul.bf16.gmra.mxu1 %v1837_v17  ;;  %v7528_v17 = vld [vmem:[#allocation37 + $0x38] sm:$0xf0] }
 0x803   :  { %v1832_v37 = vmax.f32 %v11438_v42, 0.0  ;;  %2381 = vmatpush.bf16.msra.mxu1 %v7611_v21  ;;  %2326 = vmatpush.bf16.msrb.mxu2 %v7527_v27  ;;  %v7579_v21 = vor.u32 %v9567_v40, %v7576_v44  ;;  %v2535_v40 = vld [vmem:[#allocation40 + $0x3c8] sm:$0xff] }
 0x804   :  { %2348 = vmatpush.bf16.msrb.mxu3 %v7567_v59  ;;  %v2471_v59 = vld [vmem:[#allocation40 + $0x1c8] sm:$0xff] }
 0x805   :  { %v1836_v16 = vpack.c.bf16 %v1832_v37, %v1830_v29 }
 0x807   :  { %2049 = vmatmul.bf16.gmra.mxu2 %v1836_v16  ;;  %2087 = vmatmul.bf16.gmra.mxu0 %v1836_v16  ;;  %v7531_v16 = vor.u32 %v9555_v45, %v7528_v17  ;;  %v2538_v17 = vld [vmem:[#allocation40 + $0x3e0] sm:$0xff] }
 0x808   :  { %2382 = vmatpush.bf16.msra.mxu1 %v7603_v61  ;;  %2327 = vmatpush.bf16.msrb.mxu2 %v7519_v52  ;;  %v7571_v61 = vor.u32 %v9565_v58, %v7568_v60  ;;  %v2474_v52 = vld [vmem:[#allocation40 + $0x1e0] sm:$0xff] }
 0x809   :  { %2364 = vmatpush.bf16.msrb.mxu0 %v7531_v16  ;;  %v2539_v16 = vld [vmem:[#allocation40 + $0x3e8] sm:$0xff]  ;;  %2571 = vmatpush.msra.mxu3 %v2538_v17  ;;  %v2470_v58 = vld [vmem:[#allocation40 + $0x1c0] sm:$0xff] }
 0x80b   :  { %2572 = vmatpush.msra.mxu3 %v2534_v38 }
 0x80c   :  { %2383 = vmatpush.bf16.msra.mxu1 %v7595_v62  ;;  %2328 = vmatpush.bf16.msrb.mxu2 %v7511_v2  ;;  %v7507_v62 = vor.u32 %v9549_v54, %v7504_v32  ;;  %v2466_v2 = vld [vmem:[#allocation40 + $0x1a0] sm:$0xff]  ;;  %v2519_v54 = vld [vmem:[#allocation40 + $0x348] sm:$0xff] }
 0x80d   :  { %2365 = vmatpush.bf16.msrb.mxu0 %v7523_v33  ;;  %2573 = vmatpush.msra.mxu3 %v2530_v49  ;;  %v2514_v32 = vld [vmem:[#allocation40 + $0x320] sm:$0xff] }
 0x80f   :  { %2574 = vmatpush.msra.mxu3 %v2526_v56  ;;  %v2450_v56 = vld [vmem:[#allocation40 + $0x120] sm:$0xff] }
 0x810   :  { %2384 = vmatpush.bf16.msra.mxu1 %v7587_v20  ;;  %2329 = vmatpush.bf16.msrb.mxu2 %v7503_v7  ;;  %v2462_v7 = vld [vmem:[#allocation40 + $0x180] sm:$0xff] }
 0x811   :  { %2366 = vmatpush.bf16.msrb.mxu0 %v7515_v4  ;;  %2575 = vmatpush.msra.mxu3 %v2522_v63  ;;  %v2499_v63 = vld [vmem:[#allocation40 + $0x2a8] sm:$0xff] }
 0x813   :  { %2576 = vmatpush.msra.mxu3 %v2518_v3  ;;  %v2495_v3 = vld [vmem:[#allocation40 + $0x288] sm:$0xff] }
 0x814   :  { %2385 = vmatpush.bf16.msra.mxu1 %v7579_v21  ;;  %2542 = vmatpush.msra.mxu2 %v2474_v52  ;;  %v2506_v52 = vld [vmem:[#allocation40 + $0x2e0] sm:$0xff] }
 0x815   :  { %2367 = vmatpush.bf16.msrb.mxu0 %v7507_v62  ;;  %v2463_v62 = vld [vmem:[#allocation40 + $0x188] sm:$0xff]  ;;  %2577 = vmatpush.msra.mxu3 %v2514_v32  ;;  %v2486_v32 = vld [vmem:[#allocation40 + $0x240] sm:$0xff] }
 0x816   :  { %2543 = vmatpush.msra.mxu2 %v2470_v58  ;;  %v2503_v58 = vld [vmem:[#allocation40 + $0x2c8] sm:$0xff] }
 0x818   :  { %2386 = vmatpush.bf16.msra.mxu1 %v7571_v61  ;;  %2544 = vmatpush.msra.mxu2 %v2466_v2  ;;  %v2443_v2 = vld [vmem:[#allocation40 + $0xe8] sm:$0xff] }
 0x819   :  { %2600 = vmatpush.msra.mxu0 %v2475_v53  ;;  %v2455_v53 = vld [vmem:[#allocation40 + $0x148] sm:$0xff] }
 0x81a   :  { %2545 = vmatpush.msra.mxu2 %v2462_v7  ;;  %v2434_v7 = vld [vmem:[#allocation40 + $0xa0] sm:$0xff] }
 0x81b   :  { %2601 = vmatpush.msra.mxu0 %v2471_v59  ;;  %v2446_v59 = vld [vmem:[#allocation40 + $0x100] sm:$0xff] }
 0x81c   :  { %2629 = vmatpush.msrb.mxu1 %v2539_v16 }
 0x81d   :  { %2602 = vmatpush.msra.mxu0 %v2467_v46  ;;  %v2439_v46 = vld [vmem:[#allocation40 + $0xc8] sm:$0xff] }
 0x81e   :  { %2630 = vmatpush.msrb.mxu1 %v2535_v40 }
 0x81f   :  { %2603 = vmatpush.msra.mxu0 %v2463_v62  ;;  %v2435_v62 = vld [vmem:[#allocation40 + $0xa8] sm:$0xff] }
 0x820   :  { %2631 = vmatpush.msrb.mxu1 %v2531_v50 }
 0x822   :  { %2632 = vmatpush.msrb.mxu1 %v2527_v57  ;;  %v2502_v57 = vld [vmem:[#allocation40 + $0x2c0] sm:$0xff] }
 0x824   :  { %2633 = vmatpush.msrb.mxu1 %v2523_v0  ;;  %v2442_v0 = vld [vmem:[#allocation40 + $0xe0] sm:$0xff] }
 0x826   :  { %2634 = vmatpush.msrb.mxu1 %v2519_v54  ;;  %v2491_v54 = vld [vmem:[#allocation40 + $0x268] sm:$0xff] }
 0x828   :  { %2635 = vmatpush.msrb.mxu1 %v2515_v9  ;;  %v2487_v9 = vld [vmem:[#allocation40 + $0x248] sm:$0xff] }
 0x869   :  { %v2102_v10 = vpop.f32.mrf.mxu1 }
 0x86e   :  { %v2083_v11 = vpop.f32.mrf.mxu0 }
 0x86f   :  { %v2084_v13 = vadd.f32 %v2083_v11, %v11447_v12  ;;  %v2064_v14 = vpop.f32.mrf.mxu3  ;;  %v2510_v11 = vld [vmem:[#allocation40 + $0x300] sm:$0xff] }
 0x870   :  { %2578 = vmatpush.msra.mxu3 %v2510_v11  ;;  %v2482_v11 = vld [vmem:[#allocation40 + $0x220] sm:$0xff] }
 0x871   :  { %v2103_v22 = vadd.f32 %v2102_v10, %v2084_v13  ;;  %v2104_v20 = vpop.f32.mrf.mxu1  ;;  %v2458_v10 = vld [vmem:[#allocation40 + $0x160] sm:$0xff]  ;;  %v2459_v13 = vld [vmem:[#allocation40 + $0x168] sm:$0xff] }
 0x872   :  { %2546 = vmatpush.msra.mxu2 %v2458_v10  ;;  %2604 = vmatpush.msra.mxu0 %v2459_v13  ;;  %v2430_v10 = vld [vmem:[#allocation40 + $0x80] sm:$0xff]  ;;  %v2431_v13 = vld [vmem:[#allocation40 + $0x88] sm:$0xff] }
 0x873   :  { %v2113_v45 = vmax.f32 %v2103_v22, 0.0  ;;  %2579 = vmatpush.msra.mxu3 %v2506_v52  ;;  %v2524_v52 = vld [vmem:[#allocation40 + $0x370] sm:$0xff] }
 0x874   :  { %v2045_v15 = vpop.f32.mrf.mxu2  ;;  %2605 = vmatpush.msra.mxu0 %v2455_v53  ;;  %v2473_v53 = vld [vmem:[#allocation40 + $0x1d8] sm:$0xff] }
 0x875   :  { %v2046_v30 = vadd.f32 %v2045_v15, %v11450_v18  ;;  %2580 = vmatpush.msra.mxu3 %v2502_v57  ;;  %v2468_v57 = vld [vmem:[#allocation40 + $0x1b0] sm:$0xff] }
 0x876   :  { %v2085_v19 = vpop.f32.mrf.mxu0 }
 0x877   :  { %v2086_v24 = vadd.f32 %v2085_v19, %v11447_v12  ;;  %v2065_v43 = vadd.f32 %v2064_v14, %v2046_v30  ;;  %v2066_v51 = vpop.f32.mrf.mxu3  ;;  %v2511_v14 = vld [vmem:[#allocation40 + $0x308] sm:$0xff] }
 0x878   :  { %2636 = vmatpush.msrb.mxu1 %v2511_v14  ;;  %v2483_v14 = vld [vmem:[#allocation40 + $0x228] sm:$0xff] }
 0x879   :  { %v2105_v31 = vadd.f32 %v2104_v20, %v2086_v24  ;;  %v2112_v60 = vmax.f32 %v2065_v43, 0.0 }
 0x87b   :  { %v2115_v27 = vmax.f32 %v2105_v31, 0.0 }
 0x87c   :  { %v2047_v39 = vpop.f32.mrf.mxu2 }
 0x87d   :  { %v2121_v44 = vpack.c.bf16 %v2115_v27, %v2113_v45  ;;  %v2048_v21 = vadd.f32 %v2047_v39, %v11450_v18 }
 0x87f   :  { %v2067_v33 = vadd.f32 %v2066_v51, %v2048_v21  ;;  %2349 = vmatmul.bf16.vlgmr.msrb.gmra.mxu3 %v2121_v44  ;;  %2387 = vmatmul.bf16.vlgmr.msra.gmra.mxu1 %v2121_v44  ;;  %v2107_v4 = vpop.f32.mrf.mxu1 }
 0x881   :  { %v2114_v61 = vmax.f32 %v2067_v33, 0.0  ;;  %v2507_v33 = vld [vmem:[#allocation40 + $0x2e8] sm:$0xff] }
 0x882   :  { %2637 = vmatpush.msrb.mxu1 %v2507_v33  ;;  %v2156_v33 = vld [vmem:[%s12459_s23] sm:$0x3] }
 0x883   :  { %v2120_v1 = vpack.c.bf16 %v2114_v61, %v2112_v60  ;;  %v2498_v60 = vld [vmem:[#allocation40 + $0x2a0] sm:$0xff]  ;;  %v2447_v61 = vld [vmem:[#allocation40 + $0x108] sm:$0xff] }
 0x884   :  { %v2088_v5 = vpop.f32.mrf.mxu0  ;;  %2638 = vmatpush.msrb.mxu1 %v2503_v58  ;;  %2581 = vmatpush.msra.mxu3 %v2498_v60  ;;  %v2469_v58 = vld [vmem:[#allocation40 + $0x1b8] sm:$0xff]  ;;  %v2464_v60 = vld [vmem:[#allocation40 + $0x190] sm:$0xff] }
 0x885   :  { %2330 = vmatmul.bf16.vlgmr.msrb.gmra.mxu2 %v2120_v1  ;;  %2368 = vmatmul.bf16.vlgmr.msrb.gmra.mxu0 %v2120_v1  ;;  %v2089_v15 = vadd.f32 %v2088_v5, %v11447_v12  ;;  %v2069_v19 = vpop.f32.mrf.mxu3  ;;  %v2494_v1 = vld [vmem:[#allocation40 + $0x280] sm:$0xff] }
 0x886   :  { %2639 = vmatpush.msrb.mxu1 %v2499_v63  ;;  %2582 = vmatpush.msra.mxu3 %v2494_v1  ;;  %v2490_v5 = vld [vmem:[#allocation40 + $0x260] sm:$0xff]  ;;  %v2465_v63 = vld [vmem:[#allocation40 + $0x198] sm:$0xff] }
 0x887   :  { %v2108_v20 = vadd.f32 %v2107_v4, %v2089_v15  ;;  %v2109_v31 = vpop.f32.mrf.mxu1  ;;  %v2438_v4 = vld [vmem:[#allocation40 + $0xc0] sm:$0xff]  ;;  %v2517_v1 = vld [vmem:[#allocation40 + $0x338] sm:$0xff] }
 0x888   :  { %2640 = vmatpush.msrb.mxu1 %v2495_v3  ;;  %2583 = vmatpush.msra.mxu3 %v2490_v5  ;;  %v2426_v15 = vld [vmem:[#allocation40 + $0x60] sm:$0xff]  ;;  %v2512_v3 = vld [vmem:[#allocation40 + $0x310] sm:$0xff]  ;;  %v2513_v5 = vld [vmem:[#allocation40 + $0x318] sm:$0xff] }
 0x889   :  { %v2117_v17 = vmax.f32 %v2108_v20, 0.0  ;;  %v2422_v20 = vld [vmem:[#allocation40 + $0x40] sm:$0xff] }
 0x88a   :  { %v2050_v22 = vpop.f32.mrf.mxu2  ;;  %2641 = vmatpush.msrb.mxu1 %v2491_v54  ;;  %2584 = vmatpush.msra.mxu3 %v2486_v32  ;;  %v2508_v32 = vld [vmem:[#allocation40 + $0x2f0] sm:$0xff] }
 0x88b   :  { %v2051_v45 = vadd.f32 %v2050_v22, %v11450_v18  ;;  %v2427_v22 = vld [vmem:[#allocation40 + $0x68] sm:$0xff] }
 0x88c   :  { %v2090_v24 = vpop.f32.mrf.mxu0  ;;  %2642 = vmatpush.msrb.mxu1 %v2487_v9  ;;  %2585 = vmatpush.msra.mxu3 %v2482_v11  ;;  %v2452_v11 = vld [vmem:[#allocation40 + $0x130] sm:$0xff] }
 0x88d   :  { %v2091_v30 = vadd.f32 %v2090_v24, %v11447_v12  ;;  %v2070_v39 = vadd.f32 %v2069_v19, %v2051_v45  ;;  %v2071_v44 = vpop.f32.mrf.mxu3  ;;  %v2454_v12 = vld [vmem:[#allocation40 + $0x140] sm:$0xff]  ;;  %v2479_v24 = vld [vmem:[#allocation40 + $0x208] sm:$0xff] }
 0x88e   :  { %2547 = vmatpush.msra.mxu2 %v2454_v12  ;;  %2643 = vmatpush.msrb.mxu1 %v2483_v14  ;;  %v2478_v19 = vld [vmem:[#allocation40 + $0x200] sm:$0xff]  ;;  %v2419_v45 = vld [vmem:[#allocation40 + $0x28] sm:$0xff]  ;;  %v2472_v12 = vld [vmem:[#allocation40 + $0x1d0] sm:$0xff] }
 0x88f   :  { %v2110_v27 = vadd.f32 %v2109_v31, %v2091_v30  ;;  %v2116_v49 = vmax.f32 %v2070_v39, 0.0  ;;  %2586 = vmatpush.msra.mxu3 %v2478_v19  ;;  %v2423_v30 = vld [vmem:[#allocation40 + $0x48] sm:$0xff]  ;;  %v2418_v31 = vld [vmem:[#allocation40 + $0x20] sm:$0xff]  ;;  %v2536_v39 = vld [vmem:[#allocation40 + $0x3d0] sm:$0xff]  ;;  %v11463_v19 = vperm.slane %v2156_v33, 0 }
 0x890   :  { %2548 = vmatpush.msra.mxu2 %v2450_v56  ;;  %2644 = vmatpush.msrb.mxu1 %v2479_v24  ;;  %v2525_v56 = vld [vmem:[#allocation40 + $0x378] sm:$0xff]  ;;  %v2448_v24 = vld [vmem:[#allocation40 + $0x110] sm:$0xff] }
 0x891   :  { %v2119_v16 = vmax.f32 %v2110_v27, 0.0  ;;  %v2414_v27 = vld [vmem:[#allocation40] sm:$0xff]  ;;  %v2453_v14 = vld [vmem:[#allocation40 + $0x138] sm:$0xff] }
 0x892   :  { %v2052_v38 = vpop.f32.mrf.mxu2  ;;  %2549 = vmatpush.msra.mxu2 %v2446_v59  ;;  %v2521_v59 = vld [vmem:[#allocation40 + $0x358] sm:$0xff] }
 0x893   :  { %v2053_v40 = vadd.f32 %v2052_v38, %v11450_v18  ;;  %v2123_v43 = vpack.c.bf16 %v2119_v16, %v2117_v17  ;;  %v2451_v18 = vld [vmem:[#allocation40 + $0x128] sm:$0xff]  ;;  %v2540_v16 = vld [vmem:[#allocation40 + $0x3f0] sm:$0xff]  ;;  %v2541_v38 = vld [vmem:[#allocation40 + $0x3f8] sm:$0xff] }
 0x894   :  { %2606 = vmatpush.msra.mxu0 %v2451_v18  ;;  %2550 = vmatpush.msra.mxu2 %v2442_v0  ;;  %v2415_v17 = vld [vmem:[#allocation40 + $0x8] sm:$0xff]  ;;  %v2520_v18 = vld [vmem:[#allocation40 + $0x350] sm:$0xff]  ;;  %v11460_v0 = vperm.slane %v2156_v33, 1 }
 0x895   :  { %v2072_v21 = vadd.f32 %v2071_v44, %v2053_v40  ;;  %2354 = vmatmul.bf16.gmra.mxu3 %v2123_v43  ;;  %2392 = vmatmul.bf16.gmra.mxu1 %v2123_v43  ;;  %v2537_v40 = vld [vmem:[#allocation40 + $0x3d8] sm:$0xff]  ;;  %v2532_v43 = vld [vmem:[#allocation40 + $0x3b0] sm:$0xff] }
 0x896   :  { %2607 = vmatpush.msra.mxu0 %v2447_v61  ;;  %2551 = vmatpush.msra.mxu2 %v2438_v4  ;;  %v2533_v44 = vld [vmem:[#allocation40 + $0x3b8] sm:$0xff]  ;;  %v2516_v61 = vld [vmem:[#allocation40 + $0x330] sm:$0xff] }
 0x897   :  { %v2118_v50 = vmax.f32 %v2072_v21, 0.0  ;;  %2687 = vmatpush.msrb.mxu3 %v2540_v16  ;;  %2745 = vmatpush.msra.mxu1 %v2541_v38  ;;  %v2476_v21 = vld [vmem:[#allocation40 + $0x1f0] sm:$0xff]  ;;  %v2461_v4 = vld [vmem:[#allocation40 + $0x178] sm:$0xff] }
 0x898   :  { %2608 = vmatpush.msra.mxu0 %v2443_v2  ;;  %2552 = vmatpush.msra.mxu2 %v2434_v7  ;;  %v2460_v2 = vld [vmem:[#allocation40 + $0x170] sm:$0xff] }
 0x899   :  { %v2122_v51 = vpack.c.bf16 %v2118_v50, %v2116_v49  ;;  %2688 = vmatpush.msrb.mxu3 %v2536_v39  ;;  %2746 = vmatpush.msra.mxu1 %v2537_v40  ;;  %v2528_v49 = vld [vmem:[#allocation40 + $0x390] sm:$0xff]  ;;  %v2477_v50 = vld [vmem:[#allocation40 + $0x1f8] sm:$0xff] }
 0x89a   :  { %2609 = vmatpush.msra.mxu0 %v2439_v46  ;;  %2553 = vmatpush.msra.mxu2 %v2430_v10  ;;  %v2456_v7 = vld [vmem:[#allocation40 + $0x150] sm:$0xff]  ;;  %v2509_v10 = vld [vmem:[#allocation40 + $0x2f8] sm:$0xff] }
 0x89b   :  { %2335 = vmatmul.bf16.gmra.mxu2 %v2122_v51  ;;  %2373 = vmatmul.bf16.gmra.mxu0 %v2122_v51  ;;  %v2529_v51 = vld [vmem:[#allocation40 + $0x398] sm:$0xff]  ;;  %v2444_v16 = vld [vmem:[#allocation40 + $0xf0] sm:$0xff] }
 0x89c   :  { %2610 = vmatpush.msra.mxu0 %v2435_v62  ;;  %2554 = vmatpush.msra.mxu2 %v2426_v15  ;;  %v2457_v62 = vld [vmem:[#allocation40 + $0x158] sm:$0xff]  ;;  %v2496_v38 = vld [vmem:[#allocation40 + $0x290] sm:$0xff] }
 0x89d   :  { %2689 = vmatpush.msrb.mxu3 %v2532_v43  ;;  %2747 = vmatpush.msra.mxu1 %v2533_v44  ;;  %v2445_v39 = vld [vmem:[#allocation40 + $0xf8] sm:$0xff]  ;;  %v2488_v33 = vld [vmem:[#allocation40 + $0x250] sm:$0xff] }
 0x89e   :  { %2611 = vmatpush.msra.mxu0 %v2431_v13  ;;  %2555 = vmatpush.msra.mxu2 %v2422_v20  ;;  %v2504_v13 = vld [vmem:[#allocation40 + $0x2d0] sm:$0xff]  ;;  %v2497_v44 = vld [vmem:[#allocation40 + $0x298] sm:$0xff] }
 0x89f   :  { %2690 = vmatpush.msrb.mxu3 %v2528_v49  ;;  %2748 = vmatpush.msra.mxu1 %v2529_v51  ;;  %v2500_v20 = vld [vmem:[#allocation40 + $0x2b0] sm:$0xff]  ;;  %v2441_v49 = vld [vmem:[#allocation40 + $0xd8] sm:$0xff] }
 0x8a0   :  { %2612 = vmatpush.msra.mxu0 %v2427_v22  ;;  %2556 = vmatpush.msra.mxu2 %v2418_v31  ;;  %v2505_v22 = vld [vmem:[#allocation40 + $0x2d8] sm:$0xff] }
 0x8a1   :  { %2691 = vmatpush.msrb.mxu3 %v2524_v52  ;;  %2749 = vmatpush.msra.mxu1 %v2525_v56  ;;  %v2437_v56 = vld [vmem:[#allocation40 + $0xb8] sm:$0xff] }
 0x8a2   :  { %2613 = vmatpush.msra.mxu0 %v2423_v30  ;;  %2557 = vmatpush.msra.mxu2 %v2414_v27  ;;  %v2449_v30 = vld [vmem:[#allocation40 + $0x118] sm:$0xff] }
 0x8a3   :  { %2692 = vmatpush.msrb.mxu3 %v2520_v18  ;;  %2750 = vmatpush.msra.mxu1 %v2521_v59  ;;  %v2432_v59 = vld [vmem:[#allocation40 + $0x90] sm:$0xff] }
 0x8a4   :  { %2614 = vmatpush.msra.mxu0 %v2419_v45  ;;  %2658 = vmatpush.msrb.mxu2 %v2476_v21  ;;  %v2501_v45 = vld [vmem:[#allocation40 + $0x2b8] sm:$0xff] }
 0x8a5   :  { %2693 = vmatpush.msrb.mxu3 %v2516_v61  ;;  %2751 = vmatpush.msra.mxu1 %v2517_v1 }
 0x8a6   :  { %2615 = vmatpush.msra.mxu0 %v2415_v17  ;;  %2659 = vmatpush.msrb.mxu2 %v2472_v12  ;;  %v2493_v12 = vld [vmem:[#allocation40 + $0x278] sm:$0xff] }
 0x8a7   :  { %2694 = vmatpush.msrb.mxu3 %v2512_v3  ;;  %2752 = vmatpush.msra.mxu1 %v2513_v5  ;;  %v9643_v3 = vld [vmem:[%s12460_s26 + $0x1ec] sm:$0xf0] }
 0x8a8   :  { %2716 = vmatpush.msrb.mxu0 %v2477_v50  ;;  %2660 = vmatpush.msrb.mxu2 %v2468_v57 }
 0x8a9   :  { %2695 = vmatpush.msrb.mxu3 %v2508_v32  ;;  %2753 = vmatpush.msra.mxu1 %v2509_v10  ;;  %v2481_v32 = vld [vmem:[#allocation40 + $0x218] sm:$0xff] }
 0x8aa   :  { %2717 = vmatpush.msrb.mxu0 %v2473_v53  ;;  %2661 = vmatpush.msrb.mxu2 %v2464_v60  ;;  %v2436_v53 = vld [vmem:[#allocation40 + $0xb0] sm:$0xff] }
 0x8ab   :  { %2696 = vmatpush.msrb.mxu3 %v2504_v13  ;;  %2754 = vmatpush.msra.mxu1 %v2505_v22  ;;  %v2484_v60 = vld [vmem:[#allocation40 + $0x230] sm:$0xff]  ;;  %v2425_v13 = vld [vmem:[#allocation40 + $0x58] sm:$0xff] }
 0x8ac   :  { %2718 = vmatpush.msrb.mxu0 %v2469_v58  ;;  %2662 = vmatpush.msrb.mxu2 %v2460_v2  ;;  %v2489_v58 = vld [vmem:[#allocation40 + $0x258] sm:$0xff]  ;;  %v7870_v2 = vld [vmem:[%s12460_s26 + $0x1e0] sm:$0xf] }
 0x8ad   :  { %2697 = vmatpush.msrb.mxu3 %v2500_v20  ;;  %2755 = vmatpush.msra.mxu1 %v2501_v45  ;;  %v9639_v22 = vld [vmem:[%s12460_s26 + $0x1cc] sm:$0xf0]  ;;  %v7856_v20 = vld [vmem:[%s12460_s26 + $0x1d0] sm:$0xf0] }
 0x8ae   :  { %2719 = vmatpush.msrb.mxu0 %v2465_v63  ;;  %2663 = vmatpush.msrb.mxu2 %v2456_v7  ;;  %v2429_v7 = vld [vmem:[#allocation40 + $0x78] sm:$0xff] }
 0x8af   :  { %2698 = vmatpush.msrb.mxu3 %v2496_v38  ;;  %2756 = vmatpush.msra.mxu1 %v2497_v44  ;;  %v2421_v45 = vld [vmem:[#allocation40 + $0x38] sm:$0xff] }
 0x8b0   :  { %2720 = vmatpush.msrb.mxu0 %v2461_v4  ;;  %2664 = vmatpush.msrb.mxu2 %v2452_v11  ;;  %v2424_v11 = vld [vmem:[#allocation40 + $0x50] sm:$0xff]  ;;  %v7744_v44 = vld [vmem:[%s12460_s26 + $0xf0] sm:$0xf0] }
 0x8b1   :  { %2757 = vmatpush.msra.mxu1 %v2493_v12 }
 0x8b2   :  { %2721 = vmatpush.msrb.mxu0 %v2457_v62  ;;  %2665 = vmatpush.msrb.mxu2 %v2448_v24  ;;  %v7871_v62 = vor.u32 %v9643_v3, %v7870_v2  ;;  %v9637_v24 = vld [vmem:[%s12460_s26 + $0x1c4] sm:$0xf]  ;;  %v7824_v2 = vld [vmem:[%s12460_s26 + $0x190] sm:$0xf0] }
 0x8b3   :  { %2758 = vmatpush.msra.mxu1 %v2489_v58 }
 0x8b4   :  { %2722 = vmatpush.msrb.mxu0 %v2453_v14  ;;  %2666 = vmatpush.msrb.mxu2 %v2444_v16  ;;  %v9609_v16 = vld [vmem:[%s12460_s26 + $0xe4] sm:$0xf] }
 0x8b6   :  { %2723 = vmatpush.msrb.mxu0 %v2449_v30  ;;  %2667 = vmatpush.msrb.mxu2 %v2440_v41 }
 0x8b8   :  { %2724 = vmatpush.msrb.mxu0 %v2445_v39  ;;  %2668 = vmatpush.msrb.mxu2 %v2436_v53  ;;  %v2416_v39 = vld [vmem:[#allocation40 + $0x10] sm:$0xff]  ;;  %v7840_v53 = vld [vmem:[%s12460_s26 + $0x1b0] sm:$0xf0] }
 0x8ba   :  { %2725 = vmatpush.msrb.mxu0 %v2441_v49  ;;  %2669 = vmatpush.msrb.mxu2 %v2432_v59  ;;  %v7838_v49 = vld [vmem:[%s12460_s26 + $0x1a0] sm:$0xf]  ;;  %v9605_v59 = vld [vmem:[%s12460_s26 + $0xc4] sm:$0xf] }
 0x8bc   :  { %2726 = vmatpush.msrb.mxu0 %v2437_v56  ;;  %2670 = vmatpush.msrb.mxu2 %v2428_v48  ;;  %v9607_v56 = vld [vmem:[%s12460_s26 + $0xcc] sm:$0xf0] }
 0x8be   :  { %2727 = vmatpush.msrb.mxu0 %v2433_v26  ;;  %2671 = vmatpush.msrb.mxu2 %v2424_v11 }
 0x8c0   :  { %2728 = vmatpush.msrb.mxu0 %v2429_v7 }
 0x8c2   :  { %2729 = vmatpush.msrb.mxu0 %v2425_v13  ;;  %v7806_v13 = vld [vmem:[%s12460_s26 + $0x160] sm:$0xf] }
 0x8c4   :  { %2730 = vmatpush.msrb.mxu0 %v2421_v45  ;;  %v7694_v45 = vld [vmem:[%s12460_s26 + $0x80] sm:$0xf] }
 0x8c6   :  { %2731 = vmatpush.msrb.mxu0 %v2417_v6 }
 0x8fc   :  { %v2388_v46 = vpop.f32.mrf.mxu1 }
 0x902   :  { %v2369_v54 = vpop.f32.mrf.mxu0  ;;  %v2350_v27 = vpop.f32.mrf.mxu3 }
 0x903   :  { %v2370_v9 = vadd.f32 %v2369_v54, %v11460_v0 }
 0x904   :  { %v2390_v52 = vpop.f32.mrf.mxu1 }
 0x905   :  { %v2389_v15 = vadd.f32 %v2388_v46, %v2370_v9  ;;  %v9641_v46 = vld [vmem:[%s12460_s26 + $0x1e4] sm:$0xf]  ;;  %v7872_v9 = vld [vmem:[%s12460_s26 + $0x1f0] sm:$0xf0] }
 0x906   :  { %v7875_v14 = vor.u32 %v9641_v46, %v7872_v9  ;;  %v7710_v46 = vld [vmem:[%s12460_s26 + $0xa0] sm:$0xf] }
 0x907   :  { %v2399_v31 = vadd.f32 %v2389_v15, %v1827_v55  ;;  %v2492_v55 = vld [vmem:[#allocation40 + $0x270] sm:$0xff]  ;;  %v7854_v15 = vld [vmem:[%s12460_s26 + $0x1c0] sm:$0xf] }
 0x908   :  { %v2331_v17 = vpop.f32.mrf.mxu2  ;;  %2699 = vmatpush.msrb.mxu3 %v2492_v55 }
 0x909   :  { %v11467_v40 = vmax.f32 %v2399_v31, 0.0  ;;  %v2332_v43 = vadd.f32 %v2331_v17, %v11463_v19  ;;  %v2420_v31 = vld [vmem:[#allocation40 + $0x30] sm:$0xff]  ;;  %v9611_v17 = vld [vmem:[%s12460_s26 + $0xec] sm:$0xf0] }
 0x90a   :  { %v2371_v21 = vpop.f32.mrf.mxu0  ;;  %2700 = vmatpush.msrb.mxu3 %v2488_v33  ;;  %v2352_v54 = vpop.f32.mrf.mxu3  ;;  %2672 = vmatpush.msrb.mxu2 %v2420_v31  ;;  %v7726_v33 = vld [vmem:[%s12460_s26 + $0xc0] sm:$0xf] }
 0x90b   :  { %v2351_v50 = vadd.f32 %v2350_v27, %v2332_v43  ;;  %v2372_v51 = vadd.f32 %v2371_v21, %v11460_v0  ;;  %2587 = vmatmul.f32.vlgmr.msra.gmra.mxu3 %v11467_v40  ;;  %2645 = vmatmul.f32.vlgmr.msrb.gmra.mxu1 %v11467_v40  ;;  %v7742_v27 = vld [vmem:[%s12460_s26 + $0xe0] sm:$0xf]  ;;  %v7859_v43 = vor.u32 %v9637_v24, %v7856_v20  ;;  %v9625_v24 = vld [vmem:[%s12460_s26 + $0x164] sm:$0xf]  ;;  %v7808_v20 = vld [vmem:[%s12460_s26 + $0x170] sm:$0xf0] }
 0x90c   :  { %2701 = vmatpush.msrb.mxu3 %v2484_v60  ;;  %v7743_v55 = vor.u32 %v9611_v17, %v7742_v27  ;;  %2673 = vmatpush.msrb.mxu2 %v2416_v39  ;;  %v7728_v60 = vld [vmem:[%s12460_s26 + $0xd0] sm:$0xf0]  ;;  %v7727_v26 = vor.u32 %v9607_v56, %v7726_v33  ;;  %v9599_v17 = vld [vmem:[%s12460_s26 + $0x8c] sm:$0xf0] }
 0x90d   :  { %v2398_v57 = vadd.f32 %v2351_v50, %v1826_v34  ;;  %v2391_v18 = vadd.f32 %v2390_v52, %v2372_v51  ;;  %v2485_v34 = vld [vmem:[#allocation40 + $0x238] sm:$0xff]  ;;  %v9633_v51 = vld [vmem:[%s12460_s26 + $0x1a4] sm:$0xf]  ;;  %v7747_v52 = vor.u32 %v9609_v16, %v7744_v44 }
 0x90e   :  { %2759 = vmatpush.msra.mxu1 %v2485_v34  ;;  %v9635_v50 = vld [vmem:[%s12460_s26 + $0x1ac] sm:$0xf0]  ;;  %v7843_v58 = vor.u32 %v9633_v51, %v7840_v53  ;;  %v9597_v16 = vld [vmem:[%s12460_s26 + $0x84] sm:$0xf]  ;;  %v7696_v39 = vld [vmem:[%s12460_s26 + $0x90] sm:$0xf0] }
 0x90f   :  { %v11475_v61 = vmax.f32 %v2398_v57, 0.0  ;;  %v2401_v63 = vadd.f32 %v2391_v18, %v1829_v28  ;;  %v2480_v28 = vld [vmem:[#allocation40 + $0x210] sm:$0xff]  ;;  %v7839_v18 = vor.u32 %v9635_v50, %v7838_v49  ;;  %v9631_v34 = vld [vmem:[%s12460_s26 + $0x18c] sm:$0xf0]  ;;  %v7695_v49 = vor.u32 %v9599_v17, %v7694_v45  ;;  %v7678_v51 = vld [vmem:[%s12460_s26 + $0x60] sm:$0xf] }
 0x910   :  { %v2333_v1 = vpop.f32.mrf.mxu2  ;;  %2702 = vmatpush.msrb.mxu3 %v2480_v28  ;;  %2760 = vmatpush.msra.mxu1 %v2481_v32  ;;  %v7731_v28 = vor.u32 %v9605_v59, %v7728_v60  ;;  %v9623_v44 = vld [vmem:[%s12460_s26 + $0x14c] sm:$0xf0]  ;;  %v7699_v50 = vor.u32 %v9597_v16, %v7696_v39  ;;  %v9617_v59 = vld [vmem:[%s12460_s26 + $0x124] sm:$0xf]  ;;  %v7776_v60 = vld [vmem:[%s12460_s26 + $0x130] sm:$0xf0] }
 0x911   :  { %v11481_v4 = vmax.f32 %v2401_v63, 0.0  ;;  %v2334_v5 = vadd.f32 %v2333_v1, %v11463_v19  ;;  %2558 = vmatmul.f32.vlgmr.msra.gmra.mxu2 %v11475_v61  ;;  %2616 = vmatmul.f32.vlgmr.msra.gmra.mxu0 %v11475_v61  ;;  %v7822_v63 = vld [vmem:[%s12460_s26 + $0x180] sm:$0xf]  ;;  %v9629_v1 = vld [vmem:[%s12460_s26 + $0x184] sm:$0xf] }
 0x912   :  { %3191 = vmatpush.bf16.msra.mxu3 %v7871_v62  ;;  %3229 = vmatpush.bf16.msrb.mxu1 %v7875_v14  ;;  %v2393_v21 = vpop.f32.mrf.mxu1  ;;  %v7823_v62 = vor.u32 %v9631_v34, %v7822_v63  ;;  %v7827_v9 = vor.u32 %v9629_v1, %v7824_v2  ;;  %v7662_v34 = vld [vmem:[%s12460_s26 + $0x40] sm:$0xf]  ;;  %v9591_v2 = vld [vmem:[%s12460_s26 + $0x4c] sm:$0xf0]  ;;  %v9581_v16 = vld [vmem:[%s12460_s26 + $0x4] sm:$0xf] }
 0x913   :  { %v2353_v10 = vadd.f32 %v2352_v54, %v2334_v5  ;;  %2590 = vmatmul.f32.gmra.mxu3 %v11481_v4  ;;  %2648 = vmatmul.f32.gmra.mxu1 %v11481_v4  ;;  %v9603_v54 = vld [vmem:[%s12460_s26 + $0xac] sm:$0xf0]  ;;  %v7663_v42 = vor.u32 %v9591_v2, %v7662_v34  ;;  %v7632_v39 = vld [vmem:[%s12460_s26 + $0x10] sm:$0xf0]  ;;  %v9632_v34 = vld [vmem:[%s12460_s26 + $0x194] sm:$0xf0] }
 0x914   :  { %3172 = vmatpush.bf16.msra.mxu2 %v7743_v55  ;;  %3210 = vmatpush.bf16.msra.mxu0 %v7747_v52  ;;  %v7711_v11 = vor.u32 %v9603_v54, %v7710_v46  ;;  %v7758_v46 = vld [vmem:[%s12460_s26 + $0x100] sm:$0xf]  ;;  %v9615_v54 = vld [vmem:[%s12460_s26 + $0x10c] sm:$0xf0]  ;;  %v7832_v2 = vld [vmem:[%s12460_s26 + $0x198] sm:$0xf0] }
 0x915   :  { %v2400_v30 = vadd.f32 %v2353_v10, %v1828_v8  ;;  %v7855_v8 = vor.u32 %v9639_v22, %v7854_v15  ;;  %v9627_v22 = vld [vmem:[%s12460_s26 + $0x16c] sm:$0xf0] }
 0x916   :  { %3230 = vmatpush.bf16.msrb.mxu1 %v7859_v43  ;;  %v7807_v6 = vor.u32 %v9627_v22, %v7806_v13  ;;  %v7790_v43 = vld [vmem:[%s12460_s26 + $0x140] sm:$0xf]  ;;  %v7759_v13 = vor.u32 %v9615_v54, %v7758_v46  ;;  %v9644_v22 = vld [vmem:[%s12460_s26 + $0x1f4] sm:$0xf0]  ;;  %v9583_v17 = vld [vmem:[%s12460_s26 + $0xc] sm:$0xf0] }
 0x917   :  { %v11499_v38 = vmax.f32 %v2400_v30, 0.0  ;;  %3192 = vmatpush.bf16.msra.mxu3 %v7855_v8  ;;  %v7811_v8 = vor.u32 %v9625_v24, %v7808_v20  ;;  %v7791_v56 = vor.u32 %v9623_v44, %v7790_v43  ;;  %v9642_v24 = vld [vmem:[%s12460_s26 + $0x1ec] sm:$0xf]  ;;  %v7864_v44 = vld [vmem:[%s12460_s26 + $0x1d8] sm:$0xf0] }
 0x918   :  { %v2374_v41 = vpop.f32.mrf.mxu0  ;;  %v2355_v5 = vpop.f32.mrf.mxu3  ;;  %3173 = vmatpush.bf16.msra.mxu2 %v7727_v26  ;;  %3211 = vmatpush.bf16.msra.mxu0 %v7731_v28  ;;  %v7779_v28 = vor.u32 %v9617_v59, %v7776_v60  ;;  %v9638_v43 = vld [vmem:[%s12460_s26 + $0x1cc] sm:$0xf]  ;;  %v7736_v59 = vld [vmem:[%s12460_s26 + $0xd8] sm:$0xf0] }
 0x919   :  { %v2375_v12 = vadd.f32 %v2374_v41, %v11460_v0  ;;  %2561 = vmatmul.f32.gmra.mxu2 %v11499_v38  ;;  %2619 = vmatmul.f32.gmra.mxu0 %v11499_v38  ;;  %v7792_v41 = vld [vmem:[%s12460_s26 + $0x150] sm:$0xf0]  ;;  %v9602_v46 = vld [vmem:[%s12460_s26 + $0xac] sm:$0xf]  ;;  %v7720_v54 = vld [vmem:[%s12460_s26 + $0xb8] sm:$0xf0] }
 0x91a   :  { %3231 = vmatpush.bf16.msrb.mxu1 %v7843_v58  ;;  %v2395_v30 = vpop.f32.mrf.mxu1 }
 0x91b   :  { %v2394_v57 = vadd.f32 %v2393_v21, %v2375_v12  ;;  %3193 = vmatpush.bf16.msra.mxu3 %v7839_v18  ;;  %v9595_v12 = vld [vmem:[%s12460_s26 + $0x6c] sm:$0xf0]  ;;  %v7774_v18 = vld [vmem:[%s12460_s26 + $0x120] sm:$0xf] }
 0x91c   :  { %3174 = vmatpush.bf16.msra.mxu2 %v7711_v11  ;;  %v7679_v63 = vor.u32 %v9595_v12, %v7678_v51  ;;  %v7648_v11 = vld [vmem:[%s12460_s26 + $0x30] sm:$0xf0]  ;;  %v7867_v51 = vor.u32 %v9638_v43, %v7864_v44  ;;  %v7752_v12 = vld [vmem:[%s12460_s26 + $0xf8] sm:$0xf0] }
 0x91d   :  { %v2403_v3 = vadd.f32 %v2394_v57, %v1831_v35  ;;  %v7712_v35 = vld [vmem:[%s12460_s26 + $0xb0] sm:$0xf0] }
 0x91e   :  { %v2336_v48 = vpop.f32.mrf.mxu2  ;;  %v7715_v31 = vor.u32 %v9601_v23, %v7712_v35  ;;  %3232 = vmatpush.bf16.msrb.mxu1 %v7827_v9  ;;  %v7760_v9 = vld [vmem:[%s12460_s26 + $0x110] sm:$0xf0]  ;;  %v7646_v23 = vld [vmem:[%s12460_s26 + $0x20] sm:$0xf]  ;;  %v9587_v35 = vld [vmem:[%s12460_s26 + $0x2c] sm:$0xf0] }
 0x91f   :  { %v11521_v7 = vmax.f32 %v2403_v3, 0.0  ;;  %v2337_v32 = vadd.f32 %v2336_v48, %v11463_v19  ;;  %3194 = vmatpush.bf16.msra.mxu3 %v7823_v62  ;;  %v9589_v3 = vld [vmem:[%s12460_s26 + $0x44] sm:$0xf] }
 0x920   :  { %v2376_v10 = vpop.f32.mrf.mxu0  ;;  %3212 = vmatpush.bf16.msra.mxu0 %v7715_v31  ;;  %v2357_v33 = vpop.f32.mrf.mxu3  ;;  %3175 = vmatpush.bf16.msra.mxu2 %v7695_v49  ;;  %v9613_v62 = vld [vmem:[%s12460_s26 + $0x104] sm:$0xf]  ;;  %v7647_v31 = vor.u32 %v9587_v35, %v7646_v23  ;;  %v9610_v49 = vld [vmem:[%s12460_s26 + $0xec] sm:$0xf]  ;;  %v7816_v35 = vld [vmem:[%s12460_s26 + $0x178] sm:$0xf0] }
 0x921   :  { %v2356_v14 = vadd.f32 %v2355_v5, %v2337_v32  ;;  %v2377_v15 = vadd.f32 %v2376_v10, %v11460_v0  ;;  %2593 = vmatmul.f32.gmra.mxu3 %v11521_v7  ;;  %2651 = vmatmul.f32.gmra.mxu1 %v11521_v7  ;;  %v7664_v5 = vld [vmem:[%s12460_s26 + $0x50] sm:$0xf0]  ;;  %v9585_v10 = vld [vmem:[%s12460_s26 + $0x24] sm:$0xf]  ;;  %v9626_v23 = vld [vmem:[%s12460_s26 + $0x16c] sm:$0xf] }
 0x922   :  { %3233 = vmatpush.bf16.msrb.mxu1 %v7811_v8  ;;  %v7651_v45 = vor.u32 %v9585_v10, %v7648_v11  ;;  %v9640_v8 = vld [vmem:[%s12460_s26 + $0x1d4] sm:$0xf0]  ;;  %v7723_v11 = vor.u32 %v9602_v46, %v7720_v54  ;;  %v9582_v54 = vld [vmem:[%s12460_s26 + $0xc] sm:$0xf] }
 0x923   :  { %v2402_v27 = vadd.f32 %v2356_v14, %v1830_v29  ;;  %v2396_v0 = vadd.f32 %v2395_v30, %v2377_v15  ;;  %v9621_v29 = vld [vmem:[%s12460_s26 + $0x144] sm:$0xf]  ;;  %3195 = vmatpush.bf16.msra.mxu3 %v7807_v6  ;;  %v7763_v14 = vor.u32 %v9613_v62, %v7760_v9  ;;  %v7878_v15 = vld [vmem:[%s12460_s26 + $0x1e8] sm:$0xf]  ;;  %v7880_v30 = vld [vmem:[%s12460_s26 + $0x1f8] sm:$0xf0] }
 0x924   :  { %v7795_v57 = vor.u32 %v9621_v29, %v7792_v41  ;;  %3213 = vmatpush.bf16.msra.mxu0 %v7699_v50  ;;  %3176 = vmatpush.bf16.msra.mxu2 %v7679_v63  ;;  %v7879_v20 = vor.u32 %v9644_v22, %v7878_v15  ;;  %v7862_v6 = vld [vmem:[%s12460_s26 + $0x1c8] sm:$0xf]  ;;  %v7635_v29 = vor.u32 %v9581_v16, %v7632_v39  ;;  %v9598_v15 = vld [vmem:[%s12460_s26 + $0x8c] sm:$0xf]  ;;  %v7704_v22 = vld [vmem:[%s12460_s26 + $0x98] sm:$0xf0] }
 0x925   :  { %v11541_v21 = vmax.f32 %v2402_v27, 0.0  ;;  %v2405_v36 = vadd.f32 %v2396_v0, %v1833_v47  ;;  %v7680_v47 = vld [vmem:[%s12460_s26 + $0x70] sm:$0xf0]  ;;  %v7883_v27 = vor.u32 %v9642_v24, %v7880_v30  ;;  %v7630_v0 = vld [vmem:[%s12460_s26] sm:$0xf]  ;;  %v7863_v50 = vor.u32 %v9640_v8, %v7862_v6 }
 0x926   :  { %v2338_v55 = vpop.f32.mrf.mxu2  ;;  %v7683_v26 = vor.u32 %v9593_v25, %v7680_v47  ;;  %3234 = vmatpush.bf16.msrb.mxu1 %v7795_v57  ;;  %v7750_v41 = vld [vmem:[%s12460_s26 + $0xe8] sm:$0xf]  ;;  %v7755_v25 = vor.u32 %v9610_v49, %v7752_v12  ;;  %v7848_v57 = vld [vmem:[%s12460_s26 + $0x1b8] sm:$0xf0]  ;;  %v9596_v39 = vld [vmem:[%s12460_s26 + $0x74] sm:$0xf0] }
 0x927   :  { %v11549_v52 = vmax.f32 %v2405_v36, 0.0  ;;  %v2339_v53 = vadd.f32 %v2338_v55, %v11463_v19  ;;  %2564 = vmatmul.f32.gmra.mxu2 %v11541_v21  ;;  %2622 = vmatmul.f32.gmra.mxu0 %v11541_v21  ;;  %v9619_v19 = vld [vmem:[%s12460_s26 + $0x12c] sm:$0xf0]  ;;  %v7631_v36 = vor.u32 %v9583_v17, %v7630_v0  ;;  %v9612_v55 = vld [vmem:[%s12460_s26 + $0xf4] sm:$0xf0]  ;;  %v7707_v17 = vor.u32 %v9598_v15, %v7704_v22 }
 0x928   :  { %3196 = vmatpush.bf16.msra.mxu3 %v7791_v56  ;;  %v7775_v48 = vor.u32 %v9619_v19, %v7774_v18  ;;  %3214 = vmatpush.bf16.msra.mxu0 %v7683_v26  ;;  %v7846_v47 = vld [vmem:[%s12460_s26 + $0x1a8] sm:$0xf]  ;;  %v9634_v56 = vld [vmem:[%s12460_s26 + $0x1ac] sm:$0xf]  ;;  %v7688_v8 = vld [vmem:[%s12460_s26 + $0x78] sm:$0xf0] }
 0x929   :  { %v2358_v58 = vadd.f32 %v2357_v33, %v2339_v53  ;;  %2596 = vmatmul.f32.gmra.mxu3 %v11549_v52  ;;  %2654 = vmatmul.f32.gmra.mxu1 %v11549_v52  ;;  %v7751_v53 = vor.u32 %v9612_v55, %v7750_v41  ;;  %v9636_v33 = vld [vmem:[%s12460_s26 + $0x1b4] sm:$0xf0]  ;;  %v7734_v18 = vld [vmem:[%s12460_s26 + $0xc8] sm:$0xf]  ;;  %v9606_v19 = vld [vmem:[%s12460_s26 + $0xcc] sm:$0xf]  ;;  %v7851_v63 = vor.u32 %v9634_v56, %v7848_v57 }
 0x92a   :  { %3235 = vmatpush.bf16.msrb.mxu1 %v7779_v28  ;;  %3177 = vmatpush.bf16.msra.mxu2 %v7663_v42  ;;  %v7847_v60 = vor.u32 %v9636_v33, %v7846_v47  ;;  %v7830_v26 = vld [vmem:[%s12460_s26 + $0x188] sm:$0xf]  ;;  %v9604_v28 = vld [vmem:[%s12460_s26 + $0xb4] sm:$0xf0]  ;;  %v9594_v6 = vld [vmem:[%s12460_s26 + $0x6c] sm:$0xf] }
 0x92b   :  { %v2404_v1 = vadd.f32 %v2358_v58, %v1832_v37  ;;  %v7667_v37 = vor.u32 %v9589_v3, %v7664_v5  ;;  %v9608_v58 = vld [vmem:[%s12460_s26 + $0xd4] sm:$0xf0]  ;;  %v7739_v5 = vor.u32 %v9606_v19, %v7736_v59  ;;  %v7831_v62 = vor.u32 %v9632_v34, %v7830_v26  ;;  %v7814_v42 = vld [vmem:[%s12460_s26 + $0x168] sm:$0xf]  ;;  %v9618_v41 = vld [vmem:[%s12460_s26 + $0x12c] sm:$0xf] }
 0x92c   :  { %3197 = vmatpush.bf16.msra.mxu3 %v7775_v48  ;;  %v7735_v3 = vor.u32 %v9608_v58, %v7734_v18  ;;  %v7718_v48 = vld [vmem:[%s12460_s26 + $0xa8] sm:$0xf]  ;;  %v7784_v55 = vld [vmem:[%s12460_s26 + $0x138] sm:$0xf0]  ;;  %v9592_v12 = vld [vmem:[%s12460_s26 + $0x54] sm:$0xf0] }
 0x92d   :  { %v11570_v32 = vmax.f32 %v2404_v1, 0.0  ;;  %3215 = vmatpush.bf16.msra.mxu0 %v7667_v37  ;;  %v9630_v1 = vld [vmem:[%s12460_s26 + $0x18c] sm:$0xf]  ;;  %v9628_v37 = vld [vmem:[%s12460_s26 + $0x174] sm:$0xf0]  ;;  %v7719_v10 = vor.u32 %v9604_v28, %v7718_v48  ;;  %v7787_v33 = vor.u32 %v9618_v41, %v7784_v55 }
 0x92e   :  { %3236 = vmatpush.bf16.msrb.mxu1 %v7763_v14  ;;  %3178 = vmatpush.bf16.msra.mxu2 %v7647_v31  ;;  %v7835_v9 = vor.u32 %v9630_v1, %v7832_v2  ;;  %v9600_v14 = vld [vmem:[%s12460_s26 + $0x94] sm:$0xf0]  ;;  %v7815_v24 = vor.u32 %v9628_v37, %v7814_v42  ;;  %v7798_v30 = vld [vmem:[%s12460_s26 + $0x148] sm:$0xf]  ;;  %v9614_v18 = vld [vmem:[%s12460_s26 + $0x10c] sm:$0xf]  ;;  %v2777_v42 = vpack.c.bf16 %v11549_v52, %v11521_v7 }
 0x92f   :  { %2567 = vmatmul.f32.gmra.mxu2 %v11570_v32  ;;  %2625 = vmatmul.f32.gmra.mxu0 %v11570_v32  ;;  %v9624_v31 = vld [vmem:[%s12460_s26 + $0x154] sm:$0xf0]  ;;  %v7686_v16 = vld [vmem:[%s12460_s26 + $0x68] sm:$0xf]  ;;  %v7768_v58 = vld [vmem:[%s12460_s26 + $0x118] sm:$0xf0]  ;;  %v2776_v37 = vpack.c.bf16 %v11570_v32, %v11541_v21 }
 0x930   :  { %3198 = vmatpush.bf16.msra.mxu3 %v7759_v13  ;;  %v7702_v13 = vld [vmem:[%s12460_s26 + $0x88] sm:$0xf]  ;;  %v7799_v43 = vor.u32 %v9624_v31, %v7798_v30  ;;  %v7687_v49 = vor.u32 %v9596_v39, %v7686_v16  ;;  %v9616_v57 = vld [vmem:[%s12460_s26 + $0x114] sm:$0xf0]  ;;  %v9586_v34 = vld [vmem:[%s12460_s26 + $0x2c] sm:$0xf] }
 0x931   :  { %2703 = vmatmul.f32.vlgmr.msrb.gmra.mxu3 %v11467_v40  ;;  %2761 = vmatmul.f32.vlgmr.msra.gmra.mxu1 %v11467_v40  ;;  %v7703_v0 = vor.u32 %v9600_v14, %v7702_v13  ;;  %v7766_v56 = vld [vmem:[%s12460_s26 + $0x108] sm:$0xf]  ;;  %v9588_v26 = vld [vmem:[%s12460_s26 + $0x34] sm:$0xf0]  ;;  %v7656_v1 = vld [vmem:[%s12460_s26 + $0x38] sm:$0xf0] }
 0x932   :  { %3305 = vmatpush.bf16.msra.mxu1 %v7883_v27  ;;  %3216 = vmatpush.bf16.msra.mxu0 %v7651_v45  ;;  %v9622_v45 = vld [vmem:[%s12460_s26 + $0x14c] sm:$0xf]  ;;  %v7800_v27 = vld [vmem:[%s12460_s26 + $0x158] sm:$0xf0]  ;;  %v7767_v2 = vor.u32 %v9616_v57, %v7766_v56  ;;  %v7659_v48 = vor.u32 %v9586_v34, %v7656_v1  ;;  %v7638_v28 = vld [vmem:[%s12460_s26 + $0x8] sm:$0xf] }
 0x933   :  { %3179 = vmatpush.bf16.msra.mxu2 %v7631_v36  ;;  %v7803_v44 = vor.u32 %v9622_v45, %v7800_v27  ;;  %v7782_v36 = vld [vmem:[%s12460_s26 + $0x128] sm:$0xf]  ;;  %v9584_v46 = vld [vmem:[%s12460_s26 + $0x14] sm:$0xf0] }
 0x934   :  { %3267 = vmatpush.bf16.msrb.mxu3 %v7879_v20  ;;  %v7819_v20 = vor.u32 %v9626_v23, %v7816_v35  ;;  %v8126_v22 = vld [vmem:[#allocation38 + $0x1e0] sm:$0xf]  ;;  %v9703_v27 = vld [vmem:[#allocation38 + $0x1cc] sm:$0xf0] }
 0x935   :  { %v8110_v45 = vld [vmem:[#allocation38 + $0x1c0] sm:$0xf]  ;;  %v9675_v39 = vld [vmem:[#allocation38 + $0xec] sm:$0xf0] }
 0x936   :  { %3217 = vmatpush.bf16.msra.mxu0 %v7635_v29  ;;  %3306 = vmatpush.bf16.msra.mxu1 %v7867_v51  ;;  %v9620_v29 = vld [vmem:[%s12460_s26 + $0x134] sm:$0xf0]  ;;  %v7670_v51 = vld [vmem:[%s12460_s26 + $0x48] sm:$0xf] }
 0x937   :  { %2674 = vmatmul.f32.vlgmr.msrb.gmra.mxu2 %v11475_v61  ;;  %2732 = vmatmul.f32.vlgmr.msrb.gmra.mxu0 %v11475_v61  ;;  %v7783_v47 = vor.u32 %v9620_v29, %v7782_v36  ;;  %v7671_v19 = vor.u32 %v9592_v12, %v7670_v51  ;;  %v7998_v16 = vld [vmem:[#allocation38 + $0xe0] sm:$0xf]  ;;  %v9699_v29 = vld [vmem:[#allocation38 + $0x1ac] sm:$0xf0] }
 0x938   :  { %3268 = vmatpush.bf16.msrb.mxu3 %v7863_v50  ;;  %3248 = vmatpush.bf16.msrb.mxu2 %v7751_v53  ;;  %v7691_v50 = vor.u32 %v9594_v6, %v7688_v8  ;;  %v9590_v53 = vld [vmem:[%s12460_s26 + $0x4c] sm:$0xf]  ;;  %v7999_v8 = vor.u32 %v9675_v39, %v7998_v16  ;;  %v8094_v36 = vld [vmem:[#allocation38 + $0x1a0] sm:$0xf]  ;;  %v9667_v56 = vld [vmem:[#allocation38 + $0xac] sm:$0xf0] }
 0x939   :  { %2706 = vmatmul.f32.gmra.mxu3 %v11481_v4  ;;  %2764 = vmatmul.f32.gmra.mxu1 %v11481_v4  ;;  %v8095_v41 = vor.u32 %v9699_v29, %v8094_v36  ;;  %v8078_v12 = vld [vmem:[#allocation38 + $0x180] sm:$0xf]  ;;  %v9663_v1 = vld [vmem:[#allocation38 + $0x8c] sm:$0xf0] }
 0x93a   :  { %3286 = vmatpush.bf16.msrb.mxu0 %v7755_v25  ;;  %3307 = vmatpush.bf16.msra.mxu1 %v7851_v63  ;;  %v7672_v25 = vld [vmem:[%s12460_s26 + $0x58] sm:$0xf0]  ;;  %v2775_v63 = vpack.c.bf16 %v11481_v4, %v11467_v40  ;;  %v2774_v40 = vpack.c.bf16 %v11499_v38, %v11475_v61  ;;  %v7639_v4 = vor.u32 %v9584_v46, %v7638_v28  ;;  %v7950_v34 = vld [vmem:[#allocation38 + $0x80] sm:$0xf]  ;;  %v9771_v39 = vld [vmem:[#allocation38 + $0x3ec] sm:$0xf0] }
 0x93b   :  { %v7675_v59 = vor.u32 %v9590_v53, %v7672_v25  ;;  %v9695_v53 = vld [vmem:[#allocation38 + $0x18c] sm:$0xf0]  ;;  %v7934_v46 = vld [vmem:[#allocation38 + $0x60] sm:$0xf] }
 0x93c   :  { %3269 = vmatpush.bf16.msrb.mxu3 %v7847_v60  ;;  %3249 = vmatpush.bf16.msrb.mxu2 %v7735_v3  ;;  %v7654_v60 = vld [vmem:[%s12460_s26 + $0x28] sm:$0xf]  ;;  %v7771_v3 = vor.u32 %v9614_v18, %v7768_v58  ;;  %v8079_v25 = vor.u32 %v9695_v53, %v8078_v12  ;;  %v8382_v16 = vld [vmem:[#allocation38 + $0x3e0] sm:$0xf] }
 0x93d   :  { %v8383_v29 = vor.u32 %v9771_v39, %v8382_v16  ;;  %v8366_v53 = vld [vmem:[#allocation38 + $0x3c0] sm:$0xf] }
 0x93e   :  { %3287 = vmatpush.bf16.msrb.mxu0 %v7739_v5  ;;  %3308 = vmatpush.bf16.msra.mxu1 %v7835_v9  ;;  %v7655_v5 = vor.u32 %v9588_v26, %v7654_v60 }
 0x93f   :  { %2677 = vmatmul.f32.gmra.mxu2 %v11499_v38  ;;  %2735 = vmatmul.f32.gmra.mxu0 %v11499_v38 }
 0x940   :  { %3270 = vmatpush.bf16.msrb.mxu3 %v7831_v62  ;;  %3250 = vmatpush.bf16.msrb.mxu2 %v7719_v10  ;;  %v7640_v62 = vld [vmem:[%s12460_s26 + $0x18] sm:$0xf0] }
 0x941   :  { %2709 = vmatmul.f32.gmra.mxu3 %v11521_v7  ;;  %2767 = vmatmul.f32.gmra.mxu1 %v11521_v7  ;;  %v7643_v9 = vor.u32 %v9582_v54, %v7640_v62  ;;  %v9659_v54 = vld [vmem:[#allocation38 + $0x6c] sm:$0xf0] }
 0x942   :  { %3288 = vmatpush.bf16.msrb.mxu0 %v7723_v11  ;;  %3309 = vmatpush.bf16.msra.mxu1 %v7819_v20 }
 0x944   :  { %3271 = vmatpush.bf16.msrb.mxu3 %v7815_v24  ;;  %3251 = vmatpush.bf16.msrb.mxu2 %v7703_v0  ;;  %v9707_v24 = vld [vmem:[#allocation38 + $0x1ec] sm:$0xf0]  ;;  %v8111_v0 = vor.u32 %v9703_v27, %v8110_v45 }
 0x945   :  { %v8127_v30 = vor.u32 %v9707_v24, %v8126_v22  ;;  %v9651_v45 = vld [vmem:[#allocation38 + $0x2c] sm:$0xf0] }
 0x946   :  { %3289 = vmatpush.bf16.msrb.mxu0 %v7707_v17  ;;  %3310 = vmatpush.bf16.msra.mxu1 %v7803_v44 }
 0x947   :  { %2680 = vmatmul.f32.gmra.mxu2 %v11541_v21  ;;  %2738 = vmatmul.f32.gmra.mxu0 %v11541_v21 }
 0x948   :  { %3272 = vmatpush.bf16.msrb.mxu3 %v7799_v43  ;;  %3252 = vmatpush.bf16.msrb.mxu2 %v7687_v49  ;;  %v7982_v49 = vld [vmem:[#allocation38 + $0xc0] sm:$0xf] }
 0x949   :  { %2712 = vmatmul.f32.gmra.mxu3 %v11549_v52  ;;  %2770 = vmatmul.f32.gmra.mxu1 %v11549_v52 }
 0x94a   :  { %3290 = vmatpush.bf16.msrb.mxu0 %v7691_v50  ;;  %3311 = vmatpush.bf16.msra.mxu1 %v7787_v33  ;;  %v9671_v50 = vld [vmem:[#allocation38 + $0xcc] sm:$0xf0]  ;;  %v7966_v33 = vld [vmem:[#allocation38 + $0xa0] sm:$0xf] }
 0x94b   :  { %v7983_v51 = vor.u32 %v9671_v50, %v7982_v49  ;;  %v7967_v57 = vor.u32 %v9667_v56, %v7966_v33  ;;  %v7886_v50 = vld [vmem:[#allocation38] sm:$0xf]  ;;  %v9701_v33 = vld [vmem:[#allocation38 + $0x1c4] sm:$0xf] }
 0x94c   :  { %3273 = vmatpush.bf16.msrb.mxu3 %v7783_v47  ;;  %3253 = vmatpush.bf16.msrb.mxu2 %v7671_v19  ;;  %v8062_v19 = vld [vmem:[#allocation38 + $0x160] sm:$0xf] }
 0x94e   :  { %3291 = vmatpush.bf16.msrb.mxu0 %v7675_v59  ;;  %3312 = vmatpush.bf16.msra.mxu1 %v7771_v3  ;;  %v9691_v59 = vld [vmem:[#allocation38 + $0x16c] sm:$0xf0]  ;;  %v8046_v3 = vld [vmem:[#allocation38 + $0x140] sm:$0xf] }
 0x94f   :  { %2683 = vmatmul.f32.gmra.mxu2 %v11570_v32  ;;  %2741 = vmatmul.f32.gmra.mxu0 %v11570_v32 }
 0x950   :  { %3274 = vmatpush.bf16.msrb.mxu3 %v7767_v2  ;;  %3254 = vmatpush.bf16.msrb.mxu2 %v7655_v5  ;;  %v7951_v2 = vor.u32 %v9663_v1, %v7950_v34  ;;  %v9687_v5 = vld [vmem:[#allocation38 + $0x14c] sm:$0xf0] }
 0x951   :  { %3199 = vmatmul.bf16.vlgmr.msra.gmra.mxu3 %v2775_v63  ;;  %3237 = vmatmul.bf16.vlgmr.msrb.gmra.mxu1 %v2775_v63 }
 0x952   :  { %3292 = vmatpush.bf16.msrb.mxu0 %v7659_v48  ;;  %v8047_v48 = vor.u32 %v9687_v5, %v8046_v3  ;;  %4183 = vmatpush.bf16.msrb.mxu1 %v8383_v29  ;;  %v9731_v29 = vld [vmem:[#allocation38 + $0x2ac] sm:$0xf0] }
 0x954   :  { %3255 = vmatpush.bf16.msrb.mxu2 %v7639_v4  ;;  %4145 = vmatpush.bf16.msra.mxu3 %v8127_v30  ;;  %v7902_v30 = vld [vmem:[#allocation38 + $0x20] sm:$0xf] }
 0x955   :  { %v7903_v27 = vor.u32 %v9651_v45, %v7902_v30  ;;  %v9759_v30 = vld [vmem:[#allocation38 + $0x38c] sm:$0xf0]  ;;  %v9693_v45 = vld [vmem:[#allocation38 + $0x184] sm:$0xf] }
 0x956   :  { %3293 = vmatpush.bf16.msrb.mxu0 %v7643_v9 }
 0x957   :  { %3180 = vmatmul.bf16.vlgmr.msra.gmra.mxu2 %v2774_v40  ;;  %3218 = vmatmul.bf16.vlgmr.msra.gmra.mxu0 %v2774_v40 }
 0x958   :  { %4146 = vmatpush.bf16.msra.mxu3 %v8111_v0  ;;  %4126 = vmatpush.bf16.msra.mxu2 %v7999_v8  ;;  %v9705_v8 = vld [vmem:[#allocation38 + $0x1e4] sm:$0xf] }
 0x95c   :  { %4147 = vmatpush.bf16.msra.mxu3 %v8095_v41  ;;  %4127 = vmatpush.bf16.msra.mxu2 %v7983_v51  ;;  %v8128_v41 = vld [vmem:[#allocation38 + $0x1f0] sm:$0xf0]  ;;  %v9647_v51 = vld [vmem:[#allocation38 + $0xc] sm:$0xf0] }
 0x95d   :  { %v8131_v49 = vor.u32 %v9705_v8, %v8128_v41  ;;  %v7887_v12 = vor.u32 %v9647_v51, %v7886_v50  ;;  %v8222_v8 = vld [vmem:[#allocation38 + $0x2a0] sm:$0xf]  ;;  %v9665_v41 = vld [vmem:[#allocation38 + $0xa4] sm:$0xf]  ;;  %v7968_v50 = vld [vmem:[#allocation38 + $0xb0] sm:$0xf0] }
 0x960   :  { %4148 = vmatpush.bf16.msra.mxu3 %v8079_v25  ;;  %4128 = vmatpush.bf16.msra.mxu2 %v7967_v57  ;;  %v9767_v25 = vld [vmem:[#allocation38 + $0x3cc] sm:$0xf0]  ;;  %v8112_v57 = vld [vmem:[#allocation38 + $0x1d0] sm:$0xf0] }
 0x961   :  { %3204 = vmatmul.bf16.gmra.mxu3 %v2777_v42  ;;  %3242 = vmatmul.bf16.gmra.mxu1 %v2777_v42  ;;  %v8367_v56 = vor.u32 %v9767_v25, %v8366_v53  ;;  %v7971_v53 = vor.u32 %v9665_v41, %v7968_v50  ;;  %v8318_v25 = vld [vmem:[#allocation38 + $0x360] sm:$0xf]  ;;  %v9747_v41 = vld [vmem:[#allocation38 + $0x32c] sm:$0xf0] }
 0x963   :  { %4184 = vmatpush.bf16.msrb.mxu1 %v8367_v56 }
 0x964   :  { %4129 = vmatpush.bf16.msra.mxu2 %v7951_v2  ;;  %v8000_v2 = vld [vmem:[#allocation38 + $0xf0] sm:$0xf0] }
 0x967   :  { %3185 = vmatmul.bf16.gmra.mxu2 %v2776_v37  ;;  %3223 = vmatmul.bf16.gmra.mxu0 %v2776_v37 }
 0x971   :  { %3275 = vmatmul.bf16.vlgmr.msrb.gmra.mxu3 %v2775_v63  ;;  %3313 = vmatmul.bf16.vlgmr.msra.gmra.mxu1 %v2775_v63  ;;  %v8063_v63 = vor.u32 %v9691_v59, %v8062_v19  ;;  %v8254_v19 = vld [vmem:[#allocation38 + $0x2e0] sm:$0xf]  ;;  %v9739_v59 = vld [vmem:[#allocation38 + $0x2ec] sm:$0xf0] }
 0x972   :  { %v8255_v1 = vor.u32 %v9739_v59, %v8254_v19 }
 0x973   :  { %4149 = vmatpush.bf16.msra.mxu3 %v8063_v63  ;;  %v9673_v63 = vld [vmem:[#allocation38 + $0xe4] sm:$0xf] }
 0x974   :  { %4164 = vmatpush.bf16.msra.mxu0 %v8255_v1  ;;  %v9727_v1 = vld [vmem:[#allocation38 + $0x28c] sm:$0xf0] }
 0x977   :  { %3256 = vmatmul.bf16.vlgmr.msrb.gmra.mxu2 %v2774_v40  ;;  %3294 = vmatmul.bf16.vlgmr.msrb.gmra.mxu0 %v2774_v40  ;;  %v7935_v40 = vor.u32 %v9659_v54, %v7934_v46  ;;  %v9763_v46 = vld [vmem:[#allocation38 + $0x3ac] sm:$0xf0]  ;;  %v9697_v54 = vld [vmem:[#allocation38 + $0x1a4] sm:$0xf] }
 0x978   :  { %4150 = vmatpush.bf16.msra.mxu3 %v8047_v48  ;;  %v8003_v48 = vor.u32 %v9673_v63, %v8000_v2  ;;  %v8206_v63 = vld [vmem:[#allocation38 + $0x280] sm:$0xf]  ;;  %v9661_v2 = vld [vmem:[#allocation38 + $0x84] sm:$0xf] }
 0x979   :  { %4130 = vmatpush.bf16.msra.mxu2 %v7935_v40 }
 0x981   :  { %3280 = vmatmul.bf16.gmra.mxu3 %v2777_v42  ;;  %3318 = vmatmul.bf16.gmra.mxu1 %v2777_v42  ;;  %v8030_v42 = vld [vmem:[#allocation38 + $0x120] sm:$0xf] }
 0x987   :  { %3261 = vmatmul.bf16.gmra.mxu2 %v2776_v37  ;;  %3299 = vmatmul.bf16.gmra.mxu0 %v2776_v37  ;;  %v9683_v37 = vld [vmem:[#allocation38 + $0x12c] sm:$0xf0] }
 0x988   :  { %v2646_v61 = vpop.f32.mrf.mxu1 }
 0x98e   :  { %v2617_v38 = vpop.f32.mrf.mxu0  ;;  %v2588_v7 = vpop.f32.mrf.mxu3 }
 0x98f   :  { %v11672_v23 = vadd.f32 %v2646_v61, %v2617_v38  ;;  %v8031_v61 = vor.u32 %v9683_v37, %v8030_v42  ;;  %v8096_v42 = vld [vmem:[#allocation38 + $0x1b0] sm:$0xf0] }
 0x990   :  { %v11676_v10 = vpop.f32.mrf.mxu1 }
 0x991   :  { %4151 = vmatpush.bf16.msra.mxu3 %v8031_v61  ;;  %v8099_v61 = vor.u32 %v9697_v54, %v8096_v42  ;;  %v8302_v54 = vld [vmem:[#allocation38 + $0x340] sm:$0xf]  ;;  %v9685_v42 = vld [vmem:[#allocation38 + $0x144] sm:$0xf] }
 0x994   :  { %v2559_v52 = vpop.f32.mrf.mxu2 }
 0x995   :  { %v11674_v35 = vadd.f32 %v2588_v7, %v2559_v52  ;;  %v7918_v7 = vld [vmem:[#allocation38 + $0x40] sm:$0xf]  ;;  %v9655_v52 = vld [vmem:[#allocation38 + $0x4c] sm:$0xf0] }
 0x996   :  { %v11678_v21 = vpop.f32.mrf.mxu3  ;;  %v11680_v32 = vpop.f32.mrf.mxu0 }
 0x99c   :  { %v11682_v13 = vpop.f32.mrf.mxu2 }
 0x99e   :  { %v2652_v11 = vpop.f32.mrf.mxu1 }
 0x9a4   :  { %v2594_v14 = vpop.f32.mrf.mxu3  ;;  %v2623_v15 = vpop.f32.mrf.mxu0 }
 0x9a5   :  { %v11684_v20 = vadd.f32 %v2652_v11, %v2623_v15  ;;  %v7919_v11 = vor.u32 %v9655_v52, %v7918_v7  ;;  %v9679_v15 = vld [vmem:[#allocation38 + $0x10c] sm:$0xf0]  ;;  %v9669_v52 = vld [vmem:[#allocation38 + $0xc4] sm:$0xf] }
 0x9a6   :  { %v11686_v31 = vpop.f32.mrf.mxu1  ;;  %v9735_v7 = vld [vmem:[#allocation38 + $0x2cc] sm:$0xf0] }
 0x9a7   :  { %4131 = vmatpush.bf16.msra.mxu2 %v7919_v11 }
 0x9aa   :  { %v2565_v17 = vpop.f32.mrf.mxu2 }
 0x9ab   :  { %v11688_v6 = vadd.f32 %v2594_v14, %v2565_v17  ;;  %v8014_v14 = vld [vmem:[#allocation38 + $0x100] sm:$0xf]  ;;  %4132 = vmatpush.bf16.msra.mxu2 %v7903_v27  ;;  %v11721_v27 = vld [vmem:[%s12461_s27] sm:$0xf] }
 0x9ac   :  { %v11690_v43 = vpop.f32.mrf.mxu3  ;;  %v11692_v44 = vpop.f32.mrf.mxu0  ;;  %v8015_v22 = vor.u32 %v9679_v15, %v8014_v14  ;;  %v7984_v14 = vld [vmem:[#allocation38 + $0xd0] sm:$0xf0]  ;;  %v11728_v56 = vperm.slane %v11721_v27, 1 }
 0x9ad   :  { %v7987_v15 = vor.u32 %v9669_v52, %v7984_v14  ;;  %v8190_v14 = vld [vmem:[#allocation38 + $0x260] sm:$0xf] }
 0x9ae   :  { %v2762_v55 = vpop.f32.mrf.mxu1  ;;  %4152 = vmatpush.bf16.msra.mxu3 %v8015_v22  ;;  %v8334_v22 = vld [vmem:[#allocation38 + $0x380] sm:$0xf] }
 0x9af   :  { %4133 = vmatpush.bf16.msra.mxu2 %v7887_v12 }
 0x9b2   :  { %v11694_v47 = vpop.f32.mrf.mxu2  ;;  %4221 = vmatpush.bf16.msrb.mxu3 %v8131_v49  ;;  %v8223_v49 = vor.u32 %v9731_v29, %v8222_v8  ;;  %v8286_v29 = vld [vmem:[#allocation38 + $0x320] sm:$0xf] }
 0x9b3   :  { %4202 = vmatpush.bf16.msrb.mxu2 %v8003_v48  ;;  %v8207_v48 = vor.u32 %v9727_v1, %v8206_v63 }
 0x9b4   :  { %v2704_v18 = vpop.f32.mrf.mxu3  ;;  %v2733_v58 = vpop.f32.mrf.mxu0 }
 0x9b5   :  { %v11696_v60 = vadd.f32 %v2762_v55, %v2733_v58  ;;  %v8115_v58 = vor.u32 %v9701_v33, %v8112_v57  ;;  %v9755_v33 = vld [vmem:[#allocation38 + $0x36c] sm:$0xf0] }
 0x9b6   :  { %v11698_v26 = vpop.f32.mrf.mxu1  ;;  %v8319_v57 = vor.u32 %v9755_v33, %v8318_v25  ;;  %v8032_v25 = vld [vmem:[#allocation38 + $0x130] sm:$0xf0] }
 0x9b7   :  { %4222 = vmatpush.bf16.msrb.mxu3 %v8115_v58  ;;  %4203 = vmatpush.bf16.msrb.mxu2 %v7987_v15  ;;  %v8064_v58 = vld [vmem:[#allocation38 + $0x170] sm:$0xf0]  ;;  %v9723_v15 = vld [vmem:[#allocation38 + $0x26c] sm:$0xf0] }
 0x9ba   :  { %v2675_v28 = vpop.f32.mrf.mxu2 }
 0x9bb   :  { %v11700_v62 = vadd.f32 %v2704_v18, %v2675_v28  ;;  %v8350_v28 = vld [vmem:[#allocation38 + $0x3a0] sm:$0xf]  ;;  %4223 = vmatpush.bf16.msrb.mxu3 %v8099_v61  ;;  %4204 = vmatpush.bf16.msrb.mxu2 %v7971_v53  ;;  %v8287_v53 = vor.u32 %v9747_v41, %v8286_v29 }
 0x9bc   :  { %v11702_v4 = vpop.f32.mrf.mxu3  ;;  %v11704_v9 = vpop.f32.mrf.mxu0  ;;  %v8351_v40 = vor.u32 %v9763_v46, %v8350_v28  ;;  %v7952_v28 = vld [vmem:[#allocation38 + $0x90] sm:$0xf0] }
 0x9bd   :  { %v7955_v46 = vor.u32 %v9661_v2, %v7952_v28  ;;  %v8270_v28 = vld [vmem:[#allocation38 + $0x300] sm:$0xf] }
 0x9be   :  { %v2768_v38 = vpop.f32.mrf.mxu1  ;;  %4185 = vmatpush.bf16.msrb.mxu1 %v8351_v40  ;;  %v9751_v40 = vld [vmem:[#allocation38 + $0x34c] sm:$0xf0] }
 0x9bf   :  { %4205 = vmatpush.bf16.msrb.mxu2 %v7955_v46  ;;  %v9743_v46 = vld [vmem:[#allocation38 + $0x30c] sm:$0xf0] }
 0x9c2   :  { %v11706_v24 = vpop.f32.mrf.mxu2 }
 0x9c4   :  { %v2710_v0 = vpop.f32.mrf.mxu3  ;;  %v2739_v17 = vpop.f32.mrf.mxu0 }
 0x9c5   :  { %v11708_v36 = vadd.f32 %v2768_v38, %v2739_v17  ;;  %v8238_v38 = vld [vmem:[#allocation38 + $0x2c0] sm:$0xf]  ;;  %v8080_v17 = vld [vmem:[#allocation38 + $0x190] sm:$0xf0] }
 0x9c6   :  { %v11710_v55 = vpop.f32.mrf.mxu1  ;;  %v8239_v11 = vor.u32 %v9735_v7, %v8238_v38  ;;  %v8083_v39 = vor.u32 %v9693_v45, %v8080_v17  ;;  %v8303_v38 = vor.u32 %v9751_v40, %v8302_v54  ;;  %v8048_v7 = vld [vmem:[#allocation38 + $0x150] sm:$0xf0]  ;;  %v8191_v45 = vor.u32 %v9723_v15, %v8190_v14  ;;  %v9677_v54 = vld [vmem:[#allocation38 + $0x104] sm:$0xf]  ;;  %v8158_v14 = vld [vmem:[#allocation38 + $0x220] sm:$0xf] }
 0x9c7   :  { %v9715_v15 = vld [vmem:[#allocation38 + $0x22c] sm:$0xf0] }
 0x9c8   :  { %4165 = vmatpush.bf16.msra.mxu0 %v8239_v11  ;;  %4224 = vmatpush.bf16.msrb.mxu3 %v8083_v39  ;;  %v8051_v11 = vor.u32 %v9685_v42, %v8048_v7 }
 0x9ca   :  { %v2681_v18 = vpop.f32.mrf.mxu2 }
 0x9cb   :  { %v11712_v34 = vadd.f32 %v2710_v0, %v2681_v18  ;;  %v8335_v0 = vor.u32 %v9759_v30, %v8334_v22  ;;  %v9689_v18 = vld [vmem:[#allocation38 + $0x164] sm:$0xf]  ;;  %v11732_v30 = vperm.slane %v11721_v27, 0 }
 0x9cc   :  { %v11714_v3 = vpop.f32.mrf.mxu3  ;;  %v11716_v5 = vpop.f32.mrf.mxu0  ;;  %4166 = vmatpush.bf16.msra.mxu0 %v8223_v49  ;;  %v8067_v59 = vor.u32 %v9689_v18, %v8064_v58  ;;  %v9657_v22 = vld [vmem:[#allocation38 + $0x64] sm:$0xf]  ;;  %v8174_v18 = vld [vmem:[#allocation38 + $0x240] sm:$0xf]  ;;  %v9719_v58 = vld [vmem:[#allocation38 + $0x24c] sm:$0xf0] }
 0x9cd   :  { %4186 = vmatpush.bf16.msrb.mxu1 %v8335_v0  ;;  %v7936_v0 = vld [vmem:[#allocation38 + $0x70] sm:$0xf0]  ;;  %v9681_v49 = vld [vmem:[#allocation38 + $0x124] sm:$0xf]  ;;  %v8175_v2 = vor.u32 %v9719_v58, %v8174_v18  ;;  %v8142_v58 = vld [vmem:[#allocation38 + $0x200] sm:$0xf] }
 0x9ce   :  { %v11718_v37 = vpop.f32.mrf.mxu1  ;;  %4225 = vmatpush.bf16.msrb.mxu3 %v8067_v59  ;;  %v7939_v8 = vor.u32 %v9657_v22, %v7936_v0  ;;  %v9653_v59 = vld [vmem:[#allocation38 + $0x44] sm:$0xf]  ;;  %v8159_v0 = vor.u32 %v9715_v15, %v8158_v14  ;;  %v8256_v15 = vld [vmem:[#allocation38 + $0x2f0] sm:$0xf0] }
 0x9cf   :  { %v9737_v14 = vld [vmem:[#allocation38 + $0x2e4] sm:$0xf] }
 0x9d0   :  { %4167 = vmatpush.bf16.msra.mxu0 %v8207_v48  ;;  %4206 = vmatpush.bf16.msrb.mxu2 %v7939_v8  ;;  %v7920_v48 = vld [vmem:[#allocation38 + $0x50] sm:$0xf0] }
 0x9d1   :  { %4187 = vmatpush.bf16.msrb.mxu1 %v8319_v57  ;;  %v8035_v57 = vor.u32 %v9681_v49, %v8032_v25  ;;  %v9769_v49 = vld [vmem:[#allocation38 + $0x3e4] sm:$0xf]  ;;  %v9708_v25 = vld [vmem:[#allocation38 + $0x1f4] sm:$0xf0] }
 0x9d2   :  { %v11723_v16 = vpop.f32.mrf.mxu2  ;;  %4226 = vmatpush.bf16.msrb.mxu3 %v8051_v11 }
 0x9d4   :  { %v11725_v51 = vpop.f32.mrf.mxu3  ;;  %v3219_v12 = vpop.f32.mrf.mxu0  ;;  %4168 = vmatpush.bf16.msra.mxu0 %v8191_v45 }
 0x9d5   :  { %v3220_v61 = vadd.f32 %v3219_v12, %v11728_v56  ;;  %4188 = vmatpush.bf16.msrb.mxu1 %v8303_v38  ;;  %v8016_v38 = vld [vmem:[#allocation38 + $0x110] sm:$0xf0] }
 0x9d6   :  { %v3240_v19 = vpop.f32.mrf.mxu1  ;;  %4227 = vmatpush.bf16.msrb.mxu3 %v8035_v57  ;;  %v8019_v11 = vor.u32 %v9677_v54, %v8016_v38  ;;  %v8118_v54 = vld [vmem:[#allocation38 + $0x1c8] sm:$0xf]  ;;  %v9704_v38 = vld [vmem:[#allocation38 + $0x1d4] sm:$0xf0] }
 0x9d7   :  { %v3239_v50 = vadd.f32 %v11718_v37, %v3220_v61  ;;  %v7923_v37 = vor.u32 %v9653_v59, %v7920_v48  ;;  %v8271_v61 = vor.u32 %v9743_v46, %v8270_v28  ;;  %v9711_v59 = vld [vmem:[#allocation38 + $0x20c] sm:$0xf0]  ;;  %v9765_v46 = vld [vmem:[#allocation38 + $0x3c4] sm:$0xf] }
 0x9d8   :  { %4169 = vmatpush.bf16.msra.mxu0 %v8175_v2  ;;  %v8143_v48 = vor.u32 %v9711_v59, %v8142_v58  ;;  %v9733_v58 = vld [vmem:[#allocation38 + $0x2c4] sm:$0xf]  ;;  %v8240_v59 = vld [vmem:[#allocation38 + $0x2d0] sm:$0xf0] }
 0x9d9   :  { %4189 = vmatpush.bf16.msrb.mxu1 %v8287_v53  ;;  %v3325_v40 = vmax.f32 %v3239_v50, 0.0  ;;  %4207 = vmatpush.bf16.msrb.mxu2 %v7923_v37  ;;  %v8384_v50 = vld [vmem:[#allocation38 + $0x3f0] sm:$0xf0] }
 0x9da   :  { %v3181_v52 = vpop.f32.mrf.mxu2  ;;  %4228 = vmatpush.bf16.msrb.mxu3 %v8019_v11  ;;  %v7888_v37 = vld [vmem:[#allocation38 + $0x10] sm:$0xf0]  ;;  %v8119_v11 = vor.u32 %v9704_v38, %v8118_v54  ;;  %v9696_v38 = vld [vmem:[#allocation38 + $0x194] sm:$0xf0] }
 0x9db   :  { %v3182_v63 = vadd.f32 %v3181_v52, %v11732_v30  ;;  %v9649_v52 = vld [vmem:[#allocation38 + $0x24] sm:$0xf] }
 0x9dc   :  { %v3202_v17 = vpop.f32.mrf.mxu3  ;;  %v3221_v39 = vpop.f32.mrf.mxu0  ;;  %4170 = vmatpush.bf16.msra.mxu0 %v8159_v0 }
 0x9dd   :  { %v3222_v12 = vadd.f32 %v3221_v39, %v11728_v56  ;;  %4190 = vmatpush.bf16.msrb.mxu1 %v8271_v61  ;;  %v7904_v39 = vld [vmem:[#allocation38 + $0x30] sm:$0xf0] }
 0x9de   :  { %v11736_v33 = vpop.f32.mrf.mxu1  ;;  %v7907_v41 = vor.u32 %v9649_v52, %v7904_v39  ;;  %v8006_v52 = vld [vmem:[#allocation38 + $0xe8] sm:$0xf] }
 0x9df   :  { %v3241_v1 = vadd.f32 %v3240_v19, %v3222_v12  ;;  %v3201_v19 = vadd.f32 %v11725_v51, %v3182_v63  ;;  %v8134_v12 = vld [vmem:[#allocation38 + $0x1e8] sm:$0xf]  ;;  %v8387_v51 = vor.u32 %v9769_v49, %v8384_v50  ;;  %v9645_v63 = vld [vmem:[#allocation38 + $0x4] sm:$0xf] }
 0x9e0   :  { %4208 = vmatpush.bf16.msrb.mxu2 %v7907_v41  ;;  %v8135_v18 = vor.u32 %v9708_v25, %v8134_v12  ;;  %v7891_v28 = vor.u32 %v9645_v63, %v7888_v37  ;;  %4171 = vmatpush.bf16.msra.mxu0 %v8143_v48  ;;  %v9761_v49 = vld [vmem:[#allocation38 + $0x3a4] sm:$0xf]  ;;  %v8102_v50 = vld [vmem:[#allocation38 + $0x1a8] sm:$0xf]  ;;  %v9700_v25 = vld [vmem:[#allocation38 + $0x1b4] sm:$0xf0]  ;;  %v8243_v48 = vor.u32 %v9733_v58, %v8240_v59 }
 0x9e1   :  { %v3329_v42 = vmax.f32 %v3241_v1, 0.0  ;;  %v3324_v1 = vmax.f32 %v3201_v19, 0.0  ;;  %4259 = vmatpush.bf16.msra.mxu1 %v8387_v51  ;;  %v8259_v19 = vor.u32 %v9737_v14, %v8256_v15  ;;  %v7990_v63 = vld [vmem:[#allocation38 + $0xc8] sm:$0xf]  ;;  %v9672_v37 = vld [vmem:[#allocation38 + $0xd4] sm:$0xf0] }
 0x9e2   :  { %v3183_v7 = vpop.f32.mrf.mxu2  ;;  %v7974_v15 = vld [vmem:[#allocation38 + $0xa8] sm:$0xf]  ;;  %v9725_v59 = vld [vmem:[#allocation38 + $0x284] sm:$0xf] }
 0x9e3   :  { %v11740_v22 = vpack.c.bf16 %v3329_v42, %v3325_v40  ;;  %v3184_v45 = vadd.f32 %v3183_v7, %v11732_v30 }
 0x9e4   :  { %v11743_v8 = vpop.f32.mrf.mxu3  ;;  %v3224_v29 = vpop.f32.mrf.mxu0  ;;  %4209 = vmatpush.bf16.msrb.mxu2 %v7891_v28  ;;  %4240 = vmatpush.bf16.msrb.mxu0 %v8259_v19 }
 0x9e5   :  { %v3203_v53 = vadd.f32 %v3202_v17, %v3184_v45  ;;  %4153 = vmatmul.bf16.vlgmr.msra.gmra.mxu3 %v11740_v22  ;;  %v8368_v17 = vld [vmem:[#allocation38 + $0x3d0] sm:$0xf0]  ;;  %v3225_v42 = vadd.f32 %v3224_v29, %v11728_v56  ;;  %v9676_v45 = vld [vmem:[#allocation38 + $0xf4] sm:$0xf0] }
 0x9e6   :  { %v3245_v57 = vpop.f32.mrf.mxu1  ;;  %4297 = vmatpush.bf16.msra.mxu3 %v8135_v18  ;;  %v8371_v61 = vor.u32 %v9765_v46, %v8368_v17  ;;  %v8007_v41 = vor.u32 %v9676_v45, %v8006_v52  ;;  %v8352_v29 = vld [vmem:[#allocation38 + $0x3b0] sm:$0xf0]  ;;  %v8103_v18 = vor.u32 %v9700_v25, %v8102_v50  ;;  %v9757_v46 = vld [vmem:[#allocation38 + $0x384] sm:$0xf]  ;;  %v8086_v17 = vld [vmem:[#allocation38 + $0x188] sm:$0xf] }
 0x9e7   :  { %v3328_v2 = vmax.f32 %v3203_v53, 0.0  ;;  %v3244_v12 = vadd.f32 %v11736_v33, %v3225_v42  ;;  %v8355_v51 = vor.u32 %v9761_v49, %v8352_v29  ;;  %v7991_v33 = vor.u32 %v9672_v37, %v7990_v63  ;;  %v9753_v50 = vld [vmem:[#allocation38 + $0x364] sm:$0xf]  ;;  %v8208_v63 = vld [vmem:[#allocation38 + $0x290] sm:$0xf0] }
 0x9e8   :  { %4260 = vmatpush.bf16.msra.mxu1 %v8371_v61  ;;  %4241 = vmatpush.bf16.msrb.mxu0 %v8243_v48  ;;  %v8087_v14 = vor.u32 %v9696_v38, %v8086_v17  ;;  %v11760_v25 = vperm.slane %v11721_v27, 3  ;;  %v8211_v37 = vor.u32 %v9725_v59, %v8208_v63  ;;  %v8054_v17 = vld [vmem:[#allocation38 + $0x148] sm:$0xf]  ;;  %v8176_v63 = vld [vmem:[#allocation38 + $0x250] sm:$0xf0] }
 0x9e9   :  { %v11746_v40 = vpack.c.bf16 %v3328_v2, %v3324_v1  ;;  %v3333_v54 = vmax.f32 %v3244_v12, 0.0  ;;  %v8320_v12 = vld [vmem:[#allocation38 + $0x370] sm:$0xf0] }
 0x9ea   :  { %v3186_v7 = vpop.f32.mrf.mxu2  ;;  %4298 = vmatpush.bf16.msra.mxu3 %v8119_v11 }
 0x9eb   :  { %4134 = vmatmul.bf16.vlgmr.msra.gmra.mxu2 %v11746_v40  ;;  %v3187_v1 = vadd.f32 %v3186_v7, %v11732_v30  ;;  %v9729_v7 = vld [vmem:[#allocation38 + $0x2a4] sm:$0xf] }
 0x9ec   :  { %v3207_v0 = vpop.f32.mrf.mxu3  ;;  %v3226_v39 = vpop.f32.mrf.mxu0  ;;  %4278 = vmatpush.bf16.msra.mxu2 %v8007_v41  ;;  %4261 = vmatpush.bf16.msra.mxu1 %v8355_v51  ;;  %v9668_v41 = vld [vmem:[#allocation38 + $0xb4] sm:$0xf0] }
 0x9ed   :  { %v3227_v53 = vadd.f32 %v3226_v39, %v11728_v56  ;;  %v8336_v56 = vld [vmem:[#allocation38 + $0x390] sm:$0xf0]  ;;  %v3206_v52 = vadd.f32 %v11743_v8, %v3187_v1  ;;  %v7975_v29 = vor.u32 %v9668_v41, %v7974_v15  ;;  %v8323_v8 = vor.u32 %v9753_v50, %v8320_v12  ;;  %v7958_v1 = vld [vmem:[#allocation38 + $0x88] sm:$0xf]  ;;  %v9721_v15 = vld [vmem:[#allocation38 + $0x264] sm:$0xf] }
 0x9ee   :  { %v11753_v28 = vpop.f32.mrf.mxu1  ;;  %4299 = vmatpush.bf16.msra.mxu3 %v8103_v18  ;;  %v8339_v61 = vor.u32 %v9757_v46, %v8336_v56  ;;  %v9692_v18 = vld [vmem:[#allocation38 + $0x174] sm:$0xf0]  ;;  %v9749_v46 = vld [vmem:[#allocation38 + $0x344] sm:$0xf]  ;;  %v8304_v56 = vld [vmem:[#allocation38 + $0x350] sm:$0xf0] }
 0x9ef   :  { %v3246_v2 = vadd.f32 %v3245_v57, %v3227_v53  ;;  %v8224_v57 = vld [vmem:[#allocation38 + $0x2b0] sm:$0xf0]  ;;  %v8070_v53 = vld [vmem:[#allocation38 + $0x168] sm:$0xf]  ;;  %v8307_v38 = vor.u32 %v9749_v46, %v8304_v56  ;;  %v9660_v41 = vld [vmem:[#allocation38 + $0x74] sm:$0xf0] }
 0x9f0   :  { %4279 = vmatpush.bf16.msra.mxu2 %v7991_v33  ;;  %4262 = vmatpush.bf16.msra.mxu1 %v8339_v61  ;;  %v8227_v39 = vor.u32 %v9729_v7, %v8224_v57  ;;  %v11769_v61 = vperm.slane %v11721_v27, 2  ;;  %v8022_v46 = vld [vmem:[#allocation38 + $0x108] sm:$0xf] }
 0x9f1   :  { %v3337_v42 = vmax.f32 %v3246_v2, 0.0  ;;  %v3332_v2 = vmax.f32 %v3206_v52, 0.0  ;;  %v8192_v52 = vld [vmem:[#allocation38 + $0x270] sm:$0xf0] }
 0x9f2   :  { %v3188_v11 = vpop.f32.mrf.mxu2  ;;  %4300 = vmatpush.bf16.msra.mxu3 %v8087_v14  ;;  %4242 = vmatpush.bf16.msrb.mxu0 %v8227_v39  ;;  %v8195_v39 = vor.u32 %v9721_v15, %v8192_v52  ;;  %v8160_v15 = vld [vmem:[#allocation38 + $0x230] sm:$0xf0]  ;;  %v7910_v52 = vld [vmem:[#allocation38 + $0x28] sm:$0xf] }
 0x9f3   :  { %v11756_v19 = vpack.c.bf16 %v3337_v42, %v3333_v54  ;;  %v3189_v45 = vadd.f32 %v3188_v11, %v11732_v30  ;;  %v8071_v30 = vor.u32 %v9692_v18, %v8070_v53  ;;  %v9688_v11 = vld [vmem:[#allocation38 + $0x154] sm:$0xf0]  ;;  %v8038_v53 = vld [vmem:[#allocation38 + $0x128] sm:$0xf] }
 0x9f4   :  { %v3295_v49 = vpop.f32.mrf.mxu0  ;;  %v11763_v58 = vpop.f32.mrf.mxu3  ;;  %4280 = vmatpush.bf16.msra.mxu2 %v7975_v29  ;;  %4263 = vmatpush.bf16.msra.mxu1 %v8323_v8  ;;  %v8055_v57 = vor.u32 %v9688_v11, %v8054_v17  ;;  %v9745_v29 = vld [vmem:[#allocation38 + $0x324] sm:$0xf]  ;;  %v9680_v11 = vld [vmem:[#allocation38 + $0x114] sm:$0xf0] }
 0x9f5   :  { %v3208_v51 = vadd.f32 %v3207_v0, %v3189_v45  ;;  %4158 = vmatmul.bf16.gmra.mxu3 %v11756_v19  ;;  %v9664_v0 = vld [vmem:[#allocation38 + $0x94] sm:$0xf0]  ;;  %v3296_v42 = vadd.f32 %v3295_v49, %v11760_v25  ;;  %v7942_v45 = vld [vmem:[#allocation38 + $0x68] sm:$0xf]  ;;  %v8288_v49 = vld [vmem:[#allocation38 + $0x330] sm:$0xf0] }
 0x9f6   :  { %4301 = vmatpush.bf16.msra.mxu3 %v8071_v30  ;;  %v7959_v33 = vor.u32 %v9664_v0, %v7958_v1  ;;  %4243 = vmatpush.bf16.msrb.mxu0 %v8211_v37  ;;  %v3316_v14 = vpop.f32.mrf.mxu1  ;;  %v7943_v27 = vor.u32 %v9660_v41, %v7942_v45  ;;  %v8291_v12 = vor.u32 %v9745_v29, %v8288_v49  ;;  %v9717_v8 = vld [vmem:[#allocation38 + $0x244] sm:$0xf]  ;;  %v7926_v1 = vld [vmem:[#allocation38 + $0x48] sm:$0xf]  ;;  %v9652_v45 = vld [vmem:[#allocation38 + $0x34] sm:$0xf0] }
 0x9f7   :  { %v3336_v48 = vmax.f32 %v3208_v51, 0.0  ;;  %v9684_v51 = vld [vmem:[#allocation38 + $0x134] sm:$0xf0]  ;;  %v3315_v18 = vadd.f32 %v11753_v28, %v3296_v42  ;;  %v9741_v0 = vld [vmem:[#allocation38 + $0x304] sm:$0xf] }
 0x9f8   :  { %4281 = vmatpush.bf16.msra.mxu2 %v7959_v33  ;;  %4264 = vmatpush.bf16.msra.mxu1 %v8307_v38  ;;  %v8039_v59 = vor.u32 %v9684_v51, %v8038_v53  ;;  %v8272_v33 = vld [vmem:[#allocation38 + $0x310] sm:$0xf0]  ;;  %v9713_v28 = vld [vmem:[#allocation38 + $0x224] sm:$0xf]  ;;  %v8390_v51 = vld [vmem:[#allocation38 + $0x3e8] sm:$0xf] }
 0x9f9   :  { %v11765_v54 = vpack.c.bf16 %v3336_v48, %v3332_v2  ;;  %v9656_v2 = vld [vmem:[#allocation38 + $0x54] sm:$0xf0]  ;;  %v8179_v48 = vor.u32 %v9717_v8, %v8176_v63  ;;  %v8275_v38 = vor.u32 %v9741_v0, %v8272_v33  ;;  %v8163_v49 = vor.u32 %v9713_v28, %v8160_v15  ;;  %v8136_v63 = vld [vmem:[#allocation38 + $0x1f8] sm:$0xf0]  ;;  %v8374_v33 = vld [vmem:[#allocation38 + $0x3c8] sm:$0xf] }
 0x9fa   :  { %v3257_v7 = vpop.f32.mrf.mxu2  ;;  %4302 = vmatpush.bf16.msra.mxu3 %v8055_v57  ;;  %4244 = vmatpush.bf16.msrb.mxu0 %v8195_v39  ;;  %v7927_v37 = vor.u32 %v9656_v2, %v7926_v1  ;;  %v8023_v57 = vor.u32 %v9680_v11, %v8022_v46  ;;  %v3327_v39 = vmax.f32 %v3315_v18, 0.0  ;;  %v9772_v8 = vld [vmem:[#allocation38 + $0x3f4] sm:$0xf0]  ;;  %v9709_v1 = vld [vmem:[#allocation38 + $0x204] sm:$0xf] }
 0x9fb   :  { %4139 = vmatmul.bf16.gmra.mxu2 %v11765_v54  ;;  %v3258_v56 = vadd.f32 %v3257_v7, %v11769_v61  ;;  %v9648_v0 = vld [vmem:[#allocation38 + $0x14] sm:$0xf0]  ;;  %v9702_v11 = vld [vmem:[#allocation38 + $0x1cc] sm:$0xf] }
 0x9fc   :  { %v3297_v50 = vpop.f32.mrf.mxu0  ;;  %4282 = vmatpush.bf16.msra.mxu2 %v7943_v27  ;;  %4265 = vmatpush.bf16.msra.mxu1 %v8291_v12  ;;  %v3278_v42 = vpop.f32.mrf.mxu3 }
 0x9fd   :  { %v3298_v30 = vadd.f32 %v3297_v50, %v11760_v25  ;;  %v7911_v50 = vor.u32 %v9652_v45, %v7910_v52  ;;  %v3277_v7 = vadd.f32 %v11763_v58, %v3258_v56  ;;  %v8144_v58 = vld [vmem:[#allocation38 + $0x210] sm:$0xf0] }
 0x9fe   :  { %4303 = vmatpush.bf16.msra.mxu3 %v8039_v59  ;;  %4245 = vmatpush.bf16.msrb.mxu0 %v8179_v48  ;;  %v3319_v12 = vpop.f32.mrf.mxu1  ;;  %v8391_v59 = vor.u32 %v9772_v8, %v8390_v51  ;;  %v8147_v48 = vor.u32 %v9709_v1, %v8144_v58  ;;  %v9764_v51 = vld [vmem:[#allocation38 + $0x3b4] sm:$0xf0] }
 0x9ff   :  { %v3317_v17 = vadd.f32 %v3316_v14, %v3298_v30  ;;  %v9706_v30 = vld [vmem:[#allocation38 + $0x1ec] sm:$0xf]  ;;  %v3326_v46 = vmax.f32 %v3277_v7, 0.0  ;;  %v8008_v7 = vld [vmem:[#allocation38 + $0xf8] sm:$0xf0] }
 0xa00   :  { %4283 = vmatpush.bf16.msra.mxu2 %v7927_v37  ;;  %4266 = vmatpush.bf16.msra.mxu1 %v8275_v38  ;;  %v8139_v2 = vor.u32 %v9706_v30, %v8136_v63  ;;  %v7894_v37 = vld [vmem:[#allocation38 + $0x8] sm:$0xf]  ;;  %v9768_v38 = vld [vmem:[#allocation38 + $0x3d4] sm:$0xf0] }
 0xa01   :  { %v3331_v41 = vmax.f32 %v3317_v17, 0.0  ;;  %v7895_v17 = vor.u32 %v9648_v0, %v7894_v37  ;;  %v8375_v28 = vor.u32 %v9768_v38, %v8374_v33  ;;  %v8246_v63 = vld [vmem:[#allocation38 + $0x2c8] sm:$0xf]  ;;  %v9670_v37 = vld [vmem:[#allocation38 + $0xcc] sm:$0xf] }
 0xa02   :  { %v3259_v29 = vpop.f32.mrf.mxu2  ;;  %4304 = vmatpush.bf16.msra.mxu3 %v8023_v57  ;;  %4246 = vmatpush.bf16.msrb.mxu0 %v8163_v49  ;;  %v9674_v49 = vld [vmem:[#allocation38 + $0xec] sm:$0xf]  ;;  %v7992_v0 = vld [vmem:[#allocation38 + $0xd8] sm:$0xf0]  ;;  %v9760_v38 = vld [vmem:[#allocation38 + $0x394] sm:$0xf0] }
 0xa03   :  { %v11776_v14 = vpack.c.bf16 %v3331_v41, %v3327_v39  ;;  %v3260_v27 = vadd.f32 %v3259_v29, %v11769_v61  ;;  %v8262_v41 = vld [vmem:[#allocation38 + $0x2e8] sm:$0xf]  ;;  %v9740_v29 = vld [vmem:[#allocation38 + $0x2f4] sm:$0xf0] }
 0xa04   :  { %v3300_v53 = vpop.f32.mrf.mxu0  ;;  %4284 = vmatpush.bf16.msra.mxu2 %v7911_v50  ;;  %v3281_v45 = vpop.f32.mrf.mxu3  ;;  %v8263_v50 = vor.u32 %v9740_v29, %v8262_v41  ;;  %v8230_v41 = vld [vmem:[#allocation38 + $0x2a8] sm:$0xf]  ;;  %v9666_v29 = vld [vmem:[#allocation38 + $0xac] sm:$0xf] }
 0xa05   :  { %v3279_v18 = vadd.f32 %v3278_v42, %v3260_v27  ;;  %4191 = vmatmul.bf16.vlgmr.msrb.gmra.mxu1 %v11776_v14  ;;  %4229 = vmatmul.bf16.vlgmr.msrb.gmra.mxu3 %v11740_v22  ;;  %v8120_v42 = vld [vmem:[#allocation38 + $0x1d8] sm:$0xf0]  ;;  %v3301_v15 = vadd.f32 %v3300_v53, %v11760_v25  ;;  %v8358_v27 = vld [vmem:[#allocation38 + $0x3a8] sm:$0xf]  ;;  %v8011_v53 = vor.u32 %v9674_v49, %v8008_v7 }
 0xa06   :  { %4335 = vmatpush.bf16.msrb.mxu1 %v8391_v59  ;;  %4373 = vmatpush.bf16.msrb.mxu3 %v8139_v2  ;;  %v8123_v52 = vor.u32 %v9702_v11, %v8120_v42  ;;  %v8359_v30 = vor.u32 %v9764_v51, %v8358_v27  ;;  %v8104_v59 = vld [vmem:[#allocation38 + $0x1b8] sm:$0xf0]  ;;  %v3321_v33 = vpop.f32.mrf.mxu1  ;;  %v9694_v11 = vld [vmem:[#allocation38 + $0x18c] sm:$0xf] }
 0xa07   :  { %v3330_v56 = vmax.f32 %v3279_v18, 0.0  ;;  %4247 = vmatpush.bf16.msrb.mxu0 %v8147_v48  ;;  %v9698_v18 = vld [vmem:[#allocation38 + $0x1ac] sm:$0xf]  ;;  %v3320_v1 = vadd.f32 %v3319_v12, %v3301_v15  ;;  %v9736_v48 = vld [vmem:[#allocation38 + $0x2d4] sm:$0xf0] }
 0xa08   :  { %4285 = vmatpush.bf16.msra.mxu2 %v7895_v17  ;;  %v8107_v2 = vor.u32 %v9698_v18, %v8104_v59  ;;  %v8342_v17 = vld [vmem:[#allocation38 + $0x388] sm:$0xf]  ;;  %v9732_v15 = vld [vmem:[#allocation38 + $0x2b4] sm:$0xf0]  ;;  %v7976_v49 = vld [vmem:[#allocation38 + $0xb8] sm:$0xf0] }
 0xa09   :  { %v11781_v57 = vpack.c.bf16 %v3330_v56, %v3326_v46  ;;  %v8247_v46 = vor.u32 %v9736_v48, %v8246_v63  ;;  %v7995_v56 = vor.u32 %v9670_v37, %v7992_v0  ;;  %v8231_v51 = vor.u32 %v9732_v15, %v8230_v41  ;;  %v9756_v63 = vld [vmem:[#allocation38 + $0x374] sm:$0xf0]  ;;  %v8072_v48 = vld [vmem:[#allocation38 + $0x178] sm:$0xf0]  ;;  %v8214_v37 = vld [vmem:[#allocation38 + $0x288] sm:$0xf] }
 0xa0a   :  { %v3262_v39 = vpop.f32.mrf.mxu2  ;;  %4336 = vmatpush.bf16.msrb.mxu1 %v8375_v28  ;;  %4374 = vmatpush.bf16.msrb.mxu3 %v8123_v52  ;;  %v8088_v52 = vld [vmem:[#allocation38 + $0x198] sm:$0xf0]  ;;  %v9728_v0 = vld [vmem:[#allocation38 + $0x294] sm:$0xf0]  ;;  %v8198_v15 = vld [vmem:[#allocation38 + $0x268] sm:$0xf] }
 0xa0b   :  { %4172 = vmatmul.bf16.vlgmr.msra.gmra.mxu0 %v11781_v57  ;;  %4210 = vmatmul.bf16.vlgmr.msrb.gmra.mxu2 %v11746_v40  ;;  %v3263_v28 = vadd.f32 %v3262_v39, %v11769_v61  ;;  %v8091_v12 = vor.u32 %v9694_v11, %v8088_v52  ;;  %v8056_v41 = vld [vmem:[#allocation38 + $0x158] sm:$0xf0] }
 0xa0c   :  { %v3302_v8 = vpop.f32.mrf.mxu0  ;;  %4316 = vmatpush.bf16.msra.mxu0 %v8263_v50  ;;  %4354 = vmatpush.bf16.msrb.mxu2 %v8011_v53  ;;  %v3335_v50 = vmax.f32 %v3320_v1, 0.0  ;;  %v3283_v59 = vpop.f32.mrf.mxu3 }
 0xa0d   :  { %v3303_v58 = vadd.f32 %v3302_v8, %v11760_v25  ;;  %v8343_v25 = vor.u32 %v9760_v38, %v8342_v17  ;;  %v7979_v8 = vor.u32 %v9666_v29, %v7976_v49  ;;  %v3282_v53 = vadd.f32 %v3281_v45, %v3263_v28  ;;  %v9752_v28 = vld [vmem:[#allocation38 + $0x354] sm:$0xf0]  ;;  %v9658_v49 = vld [vmem:[#allocation38 + $0x6c] sm:$0xf] }
 0xa0e   :  { %4337 = vmatpush.bf16.msrb.mxu1 %v8359_v30  ;;  %4375 = vmatpush.bf16.msrb.mxu3 %v8107_v2  ;;  %v8326_v30 = vld [vmem:[#allocation38 + $0x368] sm:$0xf]  ;;  %v9724_v29 = vld [vmem:[#allocation38 + $0x274] sm:$0xf0] }
 0xa0f   :  { %v3322_v42 = vadd.f32 %v3321_v33, %v3303_v58  ;;  %v9690_v58 = vld [vmem:[#allocation38 + $0x16c] sm:$0xf]  ;;  %v8327_v1 = vor.u32 %v9756_v63, %v8326_v30  ;;  %v8215_v33 = vor.u32 %v9728_v0, %v8214_v37  ;;  %v3334_v17 = vmax.f32 %v3282_v53, 0.0  ;;  %v8182_v30 = vld [vmem:[#allocation38 + $0x248] sm:$0xf] }
 0xa10   :  { %4317 = vmatpush.bf16.msra.mxu0 %v8247_v46  ;;  %4355 = vmatpush.bf16.msrb.mxu2 %v7995_v56  ;;  %v8075_v45 = vor.u32 %v9690_v58, %v8072_v48  ;;  %v7960_v46 = vld [vmem:[#allocation38 + $0x98] sm:$0xf0]  ;;  %v8310_v56 = vld [vmem:[#allocation38 + $0x348] sm:$0xf]  ;;  %v9720_v58 = vld [vmem:[#allocation38 + $0x254] sm:$0xf0] }
 0xa11   :  { %v3339_v7 = vmax.f32 %v3322_v42, 0.0  ;;  %v9686_v42 = vld [vmem:[#allocation38 + $0x14c] sm:$0xf]  ;;  %v8311_v52 = vor.u32 %v9752_v28, %v8310_v56  ;;  %v8183_v48 = vor.u32 %v9720_v58, %v8182_v30  ;;  %v8278_v0 = vld [vmem:[#allocation38 + $0x308] sm:$0xf] }
 0xa12   :  { %v3264_v27 = vpop.f32.mrf.mxu2  ;;  %4338 = vmatpush.bf16.msrb.mxu1 %v8343_v25  ;;  %4376 = vmatpush.bf16.msrb.mxu3 %v8091_v12  ;;  %v8059_v12 = vor.u32 %v9686_v42, %v8056_v41  ;;  %v9716_v56 = vld [vmem:[#allocation38 + $0x234] sm:$0xf0]  ;;  %v7912_v28 = vld [vmem:[#allocation38 + $0x38] sm:$0xf0]  ;;  %v9770_v41 = vld [vmem:[#allocation38 + $0x3ec] sm:$0xf] }
 0xa13   :  { %v11788_v18 = vpack.c.bf16 %v3339_v7, %v3335_v50  ;;  %v3265_v39 = vadd.f32 %v3264_v27, %v11769_v61  ;;  %v9662_v61 = vld [vmem:[#allocation38 + $0x8c] sm:$0xf]  ;;  %v8199_v50 = vor.u32 %v9724_v29, %v8198_v15  ;;  %v7944_v7 = vld [vmem:[#allocation38 + $0x78] sm:$0xf0]  ;;  %v8294_v27 = vld [vmem:[#allocation38 + $0x328] sm:$0xf] }
 0xa14   :  { %4318 = vmatpush.bf16.msra.mxu0 %v8231_v51  ;;  %4356 = vmatpush.bf16.msrb.mxu2 %v7979_v8  ;;  %v7963_v11 = vor.u32 %v9662_v61, %v7960_v46  ;;  %v9748_v51 = vld [vmem:[#allocation38 + $0x334] sm:$0xf0]  ;;  %v7947_v8 = vor.u32 %v9658_v49, %v7944_v7  ;;  %v8024_v61 = vld [vmem:[#allocation38 + $0x118] sm:$0xf0]  ;;  %v8166_v46 = vld [vmem:[#allocation38 + $0x228] sm:$0xf] }
 0xa15   :  { %v3284_v2 = vadd.f32 %v3283_v59, %v3265_v39  ;;  %4196 = vmatmul.bf16.gmra.mxu1 %v11788_v18  ;;  %4234 = vmatmul.bf16.gmra.mxu3 %v11756_v19  ;;  %v8295_v53 = vor.u32 %v9748_v51, %v8294_v27  ;;  %v9682_v39 = vld [vmem:[#allocation38 + $0x12c] sm:$0xf]  ;;  %v8040_v59 = vld [vmem:[#allocation38 + $0x138] sm:$0xf0]  ;;  %v8167_v42 = vor.u32 %v9716_v56, %v8166_v46  ;;  %v8150_v29 = vld [vmem:[#allocation38 + $0x208] sm:$0xf] }
 0xa16   :  { %4339 = vmatpush.bf16.msrb.mxu1 %v8327_v1  ;;  %4377 = vmatpush.bf16.msrb.mxu3 %v8075_v45  ;;  %v8043_v63 = vor.u32 %v9682_v39, %v8040_v59  ;;  %v7928_v1 = vld [vmem:[#allocation38 + $0x58] sm:$0xf0]  ;;  %v9744_v45 = vld [vmem:[#allocation38 + $0x314] sm:$0xf0]  ;;  %v9766_v51 = vld [vmem:[#allocation38 + $0x3cc] sm:$0xf] }
 0xa17   :  { %v3338_v38 = vmax.f32 %v3284_v2, 0.0  ;;  %v9654_v2 = vld [vmem:[#allocation38 + $0x4c] sm:$0xf]  ;;  %v9712_v49 = vld [vmem:[#allocation38 + $0x214] sm:$0xf0] }
 0xa18   :  { %4319 = vmatpush.bf16.msra.mxu0 %v8215_v33  ;;  %4357 = vmatpush.bf16.msrb.mxu2 %v7963_v11  ;;  %v7931_v37 = vor.u32 %v9654_v2, %v7928_v1  ;;  %v9678_v33 = vld [vmem:[#allocation38 + $0x10c] sm:$0xf]  ;;  %v8151_v7 = vor.u32 %v9712_v49, %v8150_v29  ;;  %v7896_v27 = vld [vmem:[#allocation38 + $0x18] sm:$0xf0] }
 0xa19   :  { %v11793_v25 = vpack.c.bf16 %v3338_v38, %v3334_v17  ;;  %v8279_v17 = vor.u32 %v9744_v45, %v8278_v0  ;;  %v8027_v38 = vor.u32 %v9678_v33, %v8024_v61  ;;  %v9650_v11 = vld [vmem:[#allocation38 + $0x2c] sm:$0xf]  ;;  %v8264_v30 = vld [vmem:[#allocation38 + $0x2f8] sm:$0xf0] }
 0xa1a   :  { %4340 = vmatpush.bf16.msrb.mxu1 %v8311_v52  ;;  %4378 = vmatpush.bf16.msrb.mxu3 %v8059_v12  ;;  %v7915_v52 = vor.u32 %v9650_v11, %v7912_v28  ;;  %v8392_v12 = vld [vmem:[#allocation38 + $0x3f8] sm:$0xf0]  ;;  %v9738_v59 = vld [vmem:[#allocation38 + $0x2ec] sm:$0xf] }
 0xa1b   :  { %4177 = vmatmul.bf16.gmra.mxu0 %v11793_v25  ;;  %4215 = vmatmul.bf16.gmra.mxu2 %v11765_v54  ;;  %v8395_v15 = vor.u32 %v9770_v41, %v8392_v12  ;;  %v9762_v58 = vld [vmem:[#allocation38 + $0x3ac] sm:$0xf]  ;;  %v8360_v2 = vld [vmem:[#allocation38 + $0x3b8] sm:$0xf0] }
 0xa1c   :  { %4320 = vmatpush.bf16.msra.mxu0 %v8199_v50  ;;  %4358 = vmatpush.bf16.msrb.mxu2 %v7947_v8  ;;  %v9646_v50 = vld [vmem:[#allocation38 + $0xc] sm:$0xf]  ;;  %v8376_v8 = vld [vmem:[#allocation38 + $0x3d8] sm:$0xf0] }
 0xa1d   :  { %v8379_v39 = vor.u32 %v9766_v51, %v8376_v8  ;;  %v9734_v1 = vld [vmem:[#allocation38 + $0x2cc] sm:$0xf]  ;;  %v8344_v33 = vld [vmem:[#allocation38 + $0x398] sm:$0xf0] }
 0xa1e   :  { %4341 = vmatpush.bf16.msrb.mxu1 %v8295_v53  ;;  %4379 = vmatpush.bf16.msrb.mxu3 %v8043_v63  ;;  %v7899_v53 = vor.u32 %v9646_v50, %v7896_v27  ;;  %v8267_v63 = vor.u32 %v9738_v59, %v8264_v30  ;;  %v9758_v45 = vld [vmem:[#allocation38 + $0x38c] sm:$0xf]  ;;  %v8232_v46 = vld [vmem:[#allocation38 + $0x2b8] sm:$0xf0] }
 0xa1f   :  { %v9730_v61 = vld [vmem:[#allocation38 + $0x2ac] sm:$0xf]  ;;  %v8347_v56 = vor.u32 %v9758_v45, %v8344_v33  ;;  %v8328_v11 = vld [vmem:[#allocation38 + $0x378] sm:$0xf0]  ;;  %v8510_v33 = vld [vmem:[#allocation41 + $0xe0] sm:$0xf] }
 0xa20   :  { %4321 = vmatpush.bf16.msra.mxu0 %v8183_v48  ;;  %4359 = vmatpush.bf16.msrb.mxu2 %v7931_v37  ;;  %v8363_v48 = vor.u32 %v9762_v58, %v8360_v2  ;;  %v8248_v37 = vld [vmem:[#allocation38 + $0x2d8] sm:$0xf0]  ;;  %v9750_v41 = vld [vmem:[#allocation38 + $0x34c] sm:$0xf] }
 0xa21   :  { %v8251_v0 = vor.u32 %v9734_v1, %v8248_v37  ;;  %v9722_v49 = vld [vmem:[#allocation38 + $0x26c] sm:$0xf]  ;;  %v8200_v50 = vld [vmem:[#allocation38 + $0x278] sm:$0xf0] }
 0xa22   :  { %4342 = vmatpush.bf16.msrb.mxu1 %v8279_v17  ;;  %4380 = vmatpush.bf16.msrb.mxu3 %v8027_v38  ;;  %v8235_v17 = vor.u32 %v9730_v61, %v8232_v46  ;;  %v9754_v38 = vld [vmem:[#allocation38 + $0x36c] sm:$0xf]  ;;  %v8296_v51 = vld [vmem:[#allocation38 + $0x338] sm:$0xf0]  ;;  %v9803_v61 = vld [vmem:[#allocation41 + $0xec] sm:$0xf0] }
 0xa23   :  { %v8331_v28 = vor.u32 %v9754_v38, %v8328_v11  ;;  %v9746_v27 = vld [vmem:[#allocation38 + $0x32c] sm:$0xf]  ;;  %v8280_v30 = vld [vmem:[#allocation38 + $0x318] sm:$0xf0]  ;;  %v8494_v46 = vld [vmem:[#allocation41 + $0xc0] sm:$0xf] }
 0xa24   :  { %4322 = vmatpush.bf16.msra.mxu0 %v8167_v42  ;;  %4360 = vmatpush.bf16.msrb.mxu2 %v7915_v52  ;;  %v9726_v42 = vld [vmem:[#allocation38 + $0x28c] sm:$0xf]  ;;  %v8216_v52 = vld [vmem:[#allocation38 + $0x298] sm:$0xf0]  ;;  %v8478_v38 = vld [vmem:[#allocation41 + $0xa0] sm:$0xf] }
 0xa25   :  { %4267 = vmatmul.bf16.vlgmr.msra.gmra.mxu1 %v11776_v14  ;;  %4305 = vmatmul.bf16.vlgmr.msra.gmra.mxu3 %v11740_v22  ;;  %v8219_v12 = vor.u32 %v9726_v42, %v8216_v52  ;;  %v9718_v8 = vld [vmem:[#allocation38 + $0x24c] sm:$0xf]  ;;  %v8168_v2 = vld [vmem:[#allocation38 + $0x238] sm:$0xf0]  ;;  %v9795_v11 = vld [vmem:[#allocation41 + $0xac] sm:$0xf0] }
 0xa26   :  { %4411 = vmatpush.bf16.msra.mxu1 %v8395_v15  ;;  %v8312_v15 = vld [vmem:[#allocation38 + $0x358] sm:$0xf0]  ;;  %v9742_v59 = vld [vmem:[#allocation38 + $0x30c] sm:$0xf] }
 0xa27   :  { %v8315_v29 = vor.u32 %v9750_v41, %v8312_v15  ;;  %v9714_v58 = vld [vmem:[#allocation38 + $0x22c] sm:$0xf]  ;;  %v8283_v1 = vor.u32 %v9742_v59, %v8280_v30  ;;  %v8446_v41 = vld [vmem:[#allocation41 + $0x60] sm:$0xf]  ;;  %v9835_v30 = vld [vmem:[#allocation41 + $0x1ec] sm:$0xf0] }
 0xa28   :  { %4323 = vmatpush.bf16.msra.mxu0 %v8151_v7  ;;  %4361 = vmatpush.bf16.msrb.mxu2 %v7899_v53  ;;  %v8203_v7 = vor.u32 %v9722_v49, %v8200_v50  ;;  %v8299_v53 = vor.u32 %v9746_v27, %v8296_v51  ;;  %v9710_v37 = vld [vmem:[#allocation38 + $0x20c] sm:$0xf]  ;;  %v9783_v49 = vld [vmem:[#allocation41 + $0x4c] sm:$0xf0]  ;;  %v8638_v59 = vld [vmem:[#allocation41 + $0x1e0] sm:$0xf] }
 0xa29   :  { %v9779_v27 = vld [vmem:[#allocation41 + $0x2c] sm:$0xf0] }
 0xa2a   :  { %4412 = vmatpush.bf16.msra.mxu1 %v8379_v39  ;;  %v8184_v39 = vld [vmem:[#allocation38 + $0x258] sm:$0xf0] }
 0xa2b   :  { %4248 = vmatmul.bf16.vlgmr.msrb.gmra.mxu0 %v11781_v57  ;;  %4286 = vmatmul.bf16.vlgmr.msra.gmra.mxu2 %v11746_v40 }
 0xa2c   :  { %4392 = vmatpush.bf16.msrb.mxu0 %v8267_v63  ;;  %v8187_v63 = vor.u32 %v9718_v8, %v8184_v39  ;;  %v9775_v39 = vld [vmem:[#allocation41 + $0xc] sm:$0xf0] }
 0xa2e   :  { %4413 = vmatpush.bf16.msra.mxu1 %v8363_v48  ;;  %v8171_v48 = vor.u32 %v9714_v58, %v8168_v2  ;;  %v8639_v58 = vor.u32 %v9835_v30, %v8638_v59  ;;  %v8512_v2 = vld [vmem:[#allocation41 + $0xf0] sm:$0xf0]  ;;  %v9785_v59 = vld [vmem:[#allocation41 + $0x64] sm:$0xf] }
 0xa30   :  { %4393 = vmatpush.bf16.msrb.mxu0 %v8251_v0  ;;  %v8152_v0 = vld [vmem:[#allocation38 + $0x218] sm:$0xf0]  ;;  %5267 = vmatpush.bf16.msra.mxu3 %v8639_v58 }
 0xa31   :  { %v8155_v45 = vor.u32 %v9710_v37, %v8152_v0  ;;  %v11824_v37 = vld [vmem:[%s12462_s17] sm:$0xf]  ;;  %v8622_v0 = vld [vmem:[#allocation41 + $0x1c0] sm:$0xf] }
 0xa32   :  { %4414 = vmatpush.bf16.msra.mxu1 %v8347_v56  ;;  %v9799_v56 = vld [vmem:[#allocation41 + $0xcc] sm:$0xf0] }
 0xa34   :  { %4394 = vmatpush.bf16.msrb.mxu0 %v8235_v17  ;;  %v8495_v17 = vor.u32 %v9799_v56, %v8494_v46  ;;  %v11829_v56 = vperm.slane %v11824_v37, 0 }
 0xa35   :  { %4272 = vmatmul.bf16.gmra.mxu1 %v11788_v18  ;;  %4310 = vmatmul.bf16.gmra.mxu3 %v11756_v19 }
 0xa36   :  { %4415 = vmatpush.bf16.msra.mxu1 %v8331_v28  ;;  %v8479_v28 = vor.u32 %v9795_v11, %v8478_v38  ;;  %v9827_v38 = vld [vmem:[#allocation41 + $0x1ac] sm:$0xf0]  ;;  %v9793_v11 = vld [vmem:[#allocation41 + $0xa4] sm:$0xf] }
 0xa38   :  { %4395 = vmatpush.bf16.msrb.mxu0 %v8219_v12 }
 0xa3a   :  { %4416 = vmatpush.bf16.msra.mxu1 %v8315_v29  ;;  %v8430_v29 = vld [vmem:[#allocation41 + $0x40] sm:$0xf] }
 0xa3b   :  { %4253 = vmatmul.bf16.gmra.mxu0 %v11793_v25  ;;  %4291 = vmatmul.bf16.gmra.mxu2 %v11765_v54  ;;  %v8431_v50 = vor.u32 %v9783_v49, %v8430_v29  ;;  %v9823_v29 = vld [vmem:[#allocation41 + $0x18c] sm:$0xf0]  ;;  %v9789_v49 = vld [vmem:[#allocation41 + $0x84] sm:$0xf] }
 0xa3c   :  { %4396 = vmatpush.bf16.msrb.mxu0 %v8203_v7 }
 0xa3e   :  { %4417 = vmatpush.bf16.msra.mxu1 %v8299_v53  ;;  %v8398_v53 = vld [vmem:[#allocation41] sm:$0xf] }
 0xa40   :  { %4397 = vmatpush.bf16.msrb.mxu0 %v8187_v63  ;;  %v9801_v63 = vld [vmem:[#allocation41 + $0xe4] sm:$0xf] }
 0xa42   :  { %4418 = vmatpush.bf16.msra.mxu1 %v8283_v1 }
 0xa44   :  { %4398 = vmatpush.bf16.msrb.mxu0 %v8171_v48  ;;  %v8515_v48 = vor.u32 %v9801_v63, %v8512_v2  ;;  %v8448_v2 = vld [vmem:[#allocation41 + $0x70] sm:$0xf0] }
 0xa45   :  { %4343 = vmatmul.bf16.vlgmr.msrb.gmra.mxu1 %v11776_v14  ;;  %4381 = vmatmul.bf16.vlgmr.msrb.gmra.mxu3 %v11740_v22  ;;  %v8511_v22 = vor.u32 %v9803_v61, %v8510_v33  ;;  %v9797_v33 = vld [vmem:[#allocation41 + $0xc4] sm:$0xf] }
 0xa47   :  { %5248 = vmatpush.bf16.msra.mxu2 %v8511_v22  ;;  %v8496_v22 = vld [vmem:[#allocation41 + $0xd0] sm:$0xf0] }
 0xa48   :  { %4399 = vmatpush.bf16.msrb.mxu0 %v8155_v45  ;;  %v9831_v45 = vld [vmem:[#allocation41 + $0x1cc] sm:$0xf0]  ;;  %v8499_v46 = vor.u32 %v9797_v33, %v8496_v22 }
 0xa49   :  { %v8623_v61 = vor.u32 %v9831_v45, %v8622_v0  ;;  %v8558_v45 = vld [vmem:[#allocation41 + $0x140] sm:$0xf]  ;;  %v9815_v33 = vld [vmem:[#allocation41 + $0x14c] sm:$0xf0] }
 0xa4a   :  { %v8559_v22 = vor.u32 %v9815_v33, %v8558_v45  ;;  %v8766_v45 = vld [vmem:[#allocation41 + $0x2e0] sm:$0xf]  ;;  %v9867_v33 = vld [vmem:[#allocation41 + $0x2ec] sm:$0xf0] }
 0xa4b   :  { %4324 = vmatmul.bf16.vlgmr.msra.gmra.mxu0 %v11781_v57  ;;  %4362 = vmatmul.bf16.vlgmr.msrb.gmra.mxu2 %v11746_v40  ;;  %v8462_v40 = vld [vmem:[#allocation41 + $0x80] sm:$0xf] }
 0xa4c   :  { %5249 = vmatpush.bf16.msra.mxu2 %v8495_v17  ;;  %5268 = vmatpush.bf16.msra.mxu3 %v8623_v61  ;;  %v8606_v17 = vld [vmem:[#allocation41 + $0x1a0] sm:$0xf] }
 0xa50   :  { %5250 = vmatpush.bf16.msra.mxu2 %v8479_v28  ;;  %v8607_v28 = vor.u32 %v9827_v38, %v8606_v17  ;;  %v8432_v17 = vld [vmem:[#allocation41 + $0x50] sm:$0xf0] }
 0xa52   :  { %5269 = vmatpush.bf16.msra.mxu3 %v8607_v28 }
 0xa55   :  { %4348 = vmatmul.bf16.gmra.mxu1 %v11788_v18  ;;  %4386 = vmatmul.bf16.gmra.mxu3 %v11756_v19  ;;  %v9791_v19 = vld [vmem:[#allocation41 + $0x8c] sm:$0xf0] }
 0xa56   :  { %v8463_v42 = vor.u32 %v9791_v19, %v8462_v40  ;;  %v8480_v40 = vld [vmem:[#allocation41 + $0xb0] sm:$0xf0] }
 0xa57   :  { %v8483_v19 = vor.u32 %v9793_v11, %v8480_v40 }
 0xa58   :  { %5251 = vmatpush.bf16.msra.mxu2 %v8463_v42 }
 0xa5b   :  { %4329 = vmatmul.bf16.gmra.mxu0 %v11793_v25  ;;  %4367 = vmatmul.bf16.gmra.mxu2 %v11765_v54  ;;  %v9787_v54 = vld [vmem:[#allocation41 + $0x6c] sm:$0xf0] }
 0xa5c   :  { %v8447_v12 = vor.u32 %v9787_v54, %v8446_v41 }
 0xa5e   :  { %5252 = vmatpush.bf16.msra.mxu2 %v8447_v12  ;;  %v8590_v12 = vld [vmem:[#allocation41 + $0x180] sm:$0xf] }
 0xa62   :  { %5253 = vmatpush.bf16.msra.mxu2 %v8431_v50  ;;  %v8591_v50 = vor.u32 %v9823_v29, %v8590_v12  ;;  %v9777_v12 = vld [vmem:[#allocation41 + $0x24] sm:$0xf]  ;;  %v2592_v29 = vadd.f32 %v11678_v21, %v11682_v13 }
 0xa64   :  { %5270 = vmatpush.bf16.msra.mxu3 %v8591_v50  ;;  %v8416_v50 = vld [vmem:[#allocation41 + $0x30] sm:$0xf0] }
 0xa65   :  { %4419 = vmatmul.bf16.vlgmr.msra.gmra.mxu1 %v11776_v14  ;;  %v8414_v14 = vld [vmem:[#allocation41 + $0x20] sm:$0xf] }
 0xa66   :  { %v8415_v51 = vor.u32 %v9779_v27, %v8414_v14  ;;  %v8464_v14 = vld [vmem:[#allocation41 + $0x90] sm:$0xf0] }
 0xa68   :  { %v11814_v52 = vpop.f32.mrf.mxu3  ;;  %5254 = vmatpush.bf16.msra.mxu2 %v8415_v51  ;;  %v8467_v51 = vor.u32 %v9789_v49, %v8464_v14  ;;  %v8419_v14 = vor.u32 %v9777_v12, %v8416_v50  ;;  %v9863_v12 = vld [vmem:[#allocation41 + $0x2cc] sm:$0xf0]  ;;  %v8502_v50 = vld [vmem:[#allocation41 + $0xc8] sm:$0xf] }
 0xa6b   :  { %4400 = vmatmul.bf16.vlgmr.msrb.gmra.mxu0 %v11781_v57  ;;  %v8399_v57 = vor.u32 %v9775_v39, %v8398_v53 }
 0xa6d   :  { %5255 = vmatpush.bf16.msra.mxu2 %v8399_v57  ;;  %v8574_v57 = vld [vmem:[#allocation41 + $0x160] sm:$0xf] }
 0xa6e   :  { %v4135_v15 = vpop.f32.mrf.mxu2 }
 0xa6f   :  { %v4136_v42 = vadd.f32 %v4135_v15, %v11829_v56  ;;  %v9819_v15 = vld [vmem:[#allocation41 + $0x16c] sm:$0xf0] }
 0xa70   :  { %v11817_v7 = vpop.f32.mrf.mxu3  ;;  %v8575_v58 = vor.u32 %v9819_v15, %v8574_v57  ;;  %v8526_v57 = vld [vmem:[#allocation41 + $0x100] sm:$0xf]  ;;  %v9807_v15 = vld [vmem:[#allocation41 + $0x10c] sm:$0xf0] }
 0xa71   :  { %5324 = vmatpush.bf16.msrb.mxu2 %v8515_v48  ;;  %v4155_v53 = vadd.f32 %v11814_v52, %v4136_v42  ;;  %v8451_v48 = vor.u32 %v9785_v59, %v8448_v2  ;;  %v9811_v42 = vld [vmem:[#allocation41 + $0x12c] sm:$0xf0]  ;;  %v9773_v59 = vld [vmem:[#allocation41 + $0x4] sm:$0xf]  ;;  %v8527_v13 = vor.u32 %v9807_v15, %v8526_v57  ;;  %v9800_v57 = vld [vmem:[#allocation41 + $0xd4] sm:$0xf0] }
 0xa72   :  { %5271 = vmatpush.bf16.msra.mxu3 %v8575_v58  ;;  %v11872_v15 = vperm.slane %v11824_v37, 1 }
 0xa75   :  { %4424 = vmatmul.bf16.gmra.mxu1 %v11788_v18  ;;  %5325 = vmatpush.bf16.msrb.mxu2 %v8499_v46  ;;  %v9781_v46 = vld [vmem:[#allocation41 + $0x44] sm:$0xf] }
 0xa76   :  { %v4137_v8 = vpop.f32.mrf.mxu2  ;;  %5272 = vmatpush.bf16.msra.mxu3 %v8559_v22 }
 0xa77   :  { %v4138_v30 = vadd.f32 %v4137_v8, %v11829_v56  ;;  %v8435_v8 = vor.u32 %v9781_v46, %v8432_v17  ;;  %v8767_v46 = vor.u32 %v9867_v33, %v8766_v45  ;;  %v8640_v17 = vld [vmem:[#allocation41 + $0x1f0] sm:$0xf0] }
 0xa78   :  { %v11821_v1 = vpop.f32.mrf.mxu3 }
 0xa79   :  { %5326 = vmatpush.bf16.msrb.mxu2 %v8483_v19  ;;  %v4157_v52 = vadd.f32 %v11817_v7, %v4138_v30  ;;  %v8542_v19 = vld [vmem:[#allocation41 + $0x120] sm:$0xf]  ;;  %5286 = vmatpush.bf16.msra.mxu0 %v8767_v46 }
 0xa7a   :  { %v8543_v49 = vor.u32 %v9811_v42, %v8542_v19  ;;  %v8750_v42 = vld [vmem:[#allocation41 + $0x2c0] sm:$0xf] }
 0xa7b   :  { %4405 = vmatmul.bf16.gmra.mxu0 %v11793_v25 }
 0xa7c   :  { %5273 = vmatpush.bf16.msra.mxu3 %v8543_v49  ;;  %v8624_v49 = vld [vmem:[#allocation41 + $0x1d0] sm:$0xf0] }
 0xa7d   :  { %5327 = vmatpush.bf16.msrb.mxu2 %v8467_v51 }
 0xa7e   :  { %v11826_v18 = vpop.f32.mrf.mxu2 }
 0xa80   :  { %v11832_v41 = vpop.f32.mrf.mxu3  ;;  %5274 = vmatpush.bf16.msra.mxu3 %v8527_v13  ;;  %v8503_v13 = vor.u32 %v9800_v57, %v8502_v50  ;;  %v8702_v57 = vld [vmem:[#allocation41 + $0x260] sm:$0xf] }
 0xa81   :  { %5328 = vmatpush.bf16.msrb.mxu2 %v8451_v48 }
 0xa82   :  { %v4192_v25 = vpop.f32.mrf.mxu1 }
 0xa85   :  { %5329 = vmatpush.bf16.msrb.mxu2 %v8435_v8  ;;  %v9804_v8 = vld [vmem:[#allocation41 + $0xf4] sm:$0xf0] }
 0xa86   :  { %v11834_v54 = vpop.f32.mrf.mxu2 }
 0xa88   :  { %v4173_v27 = vpop.f32.mrf.mxu0  ;;  %v11841_v38 = vpop.f32.mrf.mxu3 }
 0xa89   :  { %v4174_v63 = vadd.f32 %v4173_v27, %v4155_v53  ;;  %v4141_v27 = vadd.f32 %v11826_v18, %v11829_v56  ;;  %5330 = vmatpush.bf16.msrb.mxu2 %v8419_v14 }
 0xa8a   :  { %v4194_v39 = vpop.f32.mrf.mxu1 }
 0xa8b   :  { %v4193_v61 = vadd.f32 %v4192_v25, %v4174_v63  ;;  %v4160_v58 = vadd.f32 %v11821_v1, %v4141_v27 }
 0xa8d   :  { %v11846_v25 = vadd.f32 %v4193_v61, %v11674_v35  ;;  %v9833_v61 = vld [vmem:[#allocation41 + $0x1e4] sm:$0xf] }
 0xa8e   :  { %v11838_v0 = vpop.f32.mrf.mxu2 }
 0xa8f   :  { %v4446_v21 = vmax.f32 %v11846_v25, 0.0 }
 0xa90   :  { %v4175_v11 = vpop.f32.mrf.mxu0  ;;  %v11863_v2 = vpop.f32.mrf.mxu3 }
 0xa91   :  { %v4176_v28 = vadd.f32 %v4175_v11, %v4157_v52  ;;  %v4143_v52 = vadd.f32 %v11834_v54, %v11829_v56  ;;  %v8518_v11 = vld [vmem:[#allocation41 + $0xe8] sm:$0xf]  ;;  %v8751_v54 = vor.u32 %v9863_v12, %v8750_v42 }
 0xa92   :  { %v4197_v40 = vpop.f32.mrf.mxu1  ;;  %v8519_v1 = vor.u32 %v9804_v8, %v8518_v11  ;;  %v4212_v8 = vadd.f32 %v11838_v0, %v11872_v15  ;;  %v9792_v0 = vld [vmem:[#allocation41 + $0x94] sm:$0xf0] }
 0xa93   :  { %v4195_v7 = vadd.f32 %v4194_v39, %v4176_v28  ;;  %v8400_v39 = vld [vmem:[#allocation41 + $0x10] sm:$0xf0]  ;;  %v8643_v28 = vor.u32 %v9833_v61, %v8640_v17  ;;  %v4162_v56 = vadd.f32 %v11832_v41, %v4143_v52  ;;  %5287 = vmatpush.bf16.msra.mxu0 %v8751_v54  ;;  %v2598_v41 = vadd.f32 %v11690_v43, %v11694_v47  ;;  %v8486_v52 = vld [vmem:[#allocation41 + $0xa8] sm:$0xf]  ;;  %v8718_v43 = vld [vmem:[#allocation41 + $0x280] sm:$0xf] }
 0xa94   :  { %v8403_v63 = vor.u32 %v9773_v59, %v8400_v39  ;;  %v8608_v61 = vld [vmem:[#allocation41 + $0x1b0] sm:$0xf0]  ;;  %v9821_v47 = vld [vmem:[#allocation41 + $0x184] sm:$0xf] }
 0xa95   :  { %v11850_v51 = vadd.f32 %v4195_v7, %v2592_v29  ;;  %5343 = vmatpush.bf16.msrb.mxu3 %v8643_v28  ;;  %v9829_v29 = vld [vmem:[#allocation41 + $0x1c4] sm:$0xf] }
 0xa96   :  { %v11852_v53 = vpop.f32.mrf.mxu2  ;;  %5331 = vmatpush.bf16.msrb.mxu2 %v8403_v63  ;;  %v8627_v27 = vor.u32 %v9829_v29, %v8624_v49  ;;  %v9859_v63 = vld [vmem:[#allocation41 + $0x2ac] sm:$0xf0]  ;;  %v8592_v29 = vld [vmem:[#allocation41 + $0x190] sm:$0xf0]  ;;  %v4231_v49 = vadd.f32 %v11841_v38, %v4212_v8 }
 0xa97   :  { %v4450_v35 = vmax.f32 %v11850_v51, 0.0  ;;  %v8595_v54 = vor.u32 %v9821_v47, %v8592_v29  ;;  %v8438_v29 = vld [vmem:[#allocation41 + $0x48] sm:$0xf] }
 0xa98   :  { %v4178_v30 = vpop.f32.mrf.mxu0  ;;  %v11879_v46 = vpop.f32.mrf.mxu3 }
 0xa99   :  { %v11860_v18 = vpack.c.bf16 %v4450_v35, %v4446_v21  ;;  %v4179_v22 = vadd.f32 %v4178_v30, %v4160_v58  ;;  %5344 = vmatpush.bf16.msrb.mxu3 %v8627_v27  ;;  %v8734_v30 = vld [vmem:[#allocation41 + $0x2a0] sm:$0xf]  ;;  %v9825_v58 = vld [vmem:[#allocation41 + $0x1a4] sm:$0xf] }
 0xa9a   :  { %v4199_v48 = vpop.f32.mrf.mxu1  ;;  %v8735_v33 = vor.u32 %v9859_v63, %v8734_v30  ;;  %v8611_v17 = vor.u32 %v9825_v58, %v8608_v61  ;;  %v4214_v30 = vadd.f32 %v11852_v53, %v11872_v15  ;;  %v8576_v58 = vld [vmem:[#allocation41 + $0x170] sm:$0xf0] }
 0xa9b   :  { %5256 = vmatmul.bf16.vlgmr.msra.gmra.mxu2 %v11860_v18  ;;  %v4198_v7 = vadd.f32 %v4197_v40, %v4179_v22  ;;  %v9796_v22 = vld [vmem:[#allocation41 + $0xb4] sm:$0xf0] }
 0xa9c   :  { %5400 = vmatpush.bf16.msra.mxu2 %v8519_v1  ;;  %v8487_v11 = vor.u32 %v9796_v22, %v8486_v52  ;;  %5288 = vmatpush.bf16.msra.mxu0 %v8735_v33  ;;  %v8686_v22 = vld [vmem:[#allocation41 + $0x240] sm:$0xf]  ;;  %v4233_v8 = vadd.f32 %v11863_v2, %v4214_v30  ;;  %v2650_v2 = vadd.f32 %v11676_v10, %v11680_v32  ;;  %v9839_v10 = vld [vmem:[#allocation41 + $0x20c] sm:$0xf0]  ;;  %v9805_v32 = vld [vmem:[#allocation41 + $0x104] sm:$0xf] }
 0xa9d   :  { %v11877_v40 = vadd.f32 %v4198_v7, %v11688_v6  ;;  %5345 = vmatpush.bf16.msrb.mxu3 %v8611_v17  ;;  %v9855_v6 = vld [vmem:[#allocation41 + $0x28c] sm:$0xf0]  ;;  %v8470_v7 = vld [vmem:[#allocation41 + $0x88] sm:$0xf] }
 0xa9e   :  { %v11868_v19 = vpop.f32.mrf.mxu2  ;;  %v8719_v12 = vor.u32 %v9855_v6, %v8718_v43  ;;  %v9847_v17 = vld [vmem:[#allocation41 + $0x24c] sm:$0xf0]  ;;  %v9813_v43 = vld [vmem:[#allocation41 + $0x144] sm:$0xf]  ;;  %v8560_v6 = vld [vmem:[#allocation41 + $0x150] sm:$0xf0] }
 0xa9f   :  { %v8687_v53 = vor.u32 %v9847_v17, %v8686_v22  ;;  %v8654_v22 = vld [vmem:[#allocation41 + $0x200] sm:$0xf] }
 0xaa0   :  { %v4180_v14 = vpop.f32.mrf.mxu0  ;;  %5401 = vmatpush.bf16.msra.mxu2 %v8503_v13  ;;  %5289 = vmatpush.bf16.msra.mxu0 %v8719_v12  ;;  %v9817_v13 = vld [vmem:[#allocation41 + $0x164] sm:$0xf]  ;;  %v11899_v52 = vpop.f32.mrf.mxu3  ;;  %v8563_v12 = vor.u32 %v9813_v43, %v8560_v6  ;;  %v8655_v17 = vor.u32 %v9839_v10, %v8654_v22 }
 0xaa1   :  { %v4181_v59 = vadd.f32 %v4180_v14, %v4162_v56  ;;  %v8471_v14 = vor.u32 %v9792_v0, %v8470_v7  ;;  %5346 = vmatpush.bf16.msrb.mxu3 %v8595_v54  ;;  %v8579_v33 = vor.u32 %v9817_v13, %v8576_v58  ;;  %v9784_v7 = vld [vmem:[#allocation41 + $0x54] sm:$0xf0]  ;;  %v9861_v22 = vld [vmem:[#allocation41 + $0x2c4] sm:$0xf] }
 0xaa2   :  { %v4268_v39 = vpop.f32.mrf.mxu1  ;;  %v8439_v0 = vor.u32 %v9784_v7, %v8438_v29  ;;  %v9780_v58 = vld [vmem:[#allocation41 + $0x34] sm:$0xf0] }
 0xaa3   :  { %v4200_v45 = vadd.f32 %v4199_v48, %v4181_v59  ;;  %v4454_v48 = vmax.f32 %v11877_v40, 0.0  ;;  %v9851_v59 = vld [vmem:[#allocation41 + $0x26c] sm:$0xf0] }
 0xaa4   :  { %5402 = vmatpush.bf16.msra.mxu2 %v8487_v11  ;;  %v8703_v38 = vor.u32 %v9851_v59, %v8702_v57  ;;  %v9843_v57 = vld [vmem:[#allocation41 + $0x22c] sm:$0xf0] }
 0xaa5   :  { %v11883_v28 = vadd.f32 %v4200_v45, %v2598_v41  ;;  %v8454_v41 = vld [vmem:[#allocation41 + $0x68] sm:$0xf]  ;;  %v9788_v45 = vld [vmem:[#allocation41 + $0x74] sm:$0xf0]  ;;  %5347 = vmatpush.bf16.msrb.mxu3 %v8579_v33  ;;  %v4217_v33 = vadd.f32 %v11868_v19, %v11872_v15 }
 0xaa6   :  { %v11887_v42 = vpop.f32.mrf.mxu2  ;;  %v8455_v61 = vor.u32 %v9788_v45, %v8454_v41  ;;  %5290 = vmatpush.bf16.msra.mxu0 %v8703_v38  ;;  %v8422_v38 = vld [vmem:[#allocation41 + $0x28] sm:$0xf]  ;;  %v9776_v19 = vld [vmem:[#allocation41 + $0x14] sm:$0xf0] }
 0xaa7   :  { %v4458_v1 = vmax.f32 %v11883_v28, 0.0  ;;  %v8423_v45 = vor.u32 %v9780_v58, %v8422_v38 }
 0xaa8   :  { %v4249_v56 = vpop.f32.mrf.mxu0  ;;  %5403 = vmatpush.bf16.msra.mxu2 %v8471_v14  ;;  %v8670_v14 = vld [vmem:[#allocation41 + $0x220] sm:$0xf] }
 0xaa9   :  { %v11894_v50 = vpack.c.bf16 %v4458_v1, %v4454_v48  ;;  %v4250_v63 = vadd.f32 %v4249_v56, %v4231_v49  ;;  %5348 = vmatpush.bf16.msrb.mxu3 %v8563_v12  ;;  %v8671_v30 = vor.u32 %v9843_v57, %v8670_v14  ;;  %v4236_v12 = vadd.f32 %v11879_v46, %v4217_v33  ;;  %v9865_v14 = vld [vmem:[#allocation41 + $0x2e4] sm:$0xf]  ;;  %v8646_v46 = vld [vmem:[#allocation41 + $0x1e8] sm:$0xf] }
 0xaaa   :  { %v4270_v27 = vpop.f32.mrf.mxu1  ;;  %5291 = vmatpush.bf16.msra.mxu0 %v8687_v53  ;;  %v11915_v53 = vpop.f32.mrf.mxu3  ;;  %v4219_v57 = vadd.f32 %v11887_v42, %v11872_v15  ;;  %v8878_v15 = vld [vmem:[#allocation41 + $0x3c0] sm:$0xf]  ;;  %v9895_v42 = vld [vmem:[#allocation41 + $0x3cc] sm:$0xf0] }
 0xaab   :  { %5261 = vmatmul.bf16.gmra.mxu2 %v11894_v50  ;;  %v4269_v11 = vadd.f32 %v4268_v39, %v4250_v63  ;;  %v9809_v39 = vld [vmem:[#allocation41 + $0x124] sm:$0xf]  ;;  %v8544_v63 = vld [vmem:[#allocation41 + $0x130] sm:$0xf0] }
 0xaac   :  { %5404 = vmatpush.bf16.msra.mxu2 %v8455_v61  ;;  %v8547_v41 = vor.u32 %v9809_v39, %v8544_v63  ;;  %v9836_v63 = vld [vmem:[#allocation41 + $0x1f4] sm:$0xf0] }
 0xaad   :  { %v11907_v59 = vadd.f32 %v4269_v11, %v11672_v23  ;;  %v8528_v11 = vld [vmem:[#allocation41 + $0x110] sm:$0xf0]  ;;  %v8647_v58 = vor.u32 %v9836_v63, %v8646_v46  ;;  %v9857_v46 = vld [vmem:[#allocation41 + $0x2a4] sm:$0xf] }
 0xaae   :  { %v11902_v56 = vpop.f32.mrf.mxu2  ;;  %5292 = vmatpush.bf16.msra.mxu0 %v8671_v30  ;;  %5349 = vmatpush.bf16.msrb.mxu3 %v8547_v41  ;;  %v8531_v6 = vor.u32 %v9805_v32, %v8528_v11  ;;  %v8768_v30 = vld [vmem:[#allocation41 + $0x2f0] sm:$0xf0]  ;;  %v9802_v41 = vld [vmem:[#allocation41 + $0xec] sm:$0xf]  ;;  %v4238_v32 = vadd.f32 %v11899_v52, %v4219_v57 }
 0xaaf   :  { %v12414_v23 = vmax.f32 %v11907_v59, 0.0  ;;  %v8771_v38 = vor.u32 %v9865_v14, %v8768_v30  ;;  %v8752_v11 = vld [vmem:[#allocation41 + $0x2d0] sm:$0xf0]  ;;  %v9891_v30 = vld [vmem:[#allocation41 + $0x3ac] sm:$0xf0] }
 0xab0   :  { %v4251_v47 = vpop.f32.mrf.mxu0  ;;  %5405 = vmatpush.bf16.msra.mxu2 %v8439_v0  ;;  %v9899_v0 = vld [vmem:[#allocation41 + $0x3ec] sm:$0xf0] }
 0xab1   :  { %v4252_v54 = vadd.f32 %v4251_v47, %v4233_v8  ;;  %v8406_v8 = vld [vmem:[#allocation41 + $0x8] sm:$0xf] }
 0xab2   :  { %v4273_v49 = vpop.f32.mrf.mxu1  ;;  %5293 = vmatpush.bf16.msra.mxu0 %v8655_v17  ;;  %v8407_v29 = vor.u32 %v9776_v19, %v8406_v8  ;;  %5350 = vmatpush.bf16.msrb.mxu3 %v8531_v6  ;;  %v8879_v17 = vor.u32 %v9895_v42, %v8878_v15  ;;  %v8630_v8 = vld [vmem:[#allocation41 + $0x1c8] sm:$0xf]  ;;  %v8755_v6 = vor.u32 %v9861_v22, %v8752_v11  ;;  %v9832_v19 = vld [vmem:[#allocation41 + $0x1d4] sm:$0xf0]  ;;  %v11936_v52 = vpop.f32.mrf.mxu3  ;;  %v8488_v42 = vld [vmem:[#allocation41 + $0xb8] sm:$0xf0] }
 0xab3   :  { %v4271_v13 = vadd.f32 %v4270_v27, %v4252_v54  ;;  %v8894_v54 = vld [vmem:[#allocation41 + $0x3e0] sm:$0xf]  ;;  %v8631_v14 = vor.u32 %v9832_v19, %v8630_v8  ;;  %v9853_v11 = vld [vmem:[#allocation41 + $0x284] sm:$0xf]  ;;  %v8720_v19 = vld [vmem:[#allocation41 + $0x290] sm:$0xf0] }
 0xab4   :  { %5406 = vmatpush.bf16.msra.mxu2 %v8423_v45  ;;  %v8520_v45 = vld [vmem:[#allocation41 + $0xf8] sm:$0xf0] }
 0xab5   :  { %v11911_v61 = vadd.f32 %v4271_v13, %v2650_v2  ;;  %v8895_v13 = vor.u32 %v9899_v0, %v8894_v54  ;;  %v8523_v33 = vor.u32 %v9802_v41, %v8520_v45  ;;  %v11932_v54 = vperm.slane %v11824_v37, 2  ;;  %v8736_v41 = vld [vmem:[#allocation41 + $0x2b0] sm:$0xf0]  ;;  %v8614_v45 = vld [vmem:[#allocation41 + $0x1a8] sm:$0xf] }
 0xab6   :  { %v11926_v39 = vpop.f32.mrf.mxu2  ;;  %5362 = vmatpush.bf16.msrb.mxu0 %v8771_v38  ;;  %v8739_v15 = vor.u32 %v9857_v46, %v8736_v41  ;;  %v9883_v41 = vld [vmem:[#allocation41 + $0x36c] sm:$0xf0] }
 0xab7   :  { %v12415_v27 = vmax.f32 %v11911_v61, 0.0  ;;  %5305 = vmatpush.bf16.msrb.mxu1 %v8895_v13  ;;  %v4288_v22 = vadd.f32 %v11902_v56, %v11932_v54 }
 0xab8   :  { %v4254_v43 = vpop.f32.mrf.mxu0  ;;  %5407 = vmatpush.bf16.msra.mxu2 %v8407_v29  ;;  %v8504_v29 = vld [vmem:[#allocation41 + $0xd8] sm:$0xf0] }
 0xab9   :  { %v11921_v47 = vpack.c.bf16 %v12415_v27, %v12414_v23  ;;  %v4255_v2 = vadd.f32 %v4254_v43, %v4236_v12  ;;  %v9798_v12 = vld [vmem:[#allocation41 + $0xcc] sm:$0xf] }
 0xaba   :  { %v4275_v7 = vpop.f32.mrf.mxu1  ;;  %v8507_v13 = vor.u32 %v9798_v12, %v8504_v29  ;;  %5363 = vmatpush.bf16.msrb.mxu0 %v8755_v6  ;;  %v8598_v12 = vld [vmem:[#allocation41 + $0x188] sm:$0xf]  ;;  %v8723_v29 = vor.u32 %v9853_v11, %v8720_v19  ;;  %v8456_v11 = vld [vmem:[#allocation41 + $0x78] sm:$0xf0]  ;;  %v9879_v19 = vld [vmem:[#allocation41 + $0x34c] sm:$0xf0] }
 0xabb   :  { %5275 = vmatmul.bf16.vlgmr.msra.gmra.mxu3 %v11921_v47  ;;  %5332 = vmatmul.bf16.vlgmr.msrb.gmra.mxu2 %v11860_v18  ;;  %v4274_v10 = vadd.f32 %v4273_v49, %v4255_v2  ;;  %v2656_v49 = vadd.f32 %v11686_v31, %v11692_v44  ;;  %v8862_v2 = vld [vmem:[#allocation41 + $0x3a0] sm:$0xf]  ;;  %v9794_v44 = vld [vmem:[#allocation41 + $0xac] sm:$0xf] }
 0xabc   :  { %5419 = vmatpush.bf16.msra.mxu3 %v8647_v58  ;;  %5476 = vmatpush.bf16.msrb.mxu2 %v8523_v33  ;;  %v8863_v58 = vor.u32 %v9891_v30, %v8862_v2  ;;  %v9828_v33 = vld [vmem:[#allocation41 + $0x1b4] sm:$0xf0] }
 0xabd   :  { %5306 = vmatpush.bf16.msrb.mxu1 %v8879_v17  ;;  %v11941_v63 = vadd.f32 %v4274_v10, %v11684_v20  ;;  %v8615_v31 = vor.u32 %v9828_v33, %v8614_v45  ;;  %v8491_v20 = vor.u32 %v9794_v44, %v8488_v42  ;;  %v9887_v10 = vld [vmem:[#allocation41 + $0x38c] sm:$0xf0]  ;;  %v9849_v45 = vld [vmem:[#allocation41 + $0x264] sm:$0xf]  ;;  %v4290_v33 = vadd.f32 %v11926_v39, %v11932_v54  ;;  %v8582_v44 = vld [vmem:[#allocation41 + $0x168] sm:$0xf] }
 0xabe   :  { %5364 = vmatpush.bf16.msrb.mxu0 %v8739_v15  ;;  %v9820_v42 = vld [vmem:[#allocation41 + $0x174] sm:$0xf0]  ;;  %v8814_v39 = vld [vmem:[#allocation41 + $0x340] sm:$0xf] }
 0xabf   :  { %v4455_v8 = vmax.f32 %v11941_v63, 0.0 }
 0xac0   :  { %v4256_v43 = vpop.f32.mrf.mxu0  ;;  %5420 = vmatpush.bf16.msra.mxu3 %v8631_v14  ;;  %5477 = vmatpush.bf16.msrb.mxu2 %v8507_v13  ;;  %v9790_v14 = vld [vmem:[#allocation41 + $0x8c] sm:$0xf]  ;;  %v8472_v13 = vld [vmem:[#allocation41 + $0x98] sm:$0xf0] }
 0xac1   :  { %v4257_v0 = vadd.f32 %v4256_v43, %v4238_v32  ;;  %v11945_v32 = vpop.f32.mrf.mxu2  ;;  %5307 = vmatpush.bf16.msrb.mxu1 %v8863_v58  ;;  %v8830_v58 = vld [vmem:[#allocation41 + $0x360] sm:$0xf] }
 0xac2   :  { %v11938_v57 = vpop.f32.mrf.mxu1  ;;  %5365 = vmatpush.bf16.msrb.mxu0 %v8723_v29 }
 0xac3   :  { %v4276_v38 = vadd.f32 %v4275_v7, %v4257_v0  ;;  %v8846_v7 = vld [vmem:[#allocation41 + $0x380] sm:$0xf]  ;;  %v9824_v0 = vld [vmem:[#allocation41 + $0x194] sm:$0xf0] }
 0xac4   :  { %5421 = vmatpush.bf16.msra.mxu3 %v8615_v31  ;;  %5478 = vmatpush.bf16.msrb.mxu2 %v8491_v20  ;;  %v8847_v6 = vor.u32 %v9887_v10, %v8846_v7  ;;  %v8599_v30 = vor.u32 %v9824_v0, %v8598_v12  ;;  %v8704_v31 = vld [vmem:[#allocation41 + $0x270] sm:$0xf0]  ;;  %v8583_v7 = vor.u32 %v9820_v42, %v8582_v44  ;;  %v9786_v10 = vld [vmem:[#allocation41 + $0x6c] sm:$0xf]  ;;  %v9845_v12 = vld [vmem:[#allocation41 + $0x244] sm:$0xf] }
 0xac5   :  { %v11947_v17 = vadd.f32 %v4276_v38, %v2656_v49  ;;  %v4307_v49 = vadd.f32 %v11915_v53, %v4288_v22  ;;  %v8475_v38 = vor.u32 %v9790_v14, %v8472_v13  ;;  %v8831_v53 = vor.u32 %v9883_v41, %v8830_v58  ;;  %v11962_v22 = vpop.f32.mrf.mxu3  ;;  %v8688_v13 = vld [vmem:[#allocation41 + $0x250] sm:$0xf0]  ;;  %v9816_v58 = vld [vmem:[#allocation41 + $0x154] sm:$0xf0]  ;;  %v9782_v41 = vld [vmem:[#allocation41 + $0x4c] sm:$0xf] }
 0xac6   :  { %5308 = vmatpush.bf16.msrb.mxu1 %v8847_v6  ;;  %v8707_v20 = vor.u32 %v9849_v45, %v8704_v31  ;;  %v8459_v6 = vor.u32 %v9786_v10, %v8456_v11  ;;  %v4309_v0 = vadd.f32 %v11936_v52, %v4290_v33  ;;  %v8815_v14 = vor.u32 %v9879_v19, %v8814_v39  ;;  %v8440_v45 = vld [vmem:[#allocation41 + $0x58] sm:$0xf0]  ;;  %v9841_v52 = vld [vmem:[#allocation41 + $0x224] sm:$0xf]  ;;  %v8672_v11 = vld [vmem:[#allocation41 + $0x230] sm:$0xf0] }
 0xac7   :  { %v12416_v43 = vmax.f32 %v11947_v17, 0.0  ;;  %v8443_v44 = vor.u32 %v9782_v41, %v8440_v45  ;;  %v2708_v33 = vadd.f32 %v11702_v4, %v11706_v24  ;;  %v9812_v39 = vld [vmem:[#allocation41 + $0x134] sm:$0xf0]  ;;  %v8675_v19 = vor.u32 %v9841_v52, %v8672_v11  ;;  %v8782_v24 = vld [vmem:[#allocation41 + $0x300] sm:$0xf] }
 0xac8   :  { %v4325_v56 = vpop.f32.mrf.mxu0  ;;  %5422 = vmatpush.bf16.msra.mxu3 %v8599_v30  ;;  %5479 = vmatpush.bf16.msrb.mxu2 %v8475_v38  ;;  %v8691_v38 = vor.u32 %v9845_v12, %v8688_v13  ;;  %v4293_v13 = vadd.f32 %v11945_v32, %v11932_v54  ;;  %v8656_v41 = vld [vmem:[#allocation41 + $0x210] sm:$0xf0]  ;;  %v8534_v45 = vld [vmem:[#allocation41 + $0x108] sm:$0xf] }
 0xac9   :  { %v11956_v2 = vpack.c.bf16 %v12416_v43, %v4455_v8  ;;  %v4326_v15 = vadd.f32 %v4325_v56, %v4307_v49  ;;  %5366 = vmatpush.bf16.msrb.mxu0 %v8707_v20  ;;  %v11964_v56 = vpop.f32.mrf.mxu2  ;;  %v8566_v49 = vld [vmem:[#allocation41 + $0x148] sm:$0xf] }
 0xaca   :  { %v4346_v46 = vpop.f32.mrf.mxu1  ;;  %5309 = vmatpush.bf16.msrb.mxu1 %v8831_v53  ;;  %v8567_v31 = vor.u32 %v9816_v58, %v8566_v49 }
 0xacb   :  { %5280 = vmatmul.bf16.gmra.mxu3 %v11956_v2  ;;  %5337 = vmatmul.bf16.gmra.mxu2 %v11894_v50  ;;  %v4345_v29 = vadd.f32 %v11938_v57, %v4326_v15  ;;  %v8798_v57 = vld [vmem:[#allocation41 + $0x320] sm:$0xf]  ;;  %v9875_v15 = vld [vmem:[#allocation41 + $0x32c] sm:$0xf0] }
 0xacc   :  { %5423 = vmatpush.bf16.msra.mxu3 %v8583_v7  ;;  %5480 = vmatpush.bf16.msrb.mxu2 %v8459_v6  ;;  %v8799_v10 = vor.u32 %v9875_v15, %v8798_v57  ;;  %v8550_v6 = vld [vmem:[#allocation41 + $0x128] sm:$0xf]  ;;  %v8408_v57 = vld [vmem:[#allocation41 + $0x18] sm:$0xf0] }
 0xacd   :  { %5367 = vmatpush.bf16.msrb.mxu0 %v8691_v38  ;;  %v11973_v20 = vadd.f32 %v4345_v29, %v11700_v62  ;;  %v8551_v12 = vor.u32 %v9812_v39, %v8550_v6  ;;  %v4313_v62 = vpop.f32.mrf.mxu3  ;;  %v9837_v29 = vld [vmem:[#allocation41 + $0x204] sm:$0xf]  ;;  %v8896_v39 = vld [vmem:[#allocation41 + $0x3f0] sm:$0xf0] }
 0xace   :  { %5310 = vmatpush.bf16.msrb.mxu1 %v8815_v14  ;;  %v8424_v14 = vld [vmem:[#allocation41 + $0x38] sm:$0xf0]  ;;  %v8659_v32 = vor.u32 %v9837_v29, %v8656_v41  ;;  %v9897_v6 = vld [vmem:[#allocation41 + $0x3e4] sm:$0xf] }
 0xacf   :  { %v9893_v29 = vld [vmem:[#allocation41 + $0x3c4] sm:$0xf] }
 0xad0   :  { %v4327_v30 = vpop.f32.mrf.mxu0  ;;  %5424 = vmatpush.bf16.msra.mxu3 %v8567_v31  ;;  %5481 = vmatpush.bf16.msrb.mxu2 %v8443_v44  ;;  %v9808_v31 = vld [vmem:[#allocation41 + $0x114] sm:$0xf0]  ;;  %v9774_v44 = vld [vmem:[#allocation41 + $0xc] sm:$0xf] }
 0xad1   :  { %v4328_v53 = vadd.f32 %v4327_v30, %v4309_v0  ;;  %v9778_v0 = vld [vmem:[#allocation41 + $0x2c] sm:$0xf]  ;;  %5368 = vmatpush.bf16.msrb.mxu0 %v8675_v19  ;;  %v12406_v30 = vmax.f32 %v11973_v20, 0.0  ;;  %v4363_v15 = vpop.f32.mrf.mxu2  ;;  %v8411_v11 = vor.u32 %v9774_v44, %v8408_v57  ;;  %v8774_v19 = vld [vmem:[#allocation41 + $0x2e8] sm:$0xf] }
 0xad2   :  { %v11968_v42 = vpop.f32.mrf.mxu1  ;;  %5311 = vmatpush.bf16.msrb.mxu1 %v8799_v10  ;;  %v8427_v4 = vor.u32 %v9778_v0, %v8424_v14  ;;  %v8899_v14 = vor.u32 %v9897_v6, %v8896_v39  ;;  %v9889_v39 = vld [vmem:[#allocation41 + $0x3a4] sm:$0xf] }
 0xad3   :  { %v4347_v7 = vadd.f32 %v4346_v46, %v4328_v53  ;;  %v9871_v46 = vld [vmem:[#allocation41 + $0x30c] sm:$0xf0] }
 0xad4   :  { %v8783_v58 = vor.u32 %v9871_v46, %v8782_v24  ;;  %5425 = vmatpush.bf16.msra.mxu3 %v8551_v12  ;;  %5482 = vmatpush.bf16.msrb.mxu2 %v8427_v4  ;;  %v4295_v12 = vadd.f32 %v11964_v56, %v11932_v54  ;;  %v9868_v4 = vld [vmem:[#allocation41 + $0x2f4] sm:$0xf0]  ;;  %v9834_v24 = vld [vmem:[#allocation41 + $0x1ec] sm:$0xf]  ;;  %v8880_v54 = vld [vmem:[#allocation41 + $0x3d0] sm:$0xf0] }
 0xad5   :  { %v11977_v49 = vadd.f32 %v4347_v7, %v2708_v33  ;;  %v4312_v33 = vadd.f32 %v11962_v22, %v4293_v13  ;;  %v8535_v7 = vor.u32 %v9808_v31, %v8534_v45  ;;  %5369 = vmatpush.bf16.msrb.mxu0 %v8659_v32  ;;  %v8648_v22 = vld [vmem:[#allocation41 + $0x1f8] sm:$0xf0]  ;;  %v8775_v13 = vor.u32 %v9868_v4, %v8774_v19  ;;  %v8758_v56 = vld [vmem:[#allocation41 + $0x2c8] sm:$0xf]  ;;  %v9830_v32 = vld [vmem:[#allocation41 + $0x1cc] sm:$0xf]  ;;  %v4382_v31 = vpop.f32.mrf.mxu3 }
 0xad6   :  { %5312 = vmatpush.bf16.msrb.mxu1 %v8783_v58  ;;  %v8651_v46 = vor.u32 %v9834_v24, %v8648_v22  ;;  %v4314_v41 = vadd.f32 %v4313_v62, %v4295_v12  ;;  %v8883_v45 = vor.u32 %v9893_v29, %v8880_v54  ;;  %v8864_v19 = vld [vmem:[#allocation41 + $0x3b0] sm:$0xf0]  ;;  %v9860_v24 = vld [vmem:[#allocation41 + $0x2b4] sm:$0xf0]  ;;  %v8616_v22 = vld [vmem:[#allocation41 + $0x1b8] sm:$0xf0] }
 0xad7   :  { %v12407_v38 = vmax.f32 %v11977_v49, 0.0  ;;  %v8867_v4 = vor.u32 %v9889_v39, %v8864_v19  ;;  %v9881_v39 = vld [vmem:[#allocation41 + $0x364] sm:$0xf]  ;;  %v8832_v19 = vld [vmem:[#allocation41 + $0x370] sm:$0xf0] }
 0xad8   :  { %v4330_v53 = vpop.f32.mrf.mxu0  ;;  %5426 = vmatpush.bf16.msra.mxu3 %v8535_v7  ;;  %5483 = vmatpush.bf16.msrb.mxu2 %v8411_v11  ;;  %v11995_v7 = vperm.slane %v11824_v37, 3  ;;  %v9826_v37 = vld [vmem:[#allocation41 + $0x1ac] sm:$0xf] }
 0xad9   :  { %v11985_v52 = vpack.c.bf16 %v12407_v38, %v12406_v30  ;;  %v4331_v0 = vadd.f32 %v4330_v53, %v4312_v33  ;;  %v9864_v53 = vld [vmem:[#allocation41 + $0x2d4] sm:$0xf0]  ;;  %v8632_v33 = vld [vmem:[#allocation41 + $0x1d8] sm:$0xf0]  ;;  %v4365_v62 = vpop.f32.mrf.mxu2  ;;  %v8619_v29 = vor.u32 %v9826_v37, %v8616_v22  ;;  %v9869_v30 = vld [vmem:[#allocation41 + $0x304] sm:$0xf] }
 0xada   :  { %v4351_v10 = vpop.f32.mrf.mxu1  ;;  %5381 = vmatpush.bf16.msra.mxu1 %v8899_v14  ;;  %v8759_v57 = vor.u32 %v9864_v53, %v8758_v56  ;;  %v8635_v6 = vor.u32 %v9830_v32, %v8632_v33  ;;  %v8742_v14 = vld [vmem:[#allocation41 + $0x2a8] sm:$0xf]  ;;  %v4364_v54 = vadd.f32 %v4363_v15, %v11995_v7  ;;  %v9822_v53 = vld [vmem:[#allocation41 + $0x18c] sm:$0xf]  ;;  %v8584_v37 = vld [vmem:[#allocation41 + $0x178] sm:$0xf0] }
 0xadb   :  { %5294 = vmatmul.bf16.vlgmr.msra.gmra.mxu0 %v11985_v52  ;;  %5351 = vmatmul.bf16.vlgmr.msrb.gmra.mxu3 %v11921_v47  ;;  %v4350_v58 = vadd.f32 %v11968_v42, %v4331_v0  ;;  %v2714_v42 = vadd.f32 %v11714_v3, %v11723_v16  ;;  %v9885_v3 = vld [vmem:[#allocation41 + $0x384] sm:$0xf]  ;;  %v8848_v16 = vld [vmem:[#allocation41 + $0x390] sm:$0xf0] }
 0xadc   :  { %5408 = vmatmul.bf16.vlgmr.msra.gmra.mxu2 %v11860_v18  ;;  %5438 = vmatpush.bf16.msra.mxu0 %v8775_v13  ;;  %v4383_v33 = vadd.f32 %v4382_v31, %v4364_v54  ;;  %v8835_v31 = vor.u32 %v9881_v39, %v8832_v19  ;;  %v8816_v54 = vld [vmem:[#allocation41 + $0x350] sm:$0xf0]  ;;  %v8678_v19 = vld [vmem:[#allocation41 + $0x228] sm:$0xf] }
 0xadd   :  { %5495 = vmatpush.bf16.msrb.mxu3 %v8651_v46  ;;  %v12000_v12 = vadd.f32 %v4350_v58, %v11712_v34  ;;  %v8743_v46 = vor.u32 %v9860_v24, %v8742_v14  ;;  %v8851_v58 = vor.u32 %v9885_v3, %v8848_v16  ;;  %v8710_v14 = vld [vmem:[#allocation41 + $0x268] sm:$0xf]  ;;  %v9818_v24 = vld [vmem:[#allocation41 + $0x16c] sm:$0xf]  ;;  %v8784_v38 = vld [vmem:[#allocation41 + $0x310] sm:$0xf0] }
 0xade   :  { %5382 = vmatpush.bf16.msra.mxu1 %v8883_v45  ;;  %v9856_v45 = vld [vmem:[#allocation41 + $0x294] sm:$0xf0]  ;;  %v8694_v3 = vld [vmem:[#allocation41 + $0x248] sm:$0xf] }
 0xadf   :  { %v12413_v34 = vmax.f32 %v12000_v12, 0.0 }
 0xae0   :  { %v4332_v44 = vpop.f32.mrf.mxu0  ;;  %5439 = vmatpush.bf16.msra.mxu0 %v8759_v57  ;;  %v8600_v57 = vld [vmem:[#allocation41 + $0x198] sm:$0xf0] }
 0xae1   :  { %v4333_v11 = vadd.f32 %v4332_v44, %v4314_v41  ;;  %5496 = vmatpush.bf16.msrb.mxu3 %v8635_v6  ;;  %v8726_v41 = vld [vmem:[#allocation41 + $0x288] sm:$0xf]  ;;  %v4384_v6 = vpop.f32.mrf.mxu3  ;;  %v4368_v16 = vpop.f32.mrf.mxu2 }
 0xae2   :  { %v4420_v13 = vpop.f32.mrf.mxu1  ;;  %5383 = vmatpush.bf16.msra.mxu1 %v8867_v4  ;;  %v8727_v44 = vor.u32 %v9856_v45, %v8726_v41  ;;  %v9852_v4 = vld [vmem:[#allocation41 + $0x274] sm:$0xf0]  ;;  %v8568_v45 = vld [vmem:[#allocation41 + $0x158] sm:$0xf0] }
 0xae3   :  { %v4352_v0 = vadd.f32 %v4351_v10, %v4333_v11  ;;  %v8603_v11 = vor.u32 %v9822_v53, %v8600_v57  ;;  %v8711_v22 = vor.u32 %v9852_v4, %v8710_v14  ;;  %v9848_v41 = vld [vmem:[#allocation41 + $0x254] sm:$0xf0]  ;;  %v8800_v57 = vld [vmem:[#allocation41 + $0x330] sm:$0xf0] }
 0xae4   :  { %5440 = vmatpush.bf16.msra.mxu0 %v8743_v46  ;;  %v8587_v46 = vor.u32 %v9818_v24, %v8584_v37 }
 0xae5   :  { %v12003_v56 = vadd.f32 %v4352_v0, %v2714_v42  ;;  %5497 = vmatpush.bf16.msrb.mxu3 %v8619_v29  ;;  %v4366_v42 = vadd.f32 %v4365_v62, %v11995_v7  ;;  %v9877_v29 = vld [vmem:[#allocation41 + $0x344] sm:$0xf] }
 0xae6   :  { %5384 = vmatpush.bf16.msra.mxu1 %v8851_v58  ;;  %v8819_v62 = vor.u32 %v9877_v29, %v8816_v54  ;;  %v9814_v58 = vld [vmem:[#allocation41 + $0x14c] sm:$0xf]  ;;  %v8552_v29 = vld [vmem:[#allocation41 + $0x138] sm:$0xf0] }
 0xae7   :  { %v12412_v10 = vmax.f32 %v12003_v56, 0.0  ;;  %v4385_v39 = vadd.f32 %v4384_v6, %v4366_v42  ;;  %v8571_v4 = vor.u32 %v9814_v58, %v8568_v45  ;;  %v8662_v42 = vld [vmem:[#allocation41 + $0x208] sm:$0xf]  ;;  %v8787_v58 = vor.u32 %v9869_v30, %v8784_v38 }
 0xae8   :  { %v4401_v32 = vpop.f32.mrf.mxu0  ;;  %5441 = vmatpush.bf16.msra.mxu0 %v8727_v44  ;;  %v9873_v44 = vld [vmem:[#allocation41 + $0x324] sm:$0xf]  ;;  %v8902_v38 = vld [vmem:[#allocation41 + $0x3e8] sm:$0xf] }
 0xae9   :  { %v12011_v15 = vpack.c.bf16 %v12412_v10, %v12413_v34  ;;  %v4402_v0 = vadd.f32 %v4401_v32, %v4383_v33  ;;  %5498 = vmatpush.bf16.msrb.mxu3 %v8603_v11  ;;  %v8695_v32 = vor.u32 %v9848_v41, %v8694_v3  ;;  %v9844_v11 = vld [vmem:[#allocation41 + $0x234] sm:$0xf0]  ;;  %v8803_v37 = vor.u32 %v9873_v44, %v8800_v57  ;;  %v8536_v44 = vld [vmem:[#allocation41 + $0x118] sm:$0xf0] }
 0xaea   :  { %5385 = vmatpush.bf16.msra.mxu1 %v8835_v31  ;;  %v4422_v53 = vpop.f32.mrf.mxu1  ;;  %v9810_v31 = vld [vmem:[#allocation41 + $0x12c] sm:$0xf]  ;;  %v8679_v54 = vor.u32 %v9844_v11, %v8678_v19 }
 0xaeb   :  { %5299 = vmatmul.bf16.gmra.mxu0 %v12011_v15  ;;  %5356 = vmatmul.bf16.gmra.mxu3 %v11956_v2  ;;  %v4421_v33 = vadd.f32 %v4420_v13, %v4402_v0  ;;  %v9840_v0 = vld [vmem:[#allocation41 + $0x214] sm:$0xf0]  ;;  %v8555_v3 = vor.u32 %v9810_v31, %v8552_v29  ;;  %v9866_v19 = vld [vmem:[#allocation41 + $0x2ec] sm:$0xf]  ;;  %v8886_v29 = vld [vmem:[#allocation41 + $0x3c8] sm:$0xf] }
 0xaec   :  { %5413 = vmatmul.bf16.gmra.mxu2 %v11894_v50  ;;  %5442 = vmatpush.bf16.msra.mxu0 %v8711_v22  ;;  %v2766_v22 = vadd.f32 %v11698_v26, %v11704_v9  ;;  %v8663_v45 = vor.u32 %v9840_v0, %v8662_v42  ;;  %v4370_v26 = vpop.f32.mrf.mxu2  ;;  %v8760_v0 = vld [vmem:[#allocation41 + $0x2d8] sm:$0xf0] }
 0xaed   :  { %5499 = vmatpush.bf16.msrb.mxu3 %v8587_v46  ;;  %v12020_v13 = vadd.f32 %v4421_v33, %v11696_v60  ;;  %v4387_v46 = vpop.f32.mrf.mxu3  ;;  %v4371_v11 = vadd.f32 %v4370_v26, %v11995_v7 }
 0xaee   :  { %5386 = vmatpush.bf16.msra.mxu1 %v8819_v62  ;;  %v4369_v62 = vadd.f32 %v4368_v16, %v11995_v7 }
 0xaef   :  { %v12408_v60 = vmax.f32 %v12020_v13, 0.0 }
 0xaf0   :  { %v4403_v14 = vpop.f32.mrf.mxu0  ;;  %5443 = vmatpush.bf16.msra.mxu0 %v8695_v32  ;;  %v9806_v32 = vld [vmem:[#allocation41 + $0x10c] sm:$0xf]  ;;  %v4388_v33 = vadd.f32 %v4387_v46, %v4369_v62  ;;  %v8870_v46 = vld [vmem:[#allocation41 + $0x3a8] sm:$0xf] }
 0xaf1   :  { %v4404_v24 = vadd.f32 %v4403_v14, %v4385_v39  ;;  %5500 = vmatpush.bf16.msrb.mxu3 %v8571_v4  ;;  %v8539_v30 = vor.u32 %v9806_v32, %v8536_v44  ;;  %v9900_v39 = vld [vmem:[#allocation41 + $0x3f4] sm:$0xf0]  ;;  %v8744_v32 = vld [vmem:[#allocation41 + $0x2b8] sm:$0xf0] }
 0xaf2   :  { %5387 = vmatpush.bf16.msra.mxu1 %v8803_v37  ;;  %v8903_v4 = vor.u32 %v9900_v39, %v8902_v38  ;;  %v8854_v39 = vld [vmem:[#allocation41 + $0x388] sm:$0xf] }
 0xaf3   :  { %v4423_v6 = vadd.f32 %v4422_v53, %v4404_v24  ;;  %v4425_v53 = vpop.f32.mrf.mxu1  ;;  %v8776_v24 = vld [vmem:[#allocation41 + $0x2f8] sm:$0xf0] }
 0xaf4   :  { %5444 = vmatpush.bf16.msra.mxu0 %v8679_v54  ;;  %v8779_v37 = vor.u32 %v9866_v19, %v8776_v24  ;;  %v9896_v54 = vld [vmem:[#allocation41 + $0x3d4] sm:$0xf0] }
 0xaf5   :  { %v12023_v41 = vadd.f32 %v4423_v6, %v2766_v22  ;;  %5501 = vmatpush.bf16.msrb.mxu3 %v8555_v3  ;;  %v4389_v31 = vpop.f32.mrf.mxu3  ;;  %v9862_v22 = vld [vmem:[#allocation41 + $0x2cc] sm:$0xf]  ;;  %v8887_v42 = vor.u32 %v9896_v54, %v8886_v29  ;;  %v9888_v19 = vld [vmem:[#allocation41 + $0x394] sm:$0xf0] }
 0xaf6   :  { %5388 = vmatpush.bf16.msra.mxu1 %v8787_v58  ;;  %v4390_v6 = vadd.f32 %v4389_v31, %v4371_v11  ;;  %v8763_v62 = vor.u32 %v9862_v22, %v8760_v0  ;;  %v9892_v58 = vld [vmem:[#allocation41 + $0x3b4] sm:$0xf0]  ;;  %v9854_v11 = vld [vmem:[#allocation41 + $0x28c] sm:$0xf]  ;;  %v8855_v24 = vor.u32 %v9888_v19, %v8854_v39  ;;  %v8712_v22 = vld [vmem:[#allocation41 + $0x278] sm:$0xf0] }
 0xaf7   :  { %v12409_v9 = vmax.f32 %v12023_v41, 0.0  ;;  %v9850_v29 = vld [vmem:[#allocation41 + $0x26c] sm:$0xf]  ;;  %v8664_v39 = vld [vmem:[#allocation41 + $0x218] sm:$0xf0] }
 0xaf8   :  { %v4406_v57 = vpop.f32.mrf.mxu0  ;;  %5445 = vmatpush.bf16.msra.mxu0 %v8663_v45  ;;  %v9858_v45 = vld [vmem:[#allocation41 + $0x2ac] sm:$0xf] }
 0xaf9   :  { %v12031_v16 = vpack.c.bf16 %v12409_v9, %v12408_v60  ;;  %v4407_v14 = vadd.f32 %v4406_v57, %v4388_v33  ;;  %5502 = vmatpush.bf16.msrb.mxu3 %v8539_v30  ;;  %v8747_v57 = vor.u32 %v9858_v45, %v8744_v32  ;;  %v2772_v33 = vadd.f32 %v11710_v55, %v11716_v5  ;;  %v8838_v55 = vld [vmem:[#allocation41 + $0x368] sm:$0xf]  ;;  %v9884_v5 = vld [vmem:[#allocation41 + $0x374] sm:$0xf0]  ;;  %v9846_v0 = vld [vmem:[#allocation41 + $0x24c] sm:$0xf] }
 0xafa   :  { %v8839_v54 = vor.u32 %v9884_v5, %v8838_v55  ;;  %v9842_v32 = vld [vmem:[#allocation41 + $0x22c] sm:$0xf]  ;;  %v8888_v55 = vld [vmem:[#allocation41 + $0x3d8] sm:$0xf0] }
 0xafb   :  { %5313 = vmatmul.bf16.vlgmr.msrb.gmra.mxu1 %v12031_v16  ;;  %5370 = vmatmul.bf16.vlgmr.msrb.gmra.mxu0 %v11985_v52  ;;  %v4426_v7 = vadd.f32 %v4425_v53, %v4407_v14  ;;  %v4427_v26 = vpop.f32.mrf.mxu1 }
 0xafc   :  { %5427 = vmatmul.bf16.vlgmr.msra.gmra.mxu3 %v11921_v47  ;;  %5484 = vmatmul.bf16.vlgmr.msrb.gmra.mxu2 %v11860_v18  ;;  %v8871_v18 = vor.u32 %v9892_v58, %v8870_v46  ;;  %v9876_v58 = vld [vmem:[#allocation41 + $0x334] sm:$0xf0] }
 0xafd   :  { %5457 = vmatpush.bf16.msrb.mxu1 %v8903_v4  ;;  %5514 = vmatpush.bf16.msrb.mxu0 %v8779_v37  ;;  %v12041_v53 = vadd.f32 %v4426_v7, %v11708_v36  ;;  %v8728_v37 = vld [vmem:[#allocation41 + $0x298] sm:$0xf0]  ;;  %v8715_v7 = vor.u32 %v9850_v29, %v8712_v22  ;;  %v9890_v29 = vld [vmem:[#allocation41 + $0x3ac] sm:$0xf] }
 0xafe   :  { %v8731_v31 = vor.u32 %v9854_v11, %v8728_v37  ;;  %v9898_v11 = vld [vmem:[#allocation41 + $0x3ec] sm:$0xf] }
 0xaff   :  { %v12411_v14 = vmax.f32 %v12041_v53, 0.0 }
 0xb00   :  { %v4408_v3 = vpop.f32.mrf.mxu0 }
 0xb01   :  { %v4409_v44 = vadd.f32 %v4408_v3, %v4390_v6  ;;  %5458 = vmatpush.bf16.msrb.mxu1 %v8887_v42  ;;  %5515 = vmatpush.bf16.msrb.mxu0 %v8763_v62  ;;  %v8822_v6 = vld [vmem:[#allocation41 + $0x348] sm:$0xf]  ;;  %v9880_v42 = vld [vmem:[#allocation41 + $0x354] sm:$0xf0]  ;;  %v8696_v3 = vld [vmem:[#allocation41 + $0x258] sm:$0xf0] }
 0xb02   :  { %v8823_v46 = vor.u32 %v9880_v42, %v8822_v6  ;;  %v8806_v62 = vld [vmem:[#allocation41 + $0x328] sm:$0xf]  ;;  %v8699_v45 = vor.u32 %v9846_v0, %v8696_v3  ;;  %v8856_v6 = vld [vmem:[#allocation41 + $0x398] sm:$0xf0]  ;;  %v9882_v0 = vld [vmem:[#allocation41 + $0x36c] sm:$0xf] }
 0xb03   :  { %v4428_v30 = vadd.f32 %v4427_v26, %v4409_v44  ;;  %v8680_v44 = vld [vmem:[#allocation41 + $0x238] sm:$0xf0]  ;;  %v9878_v3 = vld [vmem:[#allocation41 + $0x34c] sm:$0xf] }
 0xb04   :  { %v8683_v26 = vor.u32 %v9842_v32, %v8680_v44  ;;  %v8808_v32 = vld [vmem:[#allocation41 + $0x338] sm:$0xf0] }
 0xb05   :  { %v12043_v38 = vadd.f32 %v4428_v30, %v2772_v33  ;;  %5459 = vmatpush.bf16.msrb.mxu1 %v8871_v18  ;;  %5516 = vmatpush.bf16.msrb.mxu0 %v8747_v57  ;;  %v8807_v18 = vor.u32 %v9876_v58, %v8806_v62  ;;  %v9872_v57 = vld [vmem:[#allocation41 + $0x314] sm:$0xf0]  ;;  %v9838_v33 = vld [vmem:[#allocation41 + $0x20c] sm:$0xf]  ;;  %v8824_v62 = vld [vmem:[#allocation41 + $0x358] sm:$0xf0] }
 0xb06   :  { %v8667_v19 = vor.u32 %v9838_v33, %v8664_v39  ;;  %v8827_v58 = vor.u32 %v9878_v3, %v8824_v62  ;;  %v9931_v33 = vld [vmem:[#allocation43 + $0xec] sm:$0xf0]  ;;  %v8926_v3 = vld [vmem:[#allocation43 + $0x20] sm:$0xf] }
 0xb07   :  { %v12410_v4 = vmax.f32 %v12043_v38, 0.0  ;;  %v9927_v39 = vld [vmem:[#allocation43 + $0xcc] sm:$0xf0] }
 0xb08   :  { %v9907_v62 = vld [vmem:[#allocation43 + $0x2c] sm:$0xf0] }
 0xb09   :  { %v12051_v36 = vpack.c.bf16 %v12410_v4, %v12411_v14  ;;  %5460 = vmatpush.bf16.msrb.mxu1 %v8855_v24  ;;  %5517 = vmatpush.bf16.msrb.mxu0 %v8731_v31  ;;  %v8904_v24 = vld [vmem:[#allocation41 + $0x3f8] sm:$0xf0]  ;;  %v9894_v31 = vld [vmem:[#allocation41 + $0x3cc] sm:$0xf]  ;;  %v9174_v4 = vld [vmem:[#allocation43 + $0x208] sm:$0xf] }
 0xb0a   :  { %v8907_v37 = vor.u32 %v9898_v11, %v8904_v24  ;;  %v8891_v5 = vor.u32 %v9894_v31, %v8888_v55  ;;  %v8990_v11 = vld [vmem:[#allocation43 + $0xa0] sm:$0xf]  ;;  %v9923_v24 = vld [vmem:[#allocation43 + $0xac] sm:$0xf0] }
 0xb0b   :  { %5318 = vmatmul.bf16.gmra.mxu1 %v12051_v36  ;;  %5375 = vmatmul.bf16.gmra.mxu0 %v12011_v15  ;;  %v8974_v31 = vld [vmem:[#allocation43 + $0x80] sm:$0xf]  ;;  %v9919_v55 = vld [vmem:[#allocation43 + $0x8c] sm:$0xf0] }
 0xb0c   :  { %5432 = vmatmul.bf16.gmra.mxu3 %v11956_v2  ;;  %5489 = vmatmul.bf16.gmra.mxu2 %v11894_v50  ;;  %v8790_v50 = vld [vmem:[#allocation41 + $0x308] sm:$0xf] }
 0xb0d   :  { %5461 = vmatpush.bf16.msrb.mxu1 %v8839_v54  ;;  %5518 = vmatpush.bf16.msrb.mxu0 %v8715_v7  ;;  %v8791_v30 = vor.u32 %v9872_v57, %v8790_v50  ;;  %v8872_v54 = vld [vmem:[#allocation41 + $0x3b8] sm:$0xf0]  ;;  %v9886_v7 = vld [vmem:[#allocation41 + $0x38c] sm:$0xf]  ;;  %v9022_v57 = vld [vmem:[#allocation43 + $0xe0] sm:$0xf] }
 0xb0e   :  { %v8875_v22 = vor.u32 %v9890_v29, %v8872_v54  ;;  %v8859_v42 = vor.u32 %v9886_v7, %v8856_v6  ;;  %v8958_v54 = vld [vmem:[#allocation43 + $0x60] sm:$0xf] }
 0xb11   :  { %5462 = vmatpush.bf16.msrb.mxu1 %v8823_v46  ;;  %5519 = vmatpush.bf16.msrb.mxu0 %v8699_v45  ;;  %v8840_v46 = vld [vmem:[#allocation41 + $0x378] sm:$0xf0]  ;;  %v9874_v45 = vld [vmem:[#allocation41 + $0x32c] sm:$0xf] }
 0xb12   :  { %v8811_v44 = vor.u32 %v9874_v45, %v8808_v32  ;;  %v8910_v32 = vld [vmem:[#allocation43] sm:$0xf] }
 0xb15   :  { %5463 = vmatpush.bf16.msrb.mxu1 %v8807_v18  ;;  %5520 = vmatpush.bf16.msrb.mxu0 %v8683_v26  ;;  %v9870_v18 = vld [vmem:[#allocation41 + $0x30c] sm:$0xf]  ;;  %v8792_v26 = vld [vmem:[#allocation41 + $0x318] sm:$0xf0] }
 0xb16   :  { %v8795_v50 = vor.u32 %v9870_v18, %v8792_v26 }
 0xb19   :  { %5464 = vmatpush.bf16.msrb.mxu1 %v8791_v30  ;;  %5521 = vmatpush.bf16.msrb.mxu0 %v8667_v19  ;;  %v9006_v30 = vld [vmem:[#allocation43 + $0xc0] sm:$0xf] }
 0xb1a   :  { %v9007_v19 = vor.u32 %v9927_v39, %v9006_v30 }
 0xb1b   :  { %5389 = vmatmul.bf16.vlgmr.msra.gmra.mxu1 %v12031_v16  ;;  %5446 = vmatmul.bf16.vlgmr.msra.gmra.mxu0 %v11985_v52 }
 0xb1c   :  { %5503 = vmatmul.bf16.vlgmr.msrb.gmra.mxu3 %v11921_v47  ;;  %v8843_v47 = vor.u32 %v9882_v0, %v8840_v46 }
 0xb1d   :  { %5533 = vmatpush.bf16.msra.mxu1 %v8907_v37  ;;  %v8991_v37 = vor.u32 %v9923_v24, %v8990_v11  ;;  %v9134_v11 = vld [vmem:[#allocation43 + $0x1c0] sm:$0xf]  ;;  %v9959_v24 = vld [vmem:[#allocation43 + $0x1cc] sm:$0xf0] }
 0xb21   :  { %5534 = vmatpush.bf16.msra.mxu1 %v8891_v5  ;;  %v12067_v5 = vpop.f32.mrf.mxu2 }
 0xb25   :  { %5535 = vmatpush.bf16.msra.mxu1 %v8875_v22  ;;  %v9915_v22 = vld [vmem:[#allocation43 + $0x6c] sm:$0xf0] }
 0xb26   :  { %v8959_v7 = vor.u32 %v9915_v22, %v8958_v54  ;;  %v9118_v54 = vld [vmem:[#allocation43 + $0x1a0] sm:$0xf]  ;;  %v9955_v22 = vld [vmem:[#allocation43 + $0x1ac] sm:$0xf0] }
 0xb29   :  { %5536 = vmatpush.bf16.msra.mxu1 %v8859_v42  ;;  %v9911_v42 = vld [vmem:[#allocation43 + $0x4c] sm:$0xf0]  ;;  %v12074_v46 = vpop.f32.mrf.mxu2 }
 0xb2b   :  { %5394 = vmatmul.bf16.gmra.mxu1 %v12051_v36  ;;  %5451 = vmatmul.bf16.gmra.mxu0 %v12011_v15 }
 0xb2c   :  { %5508 = vmatmul.bf16.gmra.mxu3 %v11956_v2  ;;  %v9023_v2 = vor.u32 %v9931_v33, %v9022_v57  ;;  %v9929_v57 = vld [vmem:[#allocation43 + $0xe4] sm:$0xf] }
 0xb2d   :  { %5537 = vmatpush.bf16.msra.mxu1 %v8843_v47 }
 0xb2e   :  { %6354 = vmatpush.bf16.msra.mxu2 %v9023_v2  ;;  %v9024_v2 = vld [vmem:[#allocation43 + $0xf0] sm:$0xf0] }
 0xb2f   :  { %v9027_v39 = vor.u32 %v9929_v57, %v9024_v2  ;;  %v9086_v2 = vld [vmem:[#allocation43 + $0x160] sm:$0xf] }
 0xb31   :  { %5538 = vmatpush.bf16.msra.mxu1 %v8827_v58  ;;  %v8927_v58 = vor.u32 %v9907_v62, %v8926_v3  ;;  %v12080_v26 = vpop.f32.mrf.mxu2  ;;  %v12090_v62 = vld [vmem:[%s12463_s1] sm:$0xf] }
 0xb32   :  { %6355 = vmatpush.bf16.msra.mxu2 %v9007_v19 }
 0xb35   :  { %5539 = vmatpush.bf16.msra.mxu1 %v8811_v44  ;;  %v9903_v44 = vld [vmem:[#allocation43 + $0xc] sm:$0xf0] }
 0xb36   :  { %6356 = vmatpush.bf16.msra.mxu2 %v8991_v37  ;;  %v8911_v18 = vor.u32 %v9903_v44, %v8910_v32  ;;  %v9925_v37 = vld [vmem:[#allocation43 + $0xc4] sm:$0xf]  ;;  %v9951_v32 = vld [vmem:[#allocation43 + $0x18c] sm:$0xf0] }
 0xb37   :  { %v9917_v44 = vld [vmem:[#allocation43 + $0x84] sm:$0xf] }
 0xb39   :  { %5540 = vmatpush.bf16.msra.mxu1 %v8795_v50  ;;  %v9150_v50 = vld [vmem:[#allocation43 + $0x1e0] sm:$0xf] }
 0xb3b   :  { %5465 = vmatmul.bf16.vlgmr.msrb.gmra.mxu1 %v12031_v16  ;;  %5522 = vmatmul.bf16.vlgmr.msrb.gmra.mxu0 %v11985_v52  ;;  %v8975_v52 = vor.u32 %v9919_v55, %v8974_v31  ;;  %v9135_v31 = vor.u32 %v9959_v24, %v9134_v11  ;;  %v9008_v55 = vld [vmem:[#allocation43 + $0xd0] sm:$0xf0]  ;;  %v9913_v11 = vld [vmem:[#allocation43 + $0x64] sm:$0xf] }
 0xb3d   :  { %6357 = vmatpush.bf16.msra.mxu2 %v8975_v52  ;;  %v9011_v52 = vor.u32 %v9925_v37, %v9008_v55  ;;  %v8960_v37 = vld [vmem:[#allocation43 + $0x70] sm:$0xf0] }
 0xb3e   :  { %v12069_v29 = vpop.f32.mrf.mxu3  ;;  %v8963_v55 = vor.u32 %v9913_v11, %v8960_v37  ;;  %v9905_v11 = vld [vmem:[#allocation43 + $0x24] sm:$0xf]  ;;  %v8928_v37 = vld [vmem:[#allocation43 + $0x30] sm:$0xf0] }
 0xb41   :  { %6358 = vmatpush.bf16.msra.mxu2 %v8959_v7  ;;  %v9921_v7 = vld [vmem:[#allocation43 + $0xa4] sm:$0xf] }
 0xb46   :  { %v12076_v47 = vpop.f32.mrf.mxu3 }
 0xb4b   :  { %5470 = vmatmul.bf16.gmra.mxu1 %v12051_v36  ;;  %5527 = vmatmul.bf16.gmra.mxu0 %v12011_v15  ;;  %v8942_v15 = vld [vmem:[#allocation43 + $0x40] sm:$0xf] }
 0xb4c   :  { %v8943_v0 = vor.u32 %v9911_v42, %v8942_v15  ;;  %v9119_v15 = vor.u32 %v9955_v22, %v9118_v54  ;;  %v8992_v42 = vld [vmem:[#allocation43 + $0xb0] sm:$0xf0]  ;;  %v9070_v22 = vld [vmem:[#allocation43 + $0x140] sm:$0xf] }
 0xb4d   :  { %v8995_v3 = vor.u32 %v9921_v7, %v8992_v42  ;;  %v9943_v7 = vld [vmem:[#allocation43 + $0x14c] sm:$0xf0] }
 0xb4e   :  { %6359 = vmatpush.bf16.msra.mxu2 %v8943_v0  ;;  %v12082_v30 = vpop.f32.mrf.mxu3  ;;  %v12087_v0 = vpop.f32.mrf.mxu2 }
 0xb52   :  { %6360 = vmatpush.bf16.msra.mxu2 %v8927_v58 }
 0xb56   :  { %6361 = vmatpush.bf16.msra.mxu2 %v8911_v18  ;;  %v12092_v58 = vpop.f32.mrf.mxu3  ;;  %v12101_v54 = vpop.f32.mrf.mxu2 }
 0xb58   :  { %v12071_v6 = vpop.f32.mrf.mxu0 }
 0xb5a   :  { %6430 = vmatpush.bf16.msrb.mxu2 %v9027_v39  ;;  %v9947_v39 = vld [vmem:[#allocation43 + $0x16c] sm:$0xf0] }
 0xb5b   :  { %5541 = vmatmul.bf16.vlgmr.msra.gmra.mxu1 %v12031_v16  ;;  %v9963_v16 = vld [vmem:[#allocation43 + $0x1ec] sm:$0xf0]  ;;  %v9087_v24 = vor.u32 %v9947_v39, %v9086_v2  ;;  %v9054_v2 = vld [vmem:[#allocation43 + $0x120] sm:$0xf] }
 0xb5c   :  { %v9151_v33 = vor.u32 %v9963_v16, %v9150_v50  ;;  %v8976_v50 = vld [vmem:[#allocation43 + $0x90] sm:$0xf0]  ;;  %v9939_v39 = vld [vmem:[#allocation43 + $0x12c] sm:$0xf0] }
 0xb5d   :  { %v8979_v57 = vor.u32 %v9917_v44, %v8976_v50 }
 0xb5e   :  { %6373 = vmatpush.bf16.msra.mxu3 %v9151_v33  ;;  %6431 = vmatpush.bf16.msrb.mxu2 %v9011_v52  ;;  %v12097_v33 = vperm.slane %v12090_v62, 0  ;;  %v12106_v44 = vpop.f32.mrf.mxu3 }
 0xb60   :  { %v12078_v45 = vpop.f32.mrf.mxu0  ;;  %v5258_v52 = vadd.f32 %v12067_v5, %v12097_v33  ;;  %v5260_v42 = vadd.f32 %v12074_v46, %v12097_v33 }
 0xb62   :  { %6374 = vmatpush.bf16.msra.mxu3 %v9135_v31  ;;  %6432 = vmatpush.bf16.msrb.mxu2 %v8995_v3  ;;  %v5277_v3 = vadd.f32 %v12069_v29, %v5258_v52  ;;  %v5279_v50 = vadd.f32 %v12076_v47, %v5260_v42  ;;  %v9055_v29 = vor.u32 %v9939_v39, %v9054_v2  ;;  %v9038_v47 = vld [vmem:[#allocation43 + $0x100] sm:$0xf]  ;;  %v9152_v39 = vld [vmem:[#allocation43 + $0x1f0] sm:$0xf0] }
 0xb63   :  { %v8931_v52 = vor.u32 %v9905_v11, %v8928_v37  ;;  %v9030_v11 = vld [vmem:[#allocation43 + $0xe8] sm:$0xf] }
 0xb64   :  { %v5296_v5 = vadd.f32 %v12071_v6, %v5277_v3  ;;  %v5298_v46 = vadd.f32 %v12078_v45, %v5279_v50  ;;  %v9901_v6 = vld [vmem:[#allocation43 + $0x4] sm:$0xf]  ;;  %v9995_v50 = vld [vmem:[#allocation43 + $0x2ec] sm:$0xf0] }
 0xb66   :  { %6375 = vmatpush.bf16.msra.mxu3 %v9119_v15  ;;  %6433 = vmatpush.bf16.msrb.mxu2 %v8979_v57  ;;  %v9909_v15 = vld [vmem:[#allocation43 + $0x44] sm:$0xf]  ;;  %v12117_v45 = vpop.f32.mrf.mxu3 }
 0xb68   :  { %v12084_v19 = vpop.f32.mrf.mxu0 }
 0xb6a   :  { %6434 = vmatpush.bf16.msrb.mxu2 %v8963_v55 }
 0xb6b   :  { %5546 = vmatmul.bf16.gmra.mxu1 %v12051_v36  ;;  %v9102_v36 = vld [vmem:[#allocation43 + $0x180] sm:$0xf] }
 0xb6c   :  { %v9103_v18 = vor.u32 %v9951_v32, %v9102_v36  ;;  %v9071_v36 = vor.u32 %v9943_v7, %v9070_v22  ;;  %v8944_v32 = vld [vmem:[#allocation43 + $0x50] sm:$0xf0]  ;;  %v9935_v7 = vld [vmem:[#allocation43 + $0x10c] sm:$0xf0] }
 0xb6d   :  { %v9039_v3 = vor.u32 %v9935_v7, %v9038_v47  ;;  %v9991_v47 = vld [vmem:[#allocation43 + $0x2cc] sm:$0xf0]  ;;  %v9957_v7 = vld [vmem:[#allocation43 + $0x1c4] sm:$0xf] }
 0xb6e   :  { %6376 = vmatpush.bf16.msra.mxu3 %v9103_v18  ;;  %v8947_v18 = vor.u32 %v9909_v15, %v8944_v32  ;;  %v12113_v32 = vpop.f32.mrf.mxu2 }
 0xb70   :  { %v12094_v16 = vpop.f32.mrf.mxu0  ;;  %6435 = vmatpush.bf16.msrb.mxu2 %v8947_v18 }
 0xb72   :  { %6377 = vmatpush.bf16.msra.mxu3 %v9087_v24 }
 0xb74   :  { %6436 = vmatpush.bf16.msrb.mxu2 %v8931_v52  ;;  %v5263_v52 = vadd.f32 %v12080_v26, %v12097_v33 }
 0xb76   :  { %6378 = vmatpush.bf16.msra.mxu3 %v9071_v36  ;;  %v8912_v36 = vld [vmem:[#allocation43 + $0x10] sm:$0xf0] }
 0xb77   :  { %v8915_v18 = vor.u32 %v9901_v6, %v8912_v36  ;;  %v5265_v6 = vadd.f32 %v12087_v0, %v12097_v33  ;;  %v9014_v36 = vld [vmem:[#allocation43 + $0xc8] sm:$0xf] }
 0xb78   :  { %v5314_v31 = vpop.f32.mrf.mxu1  ;;  %v12110_v57 = vpop.f32.mrf.mxu0 }
 0xb79   :  { %v5315_v24 = vadd.f32 %v5314_v31, %v5296_v5  ;;  %6437 = vmatpush.bf16.msrb.mxu2 %v8915_v18  ;;  %v9278_v31 = vld [vmem:[#allocation43 + $0x2e0] sm:$0xf]  ;;  %v9961_v5 = vld [vmem:[#allocation43 + $0x1e4] sm:$0xf] }
 0xb7a   :  { %6379 = vmatpush.bf16.msra.mxu3 %v9055_v29  ;;  %v9279_v2 = vor.u32 %v9995_v50, %v9278_v31  ;;  %v9155_v37 = vor.u32 %v9961_v5, %v9152_v39  ;;  %v9928_v31 = vld [vmem:[#allocation43 + $0xd4] sm:$0xf0]  ;;  %v5284_v50 = vadd.f32 %v12092_v58, %v5265_v6  ;;  %v9246_v39 = vld [vmem:[#allocation43 + $0x2a0] sm:$0xf] }
 0xb7b   :  { %v5552_v15 = vmax.f32 %v5315_v24, 0.0  ;;  %v9015_v5 = vor.u32 %v9928_v31, %v9014_v36  ;;  %v8982_v31 = vld [vmem:[#allocation43 + $0x88] sm:$0xf] }
 0xb7c   :  { %6392 = vmatpush.bf16.msra.mxu0 %v9279_v2  ;;  %v12129_v2 = vpop.f32.mrf.mxu2  ;;  %v5303_v0 = vadd.f32 %v12094_v16, %v5284_v50 }
 0xb7e   :  { %6380 = vmatpush.bf16.msra.mxu3 %v9039_v3  ;;  %v9136_v3 = vld [vmem:[#allocation43 + $0x1d0] sm:$0xf0] }
 0xb7f   :  { %v9139_v18 = vor.u32 %v9957_v7, %v9136_v3  ;;  %v9949_v3 = vld [vmem:[#allocation43 + $0x184] sm:$0xf] }
 0xb80   :  { %v5316_v55 = vpop.f32.mrf.mxu1  ;;  %v12120_v24 = vpop.f32.mrf.mxu0 }
 0xb81   :  { %v5317_v22 = vadd.f32 %v5316_v55, %v5298_v46  ;;  %v9932_v46 = vld [vmem:[#allocation43 + $0xf4] sm:$0xf0] }
 0xb82   :  { %v9031_v55 = vor.u32 %v9932_v46, %v9030_v11  ;;  %6449 = vmatpush.bf16.msrb.mxu3 %v9155_v37  ;;  %v9987_v11 = vld [vmem:[#allocation43 + $0x2ac] sm:$0xf0]  ;;  %v9953_v46 = vld [vmem:[#allocation43 + $0x1a4] sm:$0xf]  ;;  %v9120_v37 = vld [vmem:[#allocation43 + $0x1b0] sm:$0xf0] }
 0xb83   :  { %v5556_v42 = vmax.f32 %v5317_v22, 0.0  ;;  %v9262_v22 = vld [vmem:[#allocation43 + $0x2c0] sm:$0xf]  ;;  %v9247_v33 = vor.u32 %v9987_v11, %v9246_v39 }
 0xb85   :  { %v12115_v60 = vpack.c.bf16 %v5556_v42, %v5552_v15  ;;  %v5282_v15 = vadd.f32 %v12082_v30, %v5263_v52  ;;  %v9263_v42 = vor.u32 %v9991_v47, %v9262_v22  ;;  %v9924_v52 = vld [vmem:[#allocation43 + $0xb4] sm:$0xf0]  ;;  %v12132_v22 = vpop.f32.mrf.mxu3 }
 0xb86   :  { %6450 = vmatpush.bf16.msrb.mxu3 %v9139_v18  ;;  %v9104_v18 = vld [vmem:[#allocation43 + $0x190] sm:$0xf0] }
 0xb87   :  { %6362 = vmatmul.bf16.vlgmr.msra.gmra.mxu2 %v12115_v60  ;;  %v5301_v26 = vadd.f32 %v12084_v19, %v5282_v15  ;;  %6393 = vmatpush.bf16.msra.mxu0 %v9263_v42  ;;  %v9123_v19 = vor.u32 %v9953_v46, %v9120_v37  ;;  %v9230_v15 = vld [vmem:[#allocation43 + $0x280] sm:$0xf]  ;;  %v9983_v42 = vld [vmem:[#allocation43 + $0x28c] sm:$0xf0]  ;;  %v9107_v50 = vor.u32 %v9949_v3, %v9104_v18  ;;  %v9088_v37 = vld [vmem:[#allocation43 + $0x170] sm:$0xf0] }
 0xb88   :  { %v5319_v29 = vpop.f32.mrf.mxu1  ;;  %6506 = vmatpush.bf16.msra.mxu2 %v9031_v55  ;;  %v8998_v55 = vld [vmem:[#allocation43 + $0xa8] sm:$0xf]  ;;  %v12134_v6 = vpop.f32.mrf.mxu0  ;;  %v9231_v36 = vor.u32 %v9983_v42, %v9230_v15  ;;  %v9214_v46 = vld [vmem:[#allocation43 + $0x260] sm:$0xf] }
 0xb89   :  { %v5320_v30 = vadd.f32 %v5319_v29, %v5301_v26  ;;  %v8999_v47 = vor.u32 %v9924_v52, %v8998_v55  ;;  %v9920_v26 = vld [vmem:[#allocation43 + $0x94] sm:$0xf0]  ;;  %v8966_v55 = vld [vmem:[#allocation43 + $0x68] sm:$0xf]  ;;  %v9198_v3 = vld [vmem:[#allocation43 + $0x240] sm:$0xf] }
 0xb8a   :  { %6451 = vmatpush.bf16.msrb.mxu3 %v9123_v19  ;;  %v8983_v11 = vor.u32 %v9920_v26, %v8982_v31  ;;  %v9916_v52 = vld [vmem:[#allocation43 + $0x74] sm:$0xf0]  ;;  %v8950_v26 = vld [vmem:[#allocation43 + $0x48] sm:$0xf] }
 0xb8b   :  { %6394 = vmatpush.bf16.msra.mxu0 %v9247_v33  ;;  %v5560_v16 = vmax.f32 %v5320_v30, 0.0  ;;  %v9945_v33 = vld [vmem:[#allocation43 + $0x164] sm:$0xf] }
 0xb8c   :  { %6507 = vmatpush.bf16.msra.mxu2 %v9015_v5  ;;  %v12137_v5 = vperm.slane %v12090_v62, 1 }
 0xb8d   :  { %v12146_v42 = vpop.f32.mrf.mxu3 }
 0xb8e   :  { %6452 = vmatpush.bf16.msrb.mxu3 %v9107_v50  ;;  %v5334_v15 = vadd.f32 %v12101_v54, %v12137_v5  ;;  %v9072_v50 = vld [vmem:[#allocation43 + $0x150] sm:$0xf0]  ;;  %v9912_v54 = vld [vmem:[#allocation43 + $0x54] sm:$0xf0] }
 0xb8f   :  { %6395 = vmatpush.bf16.msra.mxu0 %v9231_v36  ;;  %v5336_v36 = vadd.f32 %v12113_v32, %v12137_v5  ;;  %v9937_v32 = vld [vmem:[#allocation43 + $0x124] sm:$0xf] }
 0xb90   :  { %v5321_v58 = vpop.f32.mrf.mxu1  ;;  %6508 = vmatpush.bf16.msra.mxu2 %v8999_v47  ;;  %v9091_v47 = vor.u32 %v9945_v33, %v9088_v37  ;;  %v5353_v18 = vadd.f32 %v12106_v44, %v5334_v15  ;;  %v9182_v37 = vld [vmem:[#allocation43 + $0x220] sm:$0xf]  ;;  %v9056_v15 = vld [vmem:[#allocation43 + $0x130] sm:$0xf0] }
 0xb91   :  { %v5322_v7 = vadd.f32 %v5321_v58, %v5303_v0  ;;  %v9979_v0 = vld [vmem:[#allocation43 + $0x26c] sm:$0xf0]  ;;  %v12142_v58 = vpop.f32.mrf.mxu2 }
 0xb92   :  { %v9215_v30 = vor.u32 %v9979_v0, %v9214_v46  ;;  %6453 = vmatpush.bf16.msrb.mxu3 %v9091_v47  ;;  %v5355_v0 = vadd.f32 %v12117_v45, %v5336_v36  ;;  %v5372_v33 = vadd.f32 %v12110_v57, %v5353_v18  ;;  %v9166_v36 = vld [vmem:[#allocation43 + $0x200] sm:$0xf]  ;;  %v9967_v18 = vld [vmem:[#allocation43 + $0x20c] sm:$0xf0] }
 0xb93   :  { %v5564_v29 = vmax.f32 %v5322_v7, 0.0  ;;  %v8967_v7 = vor.u32 %v9916_v52, %v8966_v55  ;;  %v9971_v55 = vld [vmem:[#allocation43 + $0x22c] sm:$0xf0] }
 0xb94   :  { %6509 = vmatpush.bf16.msra.mxu2 %v8983_v11  ;;  %6396 = vmatpush.bf16.msra.mxu0 %v9215_v30  ;;  %v12151_v11 = vpop.f32.mrf.mxu0  ;;  %v8951_v30 = vor.u32 %v9912_v54, %v8950_v26  ;;  %v5374_v44 = vadd.f32 %v12120_v24, %v5355_v0  ;;  %v9183_v47 = vor.u32 %v9971_v55, %v9182_v37  ;;  %v8918_v54 = vld [vmem:[#allocation43 + $0x8] sm:$0xf] }
 0xb95   :  { %v12139_v39 = vpack.c.bf16 %v5564_v29, %v5560_v16  ;;  %v9975_v16 = vld [vmem:[#allocation43 + $0x24c] sm:$0xf0]  ;;  %v9941_v29 = vld [vmem:[#allocation43 + $0x144] sm:$0xf]  ;;  %v9167_v24 = vor.u32 %v9967_v18, %v9166_v36  ;;  %v12158_v0 = vpop.f32.mrf.mxu3  ;;  %v9930_v36 = vld [vmem:[#allocation43 + $0xec] sm:$0xf] }
 0xb96   :  { %v9199_v31 = vor.u32 %v9975_v16, %v9198_v3  ;;  %v9075_v46 = vor.u32 %v9941_v29, %v9072_v50  ;;  %v8934_v3 = vld [vmem:[#allocation43 + $0x28] sm:$0xf]  ;;  %v9908_v16 = vld [vmem:[#allocation43 + $0x34] sm:$0xf0]  ;;  %v9059_v29 = vor.u32 %v9937_v32, %v9056_v15  ;;  %v9993_v15 = vld [vmem:[#allocation43 + $0x2e4] sm:$0xf] }
 0xb97   :  { %6367 = vmatmul.bf16.gmra.mxu2 %v12139_v39  ;;  %v8935_v50 = vor.u32 %v9908_v16, %v8934_v3  ;;  %v9280_v3 = vld [vmem:[#allocation43 + $0x2f0] sm:$0xf0]  ;;  %v9158_v16 = vld [vmem:[#allocation43 + $0x1e8] sm:$0xf]  ;;  %v9032_v18 = vld [vmem:[#allocation43 + $0xf8] sm:$0xf0] }
 0xb98   :  { %v5390_v19 = vpop.f32.mrf.mxu1  ;;  %6510 = vmatpush.bf16.msra.mxu2 %v8967_v7  ;;  %6397 = vmatpush.bf16.msra.mxu0 %v9199_v31  ;;  %v9933_v31 = vld [vmem:[#allocation43 + $0x104] sm:$0xf] }
 0xb99   :  { %6454 = vmatpush.bf16.msrb.mxu3 %v9075_v46  ;;  %v5391_v52 = vadd.f32 %v5390_v19, %v5372_v33  ;;  %v12156_v57 = vpop.f32.mrf.mxu2  ;;  %v9040_v19 = vld [vmem:[#allocation43 + $0x110] sm:$0xf0] }
 0xb9a   :  { %v9043_v33 = vor.u32 %v9933_v31, %v9040_v19  ;;  %v5339_v31 = vadd.f32 %v12129_v2, %v12137_v5  ;;  %v9989_v19 = vld [vmem:[#allocation43 + $0x2c4] sm:$0xf]  ;;  %v9960_v2 = vld [vmem:[#allocation43 + $0x1d4] sm:$0xf0] }
 0xb9b   :  { %v5553_v26 = vmax.f32 %v5391_v52, 0.0 }
 0xb9c   :  { %6511 = vmatpush.bf16.msra.mxu2 %v8951_v30  ;;  %6398 = vmatpush.bf16.msra.mxu0 %v9183_v47  ;;  %v9904_v30 = vld [vmem:[#allocation43 + $0x14] sm:$0xf0]  ;;  %v12162_v32 = vpop.f32.mrf.mxu0  ;;  %v10027_v47 = vld [vmem:[#allocation43 + $0x3ec] sm:$0xf0] }
 0xb9d   :  { %6455 = vmatpush.bf16.msrb.mxu3 %v9059_v29  ;;  %v8919_v55 = vor.u32 %v9904_v30, %v8918_v54  ;;  %v5341_v54 = vadd.f32 %v12142_v58, %v12137_v5  ;;  %v12175_v5 = vpop.f32.mrf.mxu3  ;;  %v10019_v58 = vld [vmem:[#allocation43 + $0x3ac] sm:$0xf0] }
 0xba0   :  { %v5392_v7 = vpop.f32.mrf.mxu1  ;;  %6512 = vmatpush.bf16.msra.mxu2 %v8935_v50  ;;  %6399 = vmatpush.bf16.msra.mxu0 %v9167_v24  ;;  %v9283_v50 = vor.u32 %v9993_v15, %v9280_v3  ;;  %v10023_v24 = vld [vmem:[#allocation43 + $0x3cc] sm:$0xf0]  ;;  %v9016_v3 = vld [vmem:[#allocation43 + $0xd8] sm:$0xf0] }
 0xba1   :  { %v5393_v45 = vadd.f32 %v5392_v7, %v5374_v44  ;;  %6456 = vmatpush.bf16.msrb.mxu3 %v9043_v33  ;;  %v9406_v44 = vld [vmem:[#allocation43 + $0x3e0] sm:$0xf]  ;;  %v9964_v7 = vld [vmem:[#allocation43 + $0x1f4] sm:$0xf0]  ;;  %v5358_v33 = vadd.f32 %v12132_v22, %v5339_v31 }
 0xba2   :  { %v9407_v52 = vor.u32 %v10027_v47, %v9406_v44  ;;  %v9142_v44 = vld [vmem:[#allocation43 + $0x1c8] sm:$0xf]  ;;  %v12171_v47 = vpop.f32.mrf.mxu2  ;;  %v9374_v22 = vld [vmem:[#allocation43 + $0x3a0] sm:$0xf] }
 0xba3   :  { %v5557_v46 = vmax.f32 %v5393_v45, 0.0  ;;  %v9159_v45 = vor.u32 %v9964_v7, %v9158_v16  ;;  %v5360_v16 = vadd.f32 %v12146_v42, %v5341_v54  ;;  %v5377_v7 = vadd.f32 %v12134_v6, %v5358_v33  ;;  %v9956_v42 = vld [vmem:[#allocation43 + $0x1b4] sm:$0xf0] }
 0xba4   :  { %6513 = vmatpush.bf16.msra.mxu2 %v8919_v55  ;;  %6411 = vmatpush.bf16.msrb.mxu1 %v9407_v52  ;;  %v9264_v55 = vld [vmem:[#allocation43 + $0x2d0] sm:$0xf0]  ;;  %v9926_v52 = vld [vmem:[#allocation43 + $0xcc] sm:$0xf] }
 0xba5   :  { %v12160_v37 = vpack.c.bf16 %v5557_v46, %v5553_v26  ;;  %v9035_v26 = vor.u32 %v9930_v36, %v9032_v18  ;;  %6468 = vmatpush.bf16.msrb.mxu0 %v9283_v50  ;;  %v9390_v46 = vld [vmem:[#allocation43 + $0x3c0] sm:$0xf]  ;;  %v9267_v15 = vor.u32 %v9989_v19, %v9264_v55  ;;  %v9143_v50 = vor.u32 %v9960_v2, %v9142_v44  ;;  %v9985_v36 = vld [vmem:[#allocation43 + $0x2a4] sm:$0xf]  ;;  %v12178_v19 = vpop.f32.mrf.mxu0  ;;  %v9000_v55 = vld [vmem:[#allocation43 + $0xb8] sm:$0xf0] }
 0xba6   :  { %v9391_v30 = vor.u32 %v10023_v24, %v9390_v46  ;;  %v5379_v18 = vadd.f32 %v12151_v11, %v5360_v16  ;;  %v9248_v46 = vld [vmem:[#allocation43 + $0x2b0] sm:$0xf0]  ;;  %v9126_v24 = vld [vmem:[#allocation43 + $0x1a8] sm:$0xf]  ;;  %v9358_v2 = vld [vmem:[#allocation43 + $0x380] sm:$0xf] }
 0xba7   :  { %6381 = vmatmul.bf16.vlgmr.msra.gmra.mxu3 %v12160_v37  ;;  %6438 = vmatmul.bf16.vlgmr.msrb.gmra.mxu2 %v12115_v60  ;;  %v9251_v54 = vor.u32 %v9985_v36, %v9248_v46  ;;  %v9127_v33 = vor.u32 %v9956_v42, %v9126_v24  ;;  %v10015_v11 = vld [vmem:[#allocation43 + $0x38c] sm:$0xf0]  ;;  %v8984_v36 = vld [vmem:[#allocation43 + $0x98] sm:$0xf0]  ;;  %v12181_v46 = vperm.slane %v12090_v62, 2 }
 0xba8   :  { %v5395_v29 = vpop.f32.mrf.mxu1  ;;  %6525 = vmatpush.bf16.msra.mxu3 %v9159_v45  ;;  %6582 = vmatpush.bf16.msrb.mxu2 %v9035_v26  ;;  %v9019_v45 = vor.u32 %v9926_v52, %v9016_v3  ;;  %v9375_v26 = vor.u32 %v10019_v58, %v9374_v22  ;;  %v9359_v16 = vor.u32 %v10015_v11, %v9358_v2  ;;  %v9952_v22 = vld [vmem:[#allocation43 + $0x194] sm:$0xf0]  ;;  %v9918_v58 = vld [vmem:[#allocation43 + $0x8c] sm:$0xf] }
 0xba9   :  { %6412 = vmatpush.bf16.msrb.mxu1 %v9391_v30  ;;  %6469 = vmatpush.bf16.msrb.mxu0 %v9267_v15  ;;  %v5396_v31 = vadd.f32 %v5395_v29, %v5377_v7  ;;  %v9922_v30 = vld [vmem:[#allocation43 + $0xac] sm:$0xf]  ;;  %v9981_v29 = vld [vmem:[#allocation43 + $0x284] sm:$0xf]  ;;  %v9232_v7 = vld [vmem:[#allocation43 + $0x290] sm:$0xf0]  ;;  %v8987_v24 = vor.u32 %v9918_v58, %v8984_v36  ;;  %v5412_v36 = vadd.f32 %v12171_v47, %v12181_v46 }
 0xbaa   :  { %v9003_v15 = vor.u32 %v9922_v30, %v9000_v55  ;;  %v12185_v42 = vpop.f32.mrf.mxu2  ;;  %v9216_v30 = vld [vmem:[#allocation43 + $0x270] sm:$0xf0]  ;;  %v9094_v55 = vld [vmem:[#allocation43 + $0x168] sm:$0xf]  ;;  %v9973_v58 = vld [vmem:[#allocation43 + $0x244] sm:$0xf] }
 0xbab   :  { %v5561_v52 = vmax.f32 %v5396_v31, 0.0  ;;  %v9342_v31 = vld [vmem:[#allocation43 + $0x360] sm:$0xf] }
 0xbac   :  { %6526 = vmatpush.bf16.msra.mxu3 %v9143_v50  ;;  %6583 = vmatpush.bf16.msrb.mxu2 %v9019_v45  ;;  %v9110_v50 = vld [vmem:[#allocation43 + $0x188] sm:$0xf]  ;;  %v9235_v45 = vor.u32 %v9981_v29, %v9232_v7  ;;  %v9310_v47 = vld [vmem:[#allocation43 + $0x320] sm:$0xf] }
 0xbad   :  { %6413 = vmatpush.bf16.msrb.mxu1 %v9375_v26  ;;  %6470 = vmatpush.bf16.msrb.mxu0 %v9251_v54  ;;  %v9111_v26 = vor.u32 %v9952_v22, %v9110_v50  ;;  %v9977_v54 = vld [vmem:[#allocation43 + $0x264] sm:$0xf]  ;;  %v12193_v50 = vpop.f32.mrf.mxu0  ;;  %v10007_v22 = vld [vmem:[#allocation43 + $0x34c] sm:$0xf0] }
 0xbae   :  { %v9219_v11 = vor.u32 %v9977_v54, %v9216_v30  ;;  %v8952_v30 = vld [vmem:[#allocation43 + $0x58] sm:$0xf0] }
 0xbb0   :  { %v5397_v6 = vpop.f32.mrf.mxu1  ;;  %6527 = vmatpush.bf16.msra.mxu3 %v9127_v33  ;;  %6584 = vmatpush.bf16.msrb.mxu2 %v9003_v15  ;;  %v12189_v15 = vpop.f32.mrf.mxu3 }
 0xbb1   :  { %v5398_v44 = vadd.f32 %v5397_v6, %v5379_v18  ;;  %6414 = vmatpush.bf16.msrb.mxu1 %v9359_v16  ;;  %6471 = vmatpush.bf16.msrb.mxu0 %v9235_v45  ;;  %v10011_v6 = vld [vmem:[#allocation43 + $0x36c] sm:$0xf0]  ;;  %v5410_v16 = vadd.f32 %v12156_v57, %v12181_v46  ;;  %v9326_v45 = vld [vmem:[#allocation43 + $0x340] sm:$0xf]  ;;  %v9944_v57 = vld [vmem:[#allocation43 + $0x154] sm:$0xf0] }
 0xbb2   :  { %v9343_v33 = vor.u32 %v10011_v6, %v9342_v31  ;;  %v9200_v31 = vld [vmem:[#allocation43 + $0x250] sm:$0xf0]  ;;  %v9078_v6 = vld [vmem:[#allocation43 + $0x148] sm:$0xf] }
 0xbb3   :  { %v5565_v3 = vmax.f32 %v5398_v44, 0.0  ;;  %v9948_v44 = vld [vmem:[#allocation43 + $0x174] sm:$0xf0]  ;;  %v9203_v54 = vor.u32 %v9973_v58, %v9200_v31  ;;  %v5416_v31 = vpop.f32.mrf.mxu2 }
 0xbb4   :  { %6528 = vmatpush.bf16.msra.mxu3 %v9111_v26  ;;  %6585 = vmatpush.bf16.msrb.mxu2 %v8987_v24  ;;  %v9095_v29 = vor.u32 %v9948_v44, %v9094_v55  ;;  %v5429_v26 = vadd.f32 %v12158_v0, %v5410_v16  ;;  %v9327_v24 = vor.u32 %v10007_v22, %v9326_v45  ;;  %v9969_v0 = vld [vmem:[#allocation43 + $0x224] sm:$0xf]  ;;  %v9062_v22 = vld [vmem:[#allocation43 + $0x128] sm:$0xf]  ;;  %v9940_v58 = vld [vmem:[#allocation43 + $0x134] sm:$0xf0] }
 0xbb5   :  { %v12183_v18 = vpack.c.bf16 %v5565_v3, %v5561_v52  ;;  %v9914_v52 = vld [vmem:[#allocation43 + $0x6c] sm:$0xf]  ;;  %v8968_v3 = vld [vmem:[#allocation43 + $0x78] sm:$0xf0]  ;;  %6415 = vmatpush.bf16.msrb.mxu1 %v9343_v33  ;;  %6472 = vmatpush.bf16.msrb.mxu0 %v9219_v11  ;;  %v5431_v55 = vadd.f32 %v12175_v5, %v5412_v36  ;;  %v9079_v11 = vor.u32 %v9944_v57, %v9078_v6  ;;  %v9294_v57 = vld [vmem:[#allocation43 + $0x300] sm:$0xf] }
 0xbb6   :  { %v8971_v7 = vor.u32 %v9914_v52, %v8968_v3  ;;  %v9910_v33 = vld [vmem:[#allocation43 + $0x4c] sm:$0xf]  ;;  %v5448_v44 = vadd.f32 %v12162_v32, %v5429_v26  ;;  %v10003_v3 = vld [vmem:[#allocation43 + $0x32c] sm:$0xf0]  ;;  %v9063_v32 = vor.u32 %v9940_v58, %v9062_v22  ;;  %v8936_v26 = vld [vmem:[#allocation43 + $0x38] sm:$0xf0] }
 0xbb7   :  { %6386 = vmatmul.bf16.gmra.mxu3 %v12183_v18  ;;  %6443 = vmatmul.bf16.gmra.mxu2 %v12139_v39  ;;  %v8955_v52 = vor.u32 %v9910_v33, %v8952_v30  ;;  %v5450_v16 = vadd.f32 %v12178_v19, %v5431_v55  ;;  %v9906_v36 = vld [vmem:[#allocation43 + $0x2c] sm:$0xf]  ;;  %v9999_v19 = vld [vmem:[#allocation43 + $0x30c] sm:$0xf0]  ;;  %v10025_v22 = vld [vmem:[#allocation43 + $0x3e4] sm:$0xf] }
 0xbb8   :  { %v5466_v2 = vpop.f32.mrf.mxu1  ;;  %6529 = vmatpush.bf16.msra.mxu3 %v9095_v29  ;;  %6586 = vmatpush.bf16.msrb.mxu2 %v8971_v7  ;;  %v9311_v29 = vor.u32 %v10003_v3, %v9310_v47  ;;  %v9184_v7 = vld [vmem:[#allocation43 + $0x230] sm:$0xf0]  ;;  %v8939_v6 = vor.u32 %v9906_v36, %v8936_v26  ;;  %v9295_v55 = vor.u32 %v9999_v19, %v9294_v57  ;;  %v9046_v47 = vld [vmem:[#allocation43 + $0x108] sm:$0xf]  ;;  %v5454_v3 = vpop.f32.mrf.mxu0  ;;  %v9962_v36 = vld [vmem:[#allocation43 + $0x1ec] sm:$0xf] }
 0xbb9   :  { %6416 = vmatpush.bf16.msrb.mxu1 %v9327_v24  ;;  %6473 = vmatpush.bf16.msrb.mxu0 %v9203_v54  ;;  %v5467_v45 = vadd.f32 %v5466_v2, %v5448_v44  ;;  %v9187_v5 = vor.u32 %v9969_v0, %v9184_v7  ;;  %v5435_v54 = vpop.f32.mrf.mxu3  ;;  %v9965_v2 = vld [vmem:[#allocation43 + $0x204] sm:$0xf]  ;;  %v9168_v44 = vld [vmem:[#allocation43 + $0x210] sm:$0xf0]  ;;  %v9902_v0 = vld [vmem:[#allocation43 + $0xc] sm:$0xf]  ;;  %v5415_v19 = vadd.f32 %v12185_v42, %v12181_v46 }
 0xbba   :  { %v8920_v7 = vld [vmem:[#allocation43 + $0x18] sm:$0xf0]  ;;  %v9408_v58 = vld [vmem:[#allocation43 + $0x3f0] sm:$0xf0] }
 0xbbb   :  { %v5554_v33 = vmax.f32 %v5467_v45, 0.0  ;;  %v9286_v45 = vld [vmem:[#allocation43 + $0x2e8] sm:$0xf]  ;;  %v9160_v26 = vld [vmem:[#allocation43 + $0x1f8] sm:$0xf0] }
 0xbbc   :  { %6530 = vmatpush.bf16.msra.mxu3 %v9079_v11  ;;  %6587 = vmatpush.bf16.msrb.mxu2 %v8955_v52  ;;  %v9171_v11 = vor.u32 %v9965_v2, %v9168_v44  ;;  %v9936_v52 = vld [vmem:[#allocation43 + $0x114] sm:$0xf0]  ;;  %v9163_v57 = vor.u32 %v9962_v36, %v9160_v26  ;;  %v12208_v2 = vpop.f32.mrf.mxu2  ;;  %v5417_v44 = vadd.f32 %v5416_v31, %v12181_v46  ;;  %v9144_v42 = vld [vmem:[#allocation43 + $0x1d8] sm:$0xf0]  ;;  %v9254_v46 = vld [vmem:[#allocation43 + $0x2a8] sm:$0xf] }
 0xbbd   :  { %6417 = vmatpush.bf16.msrb.mxu1 %v9311_v29  ;;  %6474 = vmatpush.bf16.msrb.mxu0 %v9187_v5  ;;  %v8923_v29 = vor.u32 %v9902_v0, %v8920_v7  ;;  %v9411_v5 = vor.u32 %v10025_v22, %v9408_v58  ;;  %v9958_v0 = vld [vmem:[#allocation43 + $0x1cc] sm:$0xf]  ;;  %v9988_v26 = vld [vmem:[#allocation43 + $0x2b4] sm:$0xf0] }
 0xbbe   :  { %v9147_v58 = vor.u32 %v9958_v0, %v9144_v42  ;;  %v9112_v42 = vld [vmem:[#allocation43 + $0x198] sm:$0xf0] }
 0xbc0   :  { %v5468_v9 = vpop.f32.mrf.mxu1  ;;  %6531 = vmatpush.bf16.msra.mxu3 %v9063_v32  ;;  %6588 = vmatpush.bf16.msrb.mxu2 %v8939_v6  ;;  %v9996_v32 = vld [vmem:[#allocation43 + $0x2f4] sm:$0xf0] }
 0xbc1   :  { %v5469_v24 = vadd.f32 %v5468_v9, %v5450_v16  ;;  %6418 = vmatpush.bf16.msrb.mxu1 %v9295_v55  ;;  %v9047_v16 = vor.u32 %v9936_v52, %v9046_v47  ;;  %6475 = vmatpush.bf16.msrb.mxu0 %v9171_v11  ;;  %v9287_v6 = vor.u32 %v9996_v32, %v9286_v45  ;;  %v9270_v55 = vld [vmem:[#allocation43 + $0x2c8] sm:$0xf]  ;;  %v9992_v52 = vld [vmem:[#allocation43 + $0x2d4] sm:$0xf0]  ;;  %v12212_v7 = vpop.f32.mrf.mxu3  ;;  %v12215_v45 = vpop.f32.mrf.mxu0  ;;  %v9376_v32 = vld [vmem:[#allocation43 + $0x3b0] sm:$0xf0] }
 0xbc2   :  { %v5434_v47 = vadd.f32 %v12189_v15, %v5415_v19 }
 0xbc3   :  { %v5558_v30 = vmax.f32 %v5469_v24, 0.0 }
 0xbc4   :  { %6532 = vmatpush.bf16.msra.mxu3 %v9047_v16  ;;  %6589 = vmatpush.bf16.msrb.mxu2 %v8923_v29  ;;  %v9271_v16 = vor.u32 %v9992_v52, %v9270_v55  ;;  %v5436_v29 = vadd.f32 %v5435_v54, %v5417_v44  ;;  %v5453_v22 = vadd.f32 %v12193_v50, %v5434_v47  ;;  %v10013_v50 = vld [vmem:[#allocation43 + $0x384] sm:$0xf]  ;;  %v9360_v55 = vld [vmem:[#allocation43 + $0x390] sm:$0xf0]  ;;  %v9238_v44 = vld [vmem:[#allocation43 + $0x288] sm:$0xf]  ;;  %v5487_v0 = vpop.f32.mrf.mxu2 }
 0xbc5   :  { %v12201_v9 = vpack.c.bf16 %v5558_v30, %v5554_v33  ;;  %6487 = vmatpush.bf16.msra.mxu1 %v9411_v5  ;;  %v10021_v33 = vld [vmem:[#allocation43 + $0x3c4] sm:$0xf]  ;;  %v9392_v30 = vld [vmem:[#allocation43 + $0x3d0] sm:$0xf0]  ;;  %v9363_v52 = vor.u32 %v10013_v50, %v9360_v55  ;;  %v9206_v50 = vld [vmem:[#allocation43 + $0x248] sm:$0xf] }
 0xbc6   :  { %v9395_v11 = vor.u32 %v10021_v33, %v9392_v30  ;;  %v10017_v5 = vld [vmem:[#allocation43 + $0x3a4] sm:$0xf]  ;;  %v5455_v31 = vadd.f32 %v5454_v3, %v5436_v29  ;;  %v9255_v33 = vor.u32 %v9988_v26, %v9254_v46  ;;  %v9984_v3 = vld [vmem:[#allocation43 + $0x294] sm:$0xf0]  ;;  %v12218_v29 = vperm.slane %v12090_v62, 3 }
 0xbc7   :  { %6400 = vmatmul.bf16.vlgmr.msra.gmra.mxu0 %v12201_v9  ;;  %6457 = vmatmul.bf16.vlgmr.msrb.gmra.mxu3 %v12160_v37  ;;  %v9379_v36 = vor.u32 %v10017_v5, %v9376_v32  ;;  %v10009_v32 = vld [vmem:[#allocation43 + $0x364] sm:$0xf]  ;;  %v9344_v46 = vld [vmem:[#allocation43 + $0x370] sm:$0xf0]  ;;  %v9946_v26 = vld [vmem:[#allocation43 + $0x16c] sm:$0xf] }
 0xbc8   :  { %6514 = vmatmul.bf16.vlgmr.msra.gmra.mxu2 %v12115_v60  ;;  %v5471_v24 = vpop.f32.mrf.mxu1  ;;  %6544 = vmatpush.bf16.msra.mxu0 %v9287_v6  ;;  %v9954_v6 = vld [vmem:[#allocation43 + $0x1ac] sm:$0xf]  ;;  %v5486_v55 = vadd.f32 %v12208_v2, %v12218_v29 }
 0xbc9   :  { %6601 = vmatpush.bf16.msrb.mxu3 %v9163_v57  ;;  %6488 = vmatpush.bf16.msra.mxu1 %v9395_v11  ;;  %v5472_v15 = vadd.f32 %v5471_v24, %v5453_v22  ;;  %v9128_v57 = vld [vmem:[#allocation43 + $0x1b8] sm:$0xf0]  ;;  %v9950_v24 = vld [vmem:[#allocation43 + $0x18c] sm:$0xf]  ;;  %v5506_v5 = vpop.f32.mrf.mxu3 }
 0xbca   :  { %v9131_v54 = vor.u32 %v9954_v6, %v9128_v57  ;;  %v9096_v6 = vld [vmem:[#allocation43 + $0x178] sm:$0xf0]  ;;  %v5525_v57 = vpop.f32.mrf.mxu0 }
 0xbcb   :  { %v5562_v47 = vmax.f32 %v5472_v15, 0.0  ;;  %v9347_v15 = vor.u32 %v10009_v32, %v9344_v46  ;;  %v9190_v32 = vld [vmem:[#allocation43 + $0x228] sm:$0xf]  ;;  %v9972_v46 = vld [vmem:[#allocation43 + $0x234] sm:$0xf0] }
 0xbcc   :  { %6545 = vmatpush.bf16.msra.mxu0 %v9271_v16  ;;  %v9239_v16 = vor.u32 %v9984_v3, %v9238_v44 }
 0xbcd   :  { %6602 = vmatpush.bf16.msrb.mxu3 %v9147_v58  ;;  %6489 = vmatpush.bf16.msra.mxu1 %v9379_v36  ;;  %v9115_v58 = vor.u32 %v9950_v24, %v9112_v42  ;;  %v9980_v36 = vld [vmem:[#allocation43 + $0x274] sm:$0xf0]  ;;  %v10001_v24 = vld [vmem:[#allocation43 + $0x324] sm:$0xf]  ;;  %v5488_v42 = vadd.f32 %v5487_v0, %v12218_v29 }
 0xbd0   :  { %v5473_v19 = vpop.f32.mrf.mxu1  ;;  %6546 = vmatpush.bf16.msra.mxu0 %v9255_v33  ;;  %v9099_v33 = vor.u32 %v9946_v26, %v9096_v6  ;;  %v9938_v26 = vld [vmem:[#allocation43 + $0x12c] sm:$0xf]  ;;  %v9064_v6 = vld [vmem:[#allocation43 + $0x138] sm:$0xf0] }
 0xbd1   :  { %v5474_v30 = vadd.f32 %v5473_v19, %v5455_v31  ;;  %6603 = vmatpush.bf16.msrb.mxu3 %v9131_v54  ;;  %6490 = vmatpush.bf16.msra.mxu1 %v9363_v52  ;;  %v9222_v31 = vld [vmem:[#allocation43 + $0x268] sm:$0xf]  ;;  %v10005_v54 = vld [vmem:[#allocation43 + $0x344] sm:$0xf]  ;;  %v9080_v52 = vld [vmem:[#allocation43 + $0x158] sm:$0xf0] }
 0xbd2   :  { %v9223_v19 = vor.u32 %v9980_v36, %v9222_v31  ;;  %v5507_v36 = vadd.f32 %v5506_v5, %v5488_v42 }
 0xbd3   :  { %v5566_v11 = vmax.f32 %v5474_v30, 0.0  ;;  %v9328_v30 = vld [vmem:[#allocation43 + $0x350] sm:$0xf0] }
 0xbd4   :  { %6547 = vmatpush.bf16.msra.mxu0 %v9239_v16  ;;  %v9331_v44 = vor.u32 %v10005_v54, %v9328_v30  ;;  %v9312_v16 = vld [vmem:[#allocation43 + $0x330] sm:$0xf0]  ;;  %v5490_v54 = vpop.f32.mrf.mxu2  ;;  %v9997_v30 = vld [vmem:[#allocation43 + $0x304] sm:$0xf] }
 0xbd5   :  { %v12220_v22 = vpack.c.bf16 %v5566_v11, %v5562_v47  ;;  %6604 = vmatpush.bf16.msrb.mxu3 %v9115_v58  ;;  %6491 = vmatpush.bf16.msra.mxu1 %v9347_v15  ;;  %v9976_v47 = vld [vmem:[#allocation43 + $0x254] sm:$0xf0]  ;;  %v9942_v11 = vld [vmem:[#allocation43 + $0x14c] sm:$0xf]  ;;  %v5505_v58 = vadd.f32 %v12212_v7, %v5486_v55  ;;  %v9315_v15 = vor.u32 %v10001_v24, %v9312_v16  ;;  %v5509_v55 = vpop.f32.mrf.mxu3  ;;  %v9048_v24 = vld [vmem:[#allocation43 + $0x118] sm:$0xf0] }
 0xbd6   :  { %v9207_v3 = vor.u32 %v9976_v47, %v9206_v50  ;;  %v9083_v31 = vor.u32 %v9942_v11, %v9080_v52  ;;  %v9296_v50 = vld [vmem:[#allocation43 + $0x310] sm:$0xf0]  ;;  %v5526_v47 = vadd.f32 %v5525_v57, %v5507_v36  ;;  %v9968_v7 = vld [vmem:[#allocation43 + $0x214] sm:$0xf0]  ;;  %v9934_v52 = vld [vmem:[#allocation43 + $0x10c] sm:$0xf] }
 0xbd7   :  { %6405 = vmatmul.bf16.gmra.mxu0 %v12220_v22  ;;  %6462 = vmatmul.bf16.gmra.mxu3 %v12183_v18  ;;  %v5524_v2 = vadd.f32 %v12215_v45, %v5505_v58  ;;  %v9299_v45 = vor.u32 %v9997_v30, %v9296_v50  ;;  %v9175_v11 = vor.u32 %v9968_v7, %v9174_v4  ;;  %v10028_v58 = vld [vmem:[#allocation43 + $0x3f4] sm:$0xf0]  ;;  %v9382_v7 = vld [vmem:[#allocation43 + $0x3a8] sm:$0xf] }
 0xbd8   :  { %6519 = vmatmul.bf16.gmra.mxu2 %v12139_v39  ;;  %v5542_v62 = vpop.f32.mrf.mxu1  ;;  %6548 = vmatpush.bf16.msra.mxu0 %v9223_v19  ;;  %v9191_v19 = vor.u32 %v9972_v46, %v9190_v32  ;;  %v9051_v57 = vor.u32 %v9934_v52, %v9048_v24  ;;  %v9994_v32 = vld [vmem:[#allocation43 + $0x2ec] sm:$0xf]  ;;  %v9288_v46 = vld [vmem:[#allocation43 + $0x2f8] sm:$0xf0] }
 0xbd9   :  { %6605 = vmatpush.bf16.msrb.mxu3 %v9099_v33  ;;  %6492 = vmatpush.bf16.msra.mxu1 %v9331_v44  ;;  %v5543_v0 = vadd.f32 %v5542_v62, %v5524_v2  ;;  %v9067_v33 = vor.u32 %v9938_v26, %v9064_v6  ;;  %v5528_v44 = vpop.f32.mrf.mxu0  ;;  %v9414_v62 = vld [vmem:[#allocation43 + $0x3e8] sm:$0xf]  ;;  %v9291_v36 = vor.u32 %v9994_v32, %v9288_v46  ;;  %v10024_v6 = vld [vmem:[#allocation43 + $0x3d4] sm:$0xf0]  ;;  %v9982_v32 = vld [vmem:[#allocation43 + $0x28c] sm:$0xf] }
 0xbda   :  { %v5491_v2 = vadd.f32 %v5490_v54, %v12218_v29  ;;  %v9398_v26 = vld [vmem:[#allocation43 + $0x3c8] sm:$0xf] }
 0xbdc   :  { %6549 = vmatpush.bf16.msra.mxu0 %v9207_v3  ;;  %v5555_v3 = vmax.f32 %v5543_v0, 0.0  ;;  %v5492_v4 = vpop.f32.mrf.mxu2  ;;  %v5510_v50 = vadd.f32 %v5509_v55, %v5491_v2  ;;  %v9272_v0 = vld [vmem:[#allocation43 + $0x2d8] sm:$0xf0]  ;;  %v10016_v55 = vld [vmem:[#allocation43 + $0x394] sm:$0xf0] }
 0xbdd   :  { %6606 = vmatpush.bf16.msrb.mxu3 %v9083_v31  ;;  %6493 = vmatpush.bf16.msra.mxu1 %v9315_v15  ;;  %v5511_v15 = vpop.f32.mrf.mxu3  ;;  %v5493_v30 = vadd.f32 %v5492_v4, %v12218_v29  ;;  %v9366_v29 = vld [vmem:[#allocation43 + $0x388] sm:$0xf] }
 0xbde   :  { %v5529_v54 = vadd.f32 %v5528_v44, %v5510_v50  ;;  %v9367_v4 = vor.u32 %v10016_v55, %v9366_v29  ;;  %v9350_v44 = vld [vmem:[#allocation43 + $0x368] sm:$0xf]  ;;  %v10026_v29 = vld [vmem:[#allocation43 + $0x3ec] sm:$0xf]  ;;  %v9416_v55 = vld [vmem:[#allocation43 + $0x3f8] sm:$0xf0] }
 0xbdf   :  { %v5512_v52 = vadd.f32 %v5511_v15, %v5493_v30  ;;  %v9334_v50 = vld [vmem:[#allocation43 + $0x348] sm:$0xf] }
 0xbe0   :  { %v5544_v14 = vpop.f32.mrf.mxu1  ;;  %6550 = vmatpush.bf16.msra.mxu0 %v9191_v19  ;;  %v9990_v19 = vld [vmem:[#allocation43 + $0x2cc] sm:$0xf] }
 0xbe1   :  { %v5545_v5 = vadd.f32 %v5544_v14, %v5526_v47  ;;  %6607 = vmatpush.bf16.msrb.mxu3 %v9067_v33  ;;  %6494 = vmatpush.bf16.msra.mxu1 %v9299_v45  ;;  %v9415_v14 = vor.u32 %v10028_v58, %v9414_v62  ;;  %v9399_v47 = vor.u32 %v10024_v6, %v9398_v26  ;;  %v5530_v33 = vpop.f32.mrf.mxu0  ;;  %v9986_v45 = vld [vmem:[#allocation43 + $0x2ac] sm:$0xf]  ;;  %v10012_v26 = vld [vmem:[#allocation43 + $0x374] sm:$0xf0] }
 0xbe2   :  { %v9978_v6 = vld [vmem:[#allocation43 + $0x26c] sm:$0xf] }
 0xbe3   :  { %v5559_v16 = vmax.f32 %v5545_v5, 0.0  ;;  %v9275_v5 = vor.u32 %v9990_v19, %v9272_v0  ;;  %v9224_v19 = vld [vmem:[#allocation43 + $0x278] sm:$0xf0]  ;;  %v9974_v0 = vld [vmem:[#allocation43 + $0x24c] sm:$0xf] }
 0xbe4   :  { %6551 = vmatpush.bf16.msra.mxu0 %v9175_v11  ;;  %v9256_v11 = vld [vmem:[#allocation43 + $0x2b8] sm:$0xf0]  ;;  %v9227_v30 = vor.u32 %v9978_v6, %v9224_v19  ;;  %v10010_v19 = vld [vmem:[#allocation43 + $0x36c] sm:$0xf] }
 0xbe5   :  { %v12230_v42 = vpack.c.bf16 %v5559_v16, %v5555_v3  ;;  %6608 = vmatpush.bf16.msrb.mxu3 %v9051_v57  ;;  %v9259_v3 = vor.u32 %v9986_v45, %v9256_v11  ;;  %v5531_v16 = vadd.f32 %v5530_v33, %v5512_v52  ;;  %v9208_v33 = vld [vmem:[#allocation43 + $0x258] sm:$0xf0]  ;;  %v9970_v11 = vld [vmem:[#allocation43 + $0x22c] sm:$0xf] }
 0xbe6   :  { %v9211_v45 = vor.u32 %v9974_v0, %v9208_v33  ;;  %v9192_v52 = vld [vmem:[#allocation43 + $0x238] sm:$0xf0] }
 0xbe7   :  { %6419 = vmatmul.bf16.vlgmr.msrb.gmra.mxu1 %v12230_v42  ;;  %6476 = vmatmul.bf16.vlgmr.msrb.gmra.mxu0 %v12201_v9  ;;  %v9368_v6 = vld [vmem:[#allocation43 + $0x398] sm:$0xf0] }
 0xbe8   :  { %6533 = vmatmul.bf16.vlgmr.msra.gmra.mxu3 %v12160_v37  ;;  %6590 = vmatmul.bf16.vlgmr.msrb.gmra.mxu2 %v12115_v60  ;;  %v5547_v31 = vpop.f32.mrf.mxu1  ;;  %v10020_v60 = vld [vmem:[#allocation43 + $0x3b4] sm:$0xf0]  ;;  %v9320_v33 = vld [vmem:[#allocation43 + $0x338] sm:$0xf0] }
 0xbe9   :  { %6563 = vmatpush.bf16.msrb.mxu1 %v9415_v14  ;;  %6620 = vmatpush.bf16.msrb.mxu0 %v9291_v36  ;;  %v9383_v24 = vor.u32 %v10020_v60, %v9382_v7  ;;  %v5548_v57 = vadd.f32 %v5547_v31, %v5529_v54  ;;  %v9240_v36 = vld [vmem:[#allocation43 + $0x298] sm:$0xf0]  ;;  %v9351_v31 = vor.u32 %v10012_v26, %v9350_v44  ;;  %v10004_v60 = vld [vmem:[#allocation43 + $0x334] sm:$0xf0]  ;;  %v10014_v26 = vld [vmem:[#allocation43 + $0x38c] sm:$0xf] }
 0xbea   :  { %v9243_v2 = vor.u32 %v9982_v32, %v9240_v36  ;;  %v9419_v32 = vor.u32 %v10026_v29, %v9416_v55  ;;  %v10018_v36 = vld [vmem:[#allocation43 + $0x3ac] sm:$0xf] }
 0xbeb   :  { %v5563_v14 = vmax.f32 %v5548_v57, 0.0 }
 0xbed   :  { %6564 = vmatpush.bf16.msrb.mxu1 %v9399_v47  ;;  %6621 = vmatpush.bf16.msrb.mxu0 %v9275_v5  ;;  %v10008_v47 = vld [vmem:[#allocation43 + $0x354] sm:$0xf0]  ;;  %v9318_v5 = vld [vmem:[#allocation43 + $0x328] sm:$0xf] }
 0xbee   :  { %v9335_v7 = vor.u32 %v10008_v47, %v9334_v50  ;;  %v9319_v54 = vor.u32 %v10004_v60, %v9318_v5  ;;  %v10006_v50 = vld [vmem:[#allocation43 + $0x34c] sm:$0xf]  ;;  %v9336_v47 = vld [vmem:[#allocation43 + $0x358] sm:$0xf0] }
 0xbef   :  { %v9339_v0 = vor.u32 %v10006_v50, %v9336_v47  ;;  %v9998_v60 = vld [vmem:[#allocation43 + $0x30c] sm:$0xf] }
 0xbf0   :  { %v5549_v62 = vpop.f32.mrf.mxu1 }
 0xbf1   :  { %v5550_v58 = vadd.f32 %v5549_v62, %v5531_v16  ;;  %6565 = vmatpush.bf16.msrb.mxu1 %v9383_v24  ;;  %6622 = vmatpush.bf16.msrb.mxu0 %v9259_v3  ;;  %v9195_v24 = vor.u32 %v9970_v11, %v9192_v52  ;;  %v10000_v3 = vld [vmem:[#allocation43 + $0x314] sm:$0xf0]  ;;  %v9966_v16 = vld [vmem:[#allocation43 + $0x20c] sm:$0xf]  ;;  %v9176_v62 = vld [vmem:[#allocation43 + $0x218] sm:$0xf0] }
 0xbf3   :  { %v5567_v46 = vmax.f32 %v5550_v58, 0.0  ;;  %v9179_v58 = vor.u32 %v9966_v16, %v9176_v62 }
 0xbf5   :  { %v12238_v15 = vpack.c.bf16 %v5567_v46, %v5563_v14  ;;  %6566 = vmatpush.bf16.msrb.mxu1 %v9367_v4  ;;  %6623 = vmatpush.bf16.msrb.mxu0 %v9243_v2  ;;  %v10022_v14 = vld [vmem:[#allocation43 + $0x3cc] sm:$0xf]  ;;  %v9400_v46 = vld [vmem:[#allocation43 + $0x3d8] sm:$0xf0] }
 0xbf6   :  { %v9403_v4 = vor.u32 %v10022_v14, %v9400_v46  ;;  %v9384_v2 = vld [vmem:[#allocation43 + $0x3b8] sm:$0xf0] }
 0xbf7   :  { %6424 = vmatmul.bf16.gmra.mxu1 %v12238_v15  ;;  %6481 = vmatmul.bf16.gmra.mxu0 %v12220_v22  ;;  %v9387_v44 = vor.u32 %v10018_v36, %v9384_v2 }
 0xbf8   :  { %6538 = vmatmul.bf16.gmra.mxu3 %v12183_v18  ;;  %6595 = vmatmul.bf16.gmra.mxu2 %v12139_v39  ;;  %v9302_v39 = vld [vmem:[#allocation43 + $0x308] sm:$0xf] }
 0xbf9   :  { %6567 = vmatpush.bf16.msrb.mxu1 %v9351_v31  ;;  %6624 = vmatpush.bf16.msrb.mxu0 %v9227_v30  ;;  %v9303_v57 = vor.u32 %v10000_v3, %v9302_v39  ;;  %v9371_v31 = vor.u32 %v10014_v26, %v9368_v6  ;;  %v9352_v30 = vld [vmem:[#allocation43 + $0x378] sm:$0xf0] }
 0xbfd   :  { %6568 = vmatpush.bf16.msrb.mxu1 %v9335_v7  ;;  %6625 = vmatpush.bf16.msrb.mxu0 %v9211_v45  ;;  %v10002_v7 = vld [vmem:[#allocation43 + $0x32c] sm:$0xf]  ;;  %v9304_v45 = vld [vmem:[#allocation43 + $0x318] sm:$0xf0] }
 0xbfe   :  { %v9323_v5 = vor.u32 %v10002_v7, %v9320_v33  ;;  %v9307_v11 = vor.u32 %v9998_v60, %v9304_v45 }
 0xc01   :  { %6569 = vmatpush.bf16.msrb.mxu1 %v9319_v54  ;;  %6626 = vmatpush.bf16.msrb.mxu0 %v9195_v24 }
 0xc05   :  { %6570 = vmatpush.bf16.msrb.mxu1 %v9303_v57  ;;  %6627 = vmatpush.bf16.msrb.mxu0 %v9179_v58 }
 0xc07   :  { %6495 = vmatmul.bf16.vlgmr.msra.gmra.mxu1 %v12230_v42  ;;  %6552 = vmatmul.bf16.vlgmr.msra.gmra.mxu0 %v12201_v9 }
 0xc08   :  { %6609 = vmatmul.bf16.vlgmr.msrb.gmra.mxu3 %v12160_v37  ;;  %v9355_v37 = vor.u32 %v10010_v19, %v9352_v30 }
 0xc09   :  { %6639 = vmatpush.bf16.msra.mxu1 %v9419_v32 }
 0xc0d   :  { %6640 = vmatpush.bf16.msra.mxu1 %v9403_v4  ;;  %v12259_v4 = vld [vmem:[%s12464_s28] sm:$0xf] }
 0xc0e   :  { %v5706_v2 = vperm.slane %v12259_v4, 0 }
 0xc11   :  { %6641 = vmatpush.bf16.msra.mxu1 %v9387_v44 }
 0xc15   :  { %6642 = vmatpush.bf16.msra.mxu1 %v9371_v31 }
 0xc17   :  { %6500 = vmatmul.bf16.gmra.mxu1 %v12238_v15  ;;  %6557 = vmatmul.bf16.gmra.mxu0 %v12220_v22 }
 0xc18   :  { %6614 = vmatmul.bf16.gmra.mxu3 %v12183_v18  ;;  %v6363_v18 = vpop.f32.mrf.mxu2 }
 0xc19   :  { %6643 = vmatpush.bf16.msra.mxu1 %v9355_v37  ;;  %v6364_v30 = vadd.f32 %v6363_v18, %v5706_v2 }
 0xc1d   :  { %6644 = vmatpush.bf16.msra.mxu1 %v9339_v0 }
 0xc20   :  { %v6365_v24 = vpop.f32.mrf.mxu2 }
 0xc21   :  { %6645 = vmatpush.bf16.msra.mxu1 %v9323_v5  ;;  %v6366_v31 = vadd.f32 %v6365_v24, %v5706_v2 }
 0xc25   :  { %6646 = vmatpush.bf16.msra.mxu1 %v9307_v11 }
 0xc27   :  { %6571 = vmatmul.bf16.vlgmr.msrb.gmra.mxu1 %v12230_v42  ;;  %6628 = vmatmul.bf16.vlgmr.msrb.gmra.mxu0 %v12201_v9 }
 0xc28   :  { %v6368_v16 = vpop.f32.mrf.mxu2 }
 0xc29   :  { %v6369_v6 = vadd.f32 %v6368_v16, %v5706_v2 }
 0xc2a   :  { %v6382_v52 = vpop.f32.mrf.mxu3 }
 0xc2b   :  { %v6383_v7 = vadd.f32 %v6382_v52, %v6364_v30 }
 0xc30   :  { %v6370_v58 = vpop.f32.mrf.mxu2 }
 0xc32   :  { %v6384_v39 = vpop.f32.mrf.mxu3 }
 0xc33   :  { %v6385_v37 = vadd.f32 %v6384_v39, %v6366_v31 }
 0xc37   :  { %6576 = vmatmul.bf16.gmra.mxu1 %v12238_v15  ;;  %6633 = vmatmul.bf16.gmra.mxu0 %v12220_v22 }
 0xc38   :  { %v6439_v32 = vpop.f32.mrf.mxu2 }
 0xc3a   :  { %v6387_v57 = vpop.f32.mrf.mxu3 }
 0xc3b   :  { %v6388_v19 = vadd.f32 %v6387_v57, %v6369_v6 }
 0xc42   :  { %v6389_v9 = vpop.f32.mrf.mxu3 }
 0xc44   :  { %v6401_v54 = vpop.f32.mrf.mxu0 }
 0xc45   :  { %v6402_v10 = vadd.f32 %v6401_v54, %v6383_v7 }
 0xc47   :  { %6647 = vmatmul.bf16.vlgmr.msra.gmra.mxu1 %v12230_v42  ;;  %v6441_v42 = vpop.f32.mrf.mxu2 }
 0xc4a   :  { %v6458_v22 = vpop.f32.mrf.mxu3 }
 0xc4c   :  { %v6403_v3 = vpop.f32.mrf.mxu0 }
 0xc4d   :  { %v6404_v33 = vadd.f32 %v6403_v3, %v6385_v37 }
 0xc4f   :  { %v6444_v0 = vpop.f32.mrf.mxu2 }
 0xc52   :  { %v6460_v36 = vpop.f32.mrf.mxu3 }
 0xc54   :  { %v6406_v62 = vpop.f32.mrf.mxu0 }
 0xc55   :  { %v6407_v47 = vadd.f32 %v6406_v62, %v6388_v19 }
 0xc57   :  { %6652 = vmatmul.bf16.gmra.mxu1 %v12238_v15  ;;  %v6371_v15 = vadd.f32 %v6370_v58, %v5706_v2  ;;  %v6446_v54 = vpop.f32.mrf.mxu2 }
 0xc59   :  { %v6390_v50 = vadd.f32 %v6389_v9, %v6371_v15 }
 0xc5a   :  { %v6463_v45 = vpop.f32.mrf.mxu3 }
 0xc5c   :  { %v6408_v29 = vpop.f32.mrf.mxu0 }
 0xc5d   :  { %v6409_v5 = vadd.f32 %v6408_v29, %v6390_v50 }
 0xc64   :  { %v6420_v55 = vpop.f32.mrf.mxu1  ;;  %v12256_v14 = vpop.f32.mrf.mxu0 }
 0xc65   :  { %v6421_v43 = vadd.f32 %v6420_v55, %v6402_v10  ;;  %v6465_v10 = vpop.f32.mrf.mxu3 }
 0xc67   :  { %v6658_v3 = vadd.f32 %v6421_v43, %v4446_v21 }
 0xc69   :  { %v6674_v58 = vmax.f32 %v6658_v3, 0.0 }
 0xc6c   :  { %v6422_v46 = vpop.f32.mrf.mxu1  ;;  %v6479_v44 = vpop.f32.mrf.mxu0 }
 0xc6d   :  { %v6423_v34 = vadd.f32 %v6422_v46, %v6404_v33 }
 0xc6f   :  { %v6662_v39 = vadd.f32 %v6423_v34, %v4450_v35  ;;  %v5707_v35 = vperm.slane %v12259_v4, 1 }
 0xc71   :  { %v6678_v62 = vmax.f32 %v6662_v39, 0.0  ;;  %v6445_v21 = vadd.f32 %v6444_v0, %v5707_v35  ;;  %v6447_v43 = vadd.f32 %v6446_v54, %v5707_v35  ;;  %v6440_v29 = vadd.f32 %v6439_v32, %v5707_v35 }
 0xc72   :  { %v12465_v32 = vmax.f32 %v11947_v17, 0.0 }
 0xc73   :  { %v6464_v34 = vadd.f32 %v6463_v45, %v6445_v21  ;;  %v6466_v46 = vadd.f32 %v6465_v10, %v6447_v43  ;;  %v6459_v6 = vadd.f32 %v6458_v22, %v6440_v29 }
 0xc74   :  { %v6425_v26 = vpop.f32.mrf.mxu1  ;;  %v6482_v27 = vpop.f32.mrf.mxu0 }
 0xc75   :  { %v6426_v60 = vadd.f32 %v6425_v26, %v6407_v47  ;;  %v6483_v2 = vadd.f32 %v6482_v27, %v6464_v34  ;;  %v6478_v50 = vadd.f32 %v12256_v14, %v6459_v6  ;;  %v12466_v27 = vmax.f32 %v11911_v61, 0.0 }
 0xc76   :  { %v12467_v14 = vmax.f32 %v11907_v59, 0.0  ;;  %v5708_v59 = vperm.slane %v12259_v4, 2 }
 0xc77   :  { %v6666_v24 = vadd.f32 %v6426_v60, %v4454_v48  ;;  %v6515_v48 = vpop.f32.mrf.mxu2 }
 0xc79   :  { %v6682_v16 = vmax.f32 %v6666_v24, 0.0 }
 0xc7c   :  { %v6427_v11 = vpop.f32.mrf.mxu1  ;;  %v6484_v40 = vpop.f32.mrf.mxu0 }
 0xc7d   :  { %v6428_v23 = vadd.f32 %v6427_v11, %v6409_v5  ;;  %v6485_v15 = vadd.f32 %v6484_v40, %v6466_v46  ;;  %v6516_v40 = vadd.f32 %v6515_v48, %v5708_v59  ;;  %v12469_v48 = vmax.f32 %v12003_v56, 0.0 }
 0xc7f   :  { %v6670_v18 = vadd.f32 %v6428_v23, %v4458_v1  ;;  %v6534_v1 = vpop.f32.mrf.mxu3  ;;  %v6442_v23 = vadd.f32 %v6441_v42, %v5707_v35  ;;  %v6517_v9 = vpop.f32.mrf.mxu2 }
 0xc81   :  { %v6686_v52 = vmax.f32 %v6670_v18, 0.0  ;;  %v6461_v55 = vadd.f32 %v6460_v36, %v6442_v23  ;;  %v6535_v23 = vadd.f32 %v6534_v1, %v6516_v40 }
 0xc83   :  { %6707 = vmatpush.msra.mxu2 %v6686_v52  ;;  %v6480_v31 = vadd.f32 %v6479_v44, %v6461_v55  ;;  %v12281_v44 = vld [vmem:[%s11069_s25] sm:$0x3] }
 0xc84   :  { %v6496_v57 = vpop.f32.mrf.mxu1  ;;  %v12270_v51 = vpop.f32.mrf.mxu0 }
 0xc85   :  { %6708 = vmatpush.msra.mxu2 %v6682_v16  ;;  %v6497_v42 = vadd.f32 %v6496_v57, %v6478_v50  ;;  %v6518_v57 = vadd.f32 %v6517_v9, %v5708_v59  ;;  %v6554_v46 = vadd.f32 %v12270_v51, %v6535_v23  ;;  %v12471_v51 = vmax.f32 %v11973_v20, 0.0  ;;  %v6822_v20 = vld [vmem:[%s11074_s3 + $0x178] sm:$0xff] }
 0xc87   :  { %6709 = vmatpush.msra.mxu2 %v6678_v62  ;;  %v6536_v26 = vpop.f32.mrf.mxu3  ;;  %v6520_v5 = vpop.f32.mrf.mxu2  ;;  %v6659_v60 = vadd.f32 %v6497_v42, %v12467_v14  ;;  %v6820_v14 = vld [vmem:[%s11074_s3 + $0x168] sm:$0xff] }
 0xc88   :  { %v6521_v16 = vadd.f32 %v6520_v5, %v5708_v59 }
 0xc89   :  { %6710 = vmatpush.msra.mxu2 %v6674_v58  ;;  %v6675_v61 = vmax.f32 %v6659_v60, 0.0  ;;  %v6788_v60 = vld [vmem:[%s11074_s3 + $0x68] sm:$0xff] }
 0xc8a   :  { %9420 = vmatmul.msk.f32.vlgmr.msra.gmra.mxu2 %vm6691_vm2, %v12281_v44 }
 0xc8c   :  { %v6498_v28 = vpop.f32.mrf.mxu1  ;;  %v6555_v30 = vpop.f32.mrf.mxu0 }
 0xc8d   :  { %v6499_v47 = vadd.f32 %v6498_v28, %v6480_v31  ;;  %v6537_v28 = vadd.f32 %v6536_v26, %v6518_v57  ;;  %v12468_v31 = vmax.f32 %v12000_v12, 0.0 }
 0xc8f   :  { %v6663_v33 = vadd.f32 %v6499_v47, %v12466_v27  ;;  %v6539_v63 = vpop.f32.mrf.mxu3  ;;  %v6522_v24 = vpop.f32.mrf.mxu2  ;;  %v6556_v43 = vadd.f32 %v6555_v30, %v6537_v28  ;;  %v6789_v27 = vld [vmem:[%s11074_s3 + $0x70] sm:$0xff] }
 0xc90   :  { %v6523_v62 = vadd.f32 %v6522_v24, %v5708_v59  ;;  %v6540_v10 = vadd.f32 %v6539_v63, %v6521_v16  ;;  %v6786_v24 = vld [vmem:[%s11074_s3 + $0x58] sm:$0xff]  ;;  %v6785_v59 = vld [vmem:[%s11074_s3 + $0x50] sm:$0xff] }
 0xc91   :  { %v6679_v17 = vmax.f32 %v6663_v33, 0.0  ;;  %v6806_v33 = vld [vmem:[%s11074_s3 + $0xf8] sm:$0xff] }
 0xc92   :  { %6863 = vmatpush.msrb.mxu1 %v6806_v33  ;;  %v6831_v33 = vld [vmem:[%s11074_s3 + $0x1c0] sm:$0xff] }
 0xc94   :  { %v6501_v25 = vpop.f32.mrf.mxu1  ;;  %v6558_v11 = vpop.f32.mrf.mxu0 }
 0xc95   :  { %v6502_v19 = vadd.f32 %v6501_v25, %v6483_v2  ;;  %v6559_v25 = vadd.f32 %v6558_v11, %v6540_v10  ;;  %v6804_v11 = vld [vmem:[%s11074_s3 + $0xe8] sm:$0xff] }
 0xc97   :  { %v6667_v7 = vadd.f32 %v6502_v19, %v4455_v8  ;;  %v6541_v39 = vpop.f32.mrf.mxu3  ;;  %v12290_v54 = vpop.f32.mrf.mxu2 }
 0xc98   :  { %v6542_v35 = vadd.f32 %v6541_v39, %v6523_v62  ;;  %v6817_v39 = vld [vmem:[%s11074_s3 + $0x150] sm:$0xff]  ;;  %v6816_v62 = vld [vmem:[%s11074_s3 + $0x148] sm:$0xff] }
 0xc99   :  { %v6683_v45 = vmax.f32 %v6667_v7, 0.0 }
 0xc9c   :  { %v6503_v37 = vpop.f32.mrf.mxu1  ;;  %v6560_v52 = vpop.f32.mrf.mxu0 }
 0xc9d   :  { %v6504_v0 = vadd.f32 %v6503_v37, %v6485_v15  ;;  %v6561_v34 = vadd.f32 %v6560_v52, %v6542_v35  ;;  %v12470_v37 = vmax.f32 %v11977_v49, 0.0  ;;  %v5709_v52 = vperm.slane %v12259_v4, 3 }
 0xc9f   :  { %v6671_v36 = vadd.f32 %v6504_v0, %v12465_v32  ;;  %v12292_v58 = vpop.f32.mrf.mxu3  ;;  %v6593_v19 = vpop.f32.mrf.mxu2  ;;  %v6790_v32 = vld [vmem:[%s11074_s3 + $0x78] sm:$0xff] }
 0xca0   :  { %6843 = vmatpush.msra.mxu0 %v6790_v32  ;;  %v6594_v28 = vadd.f32 %v6593_v19, %v5709_v52  ;;  %v12472_v19 = vmax.f32 %v12041_v53, 0.0  ;;  %v6783_v32 = vld [vmem:[%s11074_s3 + $0x40] sm:$0xff] }
 0xca1   :  { %v6687_v22 = vmax.f32 %v6671_v36, 0.0  ;;  %v6821_v36 = vld [vmem:[%s11074_s3 + $0x170] sm:$0xff] }
 0xca2   :  { %6844 = vmatpush.msra.mxu0 %v6789_v27  ;;  %v6814_v27 = vld [vmem:[%s11074_s3 + $0x138] sm:$0xff] }
 0xca3   :  { %6727 = vmatpush.msrb.mxu2 %v6687_v22 }
 0xca4   :  { %v6572_v8 = vpop.f32.mrf.mxu1  ;;  %v12294_v21 = vpop.f32.mrf.mxu0  ;;  %6845 = vmatpush.msra.mxu0 %v6788_v60  ;;  %v6830_v60 = vld [vmem:[%s11074_s3 + $0x1b8] sm:$0xff] }
 0xca5   :  { %6728 = vmatpush.msrb.mxu2 %v6683_v45  ;;  %v6573_v9 = vadd.f32 %v6572_v8, %v6554_v46  ;;  %v6805_v45 = vld [vmem:[%s11074_s3 + $0xf0] sm:$0xff]  ;;  %v6819_v8 = vld [vmem:[%s11074_s3 + $0x160] sm:$0xff] }
 0xca6   :  { %6864 = vmatpush.msrb.mxu1 %v6805_v45  ;;  %v6781_v45 = vld [vmem:[%s11074_s3 + $0x30] sm:$0xff] }
 0xca7   :  { %6729 = vmatpush.msrb.mxu2 %v6679_v17  ;;  %v6612_v50 = vpop.f32.mrf.mxu3  ;;  %v6660_v47 = vadd.f32 %v6573_v9, %v12471_v51  ;;  %v6596_v7 = vpop.f32.mrf.mxu2  ;;  %v6787_v17 = vld [vmem:[%s11074_s3 + $0x60] sm:$0xff]  ;;  %v12475_v51 = vmax.f32 %v12020_v13, 0.0  ;;  %v6836_v13 = vld [vmem:[%s11074_s3 + $0x1e8] sm:$0xff] }
 0xca8   :  { %6865 = vmatpush.msrb.mxu1 %v6804_v11  ;;  %6846 = vmatpush.msra.mxu0 %v6787_v17  ;;  %v6597_v10 = vadd.f32 %v6596_v7, %v5709_v52  ;;  %v6613_v4 = vadd.f32 %v6612_v50, %v6594_v28  ;;  %v6815_v7 = vld [vmem:[%s11074_s3 + $0x140] sm:$0xff]  ;;  %v6829_v17 = vld [vmem:[%s11074_s3 + $0x1b0] sm:$0xff]  ;;  %v6780_v11 = vld [vmem:[%s11074_s3 + $0x28] sm:$0xff] }
 0xca9   :  { %6730 = vmatpush.msrb.mxu2 %v6675_v61  ;;  %v6676_v49 = vmax.f32 %v6660_v47, 0.0  ;;  %v6818_v61 = vld [vmem:[%s11074_s3 + $0x158] sm:$0xff] }
 0xcaa   :  { %9421 = vmatmul.msk.f32.vlgmr.msrb.gmra.mxu2 %vm6691_vm2, %v12281_v44  ;;  %6847 = vmatpush.msra.mxu0 %v6786_v24  ;;  %v6811_v24 = vld [vmem:[%s11074_s3 + $0x120] sm:$0xff]  ;;  %v6794_v28 = vld [vmem:[%s11074_s3 + $0x98] sm:$0xff] }
 0xcac   :  { %v6574_v18 = vpop.f32.mrf.mxu1  ;;  %v6631_v12 = vpop.f32.mrf.mxu0  ;;  %6848 = vmatpush.msra.mxu0 %v6785_v59  ;;  %v6810_v59 = vld [vmem:[%s11074_s3 + $0x118] sm:$0xff] }
 0xcad   :  { %v6575_v2 = vadd.f32 %v6574_v18, %v6556_v43  ;;  %v6803_v18 = vld [vmem:[%s11074_s3 + $0xe0] sm:$0xff]  ;;  %v6592_v43 = vadd.f32 %v12290_v54, %v5709_v52  ;;  %v6632_v46 = vadd.f32 %v6631_v12, %v6613_v4 }
 0xcae   :  { %6866 = vmatpush.msrb.mxu1 %v6803_v18  ;;  %v6835_v12 = vld [vmem:[%s11074_s3 + $0x1e0] sm:$0xff]  ;;  %v6828_v18 = vld [vmem:[%s11074_s3 + $0x1a8] sm:$0xff] }
 0xcaf   :  { %v6664_v1 = vadd.f32 %v6575_v2, %v12470_v37  ;;  %v6615_v22 = vpop.f32.mrf.mxu3  ;;  %v6598_v16 = vpop.f32.mrf.mxu2  ;;  %v12473_v37 = vmax.f32 %v12043_v38, 0.0  ;;  %v6838_v38 = vld [vmem:[%s11074_s3 + $0x1f8] sm:$0xff]  ;;  %v6807_v4 = vld [vmem:[%s11074_s3 + $0x100] sm:$0xff] }
 0xcb0   :  { %v6599_v35 = vadd.f32 %v6598_v16, %v5709_v52  ;;  %v6796_v52 = vld [vmem:[%s11074_s3 + $0xa8] sm:$0xff]  ;;  %v6778_v16 = vld [vmem:[%s11074_s3 + $0x18] sm:$0xff] }
 0xcb1   :  { %v6680_v56 = vmax.f32 %v6664_v1, 0.0 }
 0xcb4   :  { %v6577_v3 = vpop.f32.mrf.mxu1  ;;  %v6634_v63 = vpop.f32.mrf.mxu0 }
 0xcb5   :  { %v6578_v29 = vadd.f32 %v6577_v3, %v6559_v25  ;;  %v6802_v3 = vld [vmem:[%s11074_s3 + $0xd8] sm:$0xff]  ;;  %v6616_v25 = vadd.f32 %v6615_v22, %v6597_v10 }
 0xcb6   :  { %6867 = vmatpush.msrb.mxu1 %v6802_v3  ;;  %v6782_v22 = vld [vmem:[%s11074_s3 + $0x38] sm:$0xff]  ;;  %v6827_v3 = vld [vmem:[%s11074_s3 + $0x1a0] sm:$0xff] }
 0xcb7   :  { %v6668_v15 = vadd.f32 %v6578_v29, %v12468_v31  ;;  %v6617_v40 = vpop.f32.mrf.mxu3  ;;  %v6635_v29 = vadd.f32 %v6634_v63, %v6616_v25  ;;  %v6798_v63 = vld [vmem:[%s11074_s3 + $0xb8] sm:$0xff]  ;;  %v6825_v25 = vld [vmem:[%s11074_s3 + $0x190] sm:$0xff] }
 0xcb8   :  { %v6826_v10 = vld [vmem:[%s11074_s3 + $0x198] sm:$0xff] }
 0xcb9   :  { %v6684_v0 = vmax.f32 %v6668_v15, 0.0 }
 0xcbc   :  { %v6579_v55 = vpop.f32.mrf.mxu1  ;;  %v6636_v23 = vpop.f32.mrf.mxu0 }
 0xcbd   :  { %v6580_v6 = vadd.f32 %v6579_v55, %v6561_v34  ;;  %v6618_v34 = vadd.f32 %v6617_v40, %v6599_v35  ;;  %v6611_v55 = vadd.f32 %v12292_v58, %v6592_v43  ;;  %v12474_v58 = vmax.f32 %v12023_v41, 0.0  ;;  %v6837_v41 = vld [vmem:[%s11074_s3 + $0x1f0] sm:$0xff]  ;;  %v6808_v35 = vld [vmem:[%s11074_s3 + $0x108] sm:$0xff] }
 0xcbe   :  { %v6777_v40 = vld [vmem:[%s11074_s3 + $0x10] sm:$0xff] }
 0xcbf   :  { %v6672_v26 = vadd.f32 %v6580_v6, %v12469_v48  ;;  %v6637_v2 = vadd.f32 %v6636_v23, %v6618_v34  ;;  %v6630_v31 = vadd.f32 %v12294_v21, %v6611_v55  ;;  %v6776_v23 = vld [vmem:[%s11074_s3 + $0x8] sm:$0xff]  ;;  %v6793_v43 = vld [vmem:[%s11074_s3 + $0x90] sm:$0xff]  ;;  %v6775_v55 = vld [vmem:[%s11074_s3] sm:$0xff] }
 0xcc0   :  { %v6824_v34 = vld [vmem:[%s11074_s3 + $0x188] sm:$0xff] }
 0xcc1   :  { %v6688_v30 = vmax.f32 %v6672_v26, 0.0 }
 0xcc3   :  { %6747 = vmatpush.msra.mxu2 %v6688_v30 }
 0xcc4   :  { %v12305_v42 = vpop.f32.mrf.mxu1 }
 0xcc5   :  { %6748 = vmatpush.msra.mxu2 %v6684_v0  ;;  %v6649_v26 = vadd.f32 %v12305_v42, %v6630_v31  ;;  %v6834_v42 = vld [vmem:[%s11074_s3 + $0x1d8] sm:$0xff]  ;;  %v6823_v31 = vld [vmem:[%s11074_s3 + $0x180] sm:$0xff] }
 0xcc7   :  { %6749 = vmatpush.msra.mxu2 %v6680_v56  ;;  %v6661_v21 = vadd.f32 %v6649_v26, %v12475_v51  ;;  %v6833_v56 = vld [vmem:[%s11074_s3 + $0x1d0] sm:$0xff] }
 0xcc9   :  { %6750 = vmatpush.msra.mxu2 %v6676_v49  ;;  %v6677_v53 = vmax.f32 %v6661_v21, 0.0  ;;  %v6784_v49 = vld [vmem:[%s11074_s3 + $0x48] sm:$0xff] }
 0xcca   :  { %9422 = vmatmul.msk.f32.vlgmr.msra.gmra.mxu2 %vm6691_vm2, %v12281_v44  ;;  %6849 = vmatpush.msra.mxu0 %v6784_v49 }
 0xccb   :  { %6883 = vmatpush.msrb.mxu2 %v6822_v20  ;;  %v6832_v20 = vld [vmem:[%s11074_s3 + $0x1c8] sm:$0xff] }
 0xccc   :  { %v6650_v5 = vpop.f32.mrf.mxu1  ;;  %6850 = vmatpush.msra.mxu0 %v6783_v32 }
 0xccd   :  { %6884 = vmatpush.msrb.mxu2 %v6821_v36  ;;  %v6651_v15 = vadd.f32 %v6650_v5, %v6632_v46  ;;  %v6800_v36 = vld [vmem:[%s11074_s3 + $0xc8] sm:$0xff]  ;;  %v6799_v5 = vld [vmem:[%s11074_s3 + $0xc0] sm:$0xff] }
 0xcce   :  { %6851 = vmatpush.msra.mxu0 %v6782_v22  ;;  %v6792_v46 = vld [vmem:[%s11074_s3 + $0x88] sm:$0xff] }
 0xccf   :  { %6885 = vmatpush.msrb.mxu2 %v6820_v14  ;;  %v6665_v30 = vadd.f32 %v6651_v15, %v12474_v58  ;;  %v6813_v14 = vld [vmem:[%s11074_s3 + $0x130] sm:$0xff] }
 0xcd0   :  { %6852 = vmatpush.msra.mxu0 %v6781_v45 }
 0xcd1   :  { %6886 = vmatpush.msrb.mxu2 %v6819_v8  ;;  %v6681_v0 = vmax.f32 %v6665_v30, 0.0  ;;  %v6812_v8 = vld [vmem:[%s11074_s3 + $0x128] sm:$0xff] }
 0xcd2   :  { %6853 = vmatpush.msra.mxu0 %v6780_v11 }
 0xcd3   :  { %6887 = vmatpush.msrb.mxu2 %v6818_v61  ;;  %v6797_v61 = vld [vmem:[%s11074_s3 + $0xb0] sm:$0xff] }
 0xcd4   :  { %v6653_v57 = vpop.f32.mrf.mxu1 }
 0xcd5   :  { %6888 = vmatpush.msrb.mxu2 %v6817_v39  ;;  %v6654_v6 = vadd.f32 %v6653_v57, %v6635_v29  ;;  %v6779_v39 = vld [vmem:[%s11074_s3 + $0x20] sm:$0xff] }
 0xcd6   :  { %6854 = vmatpush.msra.mxu0 %v6779_v39  ;;  %v6795_v57 = vld [vmem:[%s11074_s3 + $0xa0] sm:$0xff] }
 0xcd7   :  { %6889 = vmatpush.msrb.mxu2 %v6816_v62  ;;  %v6669_v54 = vadd.f32 %v6654_v6, %v12472_v19  ;;  %v6809_v62 = vld [vmem:[%s11074_s3 + $0x110] sm:$0xff] }
 0xcd8   :  { %6855 = vmatpush.msra.mxu0 %v6778_v16 }
 0xcd9   :  { %v6685_v47 = vmax.f32 %v6669_v54, 0.0  ;;  %6890 = vmatpush.msrb.mxu2 %v6815_v7 }
 0xcda   :  { %6856 = vmatpush.msra.mxu0 %v6777_v40 }
 0xcdb   :  { %6891 = vmatpush.msrb.mxu2 %v6814_v27 }
 0xcdc   :  { %v6655_v9 = vpop.f32.mrf.mxu1  ;;  %6857 = vmatpush.msra.mxu0 %v6776_v23 }
 0xcdd   :  { %v6656_v48 = vadd.f32 %v6655_v9, %v6637_v2  ;;  %6892 = vmatpush.msrb.mxu2 %v6813_v14  ;;  %v6791_v2 = vld [vmem:[%s11074_s3 + $0x80] sm:$0xff] }
 0xcde   :  { %6858 = vmatpush.msra.mxu0 %v6775_v55 }
 0xcdf   :  { %v6673_v1 = vadd.f32 %v6656_v48, %v12473_v37  ;;  %6893 = vmatpush.msrb.mxu2 %v6812_v8  ;;  %v10118_v48 = vld [vmem:[#allocation2] ss:$0 sm:$0xff] }
 0xce1   :  { %v6689_v50 = vmax.f32 %v6673_v1, 0.0  ;;  %6894 = vmatpush.msrb.mxu2 %v6811_v24 }
 0xce3   :  { %6767 = vmatpush.msra.mxu3 %v6689_v50  ;;  %6895 = vmatpush.msrb.mxu2 %v6810_v59 }
 0xce5   :  { %6768 = vmatpush.msra.mxu3 %v6685_v47  ;;  %6896 = vmatpush.msrb.mxu2 %v6809_v62 }
 0xce7   :  { %6769 = vmatpush.msra.mxu3 %v6681_v0  ;;  %6897 = vmatpush.msrb.mxu2 %v6808_v35 }
 0xce9   :  { %6770 = vmatpush.msra.mxu3 %v6677_v53  ;;  %6898 = vmatpush.msrb.mxu2 %v6807_v4 }
 0xcea   :  { %9423 = vmatmul.msk.f32.vlgmr.msra.gmra.mxu3 %vm6691_vm2, %v12281_v44  ;;  %v6801_v44 = vld [vmem:[%s11074_s3 + $0xd0] sm:$0xff] }
 0xceb   :  { %6903 = vmatpush.msrb.mxu3 %v6838_v38  ;;  %6868 = vmatpush.msrb.mxu1 %v6801_v44 }
 0xced   :  { %6904 = vmatpush.msrb.mxu3 %v6837_v41  ;;  %6869 = vmatpush.msrb.mxu1 %v6800_v36 }
 0xcef   :  { %6905 = vmatpush.msrb.mxu3 %v6836_v13  ;;  %6870 = vmatpush.msrb.mxu1 %v6799_v5 }
 0xcf1   :  { %6906 = vmatpush.msrb.mxu3 %v6835_v12  ;;  %6871 = vmatpush.msrb.mxu1 %v6798_v63 }
 0xcf3   :  { %6907 = vmatpush.msrb.mxu3 %v6834_v42  ;;  %6872 = vmatpush.msrb.mxu1 %v6797_v61 }
 0xcf5   :  { %6908 = vmatpush.msrb.mxu3 %v6833_v56  ;;  %6873 = vmatpush.msrb.mxu1 %v6796_v52 }
 0xcf7   :  { %6909 = vmatpush.msrb.mxu3 %v6832_v20  ;;  %6874 = vmatpush.msrb.mxu1 %v6795_v57 }
 0xcf9   :  { %6910 = vmatpush.msrb.mxu3 %v6831_v33  ;;  %6875 = vmatpush.msrb.mxu1 %v6794_v28 }
 0xcfb   :  { %6911 = vmatpush.msrb.mxu3 %v6830_v60  ;;  %6876 = vmatpush.msrb.mxu1 %v6793_v43 }
 0xcfd   :  { %6912 = vmatpush.msrb.mxu3 %v6829_v17  ;;  %6877 = vmatpush.msrb.mxu1 %v6792_v46 }
 0xcff   :  { %6913 = vmatpush.msrb.mxu3 %v6828_v18  ;;  %6878 = vmatpush.msrb.mxu1 %v6791_v2 }
 0xd01   :  { %6914 = vmatpush.msrb.mxu3 %v6827_v3 }
 0xd03   :  { %6915 = vmatpush.msrb.mxu3 %v6826_v10 }
 0xd05   :  { %6916 = vmatpush.msrb.mxu3 %v6825_v25 }
 0xd07   :  { %6917 = vmatpush.msrb.mxu3 %v6824_v34 }
 0xd09   :  { %6918 = vmatpush.msrb.mxu3 %v6823_v31 }
 0xd0d   :  { %v6712_v29 = vpop.f32.mrf.mxu2 }
 0xd0e   :  { %6859 = vmatmul.f32.vlgmr.msra.gmra.mxu0 %v6712_v29 }
 0xd2d   :  { %v6732_v6 = vpop.f32.mrf.mxu2 }
 0xd2e   :  { %6879 = vmatmul.f32.vlgmr.msrb.gmra.mxu1 %v6732_v6 }
 0xd4d   :  { %v6752_v9 = vpop.f32.mrf.mxu2 }
 0xd4e   :  { %6899 = vmatmul.f32.vlgmr.msrb.gmra.mxu2 %v6752_v9 }
 0xd6d   :  { %v6772_v15 = vpop.f32.mrf.mxu3 }
 0xd6e   :  { %6919 = vmatmul.f32.vlgmr.msrb.gmra.mxu3 %v6772_v15 }
 0xd8b   :  { %v6860_v26 = vpop.f32.mrf.mxu0 }
 0xd8c   :  { %v6861_v19 = vadd.f32 %v10118_v48, %v6860_v26 }
 0xdab   :  { %v6880_v54 = vpop.f32.mrf.mxu1 }
 0xdac   :  { %v6881_v37 = vadd.f32 %v6880_v54, %v6861_v19 }
 0xdd1   :  { %v6900_v1 = vpop.f32.mrf.mxu2 }
 0xdd2   :  { %v6901_v58 = vadd.f32 %v6900_v1, %v6881_v37 }
 0xdf1   :  { %v6920_v30 = vpop.f32.mrf.mxu3 }
 0xdf2   :  { %v6921_v50 = vadd.f32 %v6920_v30, %v6901_v58 }
 0xdf4   :  { %6924 = vst.msk [vmem:[%s11082_s14] sm:$0x3] %vm6923_vm3, %v6921_v50 }
 0xdf5   :  { %6929 = vsyncpa [#allocation4], 1 }
 0xdf6   :  { %6930 = vsyncpa [#allocation6], 1 }
 0xdf7   :  { %6931 = vsyncpa [#allocation9], 1 }
 0xdf8   :  { %6932 = vsyncpa [#allocation12], 1 }
 0xdf9   :  { %6933 = vsyncpa [#allocation15], 1 }
 0xdfa   :  { %6934 = vsyncpa [#allocation18], 1 }
 0xdfb   :  { %6935 = vsyncpa [#allocation21], 1 }
 0xdfc   :  { %6936 = vsyncpa [#allocation24], 1 }
 0xdfd   :  { %6937 = vsyncpa [#allocation27], 1 }
 0xdfe   :  { %6938 = vsyncpa [#allocation30], 1 }
 0xdff   :  { %6939 = vsyncpa [#allocation33], 1 }
 0xe00   :  { %6940 = vsyncpa [#allocation36], 1 }
 0xe01   :  { %6941 = vsyncpa [#allocation39], 1 }
 0xe02   :  { %6942 = vsyncpa [#allocation42], 1 }

</bundles_post_ra>
